<compile_context>
chip_gen: v6e
topology: v6e:2x2x1
jax: 0.10.0
libtpu: 0.0.40
codegen_flags: <defaults>
</compile_context>

<pallas_src>
import math

import jax
import jax.numpy as jnp
import numpy as np
from jax.experimental import pallas as pl
from jax.experimental.pallas import tpu as pltpu


# ----------------------------------------------------------------------------
# Fused Pallas kernel (batch-minor layout: lanes = batch tile everywhere)
# ----------------------------------------------------------------------------
def make_fused_mixer_kernel(n_agents, n_heads, head_dim, ne, H, b_tile):
    BT = b_tile
    na = n_agents
    nh = n_heads
    hd = head_dim
    scale_inv = 1.0 / math.sqrt(float(head_dim))

    def kernel(ents_ref, emask_ref, qs_ref,
               fc1_wt_ref, fc1_b_ref, in_bd_ref,
               w1_out_wt_ref, w1_out_b_ref, w1_fc2_wm_ref, w1_fc2_bm_ref,
               v_out_wt_ref, v_out_b_ref, v_fc2_wm_ref, v_fc2_bm_ref,
               o_ref):
        ents = ents_ref[...]                        # (ne, ed, BT)  batch-minor
        emask = emask_ref[...]                      # (ne, BT)  1.0 = masked / padded
        am = emask[:na, :]                          # (na, BT)  agent mask

        # Attention pre-mask, built directly in its broadcast shape (na, ne, 1, BT):
        # 1 where the agent-entity pair is unavailable.  Shared by both hypernets.
        pmb = (1.0 - (1.0 - am)[:, None, None, :] *
               (1.0 - emask)[None, :, None, :]) > 0.5        # (na, ne, 1, BT) bool
        amb = am > 0.5                                        # (na, BT) bool

        # fc1 of BOTH hypernets fused on the feature axis (+ relu): one batched MXU
        # matmul over ne entities, lanes = BT.
        x1 = jnp.einsum('ehd,edb->ehb', fc1_wt_ref[...], ents,
                        preferred_element_type=jnp.float32)
        x1 = jnp.maximum(x1 + fc1_b_ref[...], 0.0)            # (ne, 2H, BT)

        # in_trans of BOTH hypernets as one block-diagonal batched matmul (no bias).
        qkv = jnp.einsum('eij,ejb->eib', in_bd_ref[...], x1,
                         preferred_element_type=jnp.float32)  # (ne, 6H, BT)

        def attn_hypernet(q, k, v, out_wt, out_b, fc2_wm, fc2_bm):
            # q: (na, H, BT); k, v: (ne, H, BT).  All elementwise work is lane-dense.
            q_b = jnp.broadcast_to(q[:, None], (na, ne, H, BT)).reshape(na * ne, H, BT)
            k_b = jnp.broadcast_to(k[None, :], (na, ne, H, BT)).reshape(na * ne, H, BT)
            # Attention logits: VPU outer product + per-head sublane reduce (no MXU,
            # no S/St matrices).
            prod = (q_b * k_b).reshape(na * ne, nh, hd, BT)
            logits = jnp.sum(prod, axis=2).reshape(na, ne, nh, BT) * scale_inv

            # Masked softmax over entities (axis=1); fully-masked rows -> 0
            # (reproduces torch's NaN->0 behaviour).
            z = jnp.where(pmb, -1e30, logits)
            m = jnp.max(z, axis=1, keepdims=True)              # (na, 1, nh, BT)
            e = jnp.where(pmb, 0.0, jnp.exp(z - m))            # (na, ne, nh, BT)
            den = jnp.maximum(jnp.sum(e, axis=1, keepdims=True), 1e-30)
            inv = pl.reciprocal(den, approx=True)              # EUP slot
            inv = inv * (2.0 - den * inv)                      # one Newton step (f32)
            w = e * inv                                        # (na, ne, nh, BT)

            # Weighted value sum over entities: broadcast w over head_dim (VPU).
            w4 = w.reshape(na * ne, nh, 1, BT)
            v_b = jnp.broadcast_to(v[None, :], (na, ne, H, BT)).reshape(na * ne, nh, hd, BT)
            wv = (w4 * v_b).reshape(na, ne, H, BT)
            attn = jnp.sum(wv, axis=1)                         # (na, H, BT)

            # out_trans: batched-over-agents MXU matmul.
            out = jnp.einsum('ahk,akb->ahb', out_wt, attn,
                             preferred_element_type=jnp.float32) + out_b  # (na, H, BT)

            # fc2 + mean over mixing_embed_dim folded into one H-vector (exact algebra:
            # mean_m(fc2_w.T @ x + fc2_b) == (mean_m fc2_w).T @ x + mean_m fc2_b).
            pre = jnp.sum(out * fc2_wm, axis=1) + fc2_bm       # (na, BT)
            # Agent mask (post_mask == agent mask, so the intermediate mask is redundant).
            return jnp.where(amb, 0.0, pre)

        q1 = qkv[:na, 0 * H:1 * H, :]
        k1 = qkv[:, 1 * H:2 * H, :]
        v1 = qkv[:, 2 * H:3 * H, :]
        q2 = qkv[:na, 3 * H:4 * H, :]
        k2 = qkv[:, 4 * H:5 * H, :]
        v2 = qkv[:, 5 * H:6 * H, :]

        # hyper_w_1 ('alt_vector'): per-agent scalar; V ('scalar'): mean over agents.
        w1_pre = attn_hypernet(q1, k1, v1, w1_out_wt_ref[...], w1_out_b_ref[...],
                               w1_fc2_wm_ref[...], w1_fc2_bm_ref[...])    # (na, BT)
        v_pre = attn_hypernet(q2, k2, v2, v_out_wt_ref[...], v_out_b_ref[...],
                              v_fc2_wm_ref[...], v_fc2_bm_ref[...])       # (na, BT)

        # Mixing epilogue (softmax_mixing_weights=False -> abs).
        # TODO(synk): softmax_mixing_weights=True (softmax over agents) not wired in.
        w1 = jnp.abs(w1_pre)
        v_out = jnp.sum(v_pre, axis=0, keepdims=True) * (1.0 / na)        # (1, BT)
        q_tot = jnp.sum(qs_ref[...] * w1, axis=0, keepdims=True) + v_out  # (1, BT)
        o_ref[...] = q_tot                                                # lane-dense store

    return kernel


# ----------------------------------------------------------------------------
# Wrapper: layout plumbing + weight packing + pallas_call
# ----------------------------------------------------------------------------
def linear_flex_qmixer(agent_qs, entities, entity_mask, params_w1, params_v,
                       n_agents, n_heads, b_tile=512):
    bs, max_t, ne, ed = entities.shape
    B = bs * max_t
    H = params_w1['fc1_w'].shape[1]
    head_dim = H // n_heads
    f32 = jnp.float32

    # Batch tile: lane-dense (multiple of 128).  Cap so real workloads keep >= 2 grid
    # tiles (a single-tile grid would leave one v7x TensorCore idle) and the demo
    # doesn't over-pad.
    b_tile = max(128, (min(b_tile, pl.cdiv(B, 256) * 128) // 128) * 128)
    n_tiles = pl.cdiv(B, b_tile)
    B_pad = n_tiles * b_tile
    pad = B_pad - B

    ents = entities.reshape(B, ne, ed).astype(f32)
    em = entity_mask.reshape(B, ne).astype(f32)
    qs = agent_qs.reshape(B, n_agents).astype(f32)
    if pad:
        ents = jnp.pad(ents, ((0, pad), (0, 0), (0, 0)))
        em = jnp.pad(em, ((0, pad), (0, 0)), constant_values=1.0)  # padded items masked
        qs = jnp.pad(qs, ((0, pad), (0, 0)))

    # Batch-minor layouts: DMA minor dim = batch tile; pure layout plumbing.
    ents_t = jnp.transpose(ents, (1, 2, 0))     # (ne, ed, B_pad)
    em_t = jnp.transpose(em, (1, 0))            # (ne, B_pad)
    qs_t = jnp.transpose(qs, (1, 0))            # (n_agents, B_pad)

    # --- wrapper-side weight packing (once per call, outside the kernel) ---
    # fc1 of both hypernets concatenated on the output-feature axis.
    fc1_cat = jnp.concatenate([params_w1['fc1_w'], params_v['fc1_w']], axis=1)   # (ed, 2H)
    fc1_wt_b = jnp.broadcast_to(fc1_cat.T[None].astype(f32), (ne, 2 * H, ed))
    fc1_b_cat = jnp.concatenate(
        [params_w1['fc1_b'].reshape(H), params_v['fc1_b'].reshape(H)]
    ).reshape(2 * H, 1).astype(f32)
    # in_trans of both hypernets as one block-diagonal weight (zero padding is free on
    # the MXU since K=64 << MXU width).
    in_bd = jnp.zeros((6 * H, 2 * H), f32)
    in_bd = in_bd.at[0:3 * H, 0:H].set(params_w1['in_w'].T.astype(f32))
    in_bd = in_bd.at[3 * H:6 * H, H:2 * H].set(params_v['in_w'].T.astype(f32))
    in_bd_b = jnp.broadcast_to(in_bd[None], (ne, 6 * H, 2 * H))

    def per_hypernet(p):
        out_wt_b = jnp.broadcast_to(p['out_w'].T[None].astype(f32), (n_agents, H, H))
        out_b = p['out_b'].reshape(H, 1).astype(f32)
        fc2_wm = jnp.mean(p['fc2_w'], axis=1).reshape(1, H, 1).astype(f32)  # fc2+mean fold
        fc2_bm = jnp.mean(p['fc2_b']).reshape(1, 1).astype(f32)
        return out_wt_b, out_b, fc2_wm, fc2_bm

    w_args = [fc1_wt_b, fc1_b_cat, in_bd_b, *per_hypernet(params_w1), *per_hypernet(params_v)]

    def resident(w):
        return pl.BlockSpec(w.shape, lambda b, _nd=w.ndim: (0,) * _nd)  # copied once

    kernel = make_fused_mixer_kernel(n_agents, n_heads, head_dim, ne, H, b_tile)

    out = pl.pallas_call(
        kernel,
        out_shape=jax.ShapeDtypeStruct((1, B_pad), jnp.float32),
        grid=(n_tiles,),
        in_specs=[
            pl.BlockSpec((ne, ed, b_tile), lambda b: (0, 0, b)),   # batch-minor DMA
            pl.BlockSpec((ne, b_tile), lambda b: (0, b)),
            pl.BlockSpec((n_agents, b_tile), lambda b: (0, b)),
            *[resident(w) for w in w_args],
        ],
        out_specs=pl.BlockSpec((1, b_tile), lambda b: (0, b)),
        compiler_params=pltpu.CompilerParams(
            dimension_semantics=("parallel",),          # megacore-shardable grid axis
            vmem_limit_bytes=48 * 1024 * 1024,          # explicit; below v7x's 64 MiB
        ),
    )(ents_t, em_t, qs_t, *w_args)

    return out[0, :B].reshape(bs, max_t, 1)


# ----------------------------------------------------------------------------
# Pure-JAX reference (unfused math) for correctness checking
# ----------------------------------------------------------------------------
def hypernet_ref(entities, emask, p, mode, n_agents, n_heads):
    B, ne, ed = entities.shape
    H = p['fc1_w'].shape[1]
    hd = H // n_heads
    x1 = jax.nn.relu(entities @ p['fc1_w'] + p['fc1_b'])
    am = emask[:, :n_agents]
    pmask = 1.0 - (1.0 - am)[:, :, None] * (1.0 - emask)[:, None, :]
    qkv = x1 @ p['in_w']
    q, k, v = qkv[..., :H], qkv[..., H:2 * H], qkv[..., 2 * H:]
    q = q[:, :n_agents]
    qh = q.reshape(B, n_agents, n_heads, hd)
    kh = k.reshape(B, ne, n_heads, hd)
    vh = v.reshape(B, ne, n_heads, hd)
    logits = jnp.einsum('bqhd,bkhd->bhqk', qh, kh) / math.sqrt(hd)
    maskb = pmask[:, None] > 0.5
    z = jnp.where(maskb, -1e30, logits)
    m = jnp.max(z, axis=-1, keepdims=True)
    e = jnp.where(maskb, 0.0, jnp.exp(z - m))
    den = jnp.sum(e, axis=-1, keepdims=True)
    has_valid = (jnp.sum(1.0 - pmask, axis=-1, keepdims=True) > 0.5)[:, None]
    w = jnp.where(has_valid, e / jnp.maximum(den, 1e-30), 0.0)
    out = jnp.einsum('bhqk,bkhd->bqhd', w, vh).reshape(B, n_agents, H)
    out = out @ p['out_w'] + p['out_b']
    out = jnp.where(am[:, :, None] > 0.5, 0.0, out)
    x3 = out @ p['fc2_w'] + p['fc2_b']
    x3 = jnp.where(am[:, :, None] > 0.5, 0.0, x3)
    if mode == 'alt_vector':
        return x3.mean(axis=2)
    return x3.mean(axis=(1, 2))


def mixer_ref(agent_qs, entities, entity_mask, p_w1, p_v, n_agents, n_heads):
    bs, max_t, ne, ed = entities.shape
    B = bs * max_t
    ents = entities.reshape(B, ne, ed).astype(jnp.float32)
    em = entity_mask.reshape(B, ne).astype(jnp.float32)
    qs = agent_qs.reshape(B, n_agents).astype(jnp.float32)
    w1 = jnp.abs(hypernet_ref(ents, em, p_w1, 'alt_vector', n_agents, n_heads))
    v = hypernet_ref(ents, em, p_v, 'scalar', n_agents, n_heads)
    q_tot = jnp.sum(qs * w1, axis=1) + v
    return q_tot.reshape(bs, max_t, 1)


# ----------------------------------------------------------------------------
# Deterministic parameter init + demo
# ----------------------------------------------------------------------------
def init_hypernet_params(key, entity_dim, H, M):
    ks = jax.random.split(key, 7)
    s = 0.1
    return dict(
        fc1_w=(jax.random.normal(ks[0], (entity_dim, H)) * s).astype(jnp.float32),
        fc1_b=(jax.random.normal(ks[1], (1, H)) * s).astype(jnp.float32),
        in_w=(jax.random.normal(ks[2], (H, 3 * H)) * s).astype(jnp.float32),
        out_w=(jax.random.normal(ks[3], (H, H)) * s).astype(jnp.float32),
        out_b=(jax.random.normal(ks[4], (1, H)) * s).astype(jnp.float32),
        fc2_w=(jax.random.normal(ks[5], (H, M)) * s).astype(jnp.float32),
        fc2_b=(jax.random.normal(ks[6], (1, M)) * s).astype(jnp.float32),
    )


if __name__ == "__main__":
    # args: n_agents=3, entity_shape=8, hypernet_embed=32, attn_n_heads=4,
    #       mixing_embed_dim=8, pooling_type=None, softmax_mixing_weights=False
    bs, max_t = 2, 2
    n_agents, ne, entity_dim = 3, 6, 8
    hypernet_embed, n_heads, mixing_embed_dim = 32, 4, 8

    key = jax.random.PRNGKey(0)
    k_ent, k_mask, k_qs, k_pw1, k_pv = jax.random.split(key, 5)

    entities = jax.random.normal(k_ent, (bs, max_t, ne, entity_dim), jnp.float32)
    # entity_mask: 1.0 = entity unavailable/masked; keep entity 0 always available
    entity_mask = (jax.random.uniform(k_mask, (bs, max_t, ne)) < 0.3).astype(jnp.float32)
    entity_mask = entity_mask.at[..., 0].set(0.0)
    agent_qs = jax.random.normal(k_qs, (bs, max_t, n_agents), jnp.float32)

    params_w1 = init_hypernet_params(k_pw1, entity_dim, hypernet_embed, mixing_embed_dim)
    params_v = init_hypernet_params(k_pv, entity_dim, hypernet_embed, mixing_embed_dim)

    q_tot = linear_flex_qmixer(agent_qs, entities, entity_mask,
                               params_w1, params_v, n_agents, n_heads)
    q_tot = jax.block_until_ready(q_tot)

    q_ref = mixer_ref(agent_qs, entities, entity_mask,
                      params_w1, params_v, n_agents, n_heads)
    np.testing.assert_allclose(np.asarray(q_tot), np.asarray(q_ref),
                               rtol=1e-4, atol=1e-4)
    print("KERNEL_OK")
</pallas_src>

<mosaic_0001>
module attributes {stable_mosaic.version = 11 : i64} {
  func.func @kernel(%arg0: i32, %arg1: memref<6x8x128xf32, #tpu.memory_space<vmem>>, %arg2: memref<6x128xf32, #tpu.memory_space<vmem>>, %arg3: memref<3x128xf32, #tpu.memory_space<vmem>>, %arg4: memref<6x64x8xf32, #tpu.memory_space<vmem>>, %arg5: memref<64x1xf32, #tpu.memory_space<vmem>>, %arg6: memref<6x192x64xf32, #tpu.memory_space<vmem>>, %arg7: memref<3x32x32xf32, #tpu.memory_space<vmem>>, %arg8: memref<32x1xf32, #tpu.memory_space<vmem>>, %arg9: memref<1x32x1xf32, #tpu.memory_space<vmem>>, %arg10: memref<1x1xf32, #tpu.memory_space<vmem>>, %arg11: memref<3x32x32xf32, #tpu.memory_space<vmem>>, %arg12: memref<32x1xf32, #tpu.memory_space<vmem>>, %arg13: memref<1x32x1xf32, #tpu.memory_space<vmem>>, %arg14: memref<1x1xf32, #tpu.memory_space<vmem>>, %arg15: memref<1x128xf32, #tpu.memory_space<vmem>>) attributes {dimension_semantics = [#tpu.dimension_semantics<parallel>], iteration_bounds = array<i64: 1>, scalar_prefetch = 0 : i64, scratch_operands = 0 : i64, tpu.core_type = #tpu.core_type<tc>, window_params = [{transform_indices = @transform_0, window_bounds = array<i64: 6, 8, 128>}, {transform_indices = @transform_1, window_bounds = array<i64: 6, 128>}, {transform_indices = @transform_2, window_bounds = array<i64: 3, 128>}, {pipeline_mode = #tpu.pipeline_mode<synchronous>, transform_indices = @transform_3, window_bounds = array<i64: 6, 64, 8>}, {pipeline_mode = #tpu.pipeline_mode<synchronous>, transform_indices = @transform_4, window_bounds = array<i64: 64, 1>}, {pipeline_mode = #tpu.pipeline_mode<synchronous>, transform_indices = @transform_5, window_bounds = array<i64: 6, 192, 64>}, {pipeline_mode = #tpu.pipeline_mode<synchronous>, transform_indices = @transform_6, window_bounds = array<i64: 3, 32, 32>}, {pipeline_mode = #tpu.pipeline_mode<synchronous>, transform_indices = @transform_7, window_bounds = array<i64: 32, 1>}, {pipeline_mode = #tpu.pipeline_mode<synchronous>, transform_indices = @transform_8, window_bounds = array<i64: 1, 32, 1>}, {pipeline_mode = #tpu.pipeline_mode<synchronous>, transform_indices = @transform_9, window_bounds = array<i64: 1, 1>}, {pipeline_mode = #tpu.pipeline_mode<synchronous>, transform_indices = @transform_10, window_bounds = array<i64: 3, 32, 32>}, {pipeline_mode = #tpu.pipeline_mode<synchronous>, transform_indices = @transform_11, window_bounds = array<i64: 32, 1>}, {pipeline_mode = #tpu.pipeline_mode<synchronous>, transform_indices = @transform_12, window_bounds = array<i64: 1, 32, 1>}, {pipeline_mode = #tpu.pipeline_mode<synchronous>, transform_indices = @transform_13, window_bounds = array<i64: 1, 1>}, {transform_indices = @transform_14, window_bounds = array<i64: 1, 128>}]} {
    %c0 = arith.constant 0 : index
    %c0_0 = arith.constant 0 : index
    %c0_1 = arith.constant 0 : index
    %0 = vector.load %arg1[%c0, %c0_0, %c0_1] : memref<6x8x128xf32, #tpu.memory_space<vmem>>, vector<6x8x128xf32>
    %c0_2 = arith.constant 0 : index
    %c0_3 = arith.constant 0 : index
    %1 = vector.load %arg2[%c0_2, %c0_3] : memref<6x128xf32, #tpu.memory_space<vmem>>, vector<6x128xf32>
    %2 = vector.extract_strided_slice %1 {offsets = [0, 0], sizes = [3, 128], strides = [1, 1]} : vector<6x128xf32> to vector<3x128xf32>
    %cst = arith.constant 1.000000e+00 : f32
    %3 = vector.broadcast %cst : f32 to vector<3x128xf32>
    %4 = arith.subf %3, %2 : vector<3x128xf32>
    %5 = vector.shape_cast %4 : vector<3x128xf32> to vector<3x1x1x128xf32>
    %cst_4 = arith.constant 1.000000e+00 : f32
    %6 = vector.broadcast %cst_4 : f32 to vector<6x128xf32>
    %7 = arith.subf %6, %1 : vector<6x128xf32>
    %8 = vector.shape_cast %7 : vector<6x128xf32> to vector<1x6x1x128xf32>
    %9 = vector.broadcast %5 : vector<3x1x1x128xf32> to vector<3x6x1x128xf32>
    %10 = vector.broadcast %8 : vector<1x6x1x128xf32> to vector<3x6x1x128xf32>
    %11 = arith.mulf %9, %10 : vector<3x6x1x128xf32>
    %cst_5 = arith.constant 1.000000e+00 : f32
    %12 = vector.broadcast %cst_5 : f32 to vector<3x6x1x128xf32>
    %13 = arith.subf %12, %11 : vector<3x6x1x128xf32>
    %cst_6 = arith.constant 5.000000e-01 : f32
    %14 = vector.broadcast %cst_6 : f32 to vector<3x6x1x128xf32>
    %15 = arith.cmpf ogt, %13, %14 : vector<3x6x1x128xf32>
    %cst_7 = arith.constant 5.000000e-01 : f32
    %16 = vector.broadcast %cst_7 : f32 to vector<3x128xf32>
    %17 = arith.cmpf ogt, %2, %16 : vector<3x128xf32>
    %c0_8 = arith.constant 0 : index
    %c0_9 = arith.constant 0 : index
    %c0_10 = arith.constant 0 : index
    %18 = vector.load %arg4[%c0_8, %c0_9, %c0_10] : memref<6x64x8xf32, #tpu.memory_space<vmem>>, vector<6x64x8xf32>
    "tpu.trace_start"() <{level = 10 : i32, message = "ehd,edb->ehb"}> : () -> ()
    %cst_11 = arith.constant dense<0.000000e+00> : vector<6x64x128xf32>
    %19 = tpu.matmul %18, %0, %cst_11 {dimension_numbers = #tpu.dot_dimension_numbers<[2], [1], [1], [2], [0, 0, 0, 1, 1, 2], [0], [0]>} : vector<6x64x8xf32>, vector<6x8x128xf32>, vector<6x64x128xf32> -> vector<6x64x128xf32>
    "tpu.trace_stop"() : () -> ()
    %c0_12 = arith.constant 0 : index
    %c0_13 = arith.constant 0 : index
    %20 = vector.load %arg5[%c0_12, %c0_13] : memref<64x1xf32, #tpu.memory_space<vmem>>, vector<64x1xf32>
    %21 = vector.shape_cast %20 : vector<64x1xf32> to vector<1x64x1xf32>
    %22 = vector.broadcast %21 : vector<1x64x1xf32> to vector<6x64x128xf32>
    %23 = arith.addf %19, %22 : vector<6x64x128xf32>
    %cst_14 = arith.constant 0.000000e+00 : f32
    %24 = vector.broadcast %cst_14 : f32 to vector<6x64x128xf32>
    %25 = arith.maximumf %23, %24 : vector<6x64x128xf32>
    %c0_15 = arith.constant 0 : index
    %c0_16 = arith.constant 0 : index
    %c0_17 = arith.constant 0 : index
    %26 = vector.load %arg6[%c0_15, %c0_16, %c0_17] : memref<6x192x64xf32, #tpu.memory_space<vmem>>, vector<6x192x64xf32>
    "tpu.trace_start"() <{level = 10 : i32, message = "eij,ejb->eib"}> : () -> ()
    %cst_18 = arith.constant dense<0.000000e+00> : vector<6x192x128xf32>
    %27 = tpu.matmul %26, %25, %cst_18 {dimension_numbers = #tpu.dot_dimension_numbers<[2], [1], [1], [2], [0, 0, 0, 1, 1, 2], [0], [0]>} : vector<6x192x64xf32>, vector<6x64x128xf32>, vector<6x192x128xf32> -> vector<6x192x128xf32>
    "tpu.trace_stop"() : () -> ()
    %28 = vector.extract_strided_slice %27 {offsets = [0, 0, 0], sizes = [3, 32, 128], strides = [1, 1, 1]} : vector<6x192x128xf32> to vector<3x32x128xf32>
    %29 = vector.extract_strided_slice %27 {offsets = [0, 32, 0], sizes = [6, 32, 128], strides = [1, 1, 1]} : vector<6x192x128xf32> to vector<6x32x128xf32>
    %30 = vector.extract_strided_slice %27 {offsets = [0, 64, 0], sizes = [6, 32, 128], strides = [1, 1, 1]} : vector<6x192x128xf32> to vector<6x32x128xf32>
    %31 = vector.extract_strided_slice %27 {offsets = [0, 96, 0], sizes = [3, 32, 128], strides = [1, 1, 1]} : vector<6x192x128xf32> to vector<3x32x128xf32>
    %32 = vector.extract_strided_slice %27 {offsets = [0, 128, 0], sizes = [6, 32, 128], strides = [1, 1, 1]} : vector<6x192x128xf32> to vector<6x32x128xf32>
    %33 = vector.extract_strided_slice %27 {offsets = [0, 160, 0], sizes = [6, 32, 128], strides = [1, 1, 1]} : vector<6x192x128xf32> to vector<6x32x128xf32>
    %c0_19 = arith.constant 0 : index
    %c0_20 = arith.constant 0 : index
    %c0_21 = arith.constant 0 : index
    %34 = vector.load %arg7[%c0_19, %c0_20, %c0_21] : memref<3x32x32xf32, #tpu.memory_space<vmem>>, vector<3x32x32xf32>
    %c0_22 = arith.constant 0 : index
    %c0_23 = arith.constant 0 : index
    %35 = vector.load %arg8[%c0_22, %c0_23] : memref<32x1xf32, #tpu.memory_space<vmem>>, vector<32x1xf32>
    %c0_24 = arith.constant 0 : index
    %c0_25 = arith.constant 0 : index
    %c0_26 = arith.constant 0 : index
    %36 = vector.load %arg9[%c0_24, %c0_25, %c0_26] : memref<1x32x1xf32, #tpu.memory_space<vmem>>, vector<1x32x1xf32>
    %c0_27 = arith.constant 0 : index
    %c0_28 = arith.constant 0 : index
    %37 = vector.load %arg10[%c0_27, %c0_28] : memref<1x1xf32, #tpu.memory_space<vmem>>, vector<1x1xf32>
    %38 = vector.shape_cast %28 : vector<3x32x128xf32> to vector<3x1x32x128xf32>
    %39 = vector.shape_cast %38 : vector<3x1x32x128xf32> to vector<3x1x32x128xf32>
    %40 = vector.broadcast %39 : vector<3x1x32x128xf32> to vector<3x6x32x128xf32>
    %41 = vector.shape_cast %40 : vector<3x6x32x128xf32> to vector<18x32x128xf32>
    %42 = vector.shape_cast %29 : vector<6x32x128xf32> to vector<1x6x32x128xf32>
    %43 = vector.shape_cast %42 : vector<1x6x32x128xf32> to vector<1x6x32x128xf32>
    %44 = vector.broadcast %43 : vector<1x6x32x128xf32> to vector<3x6x32x128xf32>
    %45 = vector.shape_cast %44 : vector<3x6x32x128xf32> to vector<18x32x128xf32>
    %46 = arith.mulf %41, %45 : vector<18x32x128xf32>
    %47 = vector.shape_cast %46 : vector<18x32x128xf32> to vector<18x4x8x128xf32>
    %cst_29 = arith.constant dense<0.000000e+00> : vector<18x4x128xf32>
    %48 = vector.multi_reduction <add>, %47, %cst_29 [2] : vector<18x4x8x128xf32> to vector<18x4x128xf32>
    %49 = vector.shape_cast %48 : vector<18x4x128xf32> to vector<3x6x4x128xf32>
    %cst_30 = arith.constant 0.353553385 : f32
    %50 = vector.broadcast %cst_30 : f32 to vector<3x6x4x128xf32>
    %51 = arith.mulf %49, %50 : vector<3x6x4x128xf32>
    %cst_31 = arith.constant -1.000000e+30 : f32
    %52 = vector.shape_cast %15 : vector<3x6x1x128xi1> to vector<3x6x1x128xi1>
    %53 = vector.broadcast %52 : vector<3x6x1x128xi1> to vector<3x6x4x128xi1>
    %54 = vector.broadcast %cst_31 : f32 to vector<3x6x4x128xf32>
    %55 = arith.select %53, %54, %51 : vector<3x6x4x128xi1>, vector<3x6x4x128xf32>
    %cst_32 = arith.constant dense<0xFF800000> : vector<3x4x128xf32>
    %56 = vector.multi_reduction <maximumf>, %55, %cst_32 [1] : vector<3x6x4x128xf32> to vector<3x4x128xf32>
    %57 = vector.shape_cast %56 : vector<3x4x128xf32> to vector<3x1x4x128xf32>
    %58 = vector.broadcast %57 : vector<3x1x4x128xf32> to vector<3x6x4x128xf32>
    %59 = arith.subf %55, %58 : vector<3x6x4x128xf32>
    %60 = math.exp %59 : vector<3x6x4x128xf32>
    %cst_33 = arith.constant 0.000000e+00 : f32
    %61 = vector.shape_cast %15 : vector<3x6x1x128xi1> to vector<3x6x1x128xi1>
    %62 = vector.broadcast %61 : vector<3x6x1x128xi1> to vector<3x6x4x128xi1>
    %63 = vector.broadcast %cst_33 : f32 to vector<3x6x4x128xf32>
    %64 = arith.select %62, %63, %60 : vector<3x6x4x128xi1>, vector<3x6x4x128xf32>
    %cst_34 = arith.constant dense<0.000000e+00> : vector<3x4x128xf32>
    %65 = vector.multi_reduction <add>, %64, %cst_34 [1] : vector<3x6x4x128xf32> to vector<3x4x128xf32>
    %66 = vector.shape_cast %65 : vector<3x4x128xf32> to vector<3x1x4x128xf32>
    %cst_35 = arith.constant 1.000000e-30 : f32
    %67 = vector.broadcast %cst_35 : f32 to vector<3x1x4x128xf32>
    %68 = arith.maximumf %66, %67 : vector<3x1x4x128xf32>
    %69 = tpu.reciprocal %68 {approx = true} : vector<3x1x4x128xf32> -> vector<3x1x4x128xf32>
    %70 = arith.mulf %68, %69 : vector<3x1x4x128xf32>
    %cst_36 = arith.constant 2.000000e+00 : f32
    %71 = vector.broadcast %cst_36 : f32 to vector<3x1x4x128xf32>
    %72 = arith.subf %71, %70 : vector<3x1x4x128xf32>
    %73 = arith.mulf %69, %72 : vector<3x1x4x128xf32>
    %74 = vector.broadcast %73 : vector<3x1x4x128xf32> to vector<3x6x4x128xf32>
    %75 = arith.mulf %64, %74 : vector<3x6x4x128xf32>
    %76 = vector.shape_cast %75 : vector<3x6x4x128xf32> to vector<18x4x1x128xf32>
    %77 = vector.shape_cast %30 : vector<6x32x128xf32> to vector<1x6x32x128xf32>
    %78 = vector.shape_cast %77 : vector<1x6x32x128xf32> to vector<1x6x32x128xf32>
    %79 = vector.broadcast %78 : vector<1x6x32x128xf32> to vector<3x6x32x128xf32>
    %80 = vector.shape_cast %79 : vector<3x6x32x128xf32> to vector<18x4x8x128xf32>
    %81 = vector.broadcast %76 : vector<18x4x1x128xf32> to vector<18x4x8x128xf32>
    %82 = arith.mulf %81, %80 : vector<18x4x8x128xf32>
    %83 = vector.shape_cast %82 : vector<18x4x8x128xf32> to vector<3x6x32x128xf32>
    %cst_37 = arith.constant dense<0.000000e+00> : vector<3x32x128xf32>
    %84 = vector.multi_reduction <add>, %83, %cst_37 [1] : vector<3x6x32x128xf32> to vector<3x32x128xf32>
    "tpu.trace_start"() <{level = 10 : i32, message = "ahk,akb->ahb"}> : () -> ()
    %cst_38 = arith.constant dense<0.000000e+00> : vector<3x32x128xf32>
    %85 = tpu.matmul %34, %84, %cst_38 {dimension_numbers = #tpu.dot_dimension_numbers<[2], [1], [1], [2], [0, 0, 0, 1, 1, 2], [0], [0]>} : vector<3x32x32xf32>, vector<3x32x128xf32>, vector<3x32x128xf32> -> vector<3x32x128xf32>
    "tpu.trace_stop"() : () -> ()
    %86 = vector.shape_cast %35 : vector<32x1xf32> to vector<1x32x1xf32>
    %87 = vector.broadcast %86 : vector<1x32x1xf32> to vector<3x32x128xf32>
    %88 = arith.addf %85, %87 : vector<3x32x128xf32>
    %89 = vector.broadcast %36 : vector<1x32x1xf32> to vector<3x32x128xf32>
    %90 = arith.mulf %88, %89 : vector<3x32x128xf32>
    %cst_39 = arith.constant dense<0.000000e+00> : vector<3x128xf32>
    %91 = vector.multi_reduction <add>, %90, %cst_39 [1] : vector<3x32x128xf32> to vector<3x128xf32>
    %92 = vector.broadcast %37 : vector<1x1xf32> to vector<3x128xf32>
    %93 = arith.addf %91, %92 : vector<3x128xf32>
    %cst_40 = arith.constant 0.000000e+00 : f32
    %94 = vector.broadcast %cst_40 : f32 to vector<3x128xf32>
    %95 = arith.select %17, %94, %93 : vector<3x128xi1>, vector<3x128xf32>
    %c0_41 = arith.constant 0 : index
    %c0_42 = arith.constant 0 : index
    %c0_43 = arith.constant 0 : index
    %96 = vector.load %arg11[%c0_41, %c0_42, %c0_43] : memref<3x32x32xf32, #tpu.memory_space<vmem>>, vector<3x32x32xf32>
    %c0_44 = arith.constant 0 : index
    %c0_45 = arith.constant 0 : index
    %97 = vector.load %arg12[%c0_44, %c0_45] : memref<32x1xf32, #tpu.memory_space<vmem>>, vector<32x1xf32>
    %c0_46 = arith.constant 0 : index
    %c0_47 = arith.constant 0 : index
    %c0_48 = arith.constant 0 : index
    %98 = vector.load %arg13[%c0_46, %c0_47, %c0_48] : memref<1x32x1xf32, #tpu.memory_space<vmem>>, vector<1x32x1xf32>
    %c0_49 = arith.constant 0 : index
    %c0_50 = arith.constant 0 : index
    %99 = vector.load %arg14[%c0_49, %c0_50] : memref<1x1xf32, #tpu.memory_space<vmem>>, vector<1x1xf32>
    %100 = vector.shape_cast %31 : vector<3x32x128xf32> to vector<3x1x32x128xf32>
    %101 = vector.shape_cast %100 : vector<3x1x32x128xf32> to vector<3x1x32x128xf32>
    %102 = vector.broadcast %101 : vector<3x1x32x128xf32> to vector<3x6x32x128xf32>
    %103 = vector.shape_cast %102 : vector<3x6x32x128xf32> to vector<18x32x128xf32>
    %104 = vector.shape_cast %32 : vector<6x32x128xf32> to vector<1x6x32x128xf32>
    %105 = vector.shape_cast %104 : vector<1x6x32x128xf32> to vector<1x6x32x128xf32>
    %106 = vector.broadcast %105 : vector<1x6x32x128xf32> to vector<3x6x32x128xf32>
    %107 = vector.shape_cast %106 : vector<3x6x32x128xf32> to vector<18x32x128xf32>
    %108 = arith.mulf %103, %107 : vector<18x32x128xf32>
    %109 = vector.shape_cast %108 : vector<18x32x128xf32> to vector<18x4x8x128xf32>
    %cst_51 = arith.constant dense<0.000000e+00> : vector<18x4x128xf32>
    %110 = vector.multi_reduction <add>, %109, %cst_51 [2] : vector<18x4x8x128xf32> to vector<18x4x128xf32>
    %111 = vector.shape_cast %110 : vector<18x4x128xf32> to vector<3x6x4x128xf32>
    %cst_52 = arith.constant 0.353553385 : f32
    %112 = vector.broadcast %cst_52 : f32 to vector<3x6x4x128xf32>
    %113 = arith.mulf %111, %112 : vector<3x6x4x128xf32>
    %cst_53 = arith.constant -1.000000e+30 : f32
    %114 = vector.shape_cast %15 : vector<3x6x1x128xi1> to vector<3x6x1x128xi1>
    %115 = vector.broadcast %114 : vector<3x6x1x128xi1> to vector<3x6x4x128xi1>
    %116 = vector.broadcast %cst_53 : f32 to vector<3x6x4x128xf32>
    %117 = arith.select %115, %116, %113 : vector<3x6x4x128xi1>, vector<3x6x4x128xf32>
    %cst_54 = arith.constant dense<0xFF800000> : vector<3x4x128xf32>
    %118 = vector.multi_reduction <maximumf>, %117, %cst_54 [1] : vector<3x6x4x128xf32> to vector<3x4x128xf32>
    %119 = vector.shape_cast %118 : vector<3x4x128xf32> to vector<3x1x4x128xf32>
    %120 = vector.broadcast %119 : vector<3x1x4x128xf32> to vector<3x6x4x128xf32>
    %121 = arith.subf %117, %120 : vector<3x6x4x128xf32>
    %122 = math.exp %121 : vector<3x6x4x128xf32>
    %cst_55 = arith.constant 0.000000e+00 : f32
    %123 = vector.shape_cast %15 : vector<3x6x1x128xi1> to vector<3x6x1x128xi1>
    %124 = vector.broadcast %123 : vector<3x6x1x128xi1> to vector<3x6x4x128xi1>
    %125 = vector.broadcast %cst_55 : f32 to vector<3x6x4x128xf32>
    %126 = arith.select %124, %125, %122 : vector<3x6x4x128xi1>, vector<3x6x4x128xf32>
    %cst_56 = arith.constant dense<0.000000e+00> : vector<3x4x128xf32>
    %127 = vector.multi_reduction <add>, %126, %cst_56 [1] : vector<3x6x4x128xf32> to vector<3x4x128xf32>
    %128 = vector.shape_cast %127 : vector<3x4x128xf32> to vector<3x1x4x128xf32>
    %cst_57 = arith.constant 1.000000e-30 : f32
    %129 = vector.broadcast %cst_57 : f32 to vector<3x1x4x128xf32>
    %130 = arith.maximumf %128, %129 : vector<3x1x4x128xf32>
    %131 = tpu.reciprocal %130 {approx = true} : vector<3x1x4x128xf32> -> vector<3x1x4x128xf32>
    %132 = arith.mulf %130, %131 : vector<3x1x4x128xf32>
    %cst_58 = arith.constant 2.000000e+00 : f32
    %133 = vector.broadcast %cst_58 : f32 to vector<3x1x4x128xf32>
    %134 = arith.subf %133, %132 : vector<3x1x4x128xf32>
    %135 = arith.mulf %131, %134 : vector<3x1x4x128xf32>
    %136 = vector.broadcast %135 : vector<3x1x4x128xf32> to vector<3x6x4x128xf32>
    %137 = arith.mulf %126, %136 : vector<3x6x4x128xf32>
    %138 = vector.shape_cast %137 : vector<3x6x4x128xf32> to vector<18x4x1x128xf32>
    %139 = vector.shape_cast %33 : vector<6x32x128xf32> to vector<1x6x32x128xf32>
    %140 = vector.shape_cast %139 : vector<1x6x32x128xf32> to vector<1x6x32x128xf32>
    %141 = vector.broadcast %140 : vector<1x6x32x128xf32> to vector<3x6x32x128xf32>
    %142 = vector.shape_cast %141 : vector<3x6x32x128xf32> to vector<18x4x8x128xf32>
    %143 = vector.broadcast %138 : vector<18x4x1x128xf32> to vector<18x4x8x128xf32>
    %144 = arith.mulf %143, %142 : vector<18x4x8x128xf32>
    %145 = vector.shape_cast %144 : vector<18x4x8x128xf32> to vector<3x6x32x128xf32>
    %cst_59 = arith.constant dense<0.000000e+00> : vector<3x32x128xf32>
    %146 = vector.multi_reduction <add>, %145, %cst_59 [1] : vector<3x6x32x128xf32> to vector<3x32x128xf32>
    "tpu.trace_start"() <{level = 10 : i32, message = "ahk,akb->ahb"}> : () -> ()
    %cst_60 = arith.constant dense<0.000000e+00> : vector<3x32x128xf32>
    %147 = tpu.matmul %96, %146, %cst_60 {dimension_numbers = #tpu.dot_dimension_numbers<[2], [1], [1], [2], [0, 0, 0, 1, 1, 2], [0], [0]>} : vector<3x32x32xf32>, vector<3x32x128xf32>, vector<3x32x128xf32> -> vector<3x32x128xf32>
    "tpu.trace_stop"() : () -> ()
    %148 = vector.shape_cast %97 : vector<32x1xf32> to vector<1x32x1xf32>
    %149 = vector.broadcast %148 : vector<1x32x1xf32> to vector<3x32x128xf32>
    %150 = arith.addf %147, %149 : vector<3x32x128xf32>
    %151 = vector.broadcast %98 : vector<1x32x1xf32> to vector<3x32x128xf32>
    %152 = arith.mulf %150, %151 : vector<3x32x128xf32>
    %cst_61 = arith.constant dense<0.000000e+00> : vector<3x128xf32>
    %153 = vector.multi_reduction <add>, %152, %cst_61 [1] : vector<3x32x128xf32> to vector<3x128xf32>
    %154 = vector.broadcast %99 : vector<1x1xf32> to vector<3x128xf32>
    %155 = arith.addf %153, %154 : vector<3x128xf32>
    %cst_62 = arith.constant 0.000000e+00 : f32
    %156 = vector.broadcast %cst_62 : f32 to vector<3x128xf32>
    %157 = arith.select %17, %156, %155 : vector<3x128xi1>, vector<3x128xf32>
    %158 = math.absf %95 : vector<3x128xf32>
    %cst_63 = arith.constant dense<0.000000e+00> : vector<128xf32>
    %159 = vector.multi_reduction <add>, %157, %cst_63 [0] : vector<3x128xf32> to vector<128xf32>
    %160 = vector.shape_cast %159 : vector<128xf32> to vector<1x128xf32>
    %cst_64 = arith.constant 0.333333343 : f32
    %161 = vector.broadcast %cst_64 : f32 to vector<1x128xf32>
    %162 = arith.mulf %160, %161 : vector<1x128xf32>
    %c0_65 = arith.constant 0 : index
    %c0_66 = arith.constant 0 : index
    %163 = vector.load %arg3[%c0_65, %c0_66] : memref<3x128xf32, #tpu.memory_space<vmem>>, vector<3x128xf32>
    %164 = arith.mulf %163, %158 : vector<3x128xf32>
    %cst_67 = arith.constant dense<0.000000e+00> : vector<128xf32>
    %165 = vector.multi_reduction <add>, %164, %cst_67 [0] : vector<3x128xf32> to vector<128xf32>
    %166 = vector.shape_cast %165 : vector<128xf32> to vector<1x128xf32>
    %167 = arith.addf %166, %162 : vector<1x128xf32>
    %c0_68 = arith.constant 0 : index
    %c0_69 = arith.constant 0 : index
    %168 = vector.load %arg15[%c0_68, %c0_69] : memref<1x128xf32, #tpu.memory_space<vmem>>, vector<1x128xf32>
    tpu.vector_store %arg15[%c0_68, %c0_69], %167 {strides = array<i32>} : memref<1x128xf32, #tpu.memory_space<vmem>>, vector<1x128xf32>,
    return
  }
  func.func @transform_0(%arg0: i32) -> (i32, i32, i32) {
    %c0_i32 = arith.constant 0 : i32
    %c0_i32_0 = arith.constant 0 : i32
    %c0_i32_1 = arith.constant 0 : i32
    return %c0_i32, %c0_i32_0, %arg0 : i32, i32, i32
  }
  func.func @transform_1(%arg0: i32) -> (i32, i32) {
    %c0_i32 = arith.constant 0 : i32
    %c0_i32_0 = arith.constant 0 : i32
    return %c0_i32, %arg0 : i32, i32
  }
  func.func @transform_2(%arg0: i32) -> (i32, i32) {
    %c0_i32 = arith.constant 0 : i32
    %c0_i32_0 = arith.constant 0 : i32
    return %c0_i32, %arg0 : i32, i32
  }
  func.func @transform_3(%arg0: i32) -> (i32, i32, i32) {
    %c0_i32 = arith.constant 0 : i32
    %c0_i32_0 = arith.constant 0 : i32
    %c0_i32_1 = arith.constant 0 : i32
    %c0_i32_2 = arith.constant 0 : i32
    return %c0_i32, %c0_i32_0, %c0_i32_1 : i32, i32, i32
  }
  func.func @transform_4(%arg0: i32) -> (i32, i32) {
    %c0_i32 = arith.constant 0 : i32
    %c0_i32_0 = arith.constant 0 : i32
    %c0_i32_1 = arith.constant 0 : i32
    return %c0_i32, %c0_i32_0 : i32, i32
  }
  func.func @transform_5(%arg0: i32) -> (i32, i32, i32) {
    %c0_i32 = arith.constant 0 : i32
    %c0_i32_0 = arith.constant 0 : i32
    %c0_i32_1 = arith.constant 0 : i32
    %c0_i32_2 = arith.constant 0 : i32
    return %c0_i32, %c0_i32_0, %c0_i32_1 : i32, i32, i32
  }
  func.func @transform_6(%arg0: i32) -> (i32, i32, i32) {
    %c0_i32 = arith.constant 0 : i32
    %c0_i32_0 = arith.constant 0 : i32
    %c0_i32_1 = arith.constant 0 : i32
    %c0_i32_2 = arith.constant 0 : i32
    return %c0_i32, %c0_i32_0, %c0_i32_1 : i32, i32, i32
  }
  func.func @transform_7(%arg0: i32) -> (i32, i32) {
    %c0_i32 = arith.constant 0 : i32
    %c0_i32_0 = arith.constant 0 : i32
    %c0_i32_1 = arith.constant 0 : i32
    return %c0_i32, %c0_i32_0 : i32, i32
  }
  func.func @transform_8(%arg0: i32) -> (i32, i32, i32) {
    %c0_i32 = arith.constant 0 : i32
    %c0_i32_0 = arith.constant 0 : i32
    %c0_i32_1 = arith.constant 0 : i32
    %c0_i32_2 = arith.constant 0 : i32
    return %c0_i32, %c0_i32_0, %c0_i32_1 : i32, i32, i32
  }
  func.func @transform_9(%arg0: i32) -> (i32, i32) {
    %c0_i32 = arith.constant 0 : i32
    %c0_i32_0 = arith.constant 0 : i32
    %c0_i32_1 = arith.constant 0 : i32
    return %c0_i32, %c0_i32_0 : i32, i32
  }
  func.func @transform_10(%arg0: i32) -> (i32, i32, i32) {
    %c0_i32 = arith.constant 0 : i32
    %c0_i32_0 = arith.constant 0 : i32
    %c0_i32_1 = arith.constant 0 : i32
    %c0_i32_2 = arith.constant 0 : i32
    return %c0_i32, %c0_i32_0, %c0_i32_1 : i32, i32, i32
  }
  func.func @transform_11(%arg0: i32) -> (i32, i32) {
    %c0_i32 = arith.constant 0 : i32
    %c0_i32_0 = arith.constant 0 : i32
    %c0_i32_1 = arith.constant 0 : i32
    return %c0_i32, %c0_i32_0 : i32, i32
  }
  func.func @transform_12(%arg0: i32) -> (i32, i32, i32) {
    %c0_i32 = arith.constant 0 : i32
    %c0_i32_0 = arith.constant 0 : i32
    %c0_i32_1 = arith.constant 0 : i32
    %c0_i32_2 = arith.constant 0 : i32
    return %c0_i32, %c0_i32_0, %c0_i32_1 : i32, i32, i32
  }
  func.func @transform_13(%arg0: i32) -> (i32, i32) {
    %c0_i32 = arith.constant 0 : i32
    %c0_i32_0 = arith.constant 0 : i32
    %c0_i32_1 = arith.constant 0 : i32
    return %c0_i32, %c0_i32_0 : i32, i32
  }
  func.func @transform_14(%arg0: i32) -> (i32, i32) {
    %c0_i32 = arith.constant 0 : i32
    %c0_i32_0 = arith.constant 0 : i32
    return %c0_i32, %arg0 : i32, i32
  }
}

</mosaic_0001>

<bundles_post_ra>
// kernel: tpu_custom_call.1
= control target key start
LH: loop header
LB: loop body
LE: loop exit
PB: predicated region body
PF: predicated region fallthrough
CT: control target
= control target key end

     0   :  { %s12470_s0 = inlined_call_operand.vmem [shape: f32[6,8,128], index: 0, kind: input, shape index: {}]   ;;  %s12471_s1 = inlined_call_operand.vmem [shape: f32[6,128], index: 1, kind: input, shape index: {}]   ;;  %s12472_s2 = inlined_call_operand.vmem [shape: f32[3,128], index: 2, kind: input, shape index: {}]   ;;  %s12473_s3 = inlined_call_operand.vmem [shape: f32[6,64,8], index: 3, kind: input, shape index: {}]   ;;  %s12474_s4 = inlined_call_operand.vmem [shape: f32[64,1], index: 4, kind: input, shape index: {}]   ;;  %s12475_s5 = inlined_call_operand.vmem [shape: f32[6,192,64], index: 5, kind: input, shape index: {}]   ;;  %s12476_s6 = inlined_call_operand.vmem [shape: f32[3,32,32], index: 6, kind: input, shape index: {}]   ;;  %s12477_s7 = inlined_call_operand.vmem [shape: f32[32,1], index: 7, kind: input, shape index: {}]   ;;  %s12478_s8 = inlined_call_operand.vmem [shape: f32[1,32,1], index: 8, kind: input, shape index: {}]   ;;  %s12479_s9 = inlined_call_operand.<no memory space> [shape: f32[1,1], index: 9, kind: input, shape index: {}]   ;;  %s12480_s10 = inlined_call_operand.vmem [shape: f32[3,32,32], index: 10, kind: input, shape index: {}]   ;;  %s12481_s11 = inlined_call_operand.vmem [shape: f32[32,1], index: 11, kind: input, shape index: {}]   ;;  %s12482_s12 = inlined_call_operand.vmem [shape: f32[1,32,1], index: 12, kind: input, shape index: {}]   ;;  %s12483_s14 = inlined_call_operand.hbm [shape: f32[1,128], index: 14, kind: output, shape index: {}]   ;;  %s12484_s13 = inlined_call_operand.<no memory space> [shape: f32[1,1], index: 13, kind: input, shape index: {}]  }
   0x1   :  { %v19_v0 = vstv %s12479_s9  ;;  %v21_v1 = vstv %s12484_s13 }
   0x2   :  { %20 = vst [vmem:[#allocation2] sm:$0x1] %v19_v0  ;;  %22 = vst [vmem:[#allocation3] sm:$0x1] %v21_v1 }
   0x3   :  { %v52_v2 = vld [vmem:[%s12470_s0] sm:$0xff]  ;;  %v53_v3 = vld [vmem:[%s12470_s0 + $0x8] sm:$0xff]  ;;  %vm265_vm0 = vcmask 64512   ;;  %v171_v8 = vld [vmem:[%s12473_s3 + $0x10] sm:$0xff]  ;;  %v12485_v16 = vmov 0  }
   0x4   :  { %v169_v4 = vld [vmem:[%s12473_s3] sm:$0xff]  ;;  %7933 = vmatprep.subr.mxu0 %v52_v2  ;;  %7947 = vmatprep.subr.mxu1 %v53_v3  ;;  %v170_v6 = vld [vmem:[%s12473_s3 + $0x8] sm:$0xff]  ;;  %v179_v9 = vld [vmem:[%s12473_s3 + $0x50] sm:$0xff] }
   0x5   :  { %v177_v5 = vld [vmem:[%s12473_s3 + $0x40] sm:$0xff]  ;;  %v178_v7 = vld [vmem:[%s12473_s3 + $0x48] sm:$0xff]  ;;  %7934 = vmatpush3.msra.mxu0 %v52_v2  ;;  %7935 = vmatprep.mubr.msk.f32.mxu0 %vm265_vm0, %v169_v4  ;;  %v172_v10 = vld [vmem:[%s12473_s3 + $0x18] sm:$0xff] }
   0x6   :  { %7948 = vmatpush3.msra.mxu1 %v53_v3  ;;  %7949 = vmatprep.mubr.msk.f32.mxu1 %vm265_vm0, %v177_v5  ;;  %v180_v11 = vld [vmem:[%s12473_s3 + $0x58] sm:$0xff]  ;;  %v173_v12 = vld [vmem:[%s12473_s3 + $0x20] sm:$0xff]  ;;  %v54_v14 = vld [vmem:[%s12470_s0 + $0x10] sm:$0xff] }
   0x7   :  { %7936 = vmatmul.mubr.msk.f32.vlgmr.msra.gmra.mxu0 %vm265_vm0, %v170_v6  ;;  %7950 = vmatmul.mubr.msk.f32.vlgmr.msra.gmra.mxu1 %vm265_vm0, %v178_v7  ;;  %v181_v13 = vld [vmem:[%s12473_s3 + $0x60] sm:$0xff]  ;;  %v55_v15 = vld [vmem:[%s12470_s0 + $0x18] sm:$0xff]  ;;  %v174_v17 = vld [vmem:[%s12473_s3 + $0x28] sm:$0xff] }
   0x8   :  { %7938 = vmatprep.mubr.msk.f32.mxu0 %vm265_vm0, %v171_v8  ;;  %7952 = vmatprep.mubr.msk.f32.mxu1 %vm265_vm0, %v179_v9  ;;  %v182_v18 = vld [vmem:[%s12473_s3 + $0x68] sm:$0xff]  ;;  %v175_v19 = vld [vmem:[%s12473_s3 + $0x30] sm:$0xff]  ;;  %v56_v21 = vld [vmem:[%s12470_s0 + $0x20] sm:$0xff] }
   0x9   :  { %8416 = vset.pattern.permute.xlu0 %v12485_v16  ;;  %8417 = vset.pattern.permute.xlu1 %v12485_v16  ;;  %v183_v20 = vld [vmem:[%s12473_s3 + $0x70] sm:$0xff]  ;;  %v57_v22 = vld [vmem:[%s12470_s0 + $0x28] sm:$0xff]  ;;  %v224_v23 = vld [vmem:[%s12474_s4 + $0x38] sm:$0xff] }
   0xa   :  { %7961 = vmatprep.subr.mxu0 %v54_v14  ;;  %7975 = vmatprep.subr.mxu1 %v55_v15  ;;  %v176_v24 = vld [vmem:[%s12473_s3 + $0x38] sm:$0xff]  ;;  %v185_v26 = vld [vmem:[%s12473_s3 + $0x80] sm:$0xff]  ;;  %v222_v28 = vld [vmem:[%s12474_s4 + $0x28] sm:$0xff] }
   0xb   :  { %7939 = vmatmul.mubr.msk.f32.gmra.mxu0 %vm265_vm0, %v172_v10  ;;  %7953 = vmatmul.mubr.msk.f32.gmra.mxu1 %vm265_vm0, %v180_v11  ;;  %v184_v25 = vld [vmem:[%s12473_s3 + $0x78] sm:$0xff]  ;;  %v193_v27 = vld [vmem:[%s12473_s3 + $0xc0] sm:$0xff]  ;;  %v223_v29 = vld [vmem:[%s12474_s4 + $0x30] sm:$0xff] }
   0xc   :  { %7941 = vmatprep.mubr.msk.f32.mxu0 %vm265_vm0, %v173_v12  ;;  %7955 = vmatprep.mubr.msk.f32.mxu1 %vm265_vm0, %v181_v13  ;;  %v221_v30 = vld [vmem:[%s12474_s4 + $0x20] sm:$0xff]  ;;  %v186_v31 = vld [vmem:[%s12473_s3 + $0x88] sm:$0xff]  ;;  %v187_v33 = vld [vmem:[%s12473_s3 + $0x90] sm:$0xff] }
   0xd   :  { %7962 = vmatpush3.msra.mxu0 %v54_v14  ;;  %7976 = vmatpush3.msra.mxu1 %v55_v15  ;;  %v194_v32 = vld [vmem:[%s12473_s3 + $0xc8] sm:$0xff]  ;;  %v195_v34 = vld [vmem:[%s12473_s3 + $0xd0] sm:$0xff]  ;;  %v220_v35 = vld [vmem:[%s12474_s4 + $0x18] sm:$0xff] }
   0xe   :  { %7989 = vmatprep.subr.mxu0 %v56_v21  ;;  %8003 = vmatprep.subr.mxu1 %v57_v22  ;;  %v219_v36 = vld [vmem:[%s12474_s4 + $0x10] sm:$0xff]  ;;  %v188_v37 = vld [vmem:[%s12473_s3 + $0x98] sm:$0xff]  ;;  %v189_v39 = vld [vmem:[%s12473_s3 + $0xa0] sm:$0xff] }
   0xf   :  { %7942 = vmatmul.mubr.msk.f32.gmra.mxu0 %vm265_vm0, %v174_v17  ;;  %7956 = vmatmul.mubr.msk.f32.gmra.mxu1 %vm265_vm0, %v182_v18  ;;  %v196_v38 = vld [vmem:[%s12473_s3 + $0xd8] sm:$0xff]  ;;  %v197_v40 = vld [vmem:[%s12473_s3 + $0xe0] sm:$0xff]  ;;  %v218_v41 = vld [vmem:[%s12474_s4 + $0x8] sm:$0xff] }
  0x10   :  { %7944 = vmatprep.mubr.msk.f32.mxu0 %vm265_vm0, %v175_v19  ;;  %7958 = vmatprep.mubr.msk.f32.mxu1 %vm265_vm0, %v183_v20  ;;  %v217_v42 = vld [vmem:[%s12474_s4] sm:$0xff]  ;;  %v190_v43 = vld [vmem:[%s12473_s3 + $0xa8] sm:$0xff]  ;;  %v191_v45 = vld [vmem:[%s12473_s3 + $0xb0] sm:$0xff] }
  0x11   :  { %262 = vperm.xlu0 %8416, %v224_v23   ;;  %252 = vperm.xlu1 %8417, %v222_v28   ;;  %v198_v44 = vld [vmem:[%s12473_s3 + $0xe8] sm:$0xff]  ;;  %v199_v46 = vld [vmem:[%s12473_s3 + $0xf0] sm:$0xff] }
  0x13   :  { %7945 = vmatmul.mubr.msk.f32.gmra.mxu0 %vm265_vm0, %v176_v24  ;;  %7959 = vmatmul.mubr.msk.f32.gmra.mxu1 %vm265_vm0, %v184_v25 }
  0x14   :  { %7963 = vmatprep.mubr.msk.f32.mxu0 %vm265_vm0, %v185_v26  ;;  %7977 = vmatprep.mubr.msk.f32.mxu1 %vm265_vm0, %v193_v27 }
  0x15   :  { %257 = vperm.xlu0 %8416, %v223_v29   ;;  %247 = vperm.xlu1 %8417, %v221_v30  }
  0x17   :  { %7964 = vmatmul.mubr.msk.f32.vlgmr.msra.gmra.mxu0 %vm265_vm0, %v186_v31  ;;  %7978 = vmatmul.mubr.msk.f32.vlgmr.msra.gmra.mxu1 %vm265_vm0, %v194_v32 }
  0x18   :  { %7966 = vmatprep.mubr.msk.f32.mxu0 %vm265_vm0, %v187_v33  ;;  %7980 = vmatprep.mubr.msk.f32.mxu1 %vm265_vm0, %v195_v34 }
  0x19   :  { %7990 = vmatpush3.msra.mxu0 %v56_v21  ;;  %8004 = vmatpush3.msra.mxu1 %v57_v22 }
  0x1a   :  { %242 = vperm.xlu0 %8416, %v220_v35   ;;  %237 = vperm.xlu1 %8417, %v219_v36  }
  0x1b   :  { %7967 = vmatmul.mubr.msk.f32.gmra.mxu0 %vm265_vm0, %v188_v37  ;;  %7981 = vmatmul.mubr.msk.f32.gmra.mxu1 %vm265_vm0, %v196_v38 }
  0x1c   :  { %7969 = vmatprep.mubr.msk.f32.mxu0 %vm265_vm0, %v189_v39  ;;  %7983 = vmatprep.mubr.msk.f32.mxu1 %vm265_vm0, %v197_v40 }
  0x1d   :  { %23 = vsyncpa [#allocation5], 0  ;;  %v2763_v47 = vld [vmem:[%s12477_s7] sm:$0xff]  ;;  %v2764_v48 = vld [vmem:[%s12477_s7 + $0x8] sm:$0xff]  ;;  %vm1232_vm1 = vcmask 523264   ;;  %vm12654_vm5 = vcmask 1041409  }
  0x1e   :  { %232 = vperm.xlu0 %8416, %v218_v41   ;;  %227 = vperm.xlu1 %8417, %v217_v42   ;;  %v192_v49 = vld [vmem:[%s12473_s3 + $0xb8] sm:$0xff]  ;;  %v201_v51 = vld [vmem:[%s12473_s3 + $0x100] sm:$0xff]  ;;  %v2765_v53 = vld [vmem:[%s12477_s7 + $0x10] sm:$0xff]  ;;  %vm12663_vm6 = vcmask 1042434   ;;  %vm12658_vm7 = vcmask 1043459   ;;  %vm12655_vm11 = vcmask 1043456  }
  0x1f   :  { %7970 = vmatmul.mubr.msk.f32.gmra.mxu0 %vm265_vm0, %v190_v43  ;;  %7984 = vmatmul.mubr.msk.f32.gmra.mxu1 %vm265_vm0, %v198_v44  ;;  %v200_v50 = vld [vmem:[%s12473_s3 + $0xf8] sm:$0xff]  ;;  %v209_v52 = vld [vmem:[%s12473_s3 + $0x140] sm:$0xff]  ;;  %v202_v55 = vld [vmem:[%s12473_s3 + $0x108] sm:$0xff] }
  0x20   :  { %7972 = vmatprep.mubr.msk.f32.mxu0 %vm265_vm0, %v191_v45  ;;  %7986 = vmatprep.mubr.msk.f32.mxu1 %vm265_vm0, %v199_v46  ;;  %v2767_v54 = vld [vmem:[%s12478_s8] sm:$0xff]  ;;  %v210_v56 = vld [vmem:[%s12473_s3 + $0x148] sm:$0xff]  ;;  %v203_v57 = vld [vmem:[%s12473_s3 + $0x110] sm:$0xff] }
  0x21   :  { %v211_v58 = vld [vmem:[%s12473_s3 + $0x150] sm:$0xff]  ;;  %v2768_v59 = vld [vmem:[%s12478_s8 + $0x8] sm:$0xff]  ;;  %v5137_v60 = vld [vmem:[%s12481_s11] sm:$0xff] }
  0x22   :  { %4737 = vperm.xlu0 %8416, %v2763_v47   ;;  %4742 = vperm.xlu1 %8417, %v2764_v48   ;;  %v204_v61 = vld [vmem:[%s12473_s3 + $0x118] sm:$0xff]  ;;  %v205_v63 = vld [vmem:[%s12473_s3 + $0x120] sm:$0xff]  ;;  %v5138_v1 = vld [vmem:[%s12481_s11 + $0x8] sm:$0xff] }
  0x23   :  { %7973 = vmatmul.mubr.msk.f32.gmra.mxu0 %vm265_vm0, %v192_v49  ;;  %7987 = vmatmul.mubr.msk.f32.gmra.mxu1 %vm265_vm0, %v200_v50  ;;  %v212_v62 = vld [vmem:[%s12473_s3 + $0x158] sm:$0xff]  ;;  %v213_v0 = vld [vmem:[%s12473_s3 + $0x160] sm:$0xff]  ;;  %v206_v3 = vld [vmem:[%s12473_s3 + $0x128] sm:$0xff] }
  0x24   :  { %7991 = vmatprep.mubr.msk.f32.mxu0 %vm265_vm0, %v201_v51  ;;  %8005 = vmatprep.mubr.msk.f32.mxu1 %vm265_vm0, %v209_v52  ;;  %v2766_v2 = vld [vmem:[%s12477_s7 + $0x18] sm:$0xff]  ;;  %v214_v4 = vld [vmem:[%s12473_s3 + $0x168] sm:$0xff]  ;;  %v207_v5 = vld [vmem:[%s12473_s3 + $0x130] sm:$0xff] }
  0x25   :  { %v215_v6 = vld [vmem:[%s12473_s3 + $0x170] sm:$0xff]  ;;  %v208_v9 = vld [vmem:[%s12473_s3 + $0x138] sm:$0xff]  ;;  %v5141_v11 = vld [vmem:[%s12482_s12] sm:$0xff] }
  0x26   :  { %4747 = vperm.xlu0 %8416, %v2765_v53   ;;  %5049 = vperm.xlu1 %8417, %v2767_v54   ;;  %v2769_v7 = vld [vmem:[%s12478_s8 + $0x10] sm:$0xff]  ;;  %v216_v10 = vld [vmem:[%s12473_s3 + $0x178] sm:$0xff]  ;;  %v5142_v12 = vld [vmem:[%s12482_s12 + $0x8] sm:$0xff] }
  0x27   :  { %7992 = vmatmul.mubr.msk.f32.vlgmr.msra.gmra.mxu0 %vm265_vm0, %v202_v55  ;;  %8006 = vmatmul.mubr.msk.f32.vlgmr.msra.gmra.mxu1 %vm265_vm0, %v210_v56  ;;  %v5139_v8 = vld [vmem:[%s12481_s11 + $0x10] sm:$0xff]  ;;  %v2770_v13 = vld [vmem:[%s12478_s8 + $0x18] sm:$0xff]  ;;  %v7625_v18 = vld [vmem:[#allocation2] ss:$0 sm:$0xff] }
  0x28   :  { %7994 = vmatprep.mubr.msk.f32.mxu0 %vm265_vm0, %v203_v57  ;;  %8008 = vmatprep.mubr.msk.f32.mxu1 %vm265_vm0, %v211_v58  ;;  %v5140_v14 = vld [vmem:[%s12481_s11 + $0x18] sm:$0xff]  ;;  %v5143_v15 = vld [vmem:[%s12482_s12 + $0x10] sm:$0xff]  ;;  %v7638_v19 = vld [vmem:[#allocation3] ss:$0 sm:$0xff] }
  0x29   :  { %v5144_v17 = vld [vmem:[%s12482_s12 + $0x18] sm:$0xff]  ;;  %v1088_v20 = vld [vmem:[%s12475_s5] sm:$0xff] }
  0x2a   :  { %5054 = vperm.xlu0 %8416, %v2768_v59   ;;  %6999 = vperm.xlu1 %8417, %v5137_v60   ;;  %v1112_v21 = vld [vmem:[%s12475_s5 + $0xc0] sm:$0xff] }
  0x2b   :  { %7995 = vmatmul.mubr.msk.f32.gmra.mxu0 %vm265_vm0, %v204_v61  ;;  %8009 = vmatmul.mubr.msk.f32.gmra.mxu1 %vm265_vm0, %v212_v62 }
  0x2c   :  { %7997 = vmatprep.mubr.msk.f32.mxu0 %vm265_vm0, %v205_v63  ;;  %8011 = vmatprep.mubr.msk.f32.mxu1 %vm265_vm0, %v213_v0 }
  0x2e   :  { %7004 = vperm.xlu0 %8416, %v5138_v1   ;;  %4752 = vperm.xlu1 %8417, %v2766_v2  }
  0x2f   :  { %7998 = vmatmul.mubr.msk.f32.gmra.mxu0 %vm265_vm0, %v206_v3  ;;  %8012 = vmatmul.mubr.msk.f32.gmra.mxu1 %vm265_vm0, %v214_v4 }
  0x30   :  { %8000 = vmatprep.mubr.msk.f32.mxu0 %vm265_vm0, %v207_v5  ;;  %8014 = vmatprep.mubr.msk.f32.mxu1 %vm265_vm0, %v215_v6 }
  0x32   :  { %5059 = vperm.xlu0 %8416, %v2769_v7   ;;  %7009 = vperm.xlu1 %8417, %v5139_v8  }
  0x33   :  { %8001 = vmatmul.mubr.msk.f32.gmra.mxu0 %vm265_vm0, %v208_v9  ;;  %8015 = vmatmul.mubr.msk.f32.gmra.mxu1 %vm265_vm0, %v216_v10 }
  0x34   :  { %8033 = vmatprep.mubr.msk.f32.mxu0 %vm1232_vm1, %v1088_v20  ;;  %8085 = vmatprep.mubr.msk.f32.mxu1 %vm1232_vm1, %v1112_v21 }
  0x36   :  { %7310 = vperm.xlu0 %8416, %v5141_v11   ;;  %7315 = vperm.xlu1 %8417, %v5142_v12  }
  0x3a   :  { %5064 = vperm.xlu0 %8416, %v2770_v13   ;;  %7014 = vperm.xlu1 %8417, %v5140_v14  }
  0x3e   :  { %7320 = vperm.xlu0 %8416, %v5143_v15   ;;  %7325 = vperm.xlu1 %8417, %v5144_v17  }
  0x42   :  { %5112 = vperm.xlu0 %8416, %v7625_v18   ;;  %7373 = vperm.xlu1 %8417, %v7638_v19  }
  0x8c   :  { %v8909_v26 = vpop.permute.xlu0 %262  ;;  %v8911_v29 = vpop.permute.xlu1 %252 }
  0x90   :  { %v8913_v34 = vpop.permute.xlu0 %257  ;;  %v8915_v37 = vpop.permute.xlu1 %247 }
  0x95   :  { %v8921_v46 = vpop.permute.xlu0 %242  ;;  %v8929_v53 = vpop.permute.xlu1 %237 }
  0x99   :  { %v8943_v2 = vpop.permute.xlu0 %232  ;;  %v8951_v9 = vpop.permute.xlu1 %227 }
  0xc7   :  { %v8901_v22 = vpop.f32.mrf.mxu0  ;;  %v8903_v23 = vpop.f32.mrf.mxu1 }
  0xc8   :  { %v362_v10 = vadd.f32 %v8901_v22, %v8943_v2  ;;  %v491_v11 = vadd.f32 %v8903_v23, %v8943_v2 }
  0xc9   :  { %v8905_v24 = vpop.f32.mrf.mxu0  ;;  %v8907_v25 = vpop.f32.mrf.mxu1 }
  0xca   :  { %v357_v17 = vadd.f32 %v8905_v24, %v8951_v9  ;;  %v486_v18 = vadd.f32 %v8907_v25, %v8951_v9  ;;  %v1041_v23 = vmax.f32 %v362_v10, 0.0 }
  0xcb   :  { %v7940_v27 = vpop.f32.mrf.mxu0  ;;  %v7954_v28 = vpop.f32.mrf.mxu1 }
  0xcc   :  { %v372_v60 = vadd.f32 %v7940_v27, %v8921_v46  ;;  %v501_v61 = vadd.f32 %v7954_v28, %v8921_v46  ;;  %v1049_v27 = vmax.f32 %v491_v11, 0.0  ;;  %v1040_v24 = vmax.f32 %v357_v17, 0.0 }
  0xcd   :  { %v366_v30 = vpop.f32.mrf.mxu0  ;;  %v495_v31 = vpop.f32.mrf.mxu1 }
  0xce   :  { %v367_v3 = vadd.f32 %v366_v30, %v8929_v53  ;;  %v496_v4 = vadd.f32 %v495_v31, %v8929_v53  ;;  %v1043_v12 = vmax.f32 %v372_v60, 0.0  ;;  %v1051_v13 = vmax.f32 %v501_v61, 0.0 }
  0xcf   :  { %v7943_v32 = vpop.f32.mrf.mxu0  ;;  %v7957_v33 = vpop.f32.mrf.mxu1  ;;  %v1048_v31 = vmax.f32 %v486_v18, 0.0  ;;  %v1092_v18 = vld [vmem:[%s12475_s5 + $0x20] sm:$0xff] }
  0xd0   :  { %v382_v42 = vadd.f32 %v7943_v32, %v8911_v29  ;;  %v511_v43 = vadd.f32 %v7957_v33, %v8911_v29  ;;  %v1042_v19 = vmax.f32 %v367_v3, 0.0  ;;  %v1050_v20 = vmax.f32 %v496_v4, 0.0  ;;  %v1115_v3 = vld [vmem:[%s12475_s5 + $0xd8] sm:$0xff] }
  0xd1   :  { %v376_v35 = vpop.f32.mrf.mxu0  ;;  %v505_v36 = vpop.f32.mrf.mxu1 }
  0xd2   :  { %v377_v54 = vadd.f32 %v376_v35, %v8915_v37  ;;  %v506_v55 = vadd.f32 %v505_v36, %v8915_v37  ;;  %v1045_v62 = vmax.f32 %v382_v42, 0.0  ;;  %v1053_v63 = vmax.f32 %v511_v43, 0.0  ;;  %v1089_v36 = vld [vmem:[%s12475_s5 + $0x8] sm:$0xff] }
  0xd3   :  { %v7946_v38 = vpop.f32.mrf.mxu0  ;;  %v7960_v39 = vpop.f32.mrf.mxu1 }
  0xd4   :  { %v392_v40 = vadd.f32 %v7946_v38, %v8909_v26  ;;  %v521_v41 = vadd.f32 %v7960_v39, %v8909_v26  ;;  %v1044_v5 = vmax.f32 %v377_v54, 0.0  ;;  %v1052_v6 = vmax.f32 %v506_v55, 0.0  ;;  %v1113_v38 = vld [vmem:[%s12475_s5 + $0xc8] sm:$0xff]  ;;  %v1090_v55 = vld [vmem:[%s12475_s5 + $0x10] sm:$0xff] }
  0xd5   :  { %v386_v44 = vpop.f32.mrf.mxu0  ;;  %v515_v45 = vpop.f32.mrf.mxu1 }
  0xd6   :  { %v1047_v47 = vmax.f32 %v392_v40, 0.0  ;;  %v1055_v48 = vmax.f32 %v521_v41, 0.0  ;;  %v387_v49 = vadd.f32 %v386_v44, %v8913_v34  ;;  %v516_v50 = vadd.f32 %v515_v45, %v8913_v34 }
  0xd7   :  { %v8925_v51 = vpop.f32.mrf.mxu0  ;;  %v8927_v52 = vpop.f32.mrf.mxu1 }
  0xd8   :  { %v1046_v56 = vmax.f32 %v387_v49, 0.0  ;;  %v1054_v57 = vmax.f32 %v516_v50, 0.0  ;;  %8017 = vmatprep.subr.mxu0 %v1047_v47  ;;  %8069 = vmatprep.subr.mxu1 %v1055_v48 }
  0xd9   :  { %v8933_v58 = vpop.f32.mrf.mxu0  ;;  %v8935_v59 = vpop.f32.mrf.mxu1  ;;  %8018 = vmatpush3.msra.mxu0 %v1047_v47  ;;  %8070 = vmatpush3.msra.mxu1 %v1055_v48 }
  0xda   :  { %8019 = vmatprep.subr.mxu0 %v1046_v56  ;;  %8071 = vmatprep.subr.mxu1 %v1054_v57 }
  0xdb   :  { %v8939_v0 = vpop.f32.mrf.mxu0  ;;  %v8941_v1 = vpop.f32.mrf.mxu1  ;;  %8020 = vmatpush3.msra.mxu0 %v1046_v56  ;;  %8072 = vmatpush3.msra.mxu1 %v1054_v57  ;;  %v1114_v56 = vld [vmem:[%s12475_s5 + $0xd0] sm:$0xff] }
  0xdc   :  { %8021 = vmatprep.subr.mxu0 %v1045_v62  ;;  %8073 = vmatprep.subr.mxu1 %v1053_v63  ;;  %v630_v11 = vadd.f32 %v8939_v0, %v8921_v46 }
  0xdd   :  { %v8947_v7 = vpop.f32.mrf.mxu0  ;;  %v8949_v8 = vpop.f32.mrf.mxu1  ;;  %8022 = vmatpush3.msra.mxu0 %v1045_v62  ;;  %8074 = vmatpush3.msra.mxu1 %v1053_v63  ;;  %v1091_v63 = vld [vmem:[%s12475_s5 + $0x18] sm:$0xff] }
  0xde   :  { %8023 = vmatprep.subr.mxu0 %v1044_v5  ;;  %8075 = vmatprep.subr.mxu1 %v1052_v6  ;;  %v625_v0 = vadd.f32 %v8947_v7, %v8929_v53 }
  0xdf   :  { %v7971_v14 = vpop.f32.mrf.mxu0  ;;  %v7985_v15 = vpop.f32.mrf.mxu1  ;;  %8024 = vmatpush3.msra.mxu0 %v1044_v5  ;;  %8076 = vmatpush3.msra.mxu1 %v1052_v6 }
  0xe0   :  { %8025 = vmatprep.subr.mxu0 %v1043_v12  ;;  %8077 = vmatprep.subr.mxu1 %v1051_v13  ;;  %v640_v48 = vadd.f32 %v7971_v14, %v8911_v29  ;;  %v769_v49 = vadd.f32 %v7985_v15, %v8911_v29 }
  0xe1   :  { %v634_v21 = vpop.f32.mrf.mxu0  ;;  %v763_v22 = vpop.f32.mrf.mxu1  ;;  %8026 = vmatpush3.msra.mxu0 %v1043_v12  ;;  %8078 = vmatpush3.msra.mxu1 %v1051_v13  ;;  %v759_v12 = vadd.f32 %v8941_v1, %v8921_v46  ;;  %v754_v1 = vadd.f32 %v8949_v8, %v8929_v53 }
  0xe2   :  { %8027 = vmatprep.subr.mxu0 %v1042_v19  ;;  %8079 = vmatprep.subr.mxu1 %v1050_v20  ;;  %v635_v57 = vadd.f32 %v634_v21, %v8915_v37  ;;  %v764_v60 = vadd.f32 %v763_v22, %v8915_v37  ;;  %v1061_v4 = vmax.f32 %v640_v48, 0.0  ;;  %v1069_v5 = vmax.f32 %v769_v49, 0.0  ;;  %v1117_v21 = vld [vmem:[%s12475_s5 + $0xe8] sm:$0xff] }
  0xe3   :  { %v7974_v28 = vpop.f32.mrf.mxu0  ;;  %v7988_v30 = vpop.f32.mrf.mxu1  ;;  %8028 = vmatpush3.msra.mxu0 %v1042_v19  ;;  %8080 = vmatpush3.msra.mxu1 %v1050_v20  ;;  %v1116_v19 = vld [vmem:[%s12475_s5 + $0xe0] sm:$0xff]  ;;  %v1093_v20 = vld [vmem:[%s12475_s5 + $0x28] sm:$0xff]  ;;  %v1067_v8 = vmax.f32 %v759_v12, 0.0  ;;  %v1126_v12 = vld [vmem:[%s12475_s5 + $0x130] sm:$0xff] }
  0xe4   :  { %v650_v25 = vadd.f32 %v7974_v28, %v8909_v26  ;;  %v779_v32 = vadd.f32 %v7988_v30, %v8909_v26  ;;  %8029 = vmatprep.subr.mxu0 %v1041_v23  ;;  %8081 = vmatprep.subr.mxu1 %v1049_v27  ;;  %v1060_v13 = vmax.f32 %v635_v57, 0.0  ;;  %v1068_v14 = vmax.f32 %v764_v60, 0.0  ;;  %v1097_v48 = vld [vmem:[%s12475_s5 + $0x48] sm:$0xff]  ;;  %v1099_v57 = vld [vmem:[%s12475_s5 + $0x58] sm:$0xff] }
  0xe5   :  { %v644_v33 = vpop.f32.mrf.mxu0  ;;  %v773_v35 = vpop.f32.mrf.mxu1  ;;  %8030 = vmatpush3.msra.mxu0 %v1041_v23  ;;  %8082 = vmatpush3.msra.mxu1 %v1049_v27  ;;  %v1059_v23 = vmax.f32 %v630_v11, 0.0  ;;  %v620_v27 = vadd.f32 %v8925_v51, %v8943_v2  ;;  %v749_v28 = vadd.f32 %v8927_v52, %v8943_v2  ;;  %v1058_v30 = vmax.f32 %v625_v0, 0.0  ;;  %v1121_v49 = vld [vmem:[%s12475_s5 + $0x108] sm:$0xff]  ;;  %v1123_v60 = vld [vmem:[%s12475_s5 + $0x118] sm:$0xff]  ;;  %v1102_v11 = vld [vmem:[%s12475_s5 + $0x70] sm:$0xff] }
  0xe6   :  { %v1063_v39 = vmax.f32 %v650_v25, 0.0  ;;  %v1071_v40 = vmax.f32 %v779_v32, 0.0  ;;  %v645_v41 = vadd.f32 %v644_v33, %v8913_v34  ;;  %v774_v42 = vadd.f32 %v773_v35, %v8913_v34  ;;  %8031 = vmatprep.subr.mxu0 %v1040_v24  ;;  %8083 = vmatprep.subr.mxu1 %v1048_v31  ;;  %v1118_v25 = vld [vmem:[%s12475_s5 + $0xf0] sm:$0xff]  ;;  %v1095_v35 = vld [vmem:[%s12475_s5 + $0x38] sm:$0xff]  ;;  %v1105_v0 = vld [vmem:[%s12475_s5 + $0x88] sm:$0xff] }
  0xe7   :  { %v8971_v43 = vpop.f32.mrf.mxu0  ;;  %v8973_v44 = vpop.f32.mrf.mxu1  ;;  %8032 = vmatpush3.msra.mxu0 %v1040_v24  ;;  %8084 = vmatpush3.msra.mxu1 %v1048_v31  ;;  %v1066_v24 = vmax.f32 %v754_v1, 0.0  ;;  %v1094_v31 = vld [vmem:[%s12475_s5 + $0x30] sm:$0xff]  ;;  %v615_v51 = vadd.f32 %v8933_v58, %v8951_v9  ;;  %v744_v52 = vadd.f32 %v8935_v59, %v8951_v9  ;;  %v1129_v1 = vld [vmem:[%s12475_s5 + $0x148] sm:$0xff] }
  0xe8   :  { %v1062_v45 = vmax.f32 %v645_v41, 0.0  ;;  %v1070_v47 = vmax.f32 %v774_v42, 0.0  ;;  %8034 = vmatmul.mubr.msk.f32.vlgmr.msra.gmra.mxu0 %vm1232_vm1, %v1089_v36  ;;  %8086 = vmatmul.mubr.msk.f32.vlgmr.msra.gmra.mxu1 %vm1232_vm1, %v1113_v38  ;;  %v1119_v36 = vld [vmem:[%s12475_s5 + $0xf8] sm:$0xff]  ;;  %v1057_v38 = vmax.f32 %v620_v27, 0.0  ;;  %v1096_v42 = vld [vmem:[%s12475_s5 + $0x40] sm:$0xff] }
  0xe9   :  { %8121 = vmatprep.subr.mxu0 %v1063_v39  ;;  %8173 = vmatprep.subr.mxu1 %v1071_v40  ;;  %v8979_v50 = vpop.f32.mrf.mxu0  ;;  %v8981_v54 = vpop.f32.mrf.mxu1  ;;  %v1064_v41 = vmax.f32 %v744_v52, 0.0  ;;  %v1108_v27 = vld [vmem:[%s12475_s5 + $0xa0] sm:$0xff]  ;;  %v1135_v52 = vld [vmem:[%s12475_s5 + $0x178] sm:$0xff] }
  0xea   :  { %8122 = vmatpush3.msra.mxu0 %v1063_v39  ;;  %8174 = vmatpush3.msra.mxu1 %v1071_v40  ;;  %v1065_v39 = vmax.f32 %v749_v28, 0.0  ;;  %v1056_v40 = vmax.f32 %v615_v51, 0.0  ;;  %v1132_v28 = vld [vmem:[%s12475_s5 + $0x160] sm:$0xff]  ;;  %v1111_v51 = vld [vmem:[%s12475_s5 + $0xb8] sm:$0xff] }
  0xeb   :  { %8123 = vmatprep.subr.mxu0 %v1062_v45  ;;  %8175 = vmatprep.subr.mxu1 %v1070_v47  ;;  %v8991_v61 = vpop.f32.mrf.mxu0  ;;  %v8993_v62 = vpop.f32.mrf.mxu1 }
  0xec   :  { %8036 = vmatprep.mubr.msk.f32.mxu0 %vm1232_vm1, %v1090_v55  ;;  %8088 = vmatprep.mubr.msk.f32.mxu1 %vm1232_vm1, %v1114_v56  ;;  %v1098_v55 = vld [vmem:[%s12475_s5 + $0x50] sm:$0xff] }
  0xed   :  { %8124 = vmatpush3.msra.mxu0 %v1062_v45  ;;  %8176 = vmatpush3.msra.mxu1 %v1070_v47  ;;  %v9003_v6 = vpop.f32.mrf.mxu0  ;;  %v9005_v10 = vpop.f32.mrf.mxu1  ;;  %v1120_v45 = vld [vmem:[%s12475_s5 + $0x100] sm:$0xff]  ;;  %v1122_v56 = vld [vmem:[%s12475_s5 + $0x110] sm:$0xff] }
  0xee   :  { %8037 = vmatmul.mubr.msk.f32.gmra.mxu0 %vm1232_vm1, %v1091_v63  ;;  %8089 = vmatmul.mubr.msk.f32.gmra.mxu1 %vm1232_vm1, %v1115_v3  ;;  %v1100_v63 = vld [vmem:[%s12475_s5 + $0x60] sm:$0xff] }
  0xef   :  { %8125 = vmatprep.subr.mxu0 %v1061_v4  ;;  %8177 = vmatprep.subr.mxu1 %v1069_v5  ;;  %v9013_v15 = vpop.f32.mrf.mxu0  ;;  %v9015_v17 = vpop.f32.mrf.mxu1  ;;  %v1124_v3 = vld [vmem:[%s12475_s5 + $0x120] sm:$0xff] }
  0xf0   :  { %8126 = vmatpush3.msra.mxu0 %v1061_v4  ;;  %8178 = vmatpush3.msra.mxu1 %v1069_v5  ;;  %v1101_v4 = vld [vmem:[%s12475_s5 + $0x68] sm:$0xff] }
  0xf1   :  { %8127 = vmatprep.subr.mxu0 %v1060_v13  ;;  %8179 = vmatprep.subr.mxu1 %v1068_v14  ;;  %v9035_v22 = vpop.f32.mrf.mxu0  ;;  %v9037_v7 = vpop.f32.mrf.mxu1  ;;  %v1125_v5 = vld [vmem:[%s12475_s5 + $0x128] sm:$0xff] }
  0xf2   :  { %8039 = vmatprep.mubr.msk.f32.mxu0 %vm1232_vm1, %v1092_v18  ;;  %8091 = vmatprep.mubr.msk.f32.mxu1 %vm1232_vm1, %v1116_v19  ;;  %v1104_v18 = vld [vmem:[%s12475_s5 + $0x80] sm:$0xff] }
  0xf3   :  { %8128 = vmatpush3.msra.mxu0 %v1060_v13  ;;  %8180 = vmatpush3.msra.mxu1 %v1068_v14  ;;  %v8002_v32 = vpop.f32.mrf.mxu0  ;;  %v8016_v33 = vpop.f32.mrf.mxu1  ;;  %v1103_v13 = vld [vmem:[%s12475_s5 + $0x78] sm:$0xff]  ;;  %v1128_v19 = vld [vmem:[%s12475_s5 + $0x140] sm:$0xff] }
  0xf4   :  { %8040 = vmatmul.mubr.msk.f32.gmra.mxu0 %vm1232_vm1, %v1093_v20  ;;  %8092 = vmatmul.mubr.msk.f32.gmra.mxu1 %vm1232_vm1, %v1117_v21  ;;  %v9064_v58 = vadd.f32 %v8002_v32, %v8909_v26  ;;  %v9067_v59 = vadd.f32 %v8016_v33, %v8909_v26  ;;  %v1127_v14 = vld [vmem:[%s12475_s5 + $0x138] sm:$0xff]  ;;  %v1106_v20 = vld [vmem:[%s12475_s5 + $0x90] sm:$0xff] }
  0xf5   :  { %8129 = vmatprep.subr.mxu0 %v1059_v23  ;;  %8181 = vmatprep.subr.mxu1 %v1067_v8  ;;  %v1130_v21 = vld [vmem:[%s12475_s5 + $0x150] sm:$0xff]  ;;  %v902_v32 = vpop.f32.mrf.mxu0  ;;  %v1031_v33 = vpop.f32.mrf.mxu1 }
  0xf6   :  { %8130 = vmatpush3.msra.mxu0 %v1059_v23  ;;  %8182 = vmatpush3.msra.mxu1 %v1067_v8  ;;  %v1079_v26 = vmax.f32 %v9064_v58, 0.0  ;;  %v1087_v47 = vmax.f32 %v9067_v59, 0.0  ;;  %v1107_v23 = vld [vmem:[%s12475_s5 + $0x98] sm:$0xff] }
  0xf7   :  { %8131 = vmatprep.subr.mxu0 %v1058_v30  ;;  %8183 = vmatprep.subr.mxu1 %v1066_v24  ;;  %v1131_v8 = vld [vmem:[%s12475_s5 + $0x158] sm:$0xff] }
  0xf8   :  { %8042 = vmatprep.mubr.msk.f32.mxu0 %vm1232_vm1, %v1094_v31  ;;  %8094 = vmatprep.mubr.msk.f32.mxu1 %vm1232_vm1, %v1118_v25  ;;  %v1110_v31 = vld [vmem:[%s12475_s5 + $0xb0] sm:$0xff]  ;;  %v1139_v59 = vld [vmem:[%s12475_s5 + $0x198] sm:$0xff] }
  0xf9   :  { %8132 = vmatpush3.msra.mxu0 %v1058_v30  ;;  %8184 = vmatpush3.msra.mxu1 %v1066_v24  ;;  %v1109_v30 = vld [vmem:[%s12475_s5 + $0xa8] sm:$0xff]  ;;  %v1134_v25 = vld [vmem:[%s12475_s5 + $0x170] sm:$0xff] }
  0xfa   :  { %8043 = vmatmul.mubr.msk.f32.gmra.mxu0 %vm1232_vm1, %v1095_v35  ;;  %8095 = vmatmul.mubr.msk.f32.gmra.mxu1 %vm1232_vm1, %v1119_v36  ;;  %v1133_v24 = vld [vmem:[%s12475_s5 + $0x168] sm:$0xff]  ;;  %v1136_v35 = vld [vmem:[%s12475_s5 + $0x180] sm:$0xff] }
  0xfb   :  { %8133 = vmatprep.subr.mxu0 %v1057_v38  ;;  %8185 = vmatprep.subr.mxu1 %v1065_v39  ;;  %v1160_v36 = vld [vmem:[%s12475_s5 + $0x240] sm:$0xff] }
  0xfc   :  { %8134 = vmatpush3.msra.mxu0 %v1057_v38  ;;  %8186 = vmatpush3.msra.mxu1 %v1065_v39  ;;  %v903_v38 = vadd.f32 %v902_v32, %v8913_v34  ;;  %v1032_v39 = vadd.f32 %v1031_v33, %v8913_v34  ;;  %v1027_v34 = vadd.f32 %v9015_v17, %v8911_v29  ;;  %v1175_v32 = vld [vmem:[%s12475_s5 + $0x2b8] sm:$0xff]  ;;  %v1152_v33 = vld [vmem:[%s12475_s5 + $0x200] sm:$0xff] }
  0xfd   :  { %8135 = vmatprep.subr.mxu0 %v1056_v40  ;;  %8187 = vmatprep.subr.mxu1 %v1064_v41  ;;  %v1022_v17 = vadd.f32 %v9037_v7, %v8915_v37 }
  0xfe   :  { %8045 = vmatprep.mubr.msk.f32.mxu0 %vm1232_vm1, %v1096_v42  ;;  %8097 = vmatprep.mubr.msk.f32.mxu1 %vm1232_vm1, %v1120_v45  ;;  %v898_v42 = vadd.f32 %v9013_v15, %v8911_v29  ;;  %v1078_v45 = vmax.f32 %v903_v38, 0.0  ;;  %v1162_v29 = vld [vmem:[%s12475_s5 + $0x250] sm:$0xff]  ;;  %v893_v15 = vadd.f32 %v9035_v22, %v8915_v37  ;;  %v888_v37 = vadd.f32 %v8991_v61, %v8921_v46  ;;  %v1164_v61 = vld [vmem:[%s12475_s5 + $0x260] sm:$0xff] }
  0xff   :  { %8136 = vmatpush3.msra.mxu0 %v1056_v40  ;;  %8188 = vmatpush3.msra.mxu1 %v1064_v41  ;;  %v1137_v40 = vld [vmem:[%s12475_s5 + $0x188] sm:$0xff]  ;;  %v1017_v22 = vadd.f32 %v8993_v62, %v8921_v46  ;;  %v883_v46 = vadd.f32 %v9003_v6, %v8929_v53  ;;  %v1012_v62 = vadd.f32 %v9005_v10, %v8929_v53  ;;  %v1178_v38 = vld [vmem:[%s12475_s5 + $0x2d0] sm:$0xff] }
 0x100   :  { %8046 = vmatmul.mubr.msk.f32.gmra.mxu0 %vm1232_vm1, %v1097_v48  ;;  %8098 = vmatmul.mubr.msk.f32.gmra.mxu1 %vm1232_vm1, %v1121_v49  ;;  %v1161_v41 = vld [vmem:[%s12475_s5 + $0x248] sm:$0xff]  ;;  %v1086_v48 = vmax.f32 %v1032_v39, 0.0  ;;  %v1138_v49 = vld [vmem:[%s12475_s5 + $0x190] sm:$0xff]  ;;  %v1077_v58 = vmax.f32 %v898_v42, 0.0  ;;  %v1076_v7 = vmax.f32 %v893_v15, 0.0  ;;  %v878_v53 = vadd.f32 %v8971_v43, %v8943_v2  ;;  %v1155_v39 = vld [vmem:[%s12475_s5 + $0x218] sm:$0xff] }
 0x101   :  { %8225 = vmatprep.subr.mxu0 %v1079_v26  ;;  %8277 = vmatprep.subr.mxu1 %v1087_v47  ;;  %v1007_v6 = vadd.f32 %v8973_v44, %v8943_v2  ;;  %v1074_v10 = vmax.f32 %v883_v46, 0.0  ;;  %v1166_v43 = vld [vmem:[%s12475_s5 + $0x270] sm:$0xff]  ;;  %v873_v2 = vadd.f32 %v8979_v50, %v8951_v9  ;;  %v1002_v44 = vadd.f32 %v8981_v54, %v8951_v9  ;;  %v1144_v54 = vld [vmem:[%s12475_s5 + $0x1c0] sm:$0xff]  ;;  %v1183_v15 = vld [vmem:[%s12475_s5 + $0x2f8] sm:$0xff] }
 0x102   :  { %8048 = vmatprep.mubr.msk.f32.mxu0 %vm1232_vm1, %v1098_v55  ;;  %8100 = vmatprep.mubr.msk.f32.mxu1 %vm1232_vm1, %v1122_v56  ;;  %v1084_v55 = vmax.f32 %v1022_v17, 0.0  ;;  %v1140_v56 = vld [vmem:[%s12475_s5 + $0x1a0] sm:$0xff]  ;;  %v1213_v46 = vld [vmem:[%s12475_s5 + $0x3e8] sm:$0xff] }
 0x103   :  { %v1072_v9 = vmax.f32 %v873_v2, 0.0  ;;  %v1080_v50 = vmax.f32 %v1002_v44, 0.0  ;;  %v1180_v42 = vld [vmem:[%s12475_s5 + $0x2e0] sm:$0xff]  ;;  %v1219_v2 = vld [vmem:[%s12475_s5 + $0x418] sm:$0xff] }
 0x104   :  { %8049 = vmatmul.mubr.msk.f32.gmra.mxu0 %vm1232_vm1, %v1099_v57  ;;  %8101 = vmatmul.mubr.msk.f32.gmra.mxu1 %vm1232_vm1, %v1123_v60  ;;  %v1075_v57 = vmax.f32 %v888_v37, 0.0  ;;  %v1083_v60 = vmax.f32 %v1017_v22, 0.0  ;;  %v1184_v17 = vld [vmem:[%s12475_s5 + $0x300] sm:$0xff]  ;;  %v1210_v37 = vld [vmem:[%s12475_s5 + $0x3d0] sm:$0xff]  ;;  %v1187_v22 = vld [vmem:[%s12475_s5 + $0x318] sm:$0xff] }
 0x105   :  { %8051 = vmatprep.mubr.msk.f32.mxu0 %vm1232_vm1, %v1100_v63  ;;  %8103 = vmatprep.mubr.msk.f32.mxu1 %vm1232_vm1, %v1124_v3  ;;  %v1141_v63 = vld [vmem:[%s12475_s5 + $0x1a8] sm:$0xff]  ;;  %v1196_v44 = vld [vmem:[%s12475_s5 + $0x360] sm:$0xff] }
 0x106   :  { %v1165_v3 = vld [vmem:[%s12475_s5 + $0x268] sm:$0xff] }
 0x108   :  { %8052 = vmatmul.mubr.msk.f32.gmra.mxu0 %vm1232_vm1, %v1101_v4  ;;  %8104 = vmatmul.mubr.msk.f32.gmra.mxu1 %vm1232_vm1, %v1125_v5  ;;  %v1082_v4 = vmax.f32 %v1012_v62, 0.0  ;;  %v1142_v5 = vld [vmem:[%s12475_s5 + $0x1b0] sm:$0xff] }
 0x109   :  { %8054 = vmatprep.mubr.msk.f32.mxu0 %vm1232_vm1, %v1102_v11  ;;  %8106 = vmatprep.mubr.msk.f32.mxu1 %vm1232_vm1, %v1126_v12  ;;  %v1073_v11 = vmax.f32 %v878_v53, 0.0  ;;  %v1081_v12 = vmax.f32 %v1007_v6, 0.0  ;;  %v1190_v62 = vld [vmem:[%s12475_s5 + $0x330] sm:$0xff]  ;;  %v1216_v53 = vld [vmem:[%s12475_s5 + $0x400] sm:$0xff]  ;;  %v1193_v6 = vld [vmem:[%s12475_s5 + $0x348] sm:$0xff] }
 0x10c   :  { %8055 = vmatmul.mubr.msk.f32.gmra.mxu0 %vm1232_vm1, %v1103_v13  ;;  %8107 = vmatmul.mubr.msk.f32.gmra.mxu1 %vm1232_vm1, %v1127_v14  ;;  %v1143_v13 = vld [vmem:[%s12475_s5 + $0x1b8] sm:$0xff] }
 0x10d   :  { %8057 = vmatprep.mubr.msk.f32.mxu0 %vm1232_vm1, %v1104_v18  ;;  %8109 = vmatprep.mubr.msk.f32.mxu1 %vm1232_vm1, %v1128_v19  ;;  %v1167_v14 = vld [vmem:[%s12475_s5 + $0x278] sm:$0xff]  ;;  %v1168_v18 = vld [vmem:[%s12475_s5 + $0x280] sm:$0xff]  ;;  %v1145_v19 = vld [vmem:[%s12475_s5 + $0x1c8] sm:$0xff] }
 0x110   :  { %8058 = vmatmul.mubr.msk.f32.gmra.mxu0 %vm1232_vm1, %v1105_v0  ;;  %8110 = vmatmul.mubr.msk.f32.gmra.mxu1 %vm1232_vm1, %v1129_v1  ;;  %v1169_v0 = vld [vmem:[%s12475_s5 + $0x288] sm:$0xff]  ;;  %v1146_v1 = vld [vmem:[%s12475_s5 + $0x1d0] sm:$0xff] }
 0x111   :  { %8060 = vmatprep.mubr.msk.f32.mxu0 %vm1232_vm1, %v1106_v20  ;;  %8112 = vmatprep.mubr.msk.f32.mxu1 %vm1232_vm1, %v1130_v21  ;;  %v1170_v20 = vld [vmem:[%s12475_s5 + $0x290] sm:$0xff]  ;;  %v1147_v21 = vld [vmem:[%s12475_s5 + $0x1d8] sm:$0xff] }
 0x114   :  { %8061 = vmatmul.mubr.msk.f32.gmra.mxu0 %vm1232_vm1, %v1107_v23  ;;  %8113 = vmatmul.mubr.msk.f32.gmra.mxu1 %vm1232_vm1, %v1131_v8  ;;  %v1171_v23 = vld [vmem:[%s12475_s5 + $0x298] sm:$0xff]  ;;  %v1148_v8 = vld [vmem:[%s12475_s5 + $0x1e0] sm:$0xff] }
 0x115   :  { %8063 = vmatprep.mubr.msk.f32.mxu0 %vm1232_vm1, %v1108_v27  ;;  %8115 = vmatprep.mubr.msk.f32.mxu1 %vm1232_vm1, %v1132_v28  ;;  %v1172_v27 = vld [vmem:[%s12475_s5 + $0x2a0] sm:$0xff]  ;;  %v1149_v28 = vld [vmem:[%s12475_s5 + $0x1e8] sm:$0xff] }
 0x118   :  { %8064 = vmatmul.mubr.msk.f32.gmra.mxu0 %vm1232_vm1, %v1109_v30  ;;  %8116 = vmatmul.mubr.msk.f32.gmra.mxu1 %vm1232_vm1, %v1133_v24  ;;  %v1173_v30 = vld [vmem:[%s12475_s5 + $0x2a8] sm:$0xff]  ;;  %v1150_v24 = vld [vmem:[%s12475_s5 + $0x1f0] sm:$0xff] }
 0x119   :  { %8066 = vmatprep.mubr.msk.f32.mxu0 %vm1232_vm1, %v1110_v31  ;;  %8118 = vmatprep.mubr.msk.f32.mxu1 %vm1232_vm1, %v1134_v25  ;;  %v1174_v31 = vld [vmem:[%s12475_s5 + $0x2b0] sm:$0xff]  ;;  %v1151_v25 = vld [vmem:[%s12475_s5 + $0x1f8] sm:$0xff] }
 0x11c   :  { %8067 = vmatmul.mubr.msk.f32.gmra.mxu0 %vm1232_vm1, %v1111_v51  ;;  %8119 = vmatmul.mubr.msk.f32.gmra.mxu1 %vm1232_vm1, %v1135_v52  ;;  %v1176_v51 = vld [vmem:[%s12475_s5 + $0x2c0] sm:$0xff]  ;;  %v1153_v52 = vld [vmem:[%s12475_s5 + $0x208] sm:$0xff] }
 0x11d   :  { %8137 = vmatprep.mubr.msk.f32.mxu0 %vm1232_vm1, %v1136_v35  ;;  %8189 = vmatprep.mubr.msk.f32.mxu1 %vm1232_vm1, %v1160_v36  ;;  %v1177_v35 = vld [vmem:[%s12475_s5 + $0x2c8] sm:$0xff]  ;;  %v1154_v36 = vld [vmem:[%s12475_s5 + $0x210] sm:$0xff] }
 0x120   :  { %8138 = vmatmul.mubr.msk.f32.vlgmr.msra.gmra.mxu0 %vm1232_vm1, %v1137_v40  ;;  %8190 = vmatmul.mubr.msk.f32.vlgmr.msra.gmra.mxu1 %vm1232_vm1, %v1161_v41  ;;  %v1179_v40 = vld [vmem:[%s12475_s5 + $0x2d8] sm:$0xff]  ;;  %v1156_v41 = vld [vmem:[%s12475_s5 + $0x220] sm:$0xff] }
 0x121   :  { %8226 = vmatpush3.msra.mxu0 %v1079_v26  ;;  %8278 = vmatpush3.msra.mxu1 %v1087_v47  ;;  %v1085_v26 = vmax.f32 %v1027_v34, 0.0  ;;  %v1163_v47 = vld [vmem:[%s12475_s5 + $0x258] sm:$0xff]  ;;  %v1157_v34 = vld [vmem:[%s12475_s5 + $0x228] sm:$0xff] }
 0x122   :  { %8227 = vmatprep.subr.mxu0 %v1078_v45  ;;  %8279 = vmatprep.subr.mxu1 %v1086_v48 }
 0x123   :  { %8228 = vmatpush3.msra.mxu0 %v1078_v45  ;;  %8280 = vmatpush3.msra.mxu1 %v1086_v48  ;;  %v1181_v45 = vld [vmem:[%s12475_s5 + $0x2e8] sm:$0xff]  ;;  %v1158_v48 = vld [vmem:[%s12475_s5 + $0x230] sm:$0xff] }
 0x124   :  { %8140 = vmatprep.mubr.msk.f32.mxu0 %vm1232_vm1, %v1138_v49  ;;  %8192 = vmatprep.mubr.msk.f32.mxu1 %vm1232_vm1, %v1162_v29  ;;  %v1182_v49 = vld [vmem:[%s12475_s5 + $0x2f0] sm:$0xff]  ;;  %v1159_v29 = vld [vmem:[%s12475_s5 + $0x238] sm:$0xff] }
 0x125   :  { %8229 = vmatprep.subr.mxu0 %v1077_v58  ;;  %8281 = vmatprep.subr.mxu1 %v1085_v26 }
 0x126   :  { %8141 = vmatmul.mubr.msk.f32.gmra.mxu0 %vm1232_vm1, %v1139_v59  ;;  %8193 = vmatmul.mubr.msk.f32.gmra.mxu1 %vm1232_vm1, %v1163_v47  ;;  %v1209_v59 = vld [vmem:[%s12475_s5 + $0x3c8] sm:$0xff]  ;;  %v1186_v47 = vld [vmem:[%s12475_s5 + $0x310] sm:$0xff] }
 0x127   :  { %8230 = vmatpush3.msra.mxu0 %v1077_v58  ;;  %8282 = vmatpush3.msra.mxu1 %v1085_v26  ;;  %v1208_v58 = vld [vmem:[%s12475_s5 + $0x3c0] sm:$0xff]  ;;  %v1185_v26 = vld [vmem:[%s12475_s5 + $0x308] sm:$0xff] }
 0x128   :  { %8231 = vmatprep.subr.mxu0 %v1076_v7  ;;  %8283 = vmatprep.subr.mxu1 %v1084_v55 }
 0x129   :  { %8232 = vmatpush3.msra.mxu0 %v1076_v7  ;;  %8284 = vmatpush3.msra.mxu1 %v1084_v55  ;;  %v1211_v7 = vld [vmem:[%s12475_s5 + $0x3d8] sm:$0xff]  ;;  %v1188_v55 = vld [vmem:[%s12475_s5 + $0x320] sm:$0xff] }
 0x12a   :  { %8143 = vmatprep.mubr.msk.f32.mxu0 %vm1232_vm1, %v1140_v56  ;;  %8195 = vmatprep.mubr.msk.f32.mxu1 %vm1232_vm1, %v1164_v61  ;;  %v1212_v56 = vld [vmem:[%s12475_s5 + $0x3e0] sm:$0xff]  ;;  %v1189_v61 = vld [vmem:[%s12475_s5 + $0x328] sm:$0xff] }
 0x12b   :  { %8233 = vmatprep.subr.mxu0 %v1075_v57  ;;  %8285 = vmatprep.subr.mxu1 %v1083_v60 }
 0x12c   :  { %8144 = vmatmul.mubr.msk.f32.gmra.mxu0 %vm1232_vm1, %v1141_v63  ;;  %8196 = vmatmul.mubr.msk.f32.gmra.mxu1 %vm1232_vm1, %v1165_v3  ;;  %v1215_v63 = vld [vmem:[%s12475_s5 + $0x3f8] sm:$0xff]  ;;  %v1192_v3 = vld [vmem:[%s12475_s5 + $0x340] sm:$0xff] }
 0x12d   :  { %8234 = vmatpush3.msra.mxu0 %v1075_v57  ;;  %8286 = vmatpush3.msra.mxu1 %v1083_v60  ;;  %v1214_v57 = vld [vmem:[%s12475_s5 + $0x3f0] sm:$0xff]  ;;  %v1191_v60 = vld [vmem:[%s12475_s5 + $0x338] sm:$0xff] }
 0x12e   :  { %8235 = vmatprep.subr.mxu0 %v1074_v10  ;;  %8287 = vmatprep.subr.mxu1 %v1082_v4 }
 0x12f   :  { %8236 = vmatpush3.msra.mxu0 %v1074_v10  ;;  %8288 = vmatpush3.msra.mxu1 %v1082_v4  ;;  %v1217_v10 = vld [vmem:[%s12475_s5 + $0x408] sm:$0xff]  ;;  %v1194_v4 = vld [vmem:[%s12475_s5 + $0x350] sm:$0xff] }
 0x130   :  { %8146 = vmatprep.mubr.msk.f32.mxu0 %vm1232_vm1, %v1142_v5  ;;  %8198 = vmatprep.mubr.msk.f32.mxu1 %vm1232_vm1, %v1166_v43  ;;  %v1218_v5 = vld [vmem:[%s12475_s5 + $0x410] sm:$0xff]  ;;  %v1195_v43 = vld [vmem:[%s12475_s5 + $0x358] sm:$0xff] }
 0x131   :  { %8237 = vmatprep.subr.mxu0 %v1073_v11  ;;  %8289 = vmatprep.subr.mxu1 %v1081_v12 }
 0x132   :  { %8147 = vmatmul.mubr.msk.f32.gmra.mxu0 %vm1232_vm1, %v1143_v13  ;;  %8199 = vmatmul.mubr.msk.f32.gmra.mxu1 %vm1232_vm1, %v1167_v14  ;;  %v1221_v13 = vld [vmem:[%s12475_s5 + $0x428] sm:$0xff]  ;;  %v1198_v14 = vld [vmem:[%s12475_s5 + $0x370] sm:$0xff] }
 0x133   :  { %8238 = vmatpush3.msra.mxu0 %v1073_v11  ;;  %8290 = vmatpush3.msra.mxu1 %v1081_v12  ;;  %v1220_v11 = vld [vmem:[%s12475_s5 + $0x420] sm:$0xff]  ;;  %v1197_v12 = vld [vmem:[%s12475_s5 + $0x368] sm:$0xff] }
 0x134   :  { %8239 = vmatprep.subr.mxu0 %v1072_v9  ;;  %8291 = vmatprep.subr.mxu1 %v1080_v50 }
 0x135   :  { %8240 = vmatpush3.msra.mxu0 %v1072_v9  ;;  %8292 = vmatpush3.msra.mxu1 %v1080_v50  ;;  %v1222_v9 = vld [vmem:[%s12475_s5 + $0x430] sm:$0xff]  ;;  %v1199_v50 = vld [vmem:[%s12475_s5 + $0x378] sm:$0xff] }
 0x136   :  { %8149 = vmatprep.mubr.msk.f32.mxu0 %vm1232_vm1, %v1144_v54  ;;  %8201 = vmatprep.mubr.msk.f32.mxu1 %vm1232_vm1, %v1168_v18  ;;  %v1223_v54 = vld [vmem:[%s12475_s5 + $0x438] sm:$0xff]  ;;  %v1200_v18 = vld [vmem:[%s12475_s5 + $0x380] sm:$0xff] }
 0x137   :  { %8150 = vmatmul.mubr.msk.f32.gmra.mxu0 %vm1232_vm1, %v1145_v19  ;;  %8202 = vmatmul.mubr.msk.f32.gmra.mxu1 %vm1232_vm1, %v1169_v0  ;;  %v1224_v19 = vld [vmem:[%s12475_s5 + $0x440] sm:$0xff]  ;;  %v1201_v0 = vld [vmem:[%s12475_s5 + $0x388] sm:$0xff] }
 0x138   :  { %8152 = vmatprep.mubr.msk.f32.mxu0 %vm1232_vm1, %v1146_v1  ;;  %8204 = vmatprep.mubr.msk.f32.mxu1 %vm1232_vm1, %v1170_v20  ;;  %v1225_v1 = vld [vmem:[%s12475_s5 + $0x448] sm:$0xff]  ;;  %v1202_v20 = vld [vmem:[%s12475_s5 + $0x390] sm:$0xff] }
 0x13b   :  { %8153 = vmatmul.mubr.msk.f32.gmra.mxu0 %vm1232_vm1, %v1147_v21  ;;  %8205 = vmatmul.mubr.msk.f32.gmra.mxu1 %vm1232_vm1, %v1171_v23  ;;  %v1226_v21 = vld [vmem:[%s12475_s5 + $0x450] sm:$0xff]  ;;  %v1203_v23 = vld [vmem:[%s12475_s5 + $0x398] sm:$0xff] }
 0x13c   :  { %8155 = vmatprep.mubr.msk.f32.mxu0 %vm1232_vm1, %v1148_v8  ;;  %8207 = vmatprep.mubr.msk.f32.mxu1 %vm1232_vm1, %v1172_v27  ;;  %v1227_v8 = vld [vmem:[%s12475_s5 + $0x458] sm:$0xff]  ;;  %v1204_v27 = vld [vmem:[%s12475_s5 + $0x3a0] sm:$0xff] }
 0x13f   :  { %8156 = vmatmul.mubr.msk.f32.gmra.mxu0 %vm1232_vm1, %v1149_v28  ;;  %8208 = vmatmul.mubr.msk.f32.gmra.mxu1 %vm1232_vm1, %v1173_v30  ;;  %v1228_v28 = vld [vmem:[%s12475_s5 + $0x460] sm:$0xff]  ;;  %v1205_v30 = vld [vmem:[%s12475_s5 + $0x3a8] sm:$0xff] }
 0x140   :  { %8158 = vmatprep.mubr.msk.f32.mxu0 %vm1232_vm1, %v1150_v24  ;;  %8210 = vmatprep.mubr.msk.f32.mxu1 %vm1232_vm1, %v1174_v31  ;;  %v1229_v24 = vld [vmem:[%s12475_s5 + $0x468] sm:$0xff]  ;;  %v1206_v31 = vld [vmem:[%s12475_s5 + $0x3b0] sm:$0xff] }
 0x143   :  { %8159 = vmatmul.mubr.msk.f32.gmra.mxu0 %vm1232_vm1, %v1151_v25  ;;  %8211 = vmatmul.mubr.msk.f32.gmra.mxu1 %vm1232_vm1, %v1175_v32  ;;  %v1230_v25 = vld [vmem:[%s12475_s5 + $0x470] sm:$0xff]  ;;  %v1207_v32 = vld [vmem:[%s12475_s5 + $0x3b8] sm:$0xff] }
 0x144   :  { %8161 = vmatprep.mubr.msk.f32.mxu0 %vm1232_vm1, %v1152_v33  ;;  %8213 = vmatprep.mubr.msk.f32.mxu1 %vm1232_vm1, %v1176_v51  ;;  %v1231_v33 = vld [vmem:[%s12475_s5 + $0x478] sm:$0xff]  ;;  %v8526_v51 = vmov 1966171168  }
 0x147   :  { %8162 = vmatmul.mubr.msk.f32.gmra.mxu0 %vm1232_vm1, %v1153_v52  ;;  %8214 = vmatmul.mubr.msk.f32.gmra.mxu1 %vm1232_vm1, %v1177_v35  ;;  %v62_v52 = vunpack.c.l.s4 %v8526_v51  ;;  %v64_v35 = vlaneseq }
 0x148   :  { %8164 = vmatprep.mubr.msk.f32.mxu0 %vm1232_vm1, %v1154_v36  ;;  %8216 = vmatprep.mubr.msk.f32.mxu1 %vm1232_vm1, %v1178_v38 }
 0x149   :  { %v63_v36 = vunpack.c.0.s8 %v62_v52  ;;  %v65_v38 = vshrl.u32 %v64_v35, 7 }
 0x14b   :  { %8165 = vmatmul.mubr.msk.f32.gmra.mxu0 %vm1232_vm1, %v1155_v39  ;;  %8217 = vmatmul.mubr.msk.f32.gmra.mxu1 %vm1232_vm1, %v1179_v40  ;;  %v58_v39 = vld [vmem:[%s12471_s1] sm:$0x3f] }
 0x14c   :  { %8167 = vmatprep.mubr.msk.f32.mxu0 %vm1232_vm1, %v1156_v41  ;;  %8219 = vmatprep.mubr.msk.f32.mxu1 %vm1232_vm1, %v1180_v42  ;;  %v9622_v40 = vsub.f32 1.0, %v58_v39  ;;  %v9624_v41 = vsub.s32 %v63_v36, %v65_v38 }
 0x14e   :  { %12709 = vst [vmem:[#allocation7_spill] sm:$0xff] %v9622_v40  ;;  %12710 = vst [vmem:[#allocation8_spill] sm:$0xff] %v9624_v41  ;;  %v67_v42 = vrot.slane %v9622_v40, %v9624_v41 }
 0x14f   :  { %8168 = vmatmul.mubr.msk.f32.gmra.mxu0 %vm1232_vm1, %v1157_v34  ;;  %8220 = vmatmul.mubr.msk.f32.gmra.mxu1 %vm1232_vm1, %v1181_v45 }
 0x150   :  { %8170 = vmatprep.mubr.msk.f32.mxu0 %vm1232_vm1, %v1158_v48  ;;  %8222 = vmatprep.mubr.msk.f32.mxu1 %vm1232_vm1, %v1182_v49  ;;  %v68_v34 = vcombine.high %v67_v42, %v67_v42  ;;  %v9629_v45 = vrot.slane %v67_v42, %v9624_v41 }
 0x152   :  { %12711 = vst [vmem:[#allocation9_spill] sm:$0xff] %v9629_v45  ;;  %v9632_v48 = vrot.slane %v68_v34, %v9624_v41  ;;  %v114_v49 = vmul.f32 %v9629_v45, %v9629_v45 }
 0x153   :  { %8171 = vmatmul.mubr.msk.f32.gmra.mxu0 %vm1232_vm1, %v1159_v29  ;;  %8223 = vmatmul.mubr.msk.f32.gmra.mxu1 %vm1232_vm1, %v1183_v15 }
 0x154   :  { %8241 = vmatprep.mubr.msk.f32.mxu0 %vm1232_vm1, %v1184_v17  ;;  %8293 = vmatprep.mubr.msk.f32.mxu1 %vm1232_vm1, %v1208_v58  ;;  %12712 = vst [vmem:[#allocation10_spill] sm:$0xff] %v9632_v48  ;;  %v115_v17 = vmul.f32 %v9632_v48, %v9629_v45  ;;  %v121_v58 = vmul.f32 %v9632_v48, %v9632_v48 }
 0x157   :  { %8242 = vmatmul.mubr.msk.f32.vlgmr.msra.gmra.mxu0 %vm1232_vm1, %v1185_v26  ;;  %8294 = vmatmul.mubr.msk.f32.vlgmr.msra.gmra.mxu1 %vm1232_vm1, %v1209_v59 }
 0x158   :  { %8244 = vmatprep.mubr.msk.f32.mxu0 %vm1232_vm1, %v1186_v47  ;;  %8296 = vmatprep.mubr.msk.f32.mxu1 %vm1232_vm1, %v1210_v37  ;;  %v132_v47 = vsub.f32 1.0, %v114_v49  ;;  %v133_v37 = vsub.f32 1.0, %v115_v17 }
 0x15a   :  { %vm150_vm2 = vcmp.gt.f32.partialorder %v132_v47, 0.5  ;;  %vm151_vm3 = vcmp.gt.f32.partialorder %v133_v37, 0.5 }
 0x15b   :  { %8245 = vmatmul.mubr.msk.f32.gmra.mxu0 %vm1232_vm1, %v1187_v22  ;;  %8297 = vmatmul.mubr.msk.f32.gmra.mxu1 %vm1232_vm1, %v1211_v7  ;;  %v139_v22 = vsub.f32 1.0, %v121_v58 }
 0x15c   :  { %8247 = vmatprep.mubr.msk.f32.mxu0 %vm1232_vm1, %v1188_v55  ;;  %8299 = vmatprep.mubr.msk.f32.mxu1 %vm1232_vm1, %v1212_v56 }
 0x15d   :  { %vm157_vm4 = vcmp.gt.f32.partialorder %v139_v22, 0.5 }
 0x15f   :  { %8248 = vmatmul.mubr.msk.f32.gmra.mxu0 %vm1232_vm1, %v1189_v61  ;;  %8300 = vmatmul.mubr.msk.f32.gmra.mxu1 %vm1232_vm1, %v1213_v46  ;;  %v9656_v46 = vsub.s32 0, %v65_v38 }
 0x160   :  { %8250 = vmatprep.mubr.msk.f32.mxu0 %vm1232_vm1, %v1190_v62  ;;  %8302 = vmatprep.mubr.msk.f32.mxu1 %vm1232_vm1, %v1214_v57  ;;  %v9659_v62 = vsel %vm150_vm2, 1, %v12485_v16  ;;  %v9663_v57 = vcombine.high %v9629_v45, %v9629_v45 }
 0x161   :  { %12721 = vst [vmem:[#allocation19_spill] sm:$0xff] %v9656_v46 }
 0x162   :  { %12722 = vst [vmem:[#allocation20_spill] sm:$0xff] %v9663_v57 }
 0x163   :  { %8251 = vmatmul.mubr.msk.f32.gmra.mxu0 %vm1232_vm1, %v1191_v60  ;;  %8303 = vmatmul.mubr.msk.f32.gmra.mxu1 %vm1232_vm1, %v1215_v63  ;;  %v9666_v60 = vsel %vm151_vm3, 1, %v12485_v16  ;;  %v9669_v63 = vsel %vm157_vm4, 1, %v12485_v16 }
 0x164   :  { %8253 = vmatprep.mubr.msk.f32.mxu0 %vm1232_vm1, %v1192_v3  ;;  %8305 = vmatprep.mubr.msk.f32.mxu1 %vm1232_vm1, %v1216_v53 }
 0x167   :  { %8254 = vmatmul.mubr.msk.f32.gmra.mxu0 %vm1232_vm1, %v1193_v6  ;;  %8306 = vmatmul.mubr.msk.f32.gmra.mxu1 %vm1232_vm1, %v1217_v10 }
 0x168   :  { %8256 = vmatprep.mubr.msk.f32.mxu0 %vm1232_vm1, %v1194_v4  ;;  %8308 = vmatprep.mubr.msk.f32.mxu1 %vm1232_vm1, %v1218_v5 }
 0x16b   :  { %8257 = vmatmul.mubr.msk.f32.gmra.mxu0 %vm1232_vm1, %v1195_v43  ;;  %8309 = vmatmul.mubr.msk.f32.gmra.mxu1 %vm1232_vm1, %v1219_v2 }
 0x16c   :  { %8259 = vmatprep.mubr.msk.f32.mxu0 %vm1232_vm1, %v1196_v44  ;;  %8311 = vmatprep.mubr.msk.f32.mxu1 %vm1232_vm1, %v1220_v11 }
 0x16f   :  { %8260 = vmatmul.mubr.msk.f32.gmra.mxu0 %vm1232_vm1, %v1197_v12  ;;  %8312 = vmatmul.mubr.msk.f32.gmra.mxu1 %vm1232_vm1, %v1221_v13  ;;  %v9695_v13 = vmul.f32 %v9663_v57, %v9629_v45 }
 0x170   :  { %8262 = vmatprep.mubr.msk.f32.mxu0 %vm1232_vm1, %v1198_v14  ;;  %8314 = vmatprep.mubr.msk.f32.mxu1 %vm1232_vm1, %v1222_v9  ;;  %v9699_v14 = vmul.f32 %v9663_v57, %v9632_v48 }
 0x172   :  { %12723 = vst [vmem:[#allocation21_spill] sm:$0xff] %v9699_v14 }
 0x173   :  { %8263 = vmatmul.mubr.msk.f32.gmra.mxu0 %vm1232_vm1, %v1199_v50  ;;  %8315 = vmatmul.mubr.msk.f32.gmra.mxu1 %vm1232_vm1, %v1223_v54 }
 0x174   :  { %8265 = vmatprep.mubr.msk.f32.mxu0 %vm1232_vm1, %v1200_v18  ;;  %8317 = vmatprep.mubr.msk.f32.mxu1 %vm1232_vm1, %v1224_v19 }
 0x177   :  { %8266 = vmatmul.mubr.msk.f32.gmra.mxu0 %vm1232_vm1, %v1201_v0  ;;  %8318 = vmatmul.mubr.msk.f32.gmra.mxu1 %vm1232_vm1, %v1225_v1 }
 0x178   :  { %8268 = vmatprep.mubr.msk.f32.mxu0 %vm1232_vm1, %v1202_v20  ;;  %8320 = vmatprep.mubr.msk.f32.mxu1 %vm1232_vm1, %v1226_v21 }
 0x17b   :  { %8269 = vmatmul.mubr.msk.f32.gmra.mxu0 %vm1232_vm1, %v1203_v23  ;;  %8321 = vmatmul.mubr.msk.f32.gmra.mxu1 %vm1232_vm1, %v1227_v8 }
 0x17c   :  { %8271 = vmatprep.mubr.msk.f32.mxu0 %vm1232_vm1, %v1204_v27  ;;  %8323 = vmatprep.mubr.msk.f32.mxu1 %vm1232_vm1, %v1228_v28 }
 0x17f   :  { %8272 = vmatmul.mubr.msk.f32.gmra.mxu0 %vm1232_vm1, %v1205_v30  ;;  %8324 = vmatmul.mubr.msk.f32.gmra.mxu1 %vm1232_vm1, %v1229_v24 }
 0x180   :  { %8274 = vmatprep.mubr.msk.f32.mxu0 %vm1232_vm1, %v1206_v31  ;;  %8326 = vmatprep.mubr.msk.f32.mxu1 %vm1232_vm1, %v1230_v25 }
 0x183   :  { %8275 = vmatmul.mubr.msk.f32.gmra.mxu0 %vm1232_vm1, %v1207_v32  ;;  %8327 = vmatmul.mubr.msk.f32.gmra.mxu1 %vm1232_vm1, %v1231_v33 }
 0x1a8   :  { %v9636_v29 = vpop.f32.mrf.mxu0  ;;  %v9638_v15 = vpop.f32.mrf.mxu1 }
 0x1a9   :  { %12713 = vst [vmem:[#allocation11_spill] sm:$0xff] %v9636_v29  ;;  %12714 = vst [vmem:[#allocation12_spill] sm:$0xff] %v9638_v15 }
 0x1aa   :  { %v9644_v26 = vpop.f32.mrf.mxu0  ;;  %v9646_v59 = vpop.f32.mrf.mxu1 }
 0x1ab   :  { %12715 = vst [vmem:[#allocation13_spill] sm:$0xff] %v9644_v26  ;;  %12716 = vst [vmem:[#allocation14_spill] sm:$0xff] %v9646_v59 }
 0x1ae   :  { %v9648_v7 = vpop.f32.mrf.mxu0  ;;  %v9650_v55 = vpop.f32.mrf.mxu1 }
 0x1af   :  { %12717 = vst [vmem:[#allocation15_spill] sm:$0xff] %v9648_v7  ;;  %12718 = vst [vmem:[#allocation16_spill] sm:$0xff] %v9650_v55 }
 0x1b0   :  { %v9652_v56 = vpop.f32.mrf.mxu0  ;;  %v9654_v61 = vpop.f32.mrf.mxu1 }
 0x1b1   :  { %12719 = vst [vmem:[#allocation17_spill] sm:$0xff] %v9652_v56  ;;  %12720 = vst [vmem:[#allocation18_spill] sm:$0xff] %v9654_v61 }
 0x1b4   :  { %v9671_v3 = vpop.f32.mrf.mxu0  ;;  %v9673_v53 = vpop.f32.mrf.mxu1 }
 0x1b5   :  { %v2773_v10 = vmul.f32 %v9671_v3, %v9636_v29  ;;  %v2797_v4 = vmul.f32 %v9638_v15, %v9671_v3  ;;  %v2777_v5 = vmul.f32 %v9673_v53, %v9636_v29  ;;  %v2801_v43 = vmul.f32 %v9673_v53, %v9638_v15 }
 0x1b6   :  { %v9685_v2 = vpop.f32.mrf.mxu0  ;;  %v9687_v44 = vpop.f32.mrf.mxu1 }
 0x1b7   :  { %v2850_v9 = vrot.slane %v2773_v10, 4  ;;  %v2994_v50 = vrot.slane %v2797_v4, 4  ;;  %v2874_v54 = vrot.slane %v2777_v5, 4  ;;  %v3018_v18 = vrot.slane %v2801_v43, 4 }
 0x1b8   :  { %v2772_v19 = vmul.f32 %v9685_v2, %v9644_v26  ;;  %v2796_v0 = vmul.f32 %v9646_v59, %v9685_v2  ;;  %v2776_v1 = vmul.f32 %v9687_v44, %v9644_v26  ;;  %v2800_v20 = vmul.f32 %v9687_v44, %v9646_v59 }
 0x1b9   :  { %v2851_v21 = vadd.f32 %v2850_v9, %v2773_v10  ;;  %v2995_v23 = vadd.f32 %v2994_v50, %v2797_v4  ;;  %v2875_v8 = vadd.f32 %v2874_v54, %v2777_v5  ;;  %v3019_v27 = vadd.f32 %v3018_v18, %v2801_v43 }
 0x1ba   :  { %v2844_v28 = vrot.slane %v2772_v19, 4  ;;  %v2988_v30 = vrot.slane %v2796_v0, 4  ;;  %v2868_v24 = vrot.slane %v2776_v1, 4  ;;  %v3012_v31 = vrot.slane %v2800_v20, 4  ;;  %v9709_v25 = vpop.f32.mrf.mxu0  ;;  %v9711_v32 = vpop.f32.mrf.mxu1 }
 0x1bb   :  { %v2852_v33 = vrot.slane %v2851_v21, 2  ;;  %v2996_v51 = vrot.slane %v2995_v23, 2  ;;  %v2876_v52 = vrot.slane %v2875_v8, 2  ;;  %v3020_v35 = vrot.slane %v3019_v27, 2 }
 0x1bc   :  { %v2845_v36 = vadd.f32 %v2844_v28, %v2772_v19  ;;  %v2989_v38 = vadd.f32 %v2988_v30, %v2796_v0  ;;  %v2869_v39 = vadd.f32 %v2868_v24, %v2776_v1  ;;  %v3013_v42 = vadd.f32 %v3012_v31, %v2800_v20  ;;  %v9713_v34 = vpop.f32.mrf.mxu0  ;;  %v9715_v49 = vpop.f32.mrf.mxu1 }
 0x1bd   :  { %v2853_v17 = vadd.f32 %v2852_v33, %v2851_v21  ;;  %v2997_v58 = vadd.f32 %v2996_v51, %v2995_v23  ;;  %v2877_v47 = vadd.f32 %v2876_v52, %v2875_v8  ;;  %v3021_v37 = vadd.f32 %v3020_v35, %v3019_v27 }
 0x1be   :  { %v2846_v22 = vrot.slane %v2845_v36, 2  ;;  %v2990_v10 = vrot.slane %v2989_v38, 2  ;;  %v2870_v4 = vrot.slane %v2869_v39, 2  ;;  %v3014_v5 = vrot.slane %v3013_v42, 2 }
 0x1bf   :  { %v2854_v43 = vrot.slane %v2853_v17, 1  ;;  %v2998_v9 = vrot.slane %v2997_v58, 1  ;;  %v2878_v50 = vrot.slane %v2877_v47, 1  ;;  %v3022_v54 = vrot.slane %v3021_v37, 1 }
 0x1c0   :  { %v2847_v18 = vadd.f32 %v2846_v22, %v2845_v36  ;;  %v2991_v19 = vadd.f32 %v2990_v10, %v2989_v38  ;;  %v2871_v0 = vadd.f32 %v2870_v4, %v2869_v39  ;;  %v3015_v1 = vadd.f32 %v3014_v5, %v3013_v42  ;;  %v9717_v20 = vpop.f32.mrf.mxu0  ;;  %v9719_v28 = vpop.f32.mrf.mxu1 }
 0x1c1   :  { %12724 = vst [vmem:[#allocation22_spill] sm:$0xff] %v9717_v20  ;;  %12725 = vst [vmem:[#allocation23_spill] sm:$0xff] %v9719_v28  ;;  %v2855_v21 = vadd.f32 %v2854_v43, %v2853_v17  ;;  %v2999_v23 = vadd.f32 %v2998_v9, %v2997_v58  ;;  %v2879_v8 = vadd.f32 %v2878_v50, %v2877_v47 }
 0x1c2   :  { %v3023_v27 = vadd.f32 %v3022_v54, %v3021_v37  ;;  %v2848_v30 = vrot.slane %v2847_v18, 1  ;;  %v2992_v24 = vrot.slane %v2991_v19, 1  ;;  %v2872_v31 = vrot.slane %v2871_v0, 1  ;;  %v9721_v51 = vpop.f32.mrf.mxu0  ;;  %v9723_v52 = vpop.f32.mrf.mxu1 }
 0x1c3   :  { %v3016_v33 = vrot.slane %v3015_v1, 1  ;;  %12726 = vst [vmem:[#allocation24_spill] sm:$0xff] %v9721_v51  ;;  %12727 = vst [vmem:[#allocation25_spill] sm:$0xff] %v9723_v52  ;;  %v3277_v35 = vmul.f32 0.35355338, %v2855_v21  ;;  %v2775_v39 = vmul.f32 %v9709_v25, %v9648_v7  ;;  %v2799_v4 = vmul.f32 %v9650_v55, %v9709_v25 }
 0x1c4   :  { %v3301_v36 = vmul.f32 0.35355338, %v2999_v23  ;;  %v3281_v38 = vmul.f32 0.35355338, %v2879_v8  ;;  %v3305_v42 = vmul.f32 0.35355338, %v3023_v27  ;;  %v2849_v22 = vadd.f32 %v2848_v30, %v2847_v18  ;;  %v9727_v47 = vpop.f32.mrf.mxu0  ;;  %v9729_v37 = vpop.f32.mrf.mxu1 }
 0x1c5   :  { %v2993_v17 = vadd.f32 %v2992_v24, %v2991_v19  ;;  %v2873_v58 = vadd.f32 %v2872_v31, %v2871_v0  ;;  %12728 = vst [vmem:[#allocation26_spill] sm:$0xff] %v9727_v47  ;;  %12729 = vst [vmem:[#allocation27_spill] sm:$0xff] %v9729_v37  ;;  %v3017_v10 = vadd.f32 %v3016_v33, %v3015_v1  ;;  %v2862_v5 = vrot.slane %v2775_v39, 4 }
 0x1c6   :  { %v2779_v43 = vmul.f32 %v9711_v32, %v9648_v7  ;;  %v3276_v9 = vmul.f32 0.35355338, %v2849_v22  ;;  %v2803_v18 = vmul.f32 %v9711_v32, %v9650_v55  ;;  %v9737_v19 = vpop.f32.mrf.mxu0  ;;  %v9739_v0 = vpop.f32.mrf.mxu1  ;;  %v3006_v1 = vrot.slane %v2799_v4, 4 }
 0x1c7   :  { %v3300_v50 = vmul.f32 0.35355338, %v2993_v17  ;;  %v3280_v54 = vmul.f32 0.35355338, %v2873_v58  ;;  %12730 = vst [vmem:[#allocation28_spill] sm:$0xff] %v9737_v19  ;;  %12731 = vst [vmem:[#allocation29_spill] sm:$0xff] %v9739_v0  ;;  %v2863_v23 = vadd.f32 %v2862_v5, %v2775_v39 }
 0x1c8   :  { %v3304_v21 = vmul.f32 0.35355338, %v3017_v10  ;;  %v2886_v8 = vrot.slane %v2779_v43, 4  ;;  %v9742_v27 = vsel %vm12654_vm5, %v3277_v35, %v3276_v9  ;;  %v3030_v31 = vrot.slane %v2803_v18, 4  ;;  %v9750_v33 = vpop.f32.mrf.mxu0  ;;  %v9752_v22 = vpop.f32.mrf.mxu1 }
 0x1c9   :  { %v9745_v30 = vsel %vm12654_vm5, %v3301_v36, %v3300_v50  ;;  %v9748_v24 = vsel %vm12654_vm5, %v3281_v38, %v3280_v54  ;;  %12732 = vst [vmem:[#allocation30_spill] sm:$0xff] %v9750_v33  ;;  %12733 = vst [vmem:[#allocation31_spill] sm:$0xff] %v9752_v22  ;;  %v2864_v39 = vrot.slane %v2863_v23, 2  ;;  %v3007_v58 = vadd.f32 %v3006_v1, %v2799_v4 }
 0x1ca   :  { %v9755_v17 = vsel %vm12654_vm5, %v3305_v42, %v3304_v21  ;;  %v2887_v10 = vadd.f32 %v2886_v8, %v2779_v43  ;;  %v3031_v5 = vadd.f32 %v3030_v31, %v2803_v18  ;;  %v2774_v35 = vmul.f32 %v9713_v34, %v9652_v56  ;;  %v9763_v9 = vpop.f32.mrf.mxu0  ;;  %v9765_v50 = vpop.f32.mrf.mxu1 }
 0x1cb   :  { %v2798_v36 = vmul.f32 %v9654_v61, %v9713_v34  ;;  %v2778_v38 = vmul.f32 %v9715_v49, %v9652_v56  ;;  %12734 = vst [vmem:[#allocation32_spill] sm:$0xff] %v9763_v9  ;;  %12735 = vst [vmem:[#allocation33_spill] sm:$0xff] %v9765_v50  ;;  %v2865_v54 = vadd.f32 %v2864_v39, %v2863_v23  ;;  %v3008_v42 = vrot.slane %v3007_v58, 2 }
 0x1cc   :  { %v2888_v21 = vrot.slane %v2887_v10, 2  ;;  %v2802_v4 = vmul.f32 %v9715_v49, %v9654_v61  ;;  %v3032_v43 = vrot.slane %v3031_v5, 2  ;;  %v2856_v18 = vrot.slane %v2774_v35, 4  ;;  %v9769_v31 = vpop.f32.mrf.mxu0  ;;  %v9771_v16 = vpop.f32.mrf.mxu1 }
 0x1cd   :  { %v3000_v1 = vrot.slane %v2798_v36, 4  ;;  %v2880_v8 = vrot.slane %v2778_v38, 4  ;;  %12736 = vst [vmem:[#allocation34_spill] sm:$0xff] %v9769_v31  ;;  %12737 = vst [vmem:[#allocation35_spill] sm:$0xff] %v9771_v16  ;;  %v2866_v12 = vrot.slane %v2865_v54, 1  ;;  %v3009_v11 = vadd.f32 %v3008_v42, %v3007_v58 }
 0x1ce   :  { %v2889_v6 = vadd.f32 %v2888_v21, %v2887_v10  ;;  %v3024_v0 = vrot.slane %v2802_v4, 4  ;;  %v3033_v19 = vadd.f32 %v3032_v43, %v3031_v5  ;;  %v2857_v37 = vadd.f32 %v2856_v18, %v2774_v35  ;;  %v9773_v47 = vpop.f32.mrf.mxu0  ;;  %v9775_v52 = vpop.f32.mrf.mxu1 }
 0x1cf   :  { %v3001_v23 = vadd.f32 %v3000_v1, %v2798_v36  ;;  %v2881_v39 = vadd.f32 %v2880_v8, %v2778_v38  ;;  %12738 = vst [vmem:[#allocation36_spill] sm:$0xff] %v9773_v47  ;;  %12739 = vst [vmem:[#allocation37_spill] sm:$0xff] %v9775_v52  ;;  %v2867_v51 = vadd.f32 %v2866_v12, %v2865_v54  ;;  %v3010_v28 = vrot.slane %v3009_v11, 1 }
 0x1d0   :  { %v2890_v20 = vrot.slane %v2889_v6, 1  ;;  %v3025_v41 = vadd.f32 %v3024_v0, %v2802_v4  ;;  %v3034_v40 = vrot.slane %v3033_v19, 1  ;;  %v2858_v45 = vrot.slane %v2857_v37, 2  ;;  %v9777_v10 = vpop.f32.mrf.mxu0  ;;  %v9779_v5 = vpop.f32.mrf.mxu1 }
 0x1d1   :  { %v3002_v48 = vrot.slane %v3001_v23, 2  ;;  %v2882_v58 = vrot.slane %v2881_v39, 2  ;;  %12740 = vst [vmem:[#allocation38_spill] sm:$0xff] %v9777_v10  ;;  %12741 = vst [vmem:[#allocation39_spill] sm:$0xff] %v9779_v5  ;;  %v3011_v35 = vadd.f32 %v3010_v28, %v3009_v11  ;;  %v3279_v36 = vmul.f32 0.35355338, %v2867_v51 }
 0x1d2   :  { %v2891_v38 = vadd.f32 %v2890_v20, %v2889_v6  ;;  %v3026_v42 = vrot.slane %v3025_v41, 2  ;;  %v3035_v21 = vadd.f32 %v3034_v40, %v3033_v19  ;;  %v2859_v43 = vadd.f32 %v2858_v45, %v2857_v37  ;;  %v9795_v6 = vpop.f32.mrf.mxu0  ;;  %v9797_v40 = vpop.f32.mrf.mxu1 }
 0x1d3   :  { %v3003_v12 = vadd.f32 %v3002_v48, %v3001_v23  ;;  %v12742_v54 = vrot.slane %v9659_v62, %v9656_v46  ;;  %v12743_v0 = vmov 0  ;;  %v12746_v4 = vrot.slane %v9666_v60, %v9656_v46  ;;  %12750 = vst [vmem:[#allocation42_spill] sm:$0xff] %v9795_v6  ;;  %12751 = vst [vmem:[#allocation43_spill] sm:$0xff] %v9797_v40 }
 0x1d4   :  { %v12747_v18 = vmov 0  ;;  %v2883_v11 = vadd.f32 %v2882_v58, %v2881_v39  ;;  %v3303_v45 = vmul.f32 0.35355338, %v3011_v35  ;;  %v3283_v48 = vmul.f32 0.35355338, %v2891_v38  ;;  %v9801_v60 = vpop.f32.mrf.mxu0  ;;  %v9803_v1 = vpop.f32.mrf.mxu1 }
 0x1d5   :  { %vm9784_vm8 = vcmp.eq.s32.totalorder %v12742_v54, 1  ;;  %vm9791_vm9 = vcmp.eq.s32.totalorder %v12746_v4, 1  ;;  %v3027_v20 = vadd.f32 %v3026_v42, %v3025_v41  ;;  %v5147_v62 = vmul.f32 %v9777_v10, %v9750_v33  ;;  %12752 = vst [vmem:[#allocation44_spill] sm:$0xff] %v9801_v60  ;;  %12753 = vst [vmem:[#allocation45_spill] sm:$0xff] %v9803_v1 }
 0x1d6   :  { %v12744_v0 = vsel %vm9784_vm8, 4294967295, %v12743_v0  ;;  %v12748_v18 = vsel %vm9791_vm9, 4294967295, %v12747_v18  ;;  %v3307_v28 = vmul.f32 0.35355338, %v3035_v21  ;;  %v2860_v51 = vrot.slane %v2859_v43, 1  ;;  %v9811_v21 = vpop.f32.mrf.mxu0  ;;  %v9813_v54 = vpop.f32.mrf.mxu1 }
 0x1d7   :  { %12745 = vst [vmem:[#allocation40_spill] sm:$0xff] %v12744_v0  ;;  %12749 = vst [vmem:[#allocation41_spill] sm:$0xff] %v12748_v18  ;;  %v3004_v37 = vrot.slane %v3003_v12, 1  ;;  %v2884_v19 = vrot.slane %v2883_v11, 1  ;;  %v3028_v8 = vrot.slane %v3027_v20, 1  ;;  %v5171_v23 = vmul.f32 %v9752_v22, %v9777_v10 }
 0x1d8   :  { %v5224_v39 = vrot.slane %v5147_v62, 4  ;;  %v5151_v58 = vmul.f32 %v9779_v5, %v9750_v33  ;;  %v2861_v41 = vadd.f32 %v2860_v51, %v2859_v43  ;;  %v5175_v42 = vmul.f32 %v9779_v5, %v9752_v22  ;;  %12754 = vst [vmem:[#allocation46_spill] sm:$0xff] %v9811_v21  ;;  %12755 = vst [vmem:[#allocation47_spill] sm:$0xff] %v9813_v54  ;;  %v9817_v43 = vpop.f32.mrf.mxu0 }
 0x1d9   :  { %v3005_v35 = vadd.f32 %v3004_v37, %v3003_v12  ;;  %v2885_v38 = vadd.f32 %v2884_v19, %v2883_v11  ;;  %v3029_v4 = vadd.f32 %v3028_v8, %v3027_v20  ;;  %v5368_v56 = vrot.slane %v5171_v23, 4  ;;  %12756 = vst [vmem:[#allocation48_spill] sm:$0xff] %v9817_v43  ;;  %v9819_v12 = vpop.f32.mrf.mxu1 }
 0x1da   :  { %v5225_v61 = vadd.f32 %v5224_v39, %v5147_v62  ;;  %v5248_v57 = vrot.slane %v5151_v58, 4  ;;  %v3278_v55 = vmul.f32 0.35355338, %v2861_v41  ;;  %v5146_v33 = vmul.f32 %v9795_v6, %v9763_v9  ;;  %12757 = vst [vmem:[#allocation49_spill] sm:$0xff] %v9819_v12  ;;  %v9827_v41 = vpop.f32.mrf.mxu0 }
 0x1db   :  { %v3302_v10 = vmul.f32 0.35355338, %v3005_v35  ;;  %v3282_v7 = vmul.f32 0.35355338, %v2885_v38  ;;  %v3306_v11 = vmul.f32 0.35355338, %v3029_v4  ;;  %v5369_v37 = vadd.f32 %v5368_v56, %v5171_v23  ;;  %v9829_v35 = vpop.f32.mrf.mxu1 }
 0x1dc   :  { %v5226_v51 = vrot.slane %v5225_v61, 2  ;;  %v5249_v19 = vadd.f32 %v5248_v57, %v5151_v58  ;;  %v3531_v20 = vsel %vm12663_vm6, %v3278_v55, %v9742_v27  ;;  %v5392_v39 = vrot.slane %v5175_v42, 4  ;;  %12758 = vst [vmem:[#allocation50_spill] sm:$0xff] %v9827_v41  ;;  %12759 = vst [vmem:[#allocation51_spill] sm:$0xff] %v9829_v35 }
 0x1dd   :  { %v3550_v62 = vsel %vm12663_vm6, %v3302_v10, %v9745_v30  ;;  %v3535_v8 = vsel %vm12663_vm6, %v3282_v7, %v9748_v24  ;;  %v3533_v38 = vsel %vm12658_vm7, %v3279_v36, %v3531_v20  ;;  %v3553_v55 = vsel %vm12663_vm6, %v3306_v11, %v9755_v17  ;;  %v9843_v7 = vpop.f32.mrf.mxu0  ;;  %v9845_v30 = vpop.f32.mrf.mxu1 }
 0x1de   :  { %v3551_v4 = vsel %vm12658_vm7, %v3303_v45, %v3550_v62  ;;  %v3536_v56 = vsel %vm12658_vm7, %v3283_v48, %v3535_v8  ;;  %v12760_v57 = vrot.slane %v9669_v63, %v9656_v46  ;;  %v12761_v27 = vmov 0  ;;  %12764 = vst [vmem:[#allocation53_spill] sm:$0xff] %v9843_v7  ;;  %12765 = vst [vmem:[#allocation54_spill] sm:$0xff] %v9845_v30 }
 0x1df   :  { %v9850_v10 = vsel %vm9784_vm8, -1e+30, %v3533_v38  ;;  %v9854_v17 = vsel %vm9791_vm9, -1e+30, %v3551_v4  ;;  %v3554_v63 = vsel %vm12658_vm7, %v3307_v28, %v3553_v55  ;;  %v9860_v45 = vsel %vm9791_vm9, -1e+30, %v3536_v56  ;;  %v9862_v11 = vpop.f32.mrf.mxu0  ;;  %v9864_v20 = vpop.f32.mrf.mxu1 }
 0x1e0   :  { %vm9839_vm10 = vcmp.eq.s32.totalorder %v12760_v57, 1  ;;  %12766 = vst [vmem:[#allocation55_spill] sm:$0xff] %v9850_v10  ;;  %12767 = vst [vmem:[#allocation56_spill] sm:$0xff] %v9854_v17  ;;  %v5227_v48 = vadd.f32 %v5226_v51, %v5225_v61  ;;  %v5370_v23 = vrot.slane %v5369_v37, 2  ;;  %v5250_v58 = vrot.slane %v5249_v19, 2 }
 0x1e1   :  { %v12762_v27 = vsel %vm9839_vm10, 4294967295, %v12761_v27  ;;  %12768 = vst [vmem:[#allocation57_spill] sm:$0xff] %v9860_v45  ;;  %12769 = vst [vmem:[#allocation58_spill] sm:$0xff] %v9862_v11  ;;  %v5393_v62 = vadd.f32 %v5392_v39, %v5175_v42  ;;  %v5170_v8 = vmul.f32 %v9765_v50, %v9795_v6  ;;  %v5218_v38 = vrot.slane %v5146_v33, 4  ;;  %v9872_v51 = vpop.f32.mrf.mxu0  ;;  %v8191_v56 = vpop.f32.mrf.mxu1 }
 0x1e2   :  { %12763 = vst [vmem:[#allocation52_spill] sm:$0xff] %v12762_v27  ;;  %12770 = vst [vmem:[#allocation59_spill] sm:$0xff] %v9864_v20  ;;  %v5150_v28 = vmul.f32 %v9797_v40, %v9763_v9  ;;  %v5228_v4 = vrot.slane %v5227_v48, 1  ;;  %v5371_v55 = vadd.f32 %v5370_v23, %v5369_v37  ;;  %v5251_v57 = vadd.f32 %v5250_v58, %v5249_v19 }
 0x1e3   :  { %v5174_v61 = vmul.f32 %v9797_v40, %v9765_v50  ;;  %12771 = vst [vmem:[#allocation60_spill] sm:$0xff] %v9872_v51  ;;  %v5394_v36 = vrot.slane %v5393_v62, 2  ;;  %v5219_v24 = vadd.f32 %v5218_v38, %v5146_v33  ;;  %v5362_v20 = vrot.slane %v5170_v8, 4  ;;  %v9874_v35 = vpop.f32.mrf.mxu0  ;;  %v2142_v41 = vpop.f32.mrf.mxu1 }
 0x1e4   :  { %v5242_v42 = vrot.slane %v5150_v28, 4  ;;  %v5229_v39 = vadd.f32 %v5228_v4, %v5227_v48  ;;  %v5372_v11 = vrot.slane %v5371_v55, 1  ;;  %v5252_v30 = vrot.slane %v5251_v57, 1  ;;  %12772 = vst [vmem:[#allocation61_spill] sm:$0xff] %v9874_v35 }
 0x1e5   :  { %v5386_v7 = vrot.slane %v5174_v61, 4  ;;  %v5395_v12 = vadd.f32 %v5394_v36, %v5393_v62  ;;  %v5220_v37 = vrot.slane %v5219_v24, 2  ;;  %v5363_v19 = vadd.f32 %v5362_v20, %v5170_v8 }
 0x1e6   :  { %v5243_v23 = vadd.f32 %v5242_v42, %v5150_v28  ;;  %v9878_v58 = vsel %vm9839_vm10, -1e+30, %v3554_v63  ;;  %v5373_v56 = vadd.f32 %v5372_v11, %v5371_v55  ;;  %v5253_v43 = vadd.f32 %v5252_v30, %v5251_v57  ;;  %v9882_v36 = vpop.f32.mrf.mxu0  ;;  %v8194_v20 = vpop.f32.mrf.mxu1 }
 0x1e7   :  { %12773 = vst [vmem:[#allocation62_spill] sm:$0xff] %v9878_v58  ;;  %v5387_v33 = vadd.f32 %v5386_v7, %v5174_v61  ;;  %v5396_v38 = vrot.slane %v5395_v12, 1  ;;  %v5221_v50 = vadd.f32 %v5220_v37, %v5219_v24  ;;  %v5364_v48 = vrot.slane %v5363_v19, 2 }
 0x1e8   :  { %v5244_v4 = vrot.slane %v5243_v23, 2  ;;  %v5651_v9 = vmul.f32 0.35355338, %v5229_v39  ;;  %v5675_v22 = vmul.f32 0.35355338, %v5373_v56  ;;  %v5149_v41 = vmul.f32 %v9801_v60, %v9769_v31  ;;  %v9888_v55 = vpop.f32.mrf.mxu0  ;;  %v2150_v57 = vpop.f32.mrf.mxu1 }
 0x1e9   :  { %v5388_v40 = vrot.slane %v5387_v33, 2  ;;  %v5655_v62 = vmul.f32 0.35355338, %v5253_v43  ;;  %v5222_v8 = vrot.slane %v5221_v50, 1  ;;  %v5365_v63 = vadd.f32 %v5364_v48, %v5363_v19  ;;  %12774 = vst [vmem:[#allocation63_spill] sm:$0xff] %v9888_v55 }
 0x1ea   :  { %v5245_v28 = vadd.f32 %v5244_v4, %v5243_v23  ;;  %v5173_v7 = vmul.f32 %v9771_v16, %v9801_v60  ;;  %v5236_v30 = vrot.slane %v5149_v41, 4  ;;  %v5153_v24 = vmul.f32 %v9803_v1, %v9769_v31 }
 0x1eb   :  { %v5389_v11 = vadd.f32 %v5388_v40, %v5387_v33  ;;  %v5397_v61 = vadd.f32 %v5396_v38, %v5395_v12  ;;  %v5223_v42 = vadd.f32 %v5222_v8, %v5221_v50  ;;  %v5366_v39 = vrot.slane %v5365_v63, 1 }
 0x1ec   :  { %v5246_v37 = vrot.slane %v5245_v28, 1  ;;  %v5237_v43 = vadd.f32 %v5236_v30, %v5149_v41  ;;  %v5380_v20 = vrot.slane %v5173_v7, 4  ;;  %v5177_v40 = vmul.f32 %v9803_v1, %v9771_v16  ;;  %v9892_v5 = vpop.f32.mrf.mxu0  ;;  %v9894_v12 = vpop.f32.mrf.mxu1 }
 0x1ed   :  { %v5390_v56 = vrot.slane %v5389_v11, 1  ;;  %v5367_v19 = vadd.f32 %v5366_v39, %v5365_v63  ;;  %v5650_v23 = vmul.f32 0.35355338, %v5223_v42  ;;  %v5260_v48 = vrot.slane %v5153_v24, 4 }
 0x1ee   :  { %v5247_v33 = vadd.f32 %v5246_v37, %v5245_v28  ;;  %v5238_v60 = vrot.slane %v5237_v43, 2  ;;  %v5381_v31 = vadd.f32 %v5380_v20, %v5173_v7  ;;  %v5404_v6 = vrot.slane %v5177_v40, 4  ;;  %v9899_v28 = vpop.f32.mrf.mxu0 }
 0x1ef   :  { %v5391_v4 = vadd.f32 %v5390_v56, %v5389_v11  ;;  %v5679_v50 = vmul.f32 0.35355338, %v5397_v61  ;;  %v5674_v38 = vmul.f32 0.35355338, %v5367_v19  ;;  %v5261_v41 = vadd.f32 %v5260_v48, %v5153_v24  ;;  %v9901_v11 = vpop.f32.mrf.mxu1 }
 0x1f0   :  { %v5654_v8 = vmul.f32 0.35355338, %v5247_v33  ;;  %v9897_v30 = vsel %vm12654_vm5, %v5651_v9, %v5650_v23  ;;  %v5239_v57 = vadd.f32 %v5238_v60, %v5237_v43  ;;  %v5382_v63 = vrot.slane %v5381_v31, 2 }
 0x1f1   :  { %v5405_v42 = vadd.f32 %v5404_v6, %v5177_v40  ;;  %v9904_v7 = vsel %vm12654_vm5, %v5675_v22, %v5674_v38  ;;  %v5678_v39 = vmul.f32 0.35355338, %v5391_v4  ;;  %v5262_v37 = vrot.slane %v5261_v41, 2 }
 0x1f2   :  { %v5148_v61 = vmul.f32 %v9811_v21, %v9773_v47  ;;  %v9909_v24 = vsel %vm12654_vm5, %v5655_v62, %v5654_v8  ;;  %v5240_v9 = vrot.slane %v5239_v57, 1  ;;  %v5383_v56 = vadd.f32 %v5382_v63, %v5381_v31  ;;  %v9917_v48 = vpop.f32.mrf.mxu0  ;;  %v9919_v62 = vpop.f32.mrf.mxu1 }
 0x1f3   :  { %v5406_v60 = vrot.slane %v5405_v42, 2  ;;  %v5263_v43 = vadd.f32 %v5262_v37, %v5261_v41  ;;  %v5172_v6 = vmul.f32 %v9775_v52, %v9811_v21  ;;  %v5152_v22 = vmul.f32 %v9813_v54, %v9773_v47 }
 0x1f4   :  { %v5230_v20 = vrot.slane %v5148_v61, 4  ;;  %v5241_v40 = vadd.f32 %v5240_v9, %v5239_v57  ;;  %v5384_v19 = vrot.slane %v5383_v56, 1  ;;  %v5176_v33 = vmul.f32 %v9813_v54, %v9775_v52  ;;  %v9924_v57 = vpop.f32.mrf.mxu0 }
 0x1f5   :  { %v5407_v23 = vadd.f32 %v5406_v60, %v5405_v42  ;;  %v5264_v31 = vrot.slane %v5263_v43, 1  ;;  %v5374_v38 = vrot.slane %v5172_v6, 4  ;;  %v5254_v8 = vrot.slane %v5152_v22, 4  ;;  %12775 = vst [vmem:[#allocation64_spill] sm:$0xff] %v9924_v57  ;;  %v9926_v42 = vpop.f32.mrf.mxu1 }
 0x1f6   :  { %v5231_v4 = vadd.f32 %v5230_v20, %v5148_v61  ;;  %v9922_v41 = vsel %vm12654_vm5, %v5679_v50, %v5678_v39  ;;  %v5385_v63 = vadd.f32 %v5384_v19, %v5383_v56  ;;  %v5398_v47 = vrot.slane %v5176_v33, 4  ;;  %12776 = vst [vmem:[#allocation65_spill] sm:$0xff] %v9926_v42 }
 0x1f7   :  { %v5408_v37 = vrot.slane %v5407_v23, 1  ;;  %v5265_v9 = vadd.f32 %v5264_v31, %v5263_v43  ;;  %v5375_v52 = vadd.f32 %v5374_v38, %v5172_v6  ;;  %v5255_v16 = vadd.f32 %v5254_v8, %v5152_v22  ;;  %v9930_v19 = vpop.f32.mrf.mxu0  ;;  %v9932_v46 = vpop.f32.mrf.mxu1 }
 0x1f8   :  { %v5232_v60 = vrot.slane %v5231_v4, 2  ;;  %v5653_v54 = vmul.f32 0.35355338, %v5241_v40  ;;  %v5677_v21 = vmul.f32 0.35355338, %v5385_v63  ;;  %v5399_v1 = vadd.f32 %v5398_v47, %v5176_v33  ;;  %12777 = vst [vmem:[#allocation66_spill] sm:$0xff] %v9930_v19 }
 0x1f9   :  { %v2821_v61 = vmul.f32 %v9872_v51, %v9671_v3  ;;  %v5409_v50 = vadd.f32 %v5408_v37, %v5407_v23  ;;  %v5376_v56 = vrot.slane %v5375_v52, 2  ;;  %v5256_v20 = vrot.slane %v5255_v16, 2  ;;  %12778 = vst [vmem:[#allocation67_spill] sm:$0xff] %v9932_v46  ;;  %v9938_v23 = vpop.f32.mrf.mxu0  ;;  %v9940_v31 = vpop.f32.mrf.mxu1 }
 0x1fa   :  { %v5233_v39 = vadd.f32 %v5232_v60, %v5231_v4  ;;  %v5657_v42 = vmul.f32 0.35355338, %v5265_v9  ;;  %v5400_v43 = vrot.slane %v5399_v1, 2  ;;  %v2825_v6 = vmul.f32 %v9872_v51, %v9673_v53  ;;  %12779 = vst [vmem:[#allocation68_spill] sm:$0xff] %v9938_v23  ;;  %12780 = vst [vmem:[#allocation69_spill] sm:$0xff] %v9940_v31 }
 0x1fb   :  { %v3138_v22 = vrot.slane %v2821_v61, 4  ;;  %v5377_v47 = vadd.f32 %v5376_v56, %v5375_v52  ;;  %v5257_v33 = vadd.f32 %v5256_v20, %v5255_v16  ;;  %v2820_v3 = vmul.f32 %v9874_v35, %v9685_v2  ;;  %v9944_v46 = vpop.f32.mrf.mxu0  ;;  %v9946_v16 = vpop.f32.mrf.mxu1 }
 0x1fc   :  { %v5234_v40 = vrot.slane %v5233_v39, 1  ;;  %v5401_v4 = vadd.f32 %v5400_v43, %v5399_v1  ;;  %v3162_v8 = vrot.slane %v2825_v6, 4  ;;  %v2824_v63 = vmul.f32 %v9874_v35, %v9687_v44  ;;  %12781 = vst [vmem:[#allocation70_spill] sm:$0xff] %v9944_v46  ;;  %12782 = vst [vmem:[#allocation71_spill] sm:$0xff] %v9946_v16 }
 0x1fd   :  { %v3139_v38 = vadd.f32 %v3138_v22, %v2821_v61  ;;  %v5378_v9 = vrot.slane %v5377_v47, 1  ;;  %v5258_v53 = vrot.slane %v5257_v33, 1  ;;  %v3132_v60 = vrot.slane %v2820_v3, 4  ;;  %v9948_v43 = vpop.f32.mrf.mxu0  ;;  %v9950_v22 = vpop.f32.mrf.mxu1 }
 0x1fe   :  { %v5235_v37 = vadd.f32 %v5234_v40, %v5233_v39  ;;  %v5402_v52 = vrot.slane %v5401_v4, 1  ;;  %v3163_v56 = vadd.f32 %v3162_v8, %v2825_v6  ;;  %v3156_v20 = vrot.slane %v2824_v63, 4  ;;  %12783 = vst [vmem:[#allocation72_spill] sm:$0xff] %v9948_v43  ;;  %12784 = vst [vmem:[#allocation73_spill] sm:$0xff] %v9950_v22 }
 0x1ff   :  { %v3140_v2 = vrot.slane %v3139_v38, 2  ;;  %v5379_v23 = vadd.f32 %v5378_v9, %v5377_v47  ;;  %v5259_v1 = vadd.f32 %v5258_v53, %v5257_v33  ;;  %v3133_v61 = vadd.f32 %v3132_v60, %v2820_v3  ;;  %v9954_v6 = vpop.f32.mrf.mxu0  ;;  %v8209_v47 = vpop.f32.mrf.mxu1 }
 0x200   :  { %v5652_v31 = vmul.f32 0.35355338, %v5235_v37  ;;  %v5681_v44 = vmul.f32 0.35355338, %v5409_v50  ;;  %v5403_v39 = vadd.f32 %v5402_v52, %v5401_v4  ;;  %v3164_v19 = vrot.slane %v3163_v56, 2  ;;  %12785 = vst [vmem:[#allocation74_spill] sm:$0xff] %v9954_v6 }
 0x201   :  { %v3141_v40 = vadd.f32 %v3140_v2, %v3139_v38  ;;  %v5676_v57 = vmul.f32 0.35355338, %v5379_v23  ;;  %v5656_v46 = vmul.f32 0.35355338, %v5259_v1  ;;  %v3134_v14 = vrot.slane %v3133_v61, 2  ;;  %v2198_v38 = vpop.f32.mrf.mxu1 }
 0x202   :  { %v5795_v16 = vsel %vm12663_vm6, %v5652_v31, %v9897_v30  ;;  %v5680_v3 = vmul.f32 0.35355338, %v5403_v39  ;;  %v3157_v37 = vadd.f32 %v3156_v20, %v2824_v63  ;;  %v9965_v31 = vpop.f32.mrf.mxu0  ;;  %v2827_v39 = vmul.f32 %v9882_v36, %v9711_v32 }
 0x203   :  { %v5796_v33 = vsel %vm12658_vm7, %v5653_v54, %v5795_v16  ;;  %v3142_v8 = vrot.slane %v3141_v40, 1  ;;  %v5813_v50 = vsel %vm12663_vm6, %v5676_v57, %v9904_v7  ;;  %v5798_v30 = vsel %vm12663_vm6, %v5656_v46, %v9909_v24  ;;  %12787 = vst [vmem:[#allocation76_spill] sm:$0xff] %v9965_v31  ;;  %v8212_v60 = vpop.f32.mrf.mxu1 }
 0x204   :  { %v9961_v4 = vsel %vm9784_vm8, -1e+30, %v5796_v33  ;;  %v3135_v23 = vadd.f32 %v3134_v14, %v3133_v61  ;;  %v9969_v54 = vsel %vm12655_vm11, %v9850_v10, -inf  ;;  %v5814_v63 = vsel %vm12658_vm7, %v5677_v21, %v5813_v50  ;;  %v9984_v53 = vpop.f32.mrf.mxu0 }
 0x205   :  { %12786 = vst [vmem:[#allocation75_spill] sm:$0xff] %v9961_v4  ;;  %12788 = vst [vmem:[#allocation77_spill] sm:$0xff] %v9969_v54  ;;  %v5799_v9 = vsel %vm12658_vm7, %v5657_v42, %v5798_v30  ;;  %v5816_v7 = vsel %vm12663_vm6, %v5680_v3, %v9922_v41  ;;  %v9977_v57 = vsel %vm12655_vm11, %v9854_v17, -inf  ;;  %v9981_v46 = vsel %vm9791_vm9, -1e+30, %v5814_v63  ;;  %v2206_v1 = vpop.f32.mrf.mxu1 }
 0x206   :  { %12789 = vst [vmem:[#allocation78_spill] sm:$0xff] %v9977_v57  ;;  %12790 = vst [vmem:[#allocation79_spill] sm:$0xff] %v9981_v46  ;;  %v5817_v14 = vsel %vm12658_vm7, %v5681_v44, %v5816_v7  ;;  %v3165_v24 = vadd.f32 %v3164_v19, %v3163_v56  ;;  %v9988_v21 = vsel %vm12655_vm11, %v9860_v45, -inf  ;;  %v9992_v41 = vsel %vm12655_vm11, %v9878_v58, -inf  ;;  %v10006_v20 = vpop.f32.mrf.mxu0 }
 0x207   :  { %12791 = vst [vmem:[#allocation80_spill] sm:$0xff] %v9984_v53  ;;  %12792 = vst [vmem:[#allocation81_spill] sm:$0xff] %v9988_v21  ;;  %v9996_v42 = vsel %vm12655_vm11, %v9961_v4, -inf  ;;  %v10000_v16 = vsel %vm9791_vm9, -1e+30, %v5799_v9  ;;  %v10004_v19 = vsel %vm12655_vm11, %v9981_v46, -inf  ;;  %v3143_v52 = vadd.f32 %v3142_v8, %v3141_v40  ;;  %v10024_v30 = vpop.f32.mrf.mxu1 }
 0x208   :  { %12793 = vst [vmem:[#allocation82_spill] sm:$0xff] %v9992_v41  ;;  %12794 = vst [vmem:[#allocation83_spill] sm:$0xff] %v9996_v42  ;;  %v3136_v2 = vrot.slane %v3135_v23, 1  ;;  %v3158_v56 = vrot.slane %v3157_v37, 2  ;;  %v10010_v61 = vsel %vm9839_vm10, -1e+30, %v5817_v14  ;;  %v2823_v44 = vmul.f32 %v9882_v36, %v9709_v25  ;;  %v10022_v50 = vpop.f32.mrf.mxu0 }
 0x209   :  { %12795 = vst [vmem:[#allocation84_spill] sm:$0xff] %v10000_v16  ;;  %12796 = vst [vmem:[#allocation85_spill] sm:$0xff] %v10004_v19  ;;  %v2822_v47 = vmul.f32 %v9888_v55, %v9713_v34  ;;  %v3166_v33 = vrot.slane %v3165_v24, 1  ;;  %v2826_v3 = vmul.f32 %v9888_v55, %v9715_v49  ;;  %v2781_v8 = vmul.f32 %v9892_v5, %v9636_v29  ;;  %v10038_v14 = vpop.f32.mrf.mxu1 }
 0x20a   :  { %12797 = vst [vmem:[#allocation86_spill] sm:$0xff] %v10006_v20  ;;  %12798 = vst [vmem:[#allocation87_spill] sm:$0xff] %v10010_v61  ;;  %v3159_v40 = vadd.f32 %v3158_v56, %v3157_v37  ;;  %v10028_v25 = vsel %vm12655_vm11, %v10000_v16, -inf  ;;  %v3150_v32 = vrot.slane %v2823_v44, 4  ;;  %v3174_v38 = vrot.slane %v2827_v39, 4  ;;  %v10036_v7 = vpop.f32.mrf.mxu0 }
 0x20b   :  { %12799 = vst [vmem:[#allocation88_spill] sm:$0xff] %v10028_v25  ;;  %v3144_v63 = vrot.slane %v2822_v47, 4  ;;  %v10032_v34 = vsel %vm12655_vm11, %v10010_v61, -inf  ;;  %v3137_v37 = vadd.f32 %v3136_v2, %v3135_v23  ;;  %v3168_v49 = vrot.slane %v2826_v3, 4  ;;  %v10044_v23 = vpop.f32.mrf.mxu1 }
 0x20c   :  { %12800 = vst [vmem:[#allocation89_spill] sm:$0xff] %v10032_v34  ;;  %v2805_v9 = vmul.f32 %v9892_v5, %v9638_v15  ;;  %v3151_v60 = vadd.f32 %v3150_v32, %v2823_v44  ;;  %v3175_v56 = vadd.f32 %v3174_v38, %v2827_v39  ;;  %v2829_v46 = vmul.f32 %v9892_v5, %v9872_v51  ;;  %v10042_v43 = vpop.f32.mrf.mxu0 }
 0x20d   :  { %v3145_v1 = vadd.f32 %v3144_v63, %v2822_v47  ;;  %v3167_v16 = vadd.f32 %v3166_v33, %v3165_v24  ;;  %v3160_v4 = vrot.slane %v3159_v40, 1  ;;  %v3169_v22 = vadd.f32 %v3168_v49, %v2826_v3  ;;  %12801 = vst [vmem:[#allocation90_spill] sm:$0xff] %v10044_v23  ;;  %v10048_v32 = vpop.f32.mrf.mxu1 }
 0x20e   :  { %v2898_v61 = vrot.slane %v2781_v8, 4  ;;  %v3152_v2 = vrot.slane %v3151_v60, 2  ;;  %v3176_v27 = vrot.slane %v3175_v56, 2  ;;  %v3042_v0 = vrot.slane %v2805_v9, 4  ;;  %v10046_v47 = vpop.f32.mrf.mxu0  ;;  %12803 = vst [vmem:[#allocation92_spill] sm:$0xff] %v10048_v32 }
 0x20f   :  { %v3146_v18 = vrot.slane %v3145_v1, 2  ;;  %v3324_v58 = vmul.f32 0.35355338, %v3137_v37  ;;  %v3170_v17 = vrot.slane %v3169_v22, 2  ;;  %v3186_v39 = vrot.slane %v2829_v46, 4  ;;  %12802 = vst [vmem:[#allocation91_spill] sm:$0xff] %v10046_v47  ;;  %v10052_v47 = vpop.f32.mrf.mxu1 }
 0x210   :  { %v2899_v44 = vadd.f32 %v2898_v61, %v2781_v8  ;;  %v3153_v5 = vadd.f32 %v3152_v2, %v3151_v60  ;;  %v3177_v24 = vadd.f32 %v3176_v27, %v3175_v56  ;;  %v3043_v3 = vadd.f32 %v3042_v0, %v2805_v9  ;;  %v10050_v23 = vpop.f32.mrf.mxu0  ;;  %12805 = vst [vmem:[#allocation94_spill] sm:$0xff] %v10052_v47 }
 0x211   :  { %v3147_v33 = vadd.f32 %v3146_v18, %v3145_v1  ;;  %v3161_v38 = vadd.f32 %v3160_v4, %v3159_v40  ;;  %v3171_v63 = vadd.f32 %v3170_v17, %v3169_v22  ;;  %v3187_v45 = vadd.f32 %v3186_v39, %v2829_v46  ;;  %12804 = vst [vmem:[#allocation93_spill] sm:$0xff] %v10050_v23  ;;  %v10060_v40 = vpop.f32.mrf.mxu1 }
 0x212   :  { %v2900_v49 = vrot.slane %v2899_v44, 2  ;;  %v3154_v10 = vrot.slane %v3153_v5, 1  ;;  %v3178_v34 = vrot.slane %v3177_v24, 1  ;;  %v3044_v19 = vrot.slane %v3043_v3, 2  ;;  %12807 = vst [vmem:[#allocation96_spill] sm:$0xff] %v10060_v40 }
 0x213   :  { %v3148_v25 = vrot.slane %v3147_v33, 1  ;;  %v3325_v37 = vmul.f32 0.35355338, %v3143_v52  ;;  %v3172_v42 = vrot.slane %v3171_v63, 1  ;;  %v3188_v8 = vrot.slane %v3187_v45, 2  ;;  %v10058_v52 = vpop.f32.mrf.mxu0 }
 0x214   :  { %v2901_v61 = vadd.f32 %v2900_v49, %v2899_v44  ;;  %v3155_v60 = vadd.f32 %v3154_v10, %v3153_v5  ;;  %v3179_v27 = vadd.f32 %v3178_v34, %v3177_v24  ;;  %v3045_v18 = vadd.f32 %v3044_v19, %v3043_v3  ;;  %12806 = vst [vmem:[#allocation95_spill] sm:$0xff] %v10058_v52  ;;  %v10075_v44 = vpop.f32.mrf.mxu1 }
 0x215   :  { %v2785_v0 = vmul.f32 %v9894_v12, %v9636_v29  ;;  %v3149_v17 = vadd.f32 %v3148_v25, %v3147_v33  ;;  %v3189_v4 = vadd.f32 %v3188_v8, %v3187_v45  ;;  %v2809_v46 = vmul.f32 %v9894_v12, %v9638_v15  ;;  %v10073_v2 = vpop.f32.mrf.mxu0  ;;  %12809 = vst [vmem:[#allocation98_spill] sm:$0xff] %v10075_v44 }
 0x216   :  { %v2902_v22 = vrot.slane %v2901_v61, 1  ;;  %v10062_v9 = vmul.f32 0.35355338, %v3167_v16  ;;  %v10064_v56 = vmul.f32 0.35355338, %v3161_v38  ;;  %v10067_v10 = vsel %vm12654_vm5, %v3325_v37, %v3324_v58  ;;  %12808 = vst [vmem:[#allocation97_spill] sm:$0xff] %v10073_v2  ;;  %v10085_v38 = vpop.f32.mrf.mxu1 }
 0x217   :  { %v2833_v19 = vmul.f32 %v9894_v12, %v9872_v51  ;;  %v10071_v25 = vadd.f32 %v3172_v42, %v3171_v63  ;;  %v3046_v34 = vrot.slane %v3045_v18, 1  ;;  %v3190_v1 = vrot.slane %v3189_v4, 1  ;;  %v10083_v42 = vpop.f32.mrf.mxu0  ;;  %12811 = vst [vmem:[#allocation100_spill] sm:$0xff] %v10085_v38 }
 0x218   :  { %v2903_v45 = vadd.f32 %v2902_v22, %v2901_v61  ;;  %v10077_v39 = vmul.f32 0.35355338, %v3155_v60  ;;  %v2922_v16 = vrot.slane %v2785_v0, 4  ;;  %v3066_v5 = vrot.slane %v2809_v46, 4  ;;  %12810 = vst [vmem:[#allocation99_spill] sm:$0xff] %v10083_v42  ;;  %v8295_v22 = vpop.f32.mrf.mxu1 }
 0x219   :  { %v3210_v24 = vrot.slane %v2833_v19, 4  ;;  %v10079_v33 = vmul.f32 0.35355338, %v3179_v27  ;;  %v10081_v58 = vmul.f32 0.35355338, %v3149_v17  ;;  %v3047_v3 = vadd.f32 %v3046_v34, %v3045_v18  ;;  %v8243_v17 = vpop.f32.mrf.mxu0 }
 0x21a   :  { %v3191_v12 = vadd.f32 %v3190_v1, %v3189_v4  ;;  %v2923_v63 = vadd.f32 %v2922_v16, %v2785_v0  ;;  %v3067_v49 = vadd.f32 %v3066_v5, %v2809_v46  ;;  %v2780_v61 = vmul.f32 %v9899_v28, %v9644_v26 }
 0x21b   :  { %v3211_v37 = vadd.f32 %v3210_v24, %v2833_v19  ;;  %v10089_v8 = vmul.f32 0.35355338, %v2903_v45  ;;  %v10091_v60 = vmul.f32 0.35355338, %v3047_v3  ;;  %v2804_v27 = vmul.f32 %v9899_v28, %v9646_v59  ;;  %v2391_v5 = vpop.f32.mrf.mxu0  ;;  %v2640_v24 = vpop.f32.mrf.mxu1 }
 0x21c   :  { %v2828_v18 = vmul.f32 %v9899_v28, %v9874_v35  ;;  %v2924_v4 = vrot.slane %v2923_v63, 2  ;;  %v3068_v34 = vrot.slane %v3067_v49, 2  ;;  %v2892_v46 = vrot.slane %v2780_v61, 4 }
 0x21d   :  { %v3212_v0 = vrot.slane %v3211_v37, 2  ;;  %v3036_v19 = vrot.slane %v2804_v27, 4  ;;  %v2784_v45 = vmul.f32 %v9901_v11, %v9644_v26  ;;  %v2808_v16 = vmul.f32 %v9901_v11, %v9646_v59  ;;  %v8246_v40 = vpop.f32.mrf.mxu0  ;;  %v8298_v52 = vpop.f32.mrf.mxu1 }
 0x21e   :  { %v3180_v1 = vrot.slane %v2828_v18, 4  ;;  %v2925_v3 = vadd.f32 %v2924_v4, %v2923_v63  ;;  %v3069_v38 = vadd.f32 %v3068_v34, %v3067_v49  ;;  %v2893_v28 = vadd.f32 %v2892_v46, %v2780_v61 }
 0x21f   :  { %v3213_v42 = vadd.f32 %v3212_v0, %v3211_v37  ;;  %v3333_v17 = vmul.f32 0.35355338, %v3191_v12  ;;  %v3037_v22 = vadd.f32 %v3036_v19, %v2804_v27  ;;  %v2916_v2 = vrot.slane %v2784_v45, 4  ;;  %v2399_v5 = vpop.f32.mrf.mxu0  ;;  %v2648_v24 = vpop.f32.mrf.mxu1  ;;  %v12812_v0 = vld [vmem:[#allocation15_spill] sm:$0xff] }
 0x220   :  { %v3181_v44 = vadd.f32 %v3180_v1, %v2828_v18  ;;  %v2926_v47 = vrot.slane %v2925_v3, 1  ;;  %v3070_v23 = vrot.slane %v3069_v38, 1  ;;  %v2894_v15 = vrot.slane %v2893_v28, 2 }
 0x221   :  { %v3214_v51 = vrot.slane %v3213_v42, 1  ;;  %v3038_v26 = vrot.slane %v3037_v22, 2  ;;  %v2917_v32 = vadd.f32 %v2916_v2, %v2784_v45  ;;  %v3060_v59 = vrot.slane %v2808_v16, 4 }
 0x222   :  { %v3182_v29 = vrot.slane %v3181_v44, 2  ;;  %v2927_v63 = vadd.f32 %v2926_v47, %v2925_v3  ;;  %v3071_v49 = vadd.f32 %v3070_v23, %v3069_v38  ;;  %v2895_v37 = vadd.f32 %v2894_v15, %v2893_v28  ;;  %v12813_v15 = vld [vmem:[#allocation16_spill] sm:$0xff] }
 0x223   :  { %v2832_v12 = vmul.f32 %v9901_v11, %v9874_v35  ;;  %v3039_v61 = vadd.f32 %v3038_v26, %v3037_v22  ;;  %v2918_v40 = vrot.slane %v2917_v32, 2  ;;  %v3061_v52 = vadd.f32 %v3060_v59, %v2808_v16 }
 0x224   :  { %v3183_v27 = vadd.f32 %v3182_v29, %v3181_v44  ;;  %v3215_v18 = vadd.f32 %v3214_v51, %v3213_v42  ;;  %v3289_v4 = vmul.f32 0.35355338, %v2927_v63  ;;  %v3313_v34 = vmul.f32 0.35355338, %v3071_v49 }
 0x225   :  { %v2783_v46 = vmul.f32 %v9917_v48, %v12812_v0  ;;  %v2896_v2 = vrot.slane %v2895_v37, 1  ;;  %v3040_v19 = vrot.slane %v3039_v61, 1  ;;  %v2919_v45 = vadd.f32 %v2918_v40, %v2917_v32 }
 0x226   :  { %v3184_v1 = vrot.slane %v3183_v27, 1  ;;  %v3062_v47 = vrot.slane %v3061_v52, 2  ;;  %v3204_v23 = vrot.slane %v2832_v12, 4  ;;  %v2807_v38 = vmul.f32 %v9917_v48, %v12813_v15 }
 0x227   :  { %v2831_v29 = vmul.f32 %v9917_v48, %v9882_v36  ;;  %v2897_v26 = vadd.f32 %v2896_v2, %v2895_v37  ;;  %v3041_v59 = vadd.f32 %v3040_v19, %v3039_v61  ;;  %v2920_v11 = vrot.slane %v2919_v45, 1 }
 0x228   :  { %v3185_v51 = vadd.f32 %v3184_v1, %v3183_v27  ;;  %v3063_v44 = vadd.f32 %v3062_v47, %v3061_v52  ;;  %v3205_v42 = vadd.f32 %v3204_v23, %v2832_v12  ;;  %v2910_v16 = vrot.slane %v2783_v46, 4 }
 0x229   :  { %v3054_v3 = vrot.slane %v2807_v38, 4  ;;  %v3284_v28 = vmul.f32 0.35355338, %v2897_v26  ;;  %v3308_v22 = vmul.f32 0.35355338, %v3041_v59  ;;  %v2921_v32 = vadd.f32 %v2920_v11, %v2919_v45 }
 0x22a   :  { %v3332_v5 = vmul.f32 0.35355338, %v3185_v51  ;;  %v3064_v24 = vrot.slane %v3063_v44, 1  ;;  %v3206_v63 = vrot.slane %v3205_v42, 2  ;;  %v2911_v49 = vadd.f32 %v2910_v16, %v2783_v46 }
 0x22b   :  { %v3055_v40 = vadd.f32 %v3054_v3, %v2807_v38  ;;  %v10111_v35 = vsel %vm12654_vm5, %v10089_v8, %v3284_v28  ;;  %v10115_v48 = vsel %vm12654_vm5, %v10091_v60, %v3308_v22  ;;  %v3288_v12 = vmul.f32 0.35355338, %v2921_v32  ;;  %v12817_v3 = vld [vmem:[#allocation21_spill] sm:$0xff] }
 0x22c   :  { %v10118_v37 = vsel %vm12654_vm5, %v3333_v17, %v3332_v5  ;;  %v3065_v61 = vadd.f32 %v3064_v24, %v3063_v44  ;;  %v3207_v27 = vadd.f32 %v3206_v63, %v3205_v42  ;;  %v2912_v52 = vrot.slane %v2911_v49, 2 }
 0x22d   :  { %v3056_v2 = vrot.slane %v3055_v40, 2  ;;  %v10121_v19 = vsel %vm12654_vm5, %v3289_v4, %v3288_v12  ;;  %v3198_v46 = vrot.slane %v2831_v29, 4  ;;  %v2787_v8 = vmul.f32 %v9919_v62, %v12812_v0 }
 0x22e   :  { %v2811_v1 = vmul.f32 %v9919_v62, %v12813_v15  ;;  %v3208_v60 = vrot.slane %v3207_v27, 1  ;;  %v3312_v45 = vmul.f32 0.35355338, %v3065_v61  ;;  %v2913_v47 = vadd.f32 %v2912_v52, %v2911_v49 }
 0x22f   :  { %v3057_v17 = vadd.f32 %v3056_v2, %v3055_v40  ;;  %v12814_v23 = vsub.f32 1.0, %v9695_v13  ;;  %v3199_v26 = vadd.f32 %v3198_v46, %v2831_v29  ;;  %v2835_v4 = vmul.f32 %v9919_v62, %v9882_v36 }
 0x230   :  { %v2934_v59 = vrot.slane %v2787_v8, 4  ;;  %v3078_v51 = vrot.slane %v2811_v1, 4  ;;  %v10136_v11 = vmul.f32 0.35355338, %v10071_v25  ;;  %v3209_v44 = vadd.f32 %v3208_v60, %v3207_v27  ;;  %v12821_v25 = vld [vmem:[#allocation20_spill] sm:$0xff] }
 0x231   :  { %vm10129_vm12 = vcmp.gt.f32.partialorder %v12814_v23, 0.5  ;;  %v10139_v42 = vsel %vm12654_vm5, %v3313_v34, %v3312_v45  ;;  %v2914_v16 = vrot.slane %v2913_v47, 1  ;;  %v12818_v13 = vsub.f32 1.0, %v12817_v3  ;;  %v12822_v23 = vld [vmem:[#allocation17_spill] sm:$0xff] }
 0x232   :  { %v3200_v29 = vrot.slane %v3199_v26, 2  ;;  %v2935_v22 = vadd.f32 %v2934_v59, %v2787_v8  ;;  %v3079_v5 = vadd.f32 %v3078_v51, %v2811_v1  ;;  %v3222_v62 = vrot.slane %v2835_v4, 4  ;;  %v12823_v59 = vld [vmem:[#allocation64_spill] sm:$0xff]  ;;  %v12824_v51 = vld [vmem:[#allocation18_spill] sm:$0xff] }
 0x233   :  { %vm10143_vm13 = vcmp.gt.f32.partialorder %v12818_v13, 0.5  ;;  %v3337_v32 = vmul.f32 0.35355338, %v3215_v18  ;;  %v3336_v24 = vmul.f32 0.35355338, %v3209_v44  ;;  %v3058_v63 = vrot.slane %v3057_v17, 1 }
 0x234   :  { %v128_v49 = vmul.f32 %v12821_v25, %v12821_v25  ;;  %v3201_v40 = vadd.f32 %v3200_v29, %v3199_v26  ;;  %v2936_v34 = vrot.slane %v2935_v22, 2  ;;  %v3080_v12 = vrot.slane %v3079_v5, 2 }
 0x235   :  { %v3223_v61 = vadd.f32 %v3222_v62, %v2835_v4  ;;  %v3568_v27 = vsel %vm12663_vm6, %v10081_v58, %v10067_v10  ;;  %v10153_v52 = vsel %vm12654_vm5, %v3337_v32, %v3336_v24  ;;  %v2915_v2 = vadd.f32 %v2914_v16, %v2913_v47 }
 0x236   :  { %v146_v46 = vsub.f32 1.0, %v128_v49  ;;  %v3202_v8 = vrot.slane %v3201_v40, 1  ;;  %v2937_v18 = vadd.f32 %v2936_v34, %v2935_v22  ;;  %v3081_v1 = vadd.f32 %v3080_v12, %v3079_v5 }
 0x237   :  { %v3224_v60 = vrot.slane %v3223_v61, 2  ;;  %v3059_v45 = vadd.f32 %v3058_v63, %v3057_v17  ;;  %v2782_v26 = vmul.f32 %v12823_v59, %v12822_v23  ;;  %v2806_v4 = vmul.f32 %v12823_v59, %v12824_v51 }
 0x238   :  { %v2830_v44 = vmul.f32 %v12823_v59, %v9888_v55  ;;  %v2938_v10 = vrot.slane %v2937_v18, 1  ;;  %v3082_v58 = vrot.slane %v3081_v1, 1  ;;  %vm10161_vm14 = vcmp.gt.f32.partialorder %v146_v46, 0.5  ;;  %v12828_v59 = vld [vmem:[#allocation19_spill] sm:$0xff] }
 0x239   :  { %v3225_v3 = vadd.f32 %v3224_v60, %v3223_v61  ;;  %v3203_v16 = vadd.f32 %v3202_v8, %v3201_v40  ;;  %v2904_v13 = vrot.slane %v2782_v26, 4  ;;  %v3048_v29 = vrot.slane %v2806_v4, 4 }
 0x23a   :  { %v3192_v17 = vrot.slane %v2830_v44, 4  ;;  %v2939_v22 = vadd.f32 %v2938_v10, %v2937_v18  ;;  %v3083_v5 = vadd.f32 %v3082_v58, %v3081_v1  ;;  %v12827_v32 = vmov 0  }
 0x23b   :  { %v3226_v62 = vrot.slane %v3225_v3, 1  ;;  %v3350_v24 = vsel %vm10129_vm12, 1, %v12827_v32  ;;  %v3287_v63 = vmul.f32 0.35355338, %v2915_v2  ;;  %v2905_v49 = vadd.f32 %v2904_v13, %v2782_v26 }
 0x23c   :  { %v3049_v34 = vadd.f32 %v3048_v29, %v2806_v4  ;;  %v3193_v12 = vadd.f32 %v3192_v17, %v2830_v44  ;;  %v3311_v61 = vmul.f32 0.35355338, %v3059_v45  ;;  %v3356_v40 = vsel %vm10143_vm13, 1, %v12827_v32  ;;  %v12829_v29 = vld [vmem:[#allocation10_spill] sm:$0xff] }
 0x23d   :  { %v3227_v46 = vadd.f32 %v3226_v62, %v3225_v3  ;;  %v3362_v8 = vsel %vm10161_vm14, 1, %v12827_v32  ;;  %v2906_v18 = vrot.slane %v2905_v49, 2  ;;  %v3377_v38 = vrot.slane %v3350_v24, %v12828_v59 }
 0x23e   :  { %v3050_v1 = vrot.slane %v3049_v34, 2  ;;  %v3194_v60 = vrot.slane %v3193_v12, 2  ;;  %v3570_v2 = vsel %vm12654_vm5, %v10062_v9, %v10064_v56  ;;  %v3335_v26 = vmul.f32 0.35355338, %v3203_v16 }
 0x23f   :  { %v10178_v45 = vmul.f32 0.35355338, %v2939_v22  ;;  %v10180_v4 = vmul.f32 0.35355338, %v3083_v5  ;;  %v10182_v28 = vmul.f32 0.35355338, %v3227_v46  ;;  %v2907_v44 = vadd.f32 %v2906_v18, %v2905_v49 }
 0x240   :  { %v3051_v10 = vadd.f32 %v3050_v1, %v3049_v34  ;;  %v3195_v58 = vadd.f32 %v3194_v60, %v3193_v12  ;;  %v3401_v3 = vrot.slane %v3356_v40, %v12828_v59  ;;  %v3425_v47 = vrot.slane %v3362_v8, %v12828_v59  ;;  %v12833_v5 = vld [vmem:[#allocation9_spill] sm:$0xff] }
 0x241   :  { %v3569_v13 = vsel %vm12658_vm7, %v10077_v39, %v3568_v27  ;;  %v110_v9 = vcombine.high %v12829_v29, %v12829_v29  ;;  %v2908_v56 = vrot.slane %v2907_v44, 1  ;;  %vm10190_vm15 = vcmp.eq.s32.totalorder %v3377_v38, 1  ;;  %v12834_v34 = vld [vmem:[#allocation65_spill] sm:$0xff] }
 0x242   :  { %v3052_v16 = vrot.slane %v3051_v10, 1  ;;  %v3196_v17 = vrot.slane %v3195_v58, 1  ;;  %v12830_v22 = vmov 0  ;;  %v2786_v12 = vmul.f32 %v12834_v34, %v12822_v23 }
 0x243   :  { %v12831_v22 = vsel %vm10190_vm15, 4294967295, %v12830_v22  ;;  %v117_v62 = vmul.f32 %v110_v9, %v12833_v5  ;;  %v123_v24 = vmul.f32 %v110_v9, %v12829_v29  ;;  %v129_v49 = vmul.f32 %v110_v9, %v12821_v25 }
 0x244   :  { %12832 = vst [vmem:[#allocation15_spill] sm:$0xff] %v12831_v22  ;;  %v2909_v39 = vadd.f32 %v2908_v56, %v2907_v44  ;;  %v3053_v27 = vadd.f32 %v3052_v16, %v3051_v10  ;;  %v3197_v46 = vadd.f32 %v3196_v17, %v3195_v58  ;;  %v2810_v40 = vmul.f32 %v12834_v34, %v12824_v51 }
 0x245   :  { %vm10201_vm0 = vcmp.eq.s32.totalorder %v3401_v3, 1  ;;  %v12835_v8 = vmov 0  ;;  %vm10205_vm1 = vcmp.eq.s32.totalorder %v3425_v47, 1  ;;  %v12838_v18 = vmov 0 }
 0x246   :  { %v12836_v8 = vsel %vm10201_vm0, 4294967295, %v12835_v8  ;;  %v12839_v18 = vsel %vm10205_vm1, 4294967295, %v12838_v18  ;;  %v135_v1 = vsub.f32 1.0, %v117_v62  ;;  %v141_v60 = vsub.f32 1.0, %v123_v24 }
 0x247   :  { %12837 = vst [vmem:[#allocation16_spill] sm:$0xff] %v12836_v8  ;;  %12840 = vst [vmem:[#allocation21_spill] sm:$0xff] %v12839_v18  ;;  %v3571_v38 = vsel %vm12663_vm6, %v10136_v11, %v3570_v2  ;;  %v3286_v9 = vmul.f32 0.35355338, %v2909_v39  ;;  %v3310_v44 = vmul.f32 0.35355338, %v3053_v27  ;;  %v2834_v56 = vmul.f32 %v12834_v34, %v9888_v55 }
 0x248   :  { %v3334_v10 = vmul.f32 0.35355338, %v3197_v46  ;;  %v10213_v58 = vsel %vm10190_vm15, -1e+30, %v3569_v13  ;;  %v147_v3 = vsub.f32 1.0, %v129_v49  ;;  %v2928_v47 = vrot.slane %v2786_v12, 4 }
 0x249   :  { %12841 = vst [vmem:[#allocation20_spill] sm:$0xff] %v10213_v58  ;;  %v3538_v16 = vsel %vm12663_vm6, %v3286_v9, %v10111_v35  ;;  %v3556_v17 = vsel %vm12663_vm6, %v3310_v44, %v10115_v48  ;;  %v3072_v2 = vrot.slane %v2810_v40, 4  ;;  %vm153_vm2 = vcmp.gt.f32.partialorder %v135_v1, 0.5 }
 0x24a   :  { %v3574_v11 = vsel %vm12663_vm6, %v3334_v10, %v10118_v37  ;;  %v3539_v62 = vsel %vm12658_vm7, %v3287_v63, %v3538_v16  ;;  %v3557_v13 = vsel %vm12658_vm7, %v3311_v61, %v3556_v17  ;;  %v2929_v49 = vadd.f32 %v2928_v47, %v2786_v12 }
 0x24b   :  { %v3575_v24 = vsel %vm12658_vm7, %v3335_v26, %v3574_v11  ;;  %v10228_v34 = vsel %vm10190_vm15, -1e+30, %v3539_v62  ;;  %vm159_vm3 = vcmp.gt.f32.partialorder %v141_v60, 0.5  ;;  %v3073_v35 = vadd.f32 %v3072_v2, %v2810_v40 }
 0x24c   :  { %12842 = vst [vmem:[#allocation17_spill] sm:$0xff] %v10228_v34  ;;  %v10232_v48 = vsel %vm12655_vm11, %v10213_v58, -inf  ;;  %vm165_vm4 = vcmp.gt.f32.partialorder %v147_v3, 0.5  ;;  %v2930_v37 = vrot.slane %v2929_v49, 2  ;;  %v3572_v63 = vsel %vm12658_vm7, %v10079_v33, %v3571_v38 }
 0x24d   :  { %12843 = vst [vmem:[#allocation64_spill] sm:$0xff] %v10232_v48  ;;  %v10238_v61 = vsel %vm10201_vm0, -1e+30, %v3557_v13  ;;  %v10242_v26 = vsel %vm10205_vm1, -1e+30, %v3575_v24  ;;  %v10246_v12 = vsel %vm12655_vm11, %v10228_v34, -inf }
 0x24e   :  { %12844 = vst [vmem:[#allocation18_spill] sm:$0xff] %v10238_v61  ;;  %12845 = vst [vmem:[#allocation10_spill] sm:$0xff] %v10242_v26  ;;  %v3074_v39 = vrot.slane %v3073_v35, 2  ;;  %v2931_v27 = vadd.f32 %v2930_v37, %v2929_v49  ;;  %v3216_v46 = vrot.slane %v2834_v56, 4  ;;  %v3351_v40 = vsel %vm153_vm2, 1, %v12827_v32  ;;  %v12855_v49 = vld [vmem:[#allocation38_spill] sm:$0xff] }
 0x24f   :  { %12846 = vst [vmem:[#allocation9_spill] sm:$0xff] %v10246_v12  ;;  %v3357_v1 = vsel %vm159_vm3, 1, %v12827_v32  ;;  %v3363_v60 = vsel %vm165_vm4, 1, %v12827_v32  ;;  %v3381_v38 = vrot.slane %v3351_v40, %v12828_v59  ;;  %v10255_v44 = vsel %vm12655_vm11, %v10238_v61, -inf  ;;  %v12856_v37 = vld [vmem:[#allocation39_spill] sm:$0xff]  ;;  %v12860_v34 = vld [vmem:[#allocation45_spill] sm:$0xff] }
 0x250   :  { %v3075_v33 = vadd.f32 %v3074_v39, %v3073_v35  ;;  %v3405_v9 = vrot.slane %v3357_v1, %v12828_v59  ;;  %12847 = vst [vmem:[#allocation65_spill] sm:$0xff] %v10255_v44  ;;  %v10259_v10 = vsel %vm12655_vm11, %v10242_v26, -inf  ;;  %v2932_v3 = vrot.slane %v2931_v27, 1  ;;  %v12858_v1 = vld [vmem:[#allocation43_spill] sm:$0xff] }
 0x251   :  { %12848 = vst [vmem:[#allocation101_spill] sm:$0xff] %v10259_v10  ;;  %v3217_v47 = vadd.f32 %v3216_v46, %v2834_v56  ;;  %v3429_v11 = vrot.slane %v3363_v60, %v12828_v59  ;;  %vm10264_vm12 = vcmp.eq.s32.totalorder %v3381_v38, 1  ;;  %v12849_v2 = vmov 0  ;;  %v12857_v46 = vld [vmem:[#allocation42_spill] sm:$0xff] }
 0x252   :  { %v3076_v17 = vrot.slane %v3075_v33, 1  ;;  %v12850_v2 = vsel %vm10264_vm12, 4294967295, %v12849_v2  ;;  %v2933_v62 = vadd.f32 %v2932_v3, %v2931_v27  ;;  %vm10268_vm13 = vcmp.eq.s32.totalorder %v3405_v9, 1  ;;  %v12859_v9 = vld [vmem:[#allocation44_spill] sm:$0xff] }
 0x253   :  { %12851 = vst [vmem:[#allocation102_spill] sm:$0xff] %v12850_v2  ;;  %v3218_v13 = vrot.slane %v3217_v47, 2  ;;  %v12852_v24 = vmov 0  ;;  %v5195_v35 = vmul.f32 %v9954_v6, %v12855_v49  ;;  %v5199_v39 = vmul.f32 %v9954_v6, %v12856_v37 }
 0x254   :  { %v12853_v24 = vsel %vm10268_vm13, 4294967295, %v12852_v24  ;;  %v3077_v56 = vadd.f32 %v3076_v17, %v3075_v33  ;;  %v5194_v40 = vmul.f32 %v9965_v31, %v12857_v46  ;;  %v5198_v60 = vmul.f32 %v9965_v31, %v12858_v1 }
 0x255   :  { %12854 = vst [vmem:[#allocation103_spill] sm:$0xff] %v12853_v24  ;;  %v3219_v38 = vadd.f32 %v3218_v13, %v3217_v47  ;;  %v3290_v27 = vmul.f32 0.35355338, %v2933_v62  ;;  %v5512_v3 = vrot.slane %v5195_v35, 4  ;;  %v5197_v16 = vmul.f32 %v9984_v53, %v12859_v9 }
 0x256   :  { %v3314_v58 = vmul.f32 0.35355338, %v3077_v56  ;;  %v5536_v26 = vrot.slane %v5199_v39, 4  ;;  %v5506_v61 = vrot.slane %v5194_v40, 4  ;;  %v5530_v49 = vrot.slane %v5198_v60, 4 }
 0x257   :  { %v3220_v33 = vrot.slane %v3219_v38, 1  ;;  %v3541_v17 = vsel %vm12663_vm6, %v3290_v27, %v10121_v19  ;;  %v5513_v37 = vadd.f32 %v5512_v3, %v5195_v35  ;;  %v5201_v46 = vmul.f32 %v9984_v53, %v12860_v34 }
 0x258   :  { %v3542_v47 = vsel %vm12658_vm7, %v10178_v45, %v3541_v17  ;;  %v3559_v62 = vsel %vm12663_vm6, %v3314_v58, %v10139_v42  ;;  %v5537_v13 = vadd.f32 %v5536_v26, %v5199_v39  ;;  %v5507_v1 = vadd.f32 %v5506_v61, %v5194_v40 }
 0x259   :  { %v3221_v56 = vadd.f32 %v3220_v33, %v3219_v38  ;;  %v3560_v9 = vsel %vm12658_vm7, %v10180_v4, %v3559_v62  ;;  %v10294_v12 = vsel %vm10264_vm12, -1e+30, %v3542_v47  ;;  %v5514_v19 = vrot.slane %v5513_v37, 2 }
 0x25a   :  { %12861 = vst [vmem:[#allocation38_spill] sm:$0xff] %v10294_v12  ;;  %v10298_v34 = vsel %vm10268_vm13, -1e+30, %v3560_v9  ;;  %v10302_v45 = vsel %vm10201_vm0, -1e+30, %v3572_v63  ;;  %v5538_v42 = vrot.slane %v5537_v13, 2  ;;  %v5531_v63 = vadd.f32 %v5530_v49, %v5198_v60 }
 0x25b   :  { %12862 = vst [vmem:[#allocation39_spill] sm:$0xff] %v10298_v34  ;;  %12863 = vst [vmem:[#allocation42_spill] sm:$0xff] %v10302_v45  ;;  %v5508_v58 = vrot.slane %v5507_v1, 2  ;;  %v3338_v61 = vmul.f32 0.35355338, %v3221_v56  ;;  %vm10304_vm14 = vcmp.eq.s32.totalorder %v3429_v11, 1  ;;  %v5515_v35 = vadd.f32 %v5514_v19, %v5513_v37 }
 0x25c   :  { %v12864_v26 = vmov 0  ;;  %v10310_v4 = vsel %vm12655_vm11, %v10294_v12, -inf  ;;  %v10314_v39 = vsel %vm12655_vm11, %v10298_v34, -inf  ;;  %v5539_v40 = vadd.f32 %v5538_v42, %v5537_v13 }
 0x25d   :  { %v12865_v26 = vsel %vm10304_vm14, 4294967295, %v12864_v26  ;;  %12867 = vst [vmem:[#allocation44_spill] sm:$0xff] %v10310_v4  ;;  %12868 = vst [vmem:[#allocation45_spill] sm:$0xff] %v10314_v39  ;;  %v5509_v38 = vadd.f32 %v5508_v58, %v5507_v1  ;;  %v3577_v27 = vsel %vm12663_vm6, %v3338_v61, %v10153_v52  ;;  %v5516_v3 = vrot.slane %v5515_v35, 1  ;;  %v12872_v52 = vld [vmem:[#allocation47_spill] sm:$0xff] }
 0x25e   :  { %12866 = vst [vmem:[#allocation43_spill] sm:$0xff] %v12865_v26  ;;  %v5524_v11 = vrot.slane %v5197_v16, 4  ;;  %v5548_v33 = vrot.slane %v5201_v46, 4  ;;  %v3578_v17 = vsel %vm12658_vm7, %v10182_v28, %v3577_v27  ;;  %v5540_v47 = vrot.slane %v5539_v40, 1 }
 0x25f   :  { %v5510_v62 = vrot.slane %v5509_v38, 1  ;;  %v5532_v56 = vrot.slane %v5531_v63, 2  ;;  %v10330_v28 = vsel %vm12655_vm11, %v10302_v45, -inf  ;;  %v10334_v19 = vsel %vm10304_vm14, -1e+30, %v3578_v17  ;;  %v12873_v45 = vld [vmem:[#allocation30_spill] sm:$0xff] }
 0x260   :  { %v5525_v1 = vadd.f32 %v5524_v11, %v5197_v16  ;;  %v5549_v60 = vadd.f32 %v5548_v33, %v5201_v46  ;;  %12869 = vst [vmem:[#allocation104_spill] sm:$0xff] %v10330_v28  ;;  %12870 = vst [vmem:[#allocation105_spill] sm:$0xff] %v10334_v19  ;;  %v5517_v42 = vadd.f32 %v5516_v3, %v5515_v35  ;;  %v12871_v11 = vld [vmem:[#allocation46_spill] sm:$0xff]  ;;  %v10344_v17 = vsel %vm12655_vm11, %v10334_v19, -inf }
 0x261   :  { %v5533_v9 = vadd.f32 %v5532_v56, %v5531_v63  ;;  %v5541_v16 = vadd.f32 %v5540_v47, %v5539_v40  ;;  %v5511_v46 = vadd.f32 %v5510_v62, %v5509_v38  ;;  %v5196_v33 = vmul.f32 %v10006_v20, %v12871_v11  ;;  %12874 = vst [vmem:[#allocation46_spill] sm:$0xff] %v10344_v17  ;;  %v12875_v40 = vld [vmem:[#allocation31_spill] sm:$0xff]  ;;  %v12878_v28 = vld [vmem:[#allocation34_spill] sm:$0xff] }
 0x262   :  { %v5526_v58 = vrot.slane %v5525_v1, 2  ;;  %v5550_v61 = vrot.slane %v5549_v60, 2  ;;  %v5200_v37 = vmul.f32 %v10006_v20, %v12872_v52  ;;  %v5155_v63 = vmul.f32 %v10022_v50, %v12873_v45 }
 0x263   :  { %v5534_v27 = vrot.slane %v5533_v9, 1  ;;  %v5518_v3 = vrot.slane %v5196_v33, 4  ;;  %v5179_v38 = vmul.f32 %v10022_v50, %v12875_v40  ;;  %v5703_v11 = vmul.f32 0.35355338, %v5541_v16 }
 0x264   :  { %v5527_v13 = vadd.f32 %v5526_v58, %v5525_v1  ;;  %v5551_v49 = vadd.f32 %v5550_v61, %v5549_v60  ;;  %v5542_v56 = vrot.slane %v5200_v37, 4  ;;  %v5203_v1 = vmul.f32 %v10022_v50, %v9954_v6 }
 0x265   :  { %v5535_v35 = vadd.f32 %v5534_v27, %v5533_v9  ;;  %v5699_v60 = vmul.f32 0.35355338, %v5517_v42  ;;  %v5519_v52 = vadd.f32 %v5518_v3, %v5196_v33  ;;  %v5272_v58 = vrot.slane %v5155_v63, 4 }
 0x266   :  { %v5528_v47 = vrot.slane %v5527_v13, 1  ;;  %v5552_v62 = vrot.slane %v5551_v49, 1  ;;  %v5416_v61 = vrot.slane %v5179_v38, 4  ;;  %v5698_v34 = vmul.f32 0.35355338, %v5511_v46 }
 0x267   :  { %v5543_v12 = vadd.f32 %v5542_v56, %v5200_v37  ;;  %v5560_v19 = vrot.slane %v5203_v1, 4  ;;  %v5702_v39 = vmul.f32 0.35355338, %v5535_v35  ;;  %v5520_v9 = vrot.slane %v5519_v52, 2 }
 0x268   :  { %v5273_v27 = vadd.f32 %v5272_v58, %v5155_v63  ;;  %v5417_v41 = vadd.f32 %v5416_v61, %v5179_v38  ;;  %v5529_v10 = vadd.f32 %v5528_v47, %v5527_v13  ;;  %v5553_v48 = vadd.f32 %v5552_v62, %v5551_v49 }
 0x269   :  { %v5544_v4 = vrot.slane %v5543_v12, 2  ;;  %v5561_v21 = vadd.f32 %v5560_v19, %v5203_v1  ;;  %v5521_v44 = vadd.f32 %v5520_v9, %v5519_v52  ;;  %v5159_v50 = vmul.f32 %v10024_v30, %v12873_v45 }
 0x26a   :  { %v5274_v57 = vrot.slane %v5273_v27, 2  ;;  %v5418_v54 = vrot.slane %v5417_v41, 2  ;;  %v5183_v37 = vmul.f32 %v10024_v30, %v12875_v40  ;;  %v5207_v16 = vmul.f32 %v10024_v30, %v9954_v6 }
 0x26b   :  { %v5545_v42 = vadd.f32 %v5544_v4, %v5543_v12  ;;  %v5562_v33 = vrot.slane %v5561_v21, 2  ;;  %v5522_v46 = vrot.slane %v5521_v44, 1  ;;  %v5296_v49 = vrot.slane %v5159_v50, 4 }
 0x26c   :  { %v5275_v63 = vadd.f32 %v5274_v57, %v5273_v27  ;;  %v5419_v13 = vadd.f32 %v5418_v54, %v5417_v41  ;;  %v5440_v3 = vrot.slane %v5183_v37, 4  ;;  %v5584_v38 = vrot.slane %v5207_v16, 4 }
 0x26d   :  { %v5546_v35 = vrot.slane %v5545_v42, 1  ;;  %v5563_v19 = vadd.f32 %v5562_v33, %v5561_v21  ;;  %v5523_v47 = vadd.f32 %v5522_v46, %v5521_v44  ;;  %v5297_v1 = vadd.f32 %v5296_v49, %v5159_v50  ;;  %v12876_v49 = vld [vmem:[#allocation32_spill] sm:$0xff] }
 0x26e   :  { %v5276_v62 = vrot.slane %v5275_v63, 1  ;;  %v5420_v56 = vrot.slane %v5419_v13, 1  ;;  %v5441_v52 = vadd.f32 %v5440_v3, %v5183_v37  ;;  %v5585_v58 = vadd.f32 %v5584_v38, %v5207_v16 }
 0x26f   :  { %v5547_v12 = vadd.f32 %v5546_v35, %v5545_v42  ;;  %v5564_v4 = vrot.slane %v5563_v19, 1  ;;  %v5830_v30 = vsel %vm12654_vm5, %v5699_v60, %v5698_v34  ;;  %v5700_v57 = vmul.f32 0.35355338, %v5523_v47 }
 0x270   :  { %v5298_v54 = vrot.slane %v5297_v1, 2  ;;  %v10360_v41 = vsel %vm12654_vm5, %v5703_v11, %v5702_v39  ;;  %v10362_v21 = vmul.f32 0.35355338, %v5529_v10  ;;  %v5442_v44 = vrot.slane %v5441_v52, 2  ;;  %v12877_v10 = vld [vmem:[#allocation33_spill] sm:$0xff] }
 0x271   :  { %v5586_v9 = vrot.slane %v5585_v58, 2  ;;  %v10364_v27 = vmul.f32 0.35355338, %v5553_v48  ;;  %v5277_v50 = vadd.f32 %v5276_v62, %v5275_v63  ;;  %v5421_v42 = vadd.f32 %v5420_v56, %v5419_v13 }
 0x272   :  { %v5299_v33 = vadd.f32 %v5298_v54, %v5297_v1  ;;  %v10366_v37 = vmul.f32 0.35355338, %v5547_v12  ;;  %v10369_v16 = vsel %vm12663_vm6, %v5700_v57, %v5830_v30  ;;  %v5565_v34 = vadd.f32 %v5564_v4, %v5563_v19  ;;  %v10389_v57 = vpop.f32.mrf.mxu0 }
 0x273   :  { %v5443_v60 = vadd.f32 %v5442_v44, %v5441_v52  ;;  %v5587_v46 = vadd.f32 %v5586_v9, %v5585_v58  ;;  %v5154_v39 = vmul.f32 %v10036_v7, %v12876_v49  ;;  %v5178_v11 = vmul.f32 %v10036_v7, %v12877_v10 }
 0x274   :  { %v5202_v48 = vmul.f32 %v10036_v7, %v9965_v31  ;;  %v5300_v63 = vrot.slane %v5299_v33, 1  ;;  %v5158_v35 = vmul.f32 %v10038_v14, %v12876_v49  ;;  %v5182_v3 = vmul.f32 %v10038_v14, %v12877_v10 }
 0x275   :  { %v5444_v13 = vrot.slane %v5443_v60, 1  ;;  %v10381_v19 = vmul.f32 0.35355338, %v5277_v50  ;;  %v5266_v38 = vrot.slane %v5154_v39, 4  ;;  %v5410_v47 = vrot.slane %v5178_v11, 4 }
 0x276   :  { %v5554_v62 = vrot.slane %v5202_v48, 4  ;;  %v10383_v56 = vmul.f32 0.35355338, %v5421_v42  ;;  %v10385_v1 = vmul.f32 0.35355338, %v5565_v34  ;;  %v5206_v7 = vmul.f32 %v10038_v14, %v9965_v31  ;;  %v12879_v31 = vld [vmem:[#allocation35_spill] sm:$0xff] }
 0x277   :  { %v5290_v12 = vrot.slane %v5158_v35, 4  ;;  %v5588_v4 = vrot.slane %v5587_v46, 1  ;;  %v5267_v52 = vadd.f32 %v5266_v38, %v5154_v39  ;;  %v5411_v58 = vadd.f32 %v5410_v47, %v5178_v11 }
 0x278   :  { %v5555_v30 = vadd.f32 %v5554_v62, %v5202_v48  ;;  %v5301_v54 = vadd.f32 %v5300_v63, %v5299_v33  ;;  %v5445_v44 = vadd.f32 %v5444_v13, %v5443_v60  ;;  %v5434_v50 = vrot.slane %v5182_v3, 4  ;;  %v10395_v33 = vpop.f32.mrf.mxu0 }
 0x279   :  { %v5291_v9 = vadd.f32 %v5290_v12, %v5158_v35  ;;  %v5268_v61 = vrot.slane %v5267_v52, 2  ;;  %v5412_v10 = vrot.slane %v5411_v58, 2  ;;  %v5578_v49 = vrot.slane %v5206_v7, 4 }
 0x27a   :  { %v5556_v42 = vrot.slane %v5555_v30, 2  ;;  %v5435_v17 = vadd.f32 %v5434_v50, %v5182_v3  ;;  %v5157_v14 = vmul.f32 %v10042_v43, %v12878_v28  ;;  %v5181_v39 = vmul.f32 %v10042_v43, %v12879_v31 }
 0x27b   :  { %v5292_v34 = vrot.slane %v5291_v9, 2  ;;  %v5269_v11 = vadd.f32 %v5268_v61, %v5267_v52  ;;  %v5413_v48 = vadd.f32 %v5412_v10, %v5411_v58  ;;  %v5579_v47 = vadd.f32 %v5578_v49, %v5206_v7  ;;  %v10397_v52 = vpop.f32.mrf.mxu0 }
 0x27c   :  { %v5557_v38 = vadd.f32 %v5556_v42, %v5555_v30  ;;  %v5589_v60 = vadd.f32 %v5588_v4, %v5587_v46  ;;  %v5436_v13 = vrot.slane %v5435_v17, 2  ;;  %v5284_v35 = vrot.slane %v5157_v14, 4 }
 0x27d   :  { %v5293_v63 = vadd.f32 %v5292_v34, %v5291_v9  ;;  %v5270_v62 = vrot.slane %v5269_v11, 1  ;;  %v5414_v12 = vrot.slane %v5413_v48, 1  ;;  %v5580_v3 = vrot.slane %v5579_v47, 2 }
 0x27e   :  { %v5558_v6 = vrot.slane %v5557_v38, 1  ;;  %v5437_v40 = vadd.f32 %v5436_v13, %v5435_v17  ;;  %v5285_v45 = vadd.f32 %v5284_v35, %v5157_v14  ;;  %v5428_v59 = vrot.slane %v5181_v39, 4 }
 0x27f   :  { %v5294_v50 = vrot.slane %v5293_v63, 1  ;;  %v5271_v32 = vadd.f32 %v5270_v62, %v5269_v11  ;;  %v5415_v55 = vadd.f32 %v5414_v12, %v5413_v48  ;;  %v5581_v10 = vadd.f32 %v5580_v3, %v5579_v47  ;;  %v12880_v11 = vld [vmem:[#allocation90_spill] sm:$0xff] }
 0x280   :  { %v5559_v61 = vadd.f32 %v5558_v6, %v5557_v38  ;;  %v5438_v7 = vrot.slane %v5437_v40, 1  ;;  %v5286_v46 = vrot.slane %v5285_v45, 2  ;;  %v5429_v4 = vadd.f32 %v5428_v59, %v5181_v39 }
 0x281   :  { %v5295_v49 = vadd.f32 %v5294_v50, %v5293_v63  ;;  %v10399_v58 = vmul.f32 0.35355338, %v5301_v54  ;;  %v5658_v30 = vmul.f32 0.35355338, %v5271_v32  ;;  %v5682_v9 = vmul.f32 0.35355338, %v5415_v55  ;;  %v10412_v32 = vpop.f32.mrf.mxu0  ;;  %v10414_v63 = vpop.f32.mrf.mxu1 }
 0x282   :  { %v5205_v42 = vmul.f32 %v10042_v43, %v9984_v53  ;;  %v5706_v17 = vmul.f32 0.35355338, %v5559_v61  ;;  %v5582_v34 = vrot.slane %v5581_v10, 1  ;;  %v5287_v14 = vadd.f32 %v5286_v46, %v5285_v45  ;;  %v12883_v46 = vld [vmem:[#allocation91_spill] sm:$0xff] }
 0x283   :  { %v5161_v6 = vmul.f32 %v12880_v11, %v12878_v28  ;;  %v10408_v48 = vsel %vm12663_vm6, %v10366_v37, %v10360_v41  ;;  %v5687_v38 = vmul.f32 0.35355338, %v5445_v44  ;;  %v10410_v59 = vmul.f32 0.35355338, %v5589_v60  ;;  %v10432_v61 = vpop.f32.mrf.mxu0 }
 0x284   :  { %v5430_v54 = vrot.slane %v5429_v4, 2  ;;  %v5439_v55 = vadd.f32 %v5438_v7, %v5437_v40  ;;  %v5583_v39 = vadd.f32 %v5582_v34, %v5581_v10  ;;  %v5662_v43 = vmul.f32 0.35355338, %v5295_v49  ;;  %12881 = vst [vmem:[#allocation47_spill] sm:$0xff] %v10432_v61 }
 0x285   :  { %v5288_v47 = vrot.slane %v5287_v14, 1  ;;  %v5572_v13 = vrot.slane %v5205_v42, 4  ;;  %v5185_v35 = vmul.f32 %v12880_v11, %v12879_v31  ;;  %v5209_v41 = vmul.f32 %v12880_v11, %v9984_v53  ;;  %v12884_v11 = vld [vmem:[#allocation37_spill] sm:$0xff]  ;;  %v10442_v61 = vpop.f32.mrf.mxu0 }
 0x286   :  { %v5431_v45 = vadd.f32 %v5430_v54, %v5429_v4  ;;  %v10422_v37 = vsel %vm12654_vm5, %v10381_v19, %v5658_v30  ;;  %v10426_v40 = vsel %vm12654_vm5, %v10383_v56, %v5682_v9  ;;  %v10430_v44 = vsel %vm12654_vm5, %v10385_v1, %v5706_v17  ;;  %v12882_v19 = vld [vmem:[#allocation36_spill] sm:$0xff]  ;;  %v10436_v30 = vpop.f32.mrf.mxu1  ;;  %12885 = vst [vmem:[#allocation90_spill] sm:$0xff] %v10442_v61 }
 0x287   :  { %v5308_v60 = vrot.slane %v5161_v6, 4  ;;  %v5573_v12 = vadd.f32 %v5572_v13, %v5205_v42  ;;  %v5452_v3 = vrot.slane %v5185_v35, 4  ;;  %v5596_v50 = vrot.slane %v5209_v41, 4 }
 0x288   :  { %v5432_v62 = vrot.slane %v5431_v45, 1  ;;  %v5686_v10 = vmul.f32 0.35355338, %v5439_v55  ;;  %v5710_v49 = vmul.f32 0.35355338, %v5583_v39  ;;  %v5156_v4 = vmul.f32 %v12883_v46, %v12882_v19 }
 0x289   :  { %v5309_v7 = vadd.f32 %v5308_v60, %v5161_v6  ;;  %v5289_v56 = vadd.f32 %v5288_v47, %v5287_v14  ;;  %v5574_v9 = vrot.slane %v5573_v12, 2  ;;  %v5453_v34 = vadd.f32 %v5452_v3, %v5185_v35  ;;  %v10444_v35 = vpop.f32.mrf.mxu1 }
 0x28a   :  { %v5597_v1 = vadd.f32 %v5596_v50, %v5209_v41  ;;  %v5180_v42 = vmul.f32 %v12883_v46, %v12884_v11  ;;  %v5204_v54 = vmul.f32 %v12883_v46, %v10006_v20  ;;  %v5278_v13 = vrot.slane %v5156_v4, 4 }
 0x28b   :  { %v5310_v17 = vrot.slane %v5309_v7, 2  ;;  %v5433_v55 = vadd.f32 %v5432_v62, %v5431_v45  ;;  %v5575_v39 = vadd.f32 %v5574_v9, %v5573_v12  ;;  %v5454_v6 = vrot.slane %v5453_v34, 2 }
 0x28c   :  { %v5598_v60 = vrot.slane %v5597_v1, 2  ;;  %v5279_v31 = vadd.f32 %v5278_v13, %v5156_v4  ;;  %v5422_v14 = vrot.slane %v5180_v42, 4  ;;  %v5566_v47 = vrot.slane %v5204_v54, 4  ;;  %v10456_v13 = vpop.f32.mrf.mxu0 }
 0x28d   :  { %v5311_v53 = vadd.f32 %v5310_v17, %v5309_v7  ;;  %v5576_v41 = vrot.slane %v5575_v39, 1  ;;  %v5455_v3 = vadd.f32 %v5454_v6, %v5453_v34  ;;  %v5832_v46 = vsel %vm12658_vm7, %v10362_v21, %v10369_v16  ;;  %12886 = vst [vmem:[#allocation91_spill] sm:$0xff] %v10456_v13  ;;  %v10458_v21 = vpop.f32.mrf.mxu1 }
 0x28e   :  { %v5599_v50 = vadd.f32 %v5598_v60, %v5597_v1  ;;  %v5280_v45 = vrot.slane %v5279_v31, 2  ;;  %v5423_v62 = vadd.f32 %v5422_v14, %v5180_v42  ;;  %v5567_v12 = vadd.f32 %v5566_v47, %v5204_v54  ;;  %v12888_v14 = vld [vmem:[#allocation92_spill] sm:$0xff] }
 0x28f   :  { %v5312_v28 = vrot.slane %v5311_v53, 1  ;;  %v10451_v9 = vsel %vm12654_vm5, %v10399_v58, %v5662_v43  ;;  %v10454_v7 = vsel %vm12654_vm5, %v5687_v38, %v5686_v10  ;;  %v5577_v4 = vadd.f32 %v5576_v41, %v5575_v39 }
 0x290   :  { %v5456_v17 = vrot.slane %v5455_v3, 1  ;;  %v5661_v34 = vmul.f32 0.35355338, %v5289_v56  ;;  %v5281_v1 = vadd.f32 %v5280_v45, %v5279_v31  ;;  %v5424_v6 = vrot.slane %v5423_v62, 2 }
 0x291   :  { %v5568_v60 = vrot.slane %v5567_v12, 2  ;;  %v10462_v16 = vsel %vm12654_vm5, %v10410_v59, %v5710_v49  ;;  %v5685_v42 = vmul.f32 0.35355338, %v5433_v55  ;;  %v5600_v58 = vrot.slane %v5599_v50, 1  ;;  %v10472_v59 = vpop.f32.mrf.mxu0 }
 0x292   :  { %v10466_v38 = vsel %vm10190_vm15, -1e+30, %v5832_v46  ;;  %v5313_v43 = vadd.f32 %v5312_v28, %v5311_v53  ;;  %v5282_v10 = vrot.slane %v5281_v1, 1  ;;  %v5425_v54 = vadd.f32 %v5424_v6, %v5423_v62  ;;  %12889 = vst [vmem:[#allocation92_spill] sm:$0xff] %v10472_v59  ;;  %v10476_v53 = vpop.f32.mrf.mxu1 }
 0x293   :  { %12887 = vst [vmem:[#allocation106_spill] sm:$0xff] %v10466_v38  ;;  %v5569_v39 = vadd.f32 %v5568_v60, %v5567_v12  ;;  %v5709_v56 = vmul.f32 0.35355338, %v5577_v4  ;;  %v5457_v31 = vadd.f32 %v5456_v17, %v5455_v3  ;;  %v5160_v47 = vmul.f32 %v12888_v14, %v12882_v19  ;;  %v8261_v4 = vpop.f32.mrf.mxu0 }
 0x294   :  { %v5184_v41 = vmul.f32 %v12888_v14, %v12884_v11  ;;  %v5283_v49 = vadd.f32 %v5282_v10, %v5281_v1  ;;  %v5426_v55 = vrot.slane %v5425_v54, 1  ;;  %v5208_v46 = vmul.f32 %v12888_v14, %v10006_v20  ;;  %v10487_v13 = vpop.f32.mrf.mxu1 }
 0x295   :  { %v5570_v45 = vrot.slane %v5569_v39, 1  ;;  %v5601_v28 = vadd.f32 %v5600_v58, %v5599_v50  ;;  %v10480_v3 = vsel %vm12655_vm11, %v10466_v38, -inf  ;;  %v5302_v62 = vrot.slane %v5160_v47, 4  ;;  %v2447_v20 = vpop.f32.mrf.mxu0  ;;  %12891 = vst [vmem:[#allocation108_spill] sm:$0xff] %v10487_v13 }
 0x296   :  { %12890 = vst [vmem:[#allocation107_spill] sm:$0xff] %v10480_v3  ;;  %v5446_v12 = vrot.slane %v5184_v41, 4  ;;  %v5427_v17 = vadd.f32 %v5426_v55, %v5425_v54  ;;  %v5660_v60 = vmul.f32 0.35355338, %v5283_v49  ;;  %v5590_v11 = vrot.slane %v5208_v46, 4  ;;  %v12893_v55 = vld [vmem:[#allocation12_spill] sm:$0xff]  ;;  %v10508_v4 = vpop.f32.mrf.mxu1 }
 0x297   :  { %v5571_v6 = vadd.f32 %v5570_v45, %v5569_v39  ;;  %v5665_v1 = vmul.f32 0.35355338, %v5313_v43  ;;  %v5303_v10 = vadd.f32 %v5302_v62, %v5160_v47  ;;  %v5835_v14 = vsel %vm12658_vm7, %v10364_v27, %v10408_v48  ;;  %v12892_v43 = vld [vmem:[#allocation11_spill] sm:$0xff]  ;;  %12896 = vst [vmem:[#allocation109_spill] sm:$0xff] %v10508_v4 }
 0x298   :  { %v5447_v19 = vadd.f32 %v5446_v12, %v5184_v41  ;;  %v5684_v50 = vmul.f32 0.35355338, %v5427_v17  ;;  %v5801_v38 = vsel %vm12663_vm6, %v5660_v60, %v10422_v37  ;;  %v5591_v59 = vadd.f32 %v5590_v11, %v5208_v46  ;;  %v8264_v41 = vpop.f32.mrf.mxu0  ;;  %v12901_v60 = vld [vmem:[#allocation60_spill] sm:$0xff] }
 0x299   :  { %v5708_v58 = vmul.f32 0.35355338, %v5571_v6  ;;  %v5802_v54 = vsel %vm12658_vm7, %v5661_v34, %v5801_v38  ;;  %v5304_v39 = vrot.slane %v5303_v10, 2  ;;  %v2789_v47 = vmul.f32 %v10389_v57, %v12892_v43 }
 0x29a   :  { %v5448_v49 = vrot.slane %v5447_v19, 2  ;;  %v5819_v27 = vsel %vm12663_vm6, %v5684_v50, %v10426_v40  ;;  %v5592_v48 = vrot.slane %v5591_v59, 2  ;;  %v2813_v37 = vmul.f32 %v10389_v57, %v12893_v55  ;;  %v2455_v46 = vpop.f32.mrf.mxu0 }
 0x29b   :  { %v5837_v20 = vsel %vm12663_vm6, %v5708_v58, %v10430_v44  ;;  %v5820_v11 = vsel %vm12658_vm7, %v5685_v42, %v5819_v27  ;;  %v10502_v38 = vsel %vm10190_vm15, -1e+30, %v5802_v54  ;;  %v5305_v45 = vadd.f32 %v5304_v39, %v5303_v10  ;;  %v10534_v27 = vpop.f32.mrf.mxu1 }
 0x29c   :  { %v5838_v34 = vsel %vm12658_vm7, %v5709_v56, %v5837_v20  ;;  %12894 = vst [vmem:[#allocation11_spill] sm:$0xff] %v10502_v38  ;;  %v5689_v62 = vmul.f32 0.35355338, %v5457_v31  ;;  %v5713_v12 = vmul.f32 0.35355338, %v5601_v28  ;;  %v5449_v44 = vadd.f32 %v5448_v49, %v5447_v19  ;;  %12903 = vst [vmem:[#allocation114_spill] sm:$0xff] %v10534_v27 }
 0x29d   :  { %v10506_v40 = vsel %vm10201_vm0, -1e+30, %v5820_v11  ;;  %v10512_v42 = vsel %vm10205_vm1, -1e+30, %v5838_v34  ;;  %v5306_v56 = vrot.slane %v5305_v45, 1  ;;  %v5593_v17 = vadd.f32 %v5592_v48, %v5591_v59 }
 0x29e   :  { %12895 = vst [vmem:[#allocation12_spill] sm:$0xff] %v10506_v40  ;;  %12897 = vst [vmem:[#allocation110_spill] sm:$0xff] %v10512_v42  ;;  %v10516_v6 = vsel %vm10201_vm0, -1e+30, %v5835_v14  ;;  %v10520_v31 = vsel %vm12655_vm11, %v10502_v38, -inf  ;;  %v10524_v28 = vsel %vm12655_vm11, %v10506_v40, -inf  ;;  %v2837_v10 = vmul.f32 %v10389_v57, %v12901_v60  ;;  %v8313_v40 = vpop.f32.mrf.mxu1 }
 0x29f   :  { %12898 = vst [vmem:[#allocation111_spill] sm:$0xff] %v10516_v6  ;;  %12899 = vst [vmem:[#allocation112_spill] sm:$0xff] %v10520_v31  ;;  %v5450_v19 = vrot.slane %v5449_v44, 1  ;;  %v5307_v50 = vadd.f32 %v5306_v56, %v5305_v45  ;;  %v5594_v58 = vrot.slane %v5593_v17, 1  ;;  %v2946_v54 = vrot.slane %v2789_v47, 4  ;;  %v13005_v31 = vld [vmem:[#allocation34_spill] sm:$0xff] }
 0x2a0   :  { %12900 = vst [vmem:[#allocation113_spill] sm:$0xff] %v10524_v28  ;;  %v3090_v59 = vrot.slane %v2813_v37, 4  ;;  %v10530_v14 = vsel %vm12655_vm11, %v10512_v42, -inf  ;;  %v3234_v49 = vrot.slane %v2837_v10, 4  ;;  %v2793_v41 = vmul.f32 %v10414_v63, %v12892_v43 }
 0x2a1   :  { %12902 = vst [vmem:[#allocation60_spill] sm:$0xff] %v10530_v14  ;;  %v5451_v39 = vadd.f32 %v5450_v19, %v5449_v44  ;;  %v5595_v20 = vadd.f32 %v5594_v58, %v5593_v17  ;;  %v5664_v48 = vmul.f32 0.35355338, %v5307_v50  ;;  %v2947_v11 = vadd.f32 %v2946_v54, %v2789_v47  ;;  %v2696_v50 = vpop.f32.mrf.mxu1 }
 0x2a2   :  { %v3091_v34 = vadd.f32 %v3090_v59, %v2813_v37  ;;  %v3235_v45 = vadd.f32 %v3234_v49, %v2837_v10  ;;  %v2817_v46 = vmul.f32 %v10414_v63, %v12893_v55  ;;  %v2970_v56 = vrot.slane %v2793_v41, 4 }
 0x2a3   :  { %v5688_v57 = vmul.f32 0.35355338, %v5451_v39  ;;  %v5712_v42 = vmul.f32 0.35355338, %v5595_v20  ;;  %v5804_v44 = vsel %vm12663_vm6, %v5664_v48, %v10451_v9  ;;  %v2948_v19 = vrot.slane %v2947_v11, 2  ;;  %v8316_v59 = vpop.f32.mrf.mxu1 }
 0x2a4   :  { %v3092_v38 = vrot.slane %v3091_v34, 2  ;;  %v5805_v43 = vsel %vm12658_vm7, %v5665_v1, %v5804_v44  ;;  %v3236_v47 = vrot.slane %v3235_v45, 2  ;;  %v2971_v37 = vadd.f32 %v2970_v56, %v2793_v41  ;;  %v12914_v59 = vld [vmem:[#allocation14_spill] sm:$0xff]  ;;  %v12916_v41 = vld [vmem:[#allocation61_spill] sm:$0xff] }
 0x2a5   :  { %v5822_v17 = vsel %vm12663_vm6, %v5688_v57, %v10454_v7  ;;  %v5840_v55 = vsel %vm12663_vm6, %v5712_v42, %v10462_v16  ;;  %v10548_v40 = vsel %vm10264_vm12, -1e+30, %v5805_v43  ;;  %v2949_v9 = vadd.f32 %v2948_v19, %v2947_v11  ;;  %v2704_v20 = vpop.f32.mrf.mxu1 }
 0x2a6   :  { %v5823_v10 = vsel %vm12658_vm7, %v5689_v62, %v5822_v17  ;;  %12904 = vst [vmem:[#allocation115_spill] sm:$0xff] %v10548_v40  ;;  %v5841_v58 = vsel %vm12658_vm7, %v5713_v12, %v5840_v55  ;;  %v3093_v7 = vadd.f32 %v3092_v38, %v3091_v34  ;;  %v2841_v54 = vmul.f32 %v10414_v63, %v12901_v60  ;;  %v12912_v17 = vld [vmem:[#allocation13_spill] sm:$0xff] }
 0x2a7   :  { %v10553_v1 = vsel %vm10268_vm13, -1e+30, %v5823_v10  ;;  %v10563_v49 = vsel %vm12655_vm11, %v10548_v40, -inf  ;;  %v2950_v12 = vrot.slane %v2949_v9, 1  ;;  %v3237_v60 = vadd.f32 %v3236_v47, %v3235_v45 }
 0x2a8   :  { %12905 = vst [vmem:[#allocation116_spill] sm:$0xff] %v10553_v1  ;;  %12908 = vst [vmem:[#allocation117_spill] sm:$0xff] %v10563_v49  ;;  %v10569_v38 = vsel %vm12655_vm11, %v10553_v1, -inf  ;;  %v3094_v63 = vrot.slane %v3093_v7, 1  ;;  %v10573_v48 = vsel %vm10304_vm14, -1e+30, %v5841_v58  ;;  %v2788_v50 = vmul.f32 %v10395_v33, %v12912_v17 }
 0x2a9   :  { %12909 = vst [vmem:[#allocation118_spill] sm:$0xff] %v10569_v38  ;;  %12910 = vst [vmem:[#allocation119_spill] sm:$0xff] %v10573_v48  ;;  %v2951_v11 = vadd.f32 %v2950_v12, %v2949_v9  ;;  %v2972_v34 = vrot.slane %v2971_v37, 2  ;;  %v3114_v57 = vrot.slane %v2817_v46, 4  ;;  %v3238_v19 = vrot.slane %v3237_v60, 1 }
 0x2aa   :  { %v3258_v43 = vrot.slane %v2841_v54, 4  ;;  %v2812_v58 = vmul.f32 %v10395_v33, %v12914_v59  ;;  %v10585_v9 = vsel %vm12655_vm11, %v10573_v48, -inf  ;;  %v3095_v12 = vadd.f32 %v3094_v63, %v3093_v7 }
 0x2ab   :  { %v2973_v45 = vadd.f32 %v2972_v34, %v2971_v37  ;;  %v3115_v47 = vadd.f32 %v3114_v57, %v2817_v46  ;;  %12915 = vst [vmem:[#allocation13_spill] sm:$0xff] %v10585_v9  ;;  %v2836_v44 = vmul.f32 %v10395_v33, %v12916_v41  ;;  %v10589_v42 = vmul.f32 0.35355338, %v2951_v11 }
 0x2ac   :  { %v3259_v20 = vadd.f32 %v3258_v43, %v2841_v54  ;;  %v2940_v1 = vrot.slane %v2788_v50, 4  ;;  %v3084_v40 = vrot.slane %v2812_v58, 4  ;;  %v3239_v55 = vadd.f32 %v3238_v19, %v3237_v60 }
 0x2ad   :  { %v3116_v39 = vrot.slane %v3115_v47, 2  ;;  %v3228_v46 = vrot.slane %v2836_v44, 4  ;;  %v2792_v34 = vmul.f32 %v10436_v30, %v12912_v17  ;;  %v2974_v57 = vrot.slane %v2973_v45, 1 }
 0x2ae   :  { %v3260_v37 = vrot.slane %v3259_v20, 2  ;;  %v2941_v48 = vadd.f32 %v2940_v1, %v2788_v50  ;;  %v3085_v3 = vadd.f32 %v3084_v40, %v2812_v58  ;;  %v2816_v33 = vmul.f32 %v10436_v30, %v12914_v59 }
 0x2af   :  { %v3117_v14 = vadd.f32 %v3116_v39, %v3115_v47  ;;  %v3229_v54 = vadd.f32 %v3228_v46, %v2836_v44  ;;  %v2840_v63 = vmul.f32 %v10436_v30, %v12916_v41  ;;  %v3317_v11 = vmul.f32 0.35355338, %v3095_v12 }
 0x2b0   :  { %v3261_v7 = vadd.f32 %v3260_v37, %v3259_v20  ;;  %v2942_v60 = vrot.slane %v2941_v48, 2  ;;  %v3086_v19 = vrot.slane %v3085_v3, 2  ;;  %v2964_v38 = vrot.slane %v2792_v34, 4 }
 0x2b1   :  { %v3118_v43 = vrot.slane %v3117_v14, 1  ;;  %v3230_v6 = vrot.slane %v3229_v54, 2  ;;  %v3108_v17 = vrot.slane %v2816_v33, 4  ;;  %v3341_v10 = vmul.f32 0.35355338, %v3239_v55 }
 0x2b2   :  { %v3262_v9 = vrot.slane %v3261_v7, 1  ;;  %v2943_v39 = vadd.f32 %v2942_v60, %v2941_v48  ;;  %v3087_v1 = vadd.f32 %v3086_v19, %v3085_v3  ;;  %v3252_v40 = vrot.slane %v2840_v63, 4 }
 0x2b3   :  { %v2975_v50 = vadd.f32 %v2974_v57, %v2973_v45  ;;  %v3231_v44 = vadd.f32 %v3230_v6, %v3229_v54  ;;  %v2965_v47 = vadd.f32 %v2964_v38, %v2792_v34  ;;  %v3109_v58 = vadd.f32 %v3108_v17, %v2816_v33 }
 0x2b4   :  { %v3119_v59 = vadd.f32 %v3118_v43, %v3117_v14  ;;  %v2944_v20 = vrot.slane %v2943_v39, 1  ;;  %v3088_v37 = vrot.slane %v3087_v1, 1  ;;  %v3253_v30 = vadd.f32 %v3252_v40, %v2840_v63 }
 0x2b5   :  { %v3263_v41 = vadd.f32 %v3262_v9, %v3261_v7  ;;  %v3232_v12 = vrot.slane %v3231_v44, 1  ;;  %v2966_v46 = vrot.slane %v2965_v47, 2  ;;  %v3110_v49 = vrot.slane %v3109_v58, 2 }
 0x2b6   :  { %v2945_v56 = vadd.f32 %v2944_v20, %v2943_v39  ;;  %v3089_v28 = vadd.f32 %v3088_v37, %v3087_v1  ;;  %v3254_v16 = vrot.slane %v3253_v30, 2  ;;  %v2791_v48 = vmul.f32 %v10397_v52, %v12812_v0 }
 0x2b7   :  { %v3233_v3 = vadd.f32 %v3232_v12, %v3231_v44  ;;  %v2967_v55 = vadd.f32 %v2966_v46, %v2965_v47  ;;  %v3111_v45 = vadd.f32 %v3110_v49, %v3109_v58  ;;  %v2815_v6 = vmul.f32 %v10397_v52, %v12813_v15 }
 0x2b8   :  { %v3297_v14 = vmul.f32 0.35355338, %v2975_v50  ;;  %v3292_v38 = vmul.f32 0.35355338, %v2945_v56  ;;  %v3255_v34 = vadd.f32 %v3254_v16, %v3253_v30  ;;  %v2839_v9 = vmul.f32 %v10397_v52, %v9882_v36 }
 0x2b9   :  { %v3316_v57 = vmul.f32 0.35355338, %v3089_v28  ;;  %v2968_v7 = vrot.slane %v2967_v55, 1  ;;  %v3112_v54 = vrot.slane %v3111_v45, 1  ;;  %v2958_v33 = vrot.slane %v2791_v48, 4 }
 0x2ba   :  { %v3321_v63 = vmul.f32 0.35355338, %v3119_v59  ;;  %v3345_v43 = vmul.f32 0.35355338, %v3263_v41  ;;  %v3256_v60 = vrot.slane %v3255_v34, 1  ;;  %v3102_v19 = vrot.slane %v2815_v6, 4 }
 0x2bb   :  { %v3340_v17 = vmul.f32 0.35355338, %v3233_v3  ;;  %v2969_v39 = vadd.f32 %v2968_v7, %v2967_v55  ;;  %v3113_v49 = vadd.f32 %v3112_v54, %v3111_v45  ;;  %v2959_v1 = vadd.f32 %v2958_v33, %v2791_v48  ;;  %v12918_v7 = vld [vmem:[#allocation8_spill] sm:$0xff] }
 0x2bc   :  { %v3257_v40 = vadd.f32 %v3256_v60, %v3255_v34  ;;  %v3103_v44 = vadd.f32 %v3102_v19, %v2815_v6  ;;  %v3246_v50 = vrot.slane %v2839_v9, 4  ;;  %v2795_v16 = vmul.f32 %v10444_v35, %v12812_v0 }
 0x2bd   :  { %v10607_v52 = vsel %vm12654_vm5, %v10589_v42, %v3292_v38  ;;  %v10610_v28 = vsel %vm12654_vm5, %v3317_v11, %v3316_v57  ;;  %v2960_v56 = vrot.slane %v2959_v1, 2  ;;  %v2819_v47 = vmul.f32 %v10444_v35, %v12813_v15  ;;  %v12917_v15 = vld [vmem:[#allocation7_spill] sm:$0xff] }
 0x2be   :  { %v3296_v58 = vmul.f32 0.35355338, %v2969_v39  ;;  %v3104_v59 = vrot.slane %v3103_v44, 2  ;;  %v3247_v20 = vadd.f32 %v3246_v50, %v2839_v9  ;;  %v2843_v37 = vmul.f32 %v10444_v35, %v9882_v36 }
 0x2bf   :  { %v10617_v30 = vsel %vm12654_vm5, %v3341_v10, %v3340_v17  ;;  %v3320_v0 = vmul.f32 0.35355338, %v3113_v49  ;;  %v2961_v41 = vadd.f32 %v2960_v56, %v2959_v1  ;;  %v2982_v42 = vrot.slane %v2795_v16, 4 }
 0x2c0   :  { %v3344_v12 = vmul.f32 0.35355338, %v3257_v40  ;;  %v3105_v46 = vadd.f32 %v3104_v59, %v3103_v44  ;;  %v3248_v11 = vrot.slane %v3247_v20, 2  ;;  %v3126_v48 = vrot.slane %v2819_v47, 4 }
 0x2c1   :  { %v2962_v3 = vrot.slane %v2961_v41, 1  ;;  %v2983_v55 = vadd.f32 %v2982_v42, %v2795_v16  ;;  %v3270_v45 = vrot.slane %v2843_v37, 4  ;;  %v87_v6 = vcombine.high %v12917_v15, %v12917_v15 }
 0x2c2   :  { %v10622_v38 = vsel %vm12654_vm5, %v3297_v14, %v3296_v58  ;;  %v3106_v36 = vrot.slane %v3105_v46, 1  ;;  %v3249_v35 = vadd.f32 %v3248_v11, %v3247_v20  ;;  %v3127_v10 = vadd.f32 %v3126_v48, %v2819_v47 }
 0x2c3   :  { %v2963_v34 = vadd.f32 %v2962_v3, %v2961_v41  ;;  %v2984_v9 = vrot.slane %v2983_v55, 2  ;;  %v3271_v57 = vadd.f32 %v3270_v45, %v2843_v37  ;;  %v94_v54 = vrot.slane %v87_v6, %v12918_v7 }
 0x2c4   :  { %v10626_v33 = vsel %vm12654_vm5, %v3321_v63, %v3320_v0  ;;  %v3250_v60 = vrot.slane %v3249_v35, 1  ;;  %v3128_v19 = vrot.slane %v3127_v10, 2  ;;  %v2790_v17 = vmul.f32 %v10412_v32, %v12822_v23 }
 0x2c5   :  { %v10631_v39 = vsel %vm12654_vm5, %v3345_v43, %v3344_v12  ;;  %v2985_v14 = vadd.f32 %v2984_v9, %v2983_v55  ;;  %v3272_v49 = vrot.slane %v3271_v57, 2  ;;  %v102_v1 = vrot.slane %v94_v54, %v12918_v7  ;;  %v12919_v12 = vld [vmem:[#allocation63_spill] sm:$0xff] }
 0x2c6   :  { %v3107_v40 = vadd.f32 %v3106_v36, %v3105_v46  ;;  %v10634_v44 = vmul.f32 0.35355338, %v2963_v34  ;;  %v3129_v50 = vadd.f32 %v3128_v19, %v3127_v10  ;;  %v2814_v63 = vmul.f32 %v10412_v32, %v12824_v51 }
 0x2c7   :  { %v2986_v16 = vrot.slane %v2985_v14, 1  ;;  %v3273_v56 = vadd.f32 %v3272_v49, %v3271_v57  ;;  %v118_v47 = vmul.f32 %v102_v1, %v12833_v5  ;;  %v124_v58 = vmul.f32 %v102_v1, %v12829_v29 }
 0x2c8   :  { %v3251_v59 = vadd.f32 %v3250_v60, %v3249_v35  ;;  %v3130_v43 = vrot.slane %v3129_v50, 1  ;;  %v130_v20 = vmul.f32 %v102_v1, %v12821_v25  ;;  %v2952_v37 = vrot.slane %v2790_v17, 4 }
 0x2c9   :  { %v3274_v0 = vrot.slane %v3273_v56, 1  ;;  %v136_v41 = vsub.f32 1.0, %v118_v47  ;;  %v142_v42 = vsub.f32 1.0, %v124_v58  ;;  %v2838_v46 = vmul.f32 %v10412_v32, %v12919_v12 }
 0x2ca   :  { %v3319_v11 = vmul.f32 0.35355338, %v3107_v40  ;;  %v148_v48 = vsub.f32 1.0, %v130_v20  ;;  %v2953_v3 = vadd.f32 %v2952_v37, %v2790_v17  ;;  %v3096_v55 = vrot.slane %v2814_v63, 4 }
 0x2cb   :  { %v2987_v45 = vadd.f32 %v2986_v16, %v2985_v14  ;;  %v3131_v15 = vadd.f32 %v3130_v43, %v3129_v50  ;;  %vm154_vm2 = vcmp.gt.f32.partialorder %v136_v41, 0.5  ;;  %vm160_vm3 = vcmp.gt.f32.partialorder %v142_v42, 0.5  ;;  %v12921_v14 = vld [vmem:[#allocation19_spill] sm:$0xff] }
 0x2cc   :  { %v10643_v6 = vmul.f32 0.35355338, %v3251_v59  ;;  %vm166_vm4 = vcmp.gt.f32.partialorder %v148_v48, 0.5  ;;  %v2954_v36 = vrot.slane %v2953_v3, 2  ;;  %v3097_v35 = vadd.f32 %v3096_v55, %v2814_v63 }
 0x2cd   :  { %v10645_v10 = vadd.f32 %v3274_v0, %v3273_v56  ;;  %v3240_v34 = vrot.slane %v2838_v46, 4  ;;  %v12920_v9 = vmov 0   ;;  %v10651_v1 = vmul.f32 0.35355338, %v2987_v45 }
 0x2ce   :  { %v3352_v57 = vsel %vm154_vm2, 1, %v12920_v9  ;;  %v3358_v32 = vsel %vm160_vm3, 1, %v12920_v9  ;;  %v2955_v60 = vadd.f32 %v2954_v36, %v2953_v3  ;;  %v3098_v19 = vrot.slane %v3097_v35, 2 }
 0x2cf   :  { %v3364_v17 = vsel %vm166_vm4, 1, %v12920_v9  ;;  %v3385_v49 = vrot.slane %v3352_v57, %v12921_v14  ;;  %v10653_v40 = vmul.f32 0.35355338, %v3131_v15  ;;  %v3241_v50 = vadd.f32 %v3240_v34, %v2838_v46 }
 0x2d0   :  { %v95_v16 = vcombine.high %v94_v54, %v94_v54  ;;  %v2956_v63 = vrot.slane %v2955_v60, 1  ;;  %v3099_v56 = vadd.f32 %v3098_v19, %v3097_v35  ;;  %v3409_v47 = vrot.slane %v3358_v32, %v12921_v14 }
 0x2d1   :  { %v2794_v58 = vmul.f32 %v10458_v21, %v12822_v23  ;;  %v3242_v59 = vrot.slane %v3241_v50, 2  ;;  %v3433_v43 = vrot.slane %v3364_v17, %v12921_v14  ;;  %vm10659_vm2 = vcmp.eq.s32.totalorder %v3385_v49, 1 }
 0x2d2   :  { %v12922_v20 = vmov 0  ;;  %v109_v37 = vrot.slane %v95_v16, %v12918_v7  ;;  %v2957_v0 = vadd.f32 %v2956_v63, %v2955_v60  ;;  %v3100_v41 = vrot.slane %v3099_v56, 1 }
 0x2d3   :  { %v12923_v20 = vsel %vm10659_vm2, 4294967295, %v12922_v20  ;;  %v2818_v54 = vmul.f32 %v10458_v21, %v12824_v51  ;;  %v2842_v42 = vmul.f32 %v10458_v21, %v12919_v12  ;;  %v3243_v46 = vadd.f32 %v3242_v59, %v3241_v50 }
 0x2d4   :  { %12924 = vst [vmem:[#allocation14_spill] sm:$0xff] %v12923_v20  ;;  %v119_v23 = vmul.f32 %v109_v37, %v12833_v5  ;;  %v125_v48 = vmul.f32 %v109_v37, %v12829_v29  ;;  %v131_v3 = vmul.f32 %v109_v37, %v12821_v25  ;;  %v3101_v55 = vadd.f32 %v3100_v41, %v3099_v56 }
 0x2d5   :  { %v3294_v45 = vmul.f32 0.35355338, %v2957_v0  ;;  %v2976_v15 = vrot.slane %v2794_v58, 4  ;;  %v3120_v36 = vrot.slane %v2818_v54, 4  ;;  %v3244_v35 = vrot.slane %v3243_v46, 1 }
 0x2d6   :  { %v137_v34 = vsub.f32 1.0, %v119_v23  ;;  %v143_v57 = vsub.f32 1.0, %v125_v48  ;;  %v149_v32 = vsub.f32 1.0, %v131_v3  ;;  %v3318_v60 = vmul.f32 0.35355338, %v3101_v55  ;;  %v8267_v55 = vpop.f32.mrf.mxu0 }
 0x2d7   :  { %v3544_v51 = vsel %vm12663_vm6, %v3294_v45, %v10607_v52  ;;  %v2977_v21 = vadd.f32 %v2976_v15, %v2794_v58  ;;  %v3121_v12 = vadd.f32 %v3120_v36, %v2818_v54  ;;  %v3245_v19 = vadd.f32 %v3244_v35, %v3243_v46  ;;  %v12938_v45 = vld [vmem:[#allocation77_spill] sm:$0xff] }
 0x2d8   :  { %vm10673_vm3 = vcmp.eq.s32.totalorder %v3409_v47, 1  ;;  %v12925_v5 = vmov 0  ;;  %vm10677_vm4 = vcmp.eq.s32.totalorder %v3433_v43, 1  ;;  %v12928_v25 = vmov 0  ;;  %v12939_v15 = vld [vmem:[#allocation9_spill] sm:$0xff] }
 0x2d9   :  { %v12926_v5 = vsel %vm10673_vm3, 4294967295, %v12925_v5  ;;  %v12929_v25 = vsel %vm10677_vm4, 4294967295, %v12928_v25  ;;  %v3545_v29 = vsel %vm12658_vm7, %v10634_v44, %v3544_v51  ;;  %v3562_v17 = vsel %vm12663_vm6, %v3318_v60, %v10610_v28  ;;  %v12952_v28 = vld [vmem:[#allocation31_spill] sm:$0xff] }
 0x2da   :  { %12927 = vst [vmem:[#allocation61_spill] sm:$0xff] %v12926_v5  ;;  %12930 = vst [vmem:[#allocation7_spill] sm:$0xff] %v12929_v25  ;;  %v10687_v52 = vsel %vm10659_vm2, -1e+30, %v3545_v29  ;;  %vm155_vm5 = vcmp.gt.f32.partialorder %v137_v34, 0.5  ;;  %v2978_v49 = vrot.slane %v2977_v21, 2  ;;  %v3563_v16 = vsel %vm12658_vm7, %v3319_v11, %v3562_v17 }
 0x2db   :  { %v3342_v50 = vmul.f32 0.35355338, %v3245_v19  ;;  %vm10690_vm11 = vcmp.gt.f32.partialorder %v143_v57, 0.5  ;;  %v3122_v56 = vrot.slane %v3121_v12, 2  ;;  %v10696_v44 = vsel %vm10673_vm3, -1e+30, %v3563_v16 }
 0x2dc   :  { %vm10698_vm14 = vcmp.gt.f32.partialorder %v149_v32, 0.5  ;;  %v2979_v47 = vadd.f32 %v2978_v49, %v2977_v21  ;;  %v3264_v58 = vrot.slane %v2842_v42, 4  ;;  %vm12935_vm7 = vcmask 1043456   ;;  %v12941_v57 = vld [vmem:[#allocation78_spill] sm:$0xff] }
 0x2dd   :  { %v3580_v59 = vsel %vm12663_vm6, %v3342_v50, %v10617_v30  ;;  %v3628_v11 = vsel %vm12935_vm7, %v10687_v52, -inf  ;;  %v3123_v43 = vadd.f32 %v3122_v56, %v3121_v12  ;;  %v3353_v37 = vsel %vm155_vm5, 1, %v12920_v9  ;;  %vm12937_vm3 = vmmov %vm12935_vm7  ;;  %v12945_v49 = vld [vmem:[#allocation30_spill] sm:$0xff] }
 0x2de   :  { %vm12936_vm1 = vcmask 1043459   ;;  %v3639_v41 = vsel %vm12937_vm3, %v10696_v44, -inf  ;;  %v2980_v54 = vrot.slane %v2979_v47, 1  ;;  %v3265_v46 = vadd.f32 %v3264_v58, %v2842_v42  ;;  %vm12944_vm5 = vmmov %vm12937_vm3 }
 0x2df   :  { %v3581_v0 = vsel %vm12936_vm1, %v10643_v6, %v3580_v59  ;;  %v3347_v23 = vmul.f32 0.35355338, %v10645_v10  ;;  %v3124_v30 = vrot.slane %v3123_v43, 1  ;;  %v3359_v3 = vsel %vm10690_vm11, 1, %v12920_v9  ;;  %v12942_v10 = vld [vmem:[#allocation65_spill] sm:$0xff]  ;;  %v12953_v59 = vld [vmem:[#allocation74_spill] sm:$0xff] }
 0x2e0   :  { %v10714_v48 = vsel %vm10677_vm4, -1e+30, %v3581_v0  ;;  %v12940_v6 = vmax.f32 %v12938_v45, %v12939_v15  ;;  %v2981_v35 = vadd.f32 %v2980_v54, %v2979_v47  ;;  %v3266_v34 = vrot.slane %v3265_v46, 2  ;;  %v8319_v45 = vpop.f32.mrf.mxu1 }
 0x2e1   :  { %v3389_v42 = vrot.slane %v3353_v37, %v12921_v14  ;;  %v12943_v32 = vmax.f32 %v12941_v57, %v12942_v10  ;;  %v3125_v51 = vadd.f32 %v3124_v30, %v3123_v43  ;;  %v3365_v21 = vsel %vm10698_vm14, 1, %v12920_v9  ;;  %vm12954_vm14 = vmmov %vm12936_vm1 }
 0x2e2   :  { %v3629_v36 = vmax.f32 %v12940_v6, %v3628_v11  ;;  %v3413_v12 = vrot.slane %v3359_v3, %v12921_v14  ;;  %v3650_v19 = vsel %vm12944_vm5, %v10714_v48, -inf  ;;  %v3267_v29 = vadd.f32 %v3266_v34, %v3265_v46  ;;  %v12955_v34 = vld [vmem:[#allocation81_spill] sm:$0xff]  ;;  %vm12958_vm5 = vmmov %vm12937_vm3 }
 0x2e3   :  { %v3640_v60 = vmax.f32 %v12943_v32, %v3639_v41  ;;  %v3298_v17 = vmul.f32 0.35355338, %v2981_v35  ;;  %v5163_v50 = vmul.f32 %v8267_v55, %v12945_v49  ;;  %v3322_v16 = vmul.f32 0.35355338, %v3125_v51  ;;  %v12959_v32 = vld [vmem:[#allocation64_spill] sm:$0xff]  ;;  %v12960_v51 = vld [vmem:[#allocation101_spill] sm:$0xff] }
 0x2e4   :  { %vm10733_vm7 = vcmp.eq.s32.totalorder %v3389_v42, 1  ;;  %v12946_v63 = vmov 0  ;;  %vm10737_vm11 = vcmp.eq.s32.totalorder %v3413_v12, 1  ;;  %v12949_v56 = vmov 0 }
 0x2e5   :  { %v12947_v63 = vsel %vm10733_vm7, 4294967295, %v12946_v63  ;;  %v12950_v56 = vsel %vm10737_vm11, 4294967295, %v12949_v56  ;;  %v5187_v9 = vmul.f32 %v8267_v55, %v12952_v28  ;;  %v3268_v47 = vrot.slane %v3267_v29, 1 }
 0x2e6   :  { %12948 = vst [vmem:[#allocation8_spill] sm:$0xff] %v12947_v63  ;;  %12951 = vst [vmem:[#allocation63_spill] sm:$0xff] %v12950_v56  ;;  %v3547_v58 = vsel %vm12663_vm6, %v3298_v17, %v10622_v38  ;;  %v5211_v11 = vmul.f32 %v8267_v55, %v12953_v59  ;;  %v5320_v43 = vrot.slane %v5163_v50, 4  ;;  %v3437_v37 = vrot.slane %v3365_v21, %v12921_v14  ;;  %v12965_v17 = vld [vmem:[#allocation82_spill] sm:$0xff] }
 0x2e7   :  { %v3548_v0 = vsel %vm12936_vm1, %v10651_v1, %v3547_v58  ;;  %v3565_v41 = vsel %vm12663_vm6, %v3322_v16, %v10626_v33  ;;  %v5464_v54 = vrot.slane %v5187_v9, 4  ;;  %v3269_v46 = vadd.f32 %v3268_v47, %v3267_v29  ;;  %v12956_v33 = vld [vmem:[#allocation44_spill] sm:$0xff] }
 0x2e8   :  { %v3566_v30 = vsel %vm12954_vm14, %v10653_v40, %v3565_v41  ;;  %v3608_v3 = vsel %vm10733_vm7, -1e+30, %v3548_v0  ;;  %v5321_v38 = vadd.f32 %v5320_v43, %v5163_v50  ;;  %v5608_v1 = vrot.slane %v5211_v11, 4  ;;  %v12966_v50 = vld [vmem:[#allocation45_spill] sm:$0xff] }
 0x2e9   :  { %v3614_v55 = vsel %vm10737_vm11, -1e+30, %v3566_v30  ;;  %v3630_v15 = vsel %vm12937_vm3, %v3608_v3, -inf  ;;  %v5465_v6 = vadd.f32 %v5464_v54, %v5187_v9  ;;  %v3346_v35 = vmul.f32 0.35355338, %v3269_v46 }
 0x2ea   :  { %v12957_v42 = vmax.f32 %v12955_v34, %v12956_v33  ;;  %v3641_v10 = vsel %vm12958_vm5, %v3614_v55, -inf  ;;  %v5322_v40 = vrot.slane %v5321_v38, 2  ;;  %v12961_v21 = vmax.f32 %v12959_v32, %v12960_v51  ;;  %v12968_v34 = vld [vmem:[#allocation55_spill] sm:$0xff]  ;;  %v12969_v33 = vld [vmem:[#allocation57_spill] sm:$0xff]  ;;  %vm12986_vm5 = vmmov %vm12937_vm3 }
 0x2eb   :  { %vm10764_vm1 = vcmp.eq.s32.totalorder %v3437_v37, 1  ;;  %v12962_v29 = vmov 0  ;;  %v12967_v16 = vmax.f32 %v12965_v17, %v12966_v50  ;;  %v10772_v47 = vmul.f32 %v8319_v45, %v12945_v49  ;;  %v12976_v50 = vld [vmem:[#allocation39_spill] sm:$0xff] }
 0x2ec   :  { %v3631_v57 = vmax.f32 %v12957_v42, %v3630_v15  ;;  %v3651_v12 = vmax.f32 %v12961_v21, %v3650_v19  ;;  %v12963_v29 = vsel %vm10764_vm1, 4294967295, %v12962_v29  ;;  %v3583_v58 = vsel %vm12663_vm6, %v3346_v35, %v10631_v39  ;;  %v12970_v35 = vld [vmem:[#allocation17_spill] sm:$0xff]  ;;  %v12975_v21 = vld [vmem:[#allocation18_spill] sm:$0xff]  ;;  %vm12997_vm6 = vmmov %vm12937_vm3 }
 0x2ed   :  { %12964 = vst [vmem:[#allocation19_spill] sm:$0xff] %v12963_v29  ;;  %v3642_v9 = vmax.f32 %v12967_v16, %v3641_v10  ;;  %v5466_v0 = vrot.slane %v5465_v6, 2  ;;  %v5609_v41 = vadd.f32 %v5608_v1, %v5211_v11  ;;  %v3584_v54 = vsel %vm12954_vm14, %v3347_v23, %v3583_v58  ;;  %v12971_v1 = vld [vmem:[#allocation38_spill] sm:$0xff]  ;;  %vm12987_vm14 = vmmov %vm12937_vm3 }
 0x2ee   :  { %v3632_v43 = vmax.f32 %v3629_v36, %v3631_v57  ;;  %v5323_v37 = vadd.f32 %v5322_v40, %v5321_v38  ;;  %v10778_v46 = vmul.f32 %v8319_v45, %v12952_v28  ;;  %v3620_v30 = vsel %vm10764_vm1, -1e+30, %v3584_v54  ;;  %v12973_v38 = vld [vmem:[#allocation46_spill] sm:$0xff] }
 0x2ef   :  { %v3643_v19 = vmax.f32 %v3640_v60, %v3642_v9  ;;  %v3652_v39 = vsel %vm12937_vm3, %v3620_v30, -inf  ;;  %v12972_v60 = vld [vmem:[#allocation104_spill] sm:$0xff]  ;;  %v5467_v40 = vadd.f32 %v5466_v0, %v5465_v6  ;;  %v5215_v32 = vmul.f32 %v8319_v45, %v12953_v59  ;;  %v12979_v45 = vld [vmem:[#allocation10_spill] sm:$0xff] }
 0x2f0   :  { %v3660_v15 = vsub.f32 %v3608_v3, %v3632_v43  ;;  %v3655_v49 = vsub.f32 %v12968_v34, %v3632_v43  ;;  %v3656_v42 = vsub.f32 %v12969_v33, %v3632_v43  ;;  %v3657_v11 = vsub.f32 %v12970_v35, %v3632_v43  ;;  %v12977_v9 = vld [vmem:[#allocation56_spill] sm:$0xff]  ;;  %v12978_v34 = vld [vmem:[#allocation62_spill] sm:$0xff] }
 0x2f1   :  { %v3666_v36 = vsub.f32 %v3614_v55, %v3643_v19  ;;  %v3658_v23 = vsub.f32 %v12971_v1, %v3632_v43  ;;  %v12974_v57 = vmax.f32 %v12972_v60, %v12973_v38  ;;  %v3659_v51 = vsub.f32 %v10687_v52, %v3632_v43  ;;  %v12980_v43 = vld [vmem:[#allocation20_spill] sm:$0xff]  ;;  %v12981_v35 = vld [vmem:[#allocation42_spill] sm:$0xff] }
 0x2f2   :  { %v3683_v10 = vmul.f32 1.442695, %v3660_v15  ;;  %v3663_v17 = vsub.f32 %v12975_v21, %v3643_v19  ;;  %v3664_v16 = vsub.f32 %v12976_v50, %v3643_v19  ;;  %v3661_v58 = vsub.f32 %v12977_v9, %v3643_v19 }
 0x2f3   :  { %v3653_v28 = vmax.f32 %v12974_v57, %v3652_v39  ;;  %v3695_v3 = vmul.f32 1.442695, %v3666_v36  ;;  %v3673_v54 = vmul.f32 1.442695, %v3655_v49  ;;  %v3662_v33 = vsub.f32 %v12978_v34, %v3643_v19 }
 0x2f4   :  { %8418 = vpow2.f32 %v3683_v10  ;;  %v3675_v39 = vmul.f32 1.442695, %v3656_v42  ;;  %v3677_v15 = vmul.f32 1.442695, %v3657_v11  ;;  %v3665_v59 = vsub.f32 %v10696_v44, %v3643_v19 }
 0x2f5   :  { %v3654_v55 = vmax.f32 %v3651_v12, %v3653_v28  ;;  %8420 = vpow2.f32 %v3695_v3  ;;  %v3679_v52 = vmul.f32 1.442695, %v3658_v23  ;;  %v12982_v12 = vld [vmem:[#allocation105_spill] sm:$0xff]  ;;  %v3681_v49 = vmul.f32 1.442695, %v3659_v51 }
 0x2f6   :  { %8422 = vpow2.f32 %v3673_v54  ;;  %v5610_v57 = vrot.slane %v5609_v41, 2  ;;  %v3687_v11 = vmul.f32 1.442695, %v3662_v33  ;;  %v3689_v44 = vmul.f32 1.442695, %v3663_v17 }
 0x2f7   :  { %v3672_v6 = vsub.f32 %v3620_v30, %v3654_v55  ;;  %v3669_v0 = vsub.f32 %v12979_v45, %v3654_v55  ;;  %v3667_v36 = vsub.f32 %v12980_v43, %v3654_v55  ;;  %v3668_v1 = vsub.f32 %v12981_v35, %v3654_v55 }
 0x2f8   :  { %v3670_v60 = vsub.f32 %v12982_v12, %v3654_v55  ;;  %8424 = vpow2.f32 %v3675_v39  ;;  %v3671_v42 = vsub.f32 %v10714_v48, %v3654_v55  ;;  %v3685_v30 = vmul.f32 1.442695, %v3661_v58 }
 0x2f9   :  { %v3707_v38 = vmul.f32 1.442695, %v3672_v6  ;;  %8426 = vpow2.f32 %v3677_v15  ;;  %v3691_v19 = vmul.f32 1.442695, %v3664_v16  ;;  %v3693_v23 = vmul.f32 1.442695, %v3665_v59  ;;  %v2463_v6 = vpop.f32.mrf.mxu0 }
 0x2fa   :  { %v3697_v28 = vmul.f32 1.442695, %v3667_v36  ;;  %v3699_v10 = vmul.f32 1.442695, %v3668_v1  ;;  %v5324_v3 = vrot.slane %v5323_v37, 1  ;;  %v5468_v21 = vrot.slane %v5467_v40, 1 }
 0x2fb   :  { %8428 = vpow2.f32 %v3707_v38  ;;  %v5611_v50 = vadd.f32 %v5610_v57, %v5609_v41  ;;  %v5344_v9 = vrot.slane %v10772_v47, 4  ;;  %v5488_v48 = vrot.slane %v10778_v46, 4  ;;  %v12983_v36 = vld [vmem:[#allocation32_spill] sm:$0xff] }
 0x2fc   :  { %8430 = vpow2.f32 %v3679_v52  ;;  %v5325_v51 = vadd.f32 %v5324_v3, %v5323_v37  ;;  %v5632_v55 = vrot.slane %v5215_v32, 4  ;;  %v5469_v58 = vadd.f32 %v5468_v21, %v5467_v40 }
 0x2fd   :  { %8432 = vpow2.f32 %v3681_v49  ;;  %v5612_v54 = vrot.slane %v5611_v50, 1  ;;  %v5345_v17 = vadd.f32 %v5344_v9, %v10772_v47  ;;  %v3701_v16 = vmul.f32 1.442695, %v3669_v0 }
 0x2fe   :  { %8434 = vpow2.f32 %v3685_v30  ;;  %v5489_v34 = vadd.f32 %v5488_v48, %v10778_v46  ;;  %v5633_v33 = vadd.f32 %v5632_v55, %v5215_v32  ;;  %v3703_v39 = vmul.f32 1.442695, %v3670_v60 }
 0x2ff   :  { %8436 = vpow2.f32 %v3687_v11  ;;  %v5613_v41 = vadd.f32 %v5612_v54, %v5611_v50  ;;  %v5346_v15 = vrot.slane %v5345_v17, 2  ;;  %v3705_v37 = vmul.f32 1.442695, %v3671_v42 }
 0x300   :  { %8438 = vpow2.f32 %v3689_v44  ;;  %v5490_v45 = vrot.slane %v5489_v34, 2  ;;  %v5634_v52 = vrot.slane %v5633_v33, 2  ;;  %v10806_v40 = vmul.f32 0.35355338, %v5325_v51 }
 0x301   :  { %8440 = vpow2.f32 %v3691_v19  ;;  %v8419_v59 = vpop.eup %8418  ;;  %v10808_v47 = vmul.f32 0.35355338, %v5469_v58  ;;  %v5347_v0 = vadd.f32 %v5346_v15, %v5345_v17  ;;  %v5162_v35 = vmul.f32 %v2463_v6, %v12983_v36  ;;  %v12989_v17 = vld [vmem:[#allocation33_spill] sm:$0xff] }
 0x302   :  { %8442 = vpow2.f32 %v3693_v23  ;;  %v8421_v43 = vpop.eup %8420  ;;  %v10812_v46 = vsel %vm10733_vm7, 0.0, %v8419_v59  ;;  %v5491_v32 = vadd.f32 %v5490_v45, %v5489_v34  ;;  %v10815_v12 = vmul.f32 0.35355338, %v5613_v41 }
 0x303   :  { %8444 = vpow2.f32 %v3697_v28  ;;  %v8423_v1 = vpop.eup %8422  ;;  %v5348_v60 = vrot.slane %v5347_v0, 1  ;;  %v5635_v38 = vadd.f32 %v5634_v52, %v5633_v33  ;;  %v10819_v57 = vsel %vm10737_vm11, 0.0, %v8421_v43  ;;  %v12991_v43 = vld [vmem:[#allocation76_spill] sm:$0xff] }
 0x304   :  { %8446 = vpow2.f32 %v3699_v10  ;;  %v10823_v30 = vsel %vm9784_vm8, 0.0, %v8423_v1  ;;  %v5492_v11 = vrot.slane %v5491_v32, 1  ;;  %v3736_v9 = vsel %vm12937_vm3, %v10812_v46, 0.0 }
 0x305   :  { %8448 = vpow2.f32 %v3701_v16  ;;  %v8425_v49 = vpop.eup %8424  ;;  %v3727_v28 = vsel %vm12986_vm5, %v10823_v30, 0.0  ;;  %v5349_v10 = vadd.f32 %v5348_v60, %v5347_v0  ;;  %v5636_v51 = vrot.slane %v5635_v38, 1  ;;  %vm12988_vm5 = vmmov %vm12937_vm3 }
 0x306   :  { %8450 = vpow2.f32 %v3703_v39  ;;  %v8427_v44 = vpop.eup %8426  ;;  %v10827_v23 = vsel %vm9791_vm9, 0.0, %v8425_v49  ;;  %v10845_v54 = vsel %vm12988_vm5, %v10819_v57, 0.0  ;;  %v5186_v16 = vmul.f32 %v2463_v6, %v12989_v17  ;;  %vm12992_vm5 = vmmov %vm12937_vm3 }
 0x307   :  { %8452 = vpow2.f32 %v3705_v37  ;;  %v10833_v21 = vsel %vm10190_vm15, 0.0, %v8427_v44  ;;  %v3728_v50 = vsel %vm12987_vm14, %v10827_v23, 0.0  ;;  %vm12990_vm14 = vmmov %vm12937_vm3  ;;  %v5493_v41 = vadd.f32 %v5492_v11, %v5491_v32 }
 0x308   :  { %v8429_v3 = vpop.eup %8428  ;;  %v3729_v58 = vadd.f32 %v3728_v50, %v3727_v28  ;;  %v3730_v39 = vsel %vm12990_vm14, %v10833_v21, 0.0  ;;  %v10854_v15 = vmul.f32 0.35355338, %v5349_v10  ;;  %v5210_v0 = vmul.f32 %v2463_v6, %v12991_v43  ;;  %vm12994_vm14 = vmmov %vm12937_vm3 }
 0x309   :  { %v8431_v48 = vpop.eup %8430  ;;  %v10841_v55 = vsel %vm10764_vm1, 0.0, %v8429_v3  ;;  %v10871_v49 = vadd.f32 %v5636_v51, %v5635_v38  ;;  %v5314_v11 = vrot.slane %v5162_v35, 4  ;;  %v5458_v50 = vrot.slane %v5186_v16, 4 }
 0x30a   :  { %v8433_v34 = vpop.eup %8432  ;;  %v10850_v33 = vsel %vm10264_vm12, 0.0, %v8431_v48  ;;  %v3731_v45 = vadd.f32 %v3730_v39, %v3729_v58  ;;  %v10862_v52 = vsel %vm12937_vm3, %v10841_v55, 0.0  ;;  %v10924_v24 = vmul.f32 0.35355338, %v5493_v41 }
 0x30b   :  { %v8435_v59 = vpop.eup %8434  ;;  %v10858_v37 = vsel %vm10659_vm2, 0.0, %v8433_v34  ;;  %v3732_v32 = vsel %vm12992_vm5, %v10850_v33, 0.0  ;;  %vm12995_vm5 = vmmov %vm12937_vm3  ;;  %v5315_v34 = vadd.f32 %v5314_v11, %v5162_v35  ;;  %v5459_v42 = vadd.f32 %v5458_v50, %v5186_v16 }
 0x30c   :  { %v8437_v1 = vpop.eup %8436  ;;  %v10867_v60 = vsel %vm9791_vm9, 0.0, %v8435_v59  ;;  %v3733_v3 = vadd.f32 %v3732_v32, %v3731_v45  ;;  %v3734_v38 = vsel %vm12937_vm3, %v10858_v37, 0.0  ;;  %v5602_v32 = vrot.slane %v5210_v0, 4 }
 0x30d   :  { %v8439_v44 = vpop.eup %8438  ;;  %v10875_v10 = vsel %vm9839_vm10, 0.0, %v8437_v1  ;;  %v3738_v6 = vsel %vm12994_vm14, %v10867_v60, 0.0  ;;  %vm12996_vm14 = vnez %v12926_v5  ;;  %v5316_v19 = vrot.slane %v5315_v34, 2 }
 0x30e   :  { %v8441_v48 = vpop.eup %8440  ;;  %v10881_v58 = vsel %vm10201_vm0, 0.0, %v8439_v44  ;;  %v3739_v51 = vsel %vm12995_vm5, %v10875_v10, 0.0  ;;  %v3735_v45 = vadd.f32 %v3734_v38, %v3733_v3  ;;  %v5460_v50 = vrot.slane %v5459_v42, 2 }
 0x30f   :  { %v8443_v39 = vpop.eup %8442  ;;  %v10889_v59 = vsel %vm10268_vm13, 0.0, %v8441_v48  ;;  %v3740_v1 = vadd.f32 %v3739_v51, %v3738_v6  ;;  %v3741_v2 = vsel %vm12997_vm6, %v10881_v58, 0.0  ;;  %vm12998_vm6 = vmmov %vm12937_vm3  ;;  %v5317_v16 = vadd.f32 %v5316_v19, %v5315_v34 }
 0x310   :  { %v8445_v28 = vpop.eup %8444  ;;  %v10893_v44 = vsel %vm12996_vm14, 0.0, %v8443_v39  ;;  %v10901_v11 = vadd.f32 %v3736_v9, %v3735_v45  ;;  %v3743_v6 = vsel %vm12937_vm3, %v10889_v59, 0.0  ;;  %vm12999_vm5 = vnez %v12839_v18  ;;  %vm13000_vm13 = vmmov %vm12937_vm3  ;;  %v2712_v18 = vpop.f32.mrf.mxu1 }
 0x311   :  { %v8447_v29 = vpop.eup %8446  ;;  %v10899_v35 = vsel %vm10190_vm15, 0.0, %v8445_v28  ;;  %v3742_v3 = vadd.f32 %v3741_v2, %v3740_v1  ;;  %vm13001_vm3 = vnez %v12865_v26  ;;  %v3745_v19 = vsel %vm12998_vm6, %v10893_v44, 0.0 }
 0x312   :  { %v8449_v48 = vpop.eup %8448  ;;  %v10907_v38 = vsel %vm10201_vm0, 0.0, %v8447_v29  ;;  %v3749_v51 = vsel %vm12998_vm6, %v10899_v35, 0.0  ;;  %v12678_v45 = vmax.f32 %v10901_v11, 1e-30  ;;  %v5318_v8 = vrot.slane %v5317_v16, 1 }
 0x313   :  { %v8451_v39 = vpop.eup %8450  ;;  %v10913_v28 = vsel %vm12999_vm5, 0.0, %v8449_v48  ;;  %v3744_v9 = vadd.f32 %v3743_v6, %v3742_v3  ;;  %v3750_v2 = vsel %vm13000_vm13, %v10907_v38, 0.0  ;;  %vm13002_vm13 = vmmov %vm12998_vm6 }
 0x314   :  { %v8453_v1 = vpop.eup %8452  ;;  %v10920_v29 = vsel %vm13001_vm3, 0.0, %v8451_v39  ;;  %v3751_v34 = vadd.f32 %v3750_v2, %v3749_v51  ;;  %v3752_v48 = vsel %vm13002_vm13, %v10913_v28, 0.0  ;;  %8454 = vrcp.f32 %v12678_v45  ;;  %vm13003_vm3 = vmmov %vm12998_vm6 }
 0x315   :  { %v10928_v3 = vsel %vm10677_vm4, 0.0, %v8453_v1  ;;  %v3746_v6 = vadd.f32 %v3745_v19, %v3744_v9  ;;  %v3754_v26 = vsel %vm13003_vm3, %v10920_v29, 0.0  ;;  %v5461_v51 = vadd.f32 %v5460_v50, %v5459_v42  ;;  %vm13004_vm6 = vmmov %vm13003_vm3  ;;  %v8270_v50 = vpop.f32.mrf.mxu0 }
 0x316   :  { %v3753_v39 = vadd.f32 %v3752_v48, %v3751_v34  ;;  %v5603_v2 = vadd.f32 %v5602_v32, %v5210_v0  ;;  %v5166_v1 = vmul.f32 %v2712_v18, %v12983_v36  ;;  %v5190_v9 = vmul.f32 %v2712_v18, %v12989_v17 }
 0x317   :  { %v10937_v41 = vadd.f32 %v10845_v54, %v3746_v6  ;;  %v3756_v22 = vsel %vm13004_vm6, %v10928_v3, 0.0  ;;  %v5462_v56 = vrot.slane %v5461_v51, 1  ;;  %v5214_v34 = vmul.f32 %v2712_v18, %v12991_v43 }
 0x318   :  { %v3755_v19 = vadd.f32 %v3754_v26, %v3753_v39  ;;  %v5604_v45 = vrot.slane %v5603_v2, 2  ;;  %v5338_v63 = vrot.slane %v5166_v1, 4  ;;  %v5482_v42 = vrot.slane %v5190_v9, 4 }
 0x319   :  { %v12688_v48 = vmax.f32 %v10937_v41, 1e-30  ;;  %v5719_v0 = vmul.f32 0.35355338, %v10871_v49  ;;  %v5319_v32 = vadd.f32 %v5318_v8, %v5317_v16  ;;  %v5626_v36 = vrot.slane %v5214_v34, 4 }
 0x31a   :  { %v3757_v54 = vadd.f32 %v3756_v22, %v3755_v19  ;;  %v5605_v26 = vadd.f32 %v5604_v45, %v5603_v2  ;;  %v5339_v17 = vadd.f32 %v5338_v63, %v5166_v1  ;;  %v5483_v6 = vadd.f32 %v5482_v42, %v5190_v9  ;;  %v13006_v19 = vld [vmem:[#allocation35_spill] sm:$0xff] }
 0x31b   :  { %8456 = vrcp.f32 %v12688_v48  ;;  %v5463_v18 = vadd.f32 %v5462_v56, %v5461_v51  ;;  %v5627_v43 = vadd.f32 %v5626_v36, %v5214_v34  ;;  %v5165_v62 = vmul.f32 %v8270_v50, %v13005_v31  ;;  %v13007_v48 = vld [vmem:[#allocation80_spill] sm:$0xff] }
 0x31c   :  { %v10949_v39 = vadd.f32 %v10862_v52, %v3757_v54  ;;  %v5606_v25 = vrot.slane %v5605_v26, 1  ;;  %v5340_v5 = vrot.slane %v5339_v17, 2  ;;  %v5484_v22 = vrot.slane %v5483_v6, 2 }
 0x31d   :  { %v5189_v49 = vmul.f32 %v8270_v50, %v13006_v19  ;;  %v5666_v16 = vmul.f32 0.35355338, %v5319_v32  ;;  %v5628_v20 = vrot.slane %v5627_v43, 2  ;;  %v5213_v45 = vmul.f32 %v8270_v50, %v13007_v48 }
 0x31e   :  { %v3762_v8 = vmax.f32 %v10949_v39, 1e-30  ;;  %v5607_v63 = vadd.f32 %v5606_v25, %v5605_v26  ;;  %v5341_v2 = vadd.f32 %v5340_v5, %v5339_v17  ;;  %v5485_v1 = vadd.f32 %v5484_v22, %v5483_v6  ;;  %v8322_v17 = vpop.f32.mrf.mxu1 }
 0x31f   :  { %v5332_v52 = vrot.slane %v5165_v62, 4  ;;  %v5629_v56 = vadd.f32 %v5628_v20, %v5627_v43  ;;  %v5476_v51 = vrot.slane %v5189_v49, 4  ;;  %v5620_v9 = vrot.slane %v5213_v45, 4 }
 0x320   :  { %8458 = vrcp.f32 %v3762_v8  ;;  %v5690_v34 = vmul.f32 0.35355338, %v5463_v18  ;;  %v5342_v42 = vrot.slane %v5341_v2, 1  ;;  %v5486_v54 = vrot.slane %v5485_v1, 1 }
 0x321   :  { %v5333_v36 = vadd.f32 %v5332_v52, %v5165_v62  ;;  %v8455_v27 = vpop.eup %8454  ;;  %v5714_v4 = vmul.f32 0.35355338, %v5607_v63  ;;  %v5630_v32 = vrot.slane %v5629_v56, 1  ;;  %v5477_v13 = vadd.f32 %v5476_v51, %v5189_v49 }
 0x322   :  { %v5621_v61 = vadd.f32 %v5620_v9, %v5213_v45  ;;  %v13008_v25 = vmax.f32 %v10901_v11, 1e-30  ;;  %vm13009_vm3 = vcmask 1041409   ;;  %v5343_v26 = vadd.f32 %v5342_v42, %v5341_v2 }
 0x323   :  { %v10961_v50 = vsel %vm13009_vm3, %v10806_v40, %v5666_v16  ;;  %v5487_v20 = vadd.f32 %v5486_v54, %v5485_v1  ;;  %v5631_v6 = vadd.f32 %v5630_v32, %v5629_v56  ;;  %v5334_v18 = vrot.slane %v5333_v36, 2  ;;  %vm13011_vm13 = vmmov %vm13009_vm3 }
 0x324   :  { %v3766_v5 = vmul.f32 %v8455_v27, %v13008_v25  ;;  %13010 = vst [vmem:[#allocation77_spill] sm:$0xff] %v10961_v50  ;;  %v5478_v43 = vrot.slane %v5477_v13, 2  ;;  %v5622_v22 = vrot.slane %v5621_v61, 2  ;;  %v10965_v63 = vsel %vm13011_vm13, %v10808_v47, %v5690_v34  ;;  %vm13013_vm6 = vmmov %vm13009_vm3  ;;  %v13035_v50 = vld [vmem:[#allocation66_spill] sm:$0xff] }
 0x325   :  { %13012 = vst [vmem:[#allocation9_spill] sm:$0xff] %v10965_v63  ;;  %v5670_v49 = vmul.f32 0.35355338, %v5343_v26  ;;  %v5694_v45 = vmul.f32 0.35355338, %v5487_v20  ;;  %v10969_v11 = vsel %vm13013_vm6, %v10815_v12, %v5714_v4  ;;  %v5335_v16 = vadd.f32 %v5334_v18, %v5333_v36  ;;  %vm13019_vm13 = vmmov %vm13009_vm3 }
 0x326   :  { %v3769_v62 = vsub.f32 2.0, %v3766_v5  ;;  %13014 = vst [vmem:[#allocation78_spill] sm:$0xff] %v10969_v11  ;;  %v5718_v40 = vmul.f32 0.35355338, %v5631_v6  ;;  %v10972_v2 = vmul.f32 %v8322_v17, %v13005_v31  ;;  %v5479_v52 = vadd.f32 %v5478_v43, %v5477_v13  ;;  %vm13021_vm6 = vmmov %vm13009_vm3 }
 0x327   :  { %v10974_v56 = vadd.f32 %v5622_v22, %v5621_v61  ;;  %v10977_v51 = vmul.f32 %v8322_v17, %v13006_v19  ;;  %v10981_v9 = vsel %vm13009_vm3, %v10854_v15, %v5670_v49  ;;  %v10985_v4 = vsel %vm13019_vm13, %v10924_v24, %v5694_v45 }
 0x328   :  { %13015 = vst [vmem:[#allocation65_spill] sm:$0xff] %v10972_v2  ;;  %v3772_v1 = vmul.f32 %v8455_v27, %v3769_v62  ;;  %v8457_v47 = vpop.eup %8456  ;;  %13018 = vst [vmem:[#allocation74_spill] sm:$0xff] %v10981_v9  ;;  %v10988_v12 = vsel %vm13021_vm6, %v5719_v0, %v5718_v40  ;;  %v10991_v31 = vmul.f32 %v8322_v17, %v13007_v48  ;;  %v13024_v61 = vmax.f32 %v10937_v41, 1e-30 }
 0x329   :  { %13016 = vst [vmem:[#allocation30_spill] sm:$0xff] %v10974_v56  ;;  %13017 = vst [vmem:[#allocation31_spill] sm:$0xff] %v10977_v51  ;;  %v5336_v0 = vrot.slane %v5335_v16, 1  ;;  %vm13078_vm3 = vcmask 1042434   ;;  %vm13081_vm6 = vcmask 1043459  }
 0x32a   :  { %13020 = vst [vmem:[#allocation81_spill] sm:$0xff] %v10985_v4  ;;  %13022 = vst [vmem:[#allocation44_spill] sm:$0xff] %v10988_v12  ;;  %v3767_v13 = vmul.f32 %v8457_v47, %v13024_v61  ;;  %v3775_v27 = vmul.f32 %v3772_v1, %v10823_v30  ;;  %v3776_v19 = vmul.f32 %v3772_v1, %v10827_v23  ;;  %v13034_v4 = vld [vmem:[#allocation23_spill] sm:$0xff] }
 0x32b   :  { %13023 = vst [vmem:[#allocation64_spill] sm:$0xff] %v10991_v31  ;;  %v3777_v15 = vmul.f32 %v3772_v1, %v10833_v21  ;;  %v3778_v34 = vmul.f32 %v3772_v1, %v10850_v33  ;;  %v3779_v24 = vmul.f32 %v3772_v1, %v10858_v37  ;;  %v3780_v42 = vmul.f32 %v3772_v1, %v10812_v46  ;;  %v13033_v46 = vld [vmem:[#allocation22_spill] sm:$0xff]  ;;  %vm13080_vm13 = vmmov %vm13078_vm3 }
 0x32c   :  { %v3770_v54 = vsub.f32 2.0, %v3767_v13  ;;  %v11002_v48 = vrot.slane %v3775_v27, %v12918_v7  ;;  %v11005_v41 = vrot.slane %v3776_v19, %v12918_v7  ;;  %v5480_v33 = vrot.slane %v5479_v52, 1  ;;  %vm13082_vm5 = vmmov %vm13081_vm6 }
 0x32d   :  { %v11008_v30 = vrot.slane %v3777_v15, %v12918_v7  ;;  %v11011_v23 = vrot.slane %v3778_v34, %v12918_v7  ;;  %v11014_v21 = vrot.slane %v3779_v24, %v12918_v7  ;;  %v8459_v37 = vpop.eup %8458  ;;  %v11031_v6 = vadd.f32 %v5336_v0, %v5335_v16  ;;  %vm13084_vm0 = vmmov %vm13078_vm3 }
 0x32e   :  { %v11017_v36 = vmul.f32 %v8457_v47, %v3770_v54  ;;  %v3818_v32 = vcombine.high %v11002_v48, %v11002_v48  ;;  %v3842_v25 = vcombine.high %v11005_v41, %v11005_v41  ;;  %v3768_v26 = vmul.f32 %v8459_v37, %v3762_v8 }
 0x32f   :  { %v3866_v5 = vcombine.high %v11008_v30, %v11008_v30  ;;  %v3890_v20 = vcombine.high %v11011_v23, %v11011_v23  ;;  %v3914_v17 = vcombine.high %v11014_v21, %v11014_v21  ;;  %13025 = vst [vmem:[#allocation101_spill] sm:$0xff] %v11031_v6  ;;  %v11044_v49 = vrot.slane %v3780_v42, %v12918_v7  ;;  %v13037_v6 = vld [vmem:[#allocation47_spill] sm:$0xff] }
 0x330   :  { %v3781_v18 = vmul.f32 %v11017_v36, %v10867_v60  ;;  %v3782_v43 = vmul.f32 %v11017_v36, %v10875_v10  ;;  %v3783_v22 = vmul.f32 %v11017_v36, %v10881_v58  ;;  %v3784_v39 = vmul.f32 %v11017_v36, %v10889_v59 }
 0x331   :  { %v3771_v8 = vsub.f32 2.0, %v3768_v26  ;;  %v3785_v62 = vmul.f32 %v11017_v36, %v10893_v44  ;;  %v11046_v45 = vadd.f32 %v5480_v33, %v5479_v52  ;;  %v11049_v60 = vrot.slane %v3818_v32, %v12918_v7 }
 0x332   :  { %v11052_v10 = vrot.slane %v3842_v25, %v12918_v7  ;;  %v11055_v58 = vrot.slane %v3866_v5, %v12918_v7  ;;  %v11058_v59 = vrot.slane %v3781_v18, %v12918_v7  ;;  %v11063_v44 = vrot.slane %v3782_v43, %v12918_v7 }
 0x333   :  { %13026 = vst [vmem:[#allocation82_spill] sm:$0xff] %v11046_v45  ;;  %v11060_v40 = vmul.f32 %v8459_v37, %v3771_v8  ;;  %v11066_v16 = vrot.slane %v3783_v22, %v12918_v7  ;;  %v11069_v1 = vrot.slane %v3784_v39, %v12918_v7  ;;  %v11072_v52 = vrot.slane %v3890_v20, %v12918_v7  ;;  %v13036_v45 = vld [vmem:[#allocation67_spill] sm:$0xff] }
 0x334   :  { %v11075_v47 = vrot.slane %v3914_v17, %v12918_v7  ;;  %v3962_v61 = vcombine.high %v11058_v59, %v11058_v59  ;;  %v11080_v13 = vrot.slane %v3785_v62, %v12918_v7  ;;  %v3986_v42 = vcombine.high %v11063_v44, %v11063_v44 }
 0x335   :  { %v3787_v27 = vmul.f32 %v11060_v40, %v10899_v35  ;;  %v3788_v19 = vmul.f32 %v11060_v40, %v10907_v38  ;;  %v3789_v15 = vmul.f32 %v11060_v40, %v10913_v28  ;;  %v3790_v34 = vmul.f32 %v11060_v40, %v10920_v29 }
 0x336   :  { %v3791_v24 = vmul.f32 %v11060_v40, %v10928_v3  ;;  %v4010_v0 = vcombine.high %v11066_v16, %v11066_v16  ;;  %v4250_v35 = vrot.slane %v11049_v60, %v12921_v14  ;;  %v4034_v38 = vcombine.high %v11069_v1, %v11069_v1 }
 0x337   :  { %v4058_v28 = vcombine.high %v11080_v13, %v11080_v13  ;;  %v11103_v29 = vrot.slane %v3787_v27, %v12918_v7  ;;  %v11106_v3 = vrot.slane %v3788_v19, %v12918_v7  ;;  %v11109_v54 = vrot.slane %v3962_v61, %v12918_v7 }
 0x338   :  { %v11112_v33 = vrot.slane %v3789_v15, %v12918_v7  ;;  %v11115_v37 = vrot.slane %v3790_v34, %v12918_v7  ;;  %v4266_v32 = vrot.slane %v11052_v10, %v12921_v14  ;;  %v11120_v25 = vrot.slane %v3986_v42, %v12918_v7 }
 0x339   :  { %v11123_v5 = vrot.slane %v4010_v0, %v12918_v7  ;;  %v4106_v26 = vcombine.high %v11103_v29, %v11103_v29  ;;  %v4130_v20 = vcombine.high %v11106_v3, %v11106_v3  ;;  %v11130_v17 = vrot.slane %v4034_v38, %v12918_v7 }
 0x33a   :  { %v4154_v18 = vcombine.high %v11112_v33, %v11112_v33  ;;  %v4178_v43 = vcombine.high %v11115_v37, %v11115_v37  ;;  %v11137_v22 = vrot.slane %v3791_v24, %v12918_v7  ;;  %v11140_v39 = vrot.slane %v4058_v28, %v12918_v7 }
 0x33b   :  { %v11143_v8 = vrot.slane %v4106_v26, %v12918_v7  ;;  %v11146_v62 = vrot.slane %v4130_v20, %v12918_v7  ;;  %v4282_v61 = vrot.slane %v11055_v58, %v12921_v14  ;;  %v4346_v34 = vrot.slane %v11109_v54, %v12921_v14 }
 0x33c   :  { %13027 = vst [vmem:[#allocation45_spill] sm:$0xff] %v11140_v39  ;;  %v11151_v27 = vrot.slane %v4154_v18, %v12918_v7  ;;  %v11154_v19 = vrot.slane %v4178_v43, %v12918_v7  ;;  %v4202_v15 = vcombine.high %v11137_v22, %v11137_v22  ;;  %v4298_v24 = vrot.slane %v11072_v52, %v12921_v14 }
 0x33d   :  { %13028 = vst [vmem:[#allocation55_spill] sm:$0xff] %v11143_v8  ;;  %13029 = vst [vmem:[#allocation57_spill] sm:$0xff] %v11146_v62  ;;  %v4314_v42 = vrot.slane %v11075_v47, %v12921_v14  ;;  %v4362_v0 = vrot.slane %v11120_v25, %v12921_v14  ;;  %v4378_v38 = vrot.slane %v11123_v5, %v12921_v14 }
 0x33e   :  { %13030 = vst [vmem:[#allocation17_spill] sm:$0xff] %v11151_v27  ;;  %13031 = vst [vmem:[#allocation38_spill] sm:$0xff] %v11154_v19  ;;  %v11169_v28 = vrot.slane %v4202_v15, %v12918_v7  ;;  %v4394_v26 = vrot.slane %v11130_v17, %v12921_v14  ;;  %v4442_v20 = vrot.slane %v11143_v8, %v12921_v14 }
 0x33f   :  { %v4458_v18 = vrot.slane %v11146_v62, %v12921_v14  ;;  %v4410_v43 = vrot.slane %v11140_v39, %v12921_v14  ;;  %v4604_v12 = vmul.f32 %v13033_v46, %v4250_v35  ;;  %v4608_v9 = vmul.f32 %v13034_v4, %v4266_v32 }
 0x340   :  { %13032 = vst [vmem:[#allocation104_spill] sm:$0xff] %v11169_v28  ;;  %v3938_v15 = vcombine.high %v11044_v49, %v11044_v49  ;;  %v4474_v11 = vrot.slane %v11151_v27, %v12921_v14  ;;  %v4490_v63 = vrot.slane %v11154_v19, %v12921_v14  ;;  %v4612_v31 = vmul.f32 %v13035_v50, %v4282_v61 }
 0x341   :  { %v4628_v51 = vmul.f32 %v13033_v46, %v4346_v34  ;;  %v4506_v2 = vrot.slane %v11169_v28, %v12921_v14  ;;  %v4616_v35 = vmul.f32 %v13036_v45, %v4298_v24  ;;  %v4620_v32 = vmul.f32 %v13037_v6, %v4314_v42 }
 0x342   :  { %v4632_v56 = vmul.f32 %v13034_v4, %v4362_v0  ;;  %v4636_v39 = vmul.f32 %v13035_v50, %v4378_v38  ;;  %v4640_v27 = vmul.f32 %v13036_v45, %v4394_v26  ;;  %v4652_v62 = vmul.f32 %v13033_v46, %v4442_v20 }
 0x343   :  { %v4656_v19 = vmul.f32 %v13034_v4, %v4458_v18  ;;  %v4644_v61 = vmul.f32 %v13037_v6, %v4410_v43  ;;  %v4680_v34 = vadd.f32 %v4608_v9, %v4604_v12  ;;  %v3786_v28 = vmul.f32 %v11017_v36, %v10819_v57 }
 0x344   :  { %v4700_v8 = vadd.f32 %v4632_v56, %v4628_v51  ;;  %v4660_v24 = vmul.f32 %v13035_v50, %v4474_v11  ;;  %v3792_v0 = vmul.f32 %v11060_v40, %v10841_v55  ;;  %v11205_v38 = vrot.slane %v3938_v15, %v12918_v7 }
 0x345   :  { %v4720_v42 = vadd.f32 %v4656_v19, %v4652_v62  ;;  %v4664_v46 = vmul.f32 %v13036_v45, %v4490_v63  ;;  %v4681_v26 = vadd.f32 %v4680_v34, %v4612_v31  ;;  %v11209_v20 = vrot.slane %v3786_v28, %v12918_v7 }
 0x346   :  { %v4701_v4 = vadd.f32 %v4700_v8, %v4636_v39  ;;  %v4668_v56 = vmul.f32 %v13037_v6, %v4506_v2  ;;  %v11213_v57 = vrot.slane %v3792_v0, %v12918_v7  ;;  %v4330_v50 = vrot.slane %v11205_v38, %v12921_v14 }
 0x347   :  { %v4721_v51 = vadd.f32 %v4720_v42, %v4660_v24  ;;  %v4682_v55 = vadd.f32 %v4681_v26, %v4616_v35  ;;  %v4082_v9 = vcombine.high %v11209_v20, %v11209_v20  ;;  %v11221_v63 = vrot.slane %v11002_v48, %v12918_v7 }
 0x348   :  { %v4702_v11 = vadd.f32 %v4701_v4, %v4640_v27  ;;  %v4226_v2 = vcombine.high %v11213_v57, %v11213_v57  ;;  %v11227_v31 = vrot.slane %v11005_v41, %v12918_v7  ;;  %v11231_v36 = vrot.slane %v11008_v30, %v12918_v7  ;;  %v13044_v4 = vld [vmem:[#allocation25_spill] sm:$0xff] }
 0x349   :  { %v4722_v12 = vadd.f32 %v4721_v51, %v4664_v46  ;;  %v11233_v6 = vadd.f32 %v4682_v55, %v4620_v32  ;;  %v11238_v40 = vrot.slane %v4082_v9, %v12918_v7  ;;  %v11242_v48 = vrot.slane %v11011_v23, %v12918_v7  ;;  %v13043_v46 = vld [vmem:[#allocation24_spill] sm:$0xff] }
 0x34a   :  { %v11235_v45 = vadd.f32 %v4702_v11, %v4644_v61  ;;  %v11247_v41 = vrot.slane %v4226_v2, %v12918_v7  ;;  %v11250_v8 = vmul.f32 %v10476_v53, %v4330_v50  ;;  %v11254_v30 = vrot.slane %v11014_v21, %v12918_v7 }
 0x34b   :  { %13038 = vst [vmem:[#allocation46_spill] sm:$0xff] %v11233_v6  ;;  %v11244_v39 = vadd.f32 %v4722_v12, %v4668_v56  ;;  %v4426_v62 = vrot.slane %v11238_v40, %v12921_v14  ;;  %v11260_v27 = vrot.slane %v11058_v59, %v12918_v7  ;;  %v11264_v23 = vrot.slane %v11063_v44, %v12918_v7  ;;  %v13046_v12 = vld [vmem:[#allocation69_spill] sm:$0xff] }
 0x34c   :  { %13039 = vst [vmem:[#allocation18_spill] sm:$0xff] %v11235_v45  ;;  %v11268_v19 = vrot.slane %v11066_v16, %v12918_v7  ;;  %v11272_v28 = vrot.slane %v11069_v1, %v12918_v7  ;;  %v11276_v21 = vrot.slane %v11080_v13, %v12918_v7  ;;  %v11280_v59 = vrot.slane %v11103_v29, %v12918_v7 }
 0x34d   :  { %13040 = vst [vmem:[#allocation39_spill] sm:$0xff] %v11244_v39  ;;  %v11284_v44 = vrot.slane %v11106_v3, %v12918_v7  ;;  %v4522_v16 = vrot.slane %v11247_v41, %v12921_v14  ;;  %v11290_v18 = vrot.slane %v11112_v33, %v12918_v7  ;;  %v4246_v1 = vrot.slane %v11221_v63, %v12921_v14 }
 0x34e   :  { %v4262_v13 = vrot.slane %v11227_v31, %v12921_v14  ;;  %v11297_v29 = vmul.f32 %v10476_v53, %v4426_v62  ;;  %v11301_v3 = vrot.slane %v11115_v37, %v12918_v7  ;;  %v11305_v43 = vrot.slane %v11137_v22, %v12918_v7  ;;  %v13047_v62 = vld [vmem:[#allocation90_spill] sm:$0xff] }
 0x34f   :  { %v4278_v33 = vrot.slane %v11231_v36, %v12921_v14  ;;  %v4294_v15 = vrot.slane %v11242_v48, %v12921_v14  ;;  %v4310_v35 = vrot.slane %v11254_v30, %v12921_v14  ;;  %v4342_v32 = vrot.slane %v11260_v27, %v12921_v14 }
 0x350   :  { %13041 = vst [vmem:[#allocation56_spill] sm:$0xff] %v11297_v29  ;;  %v4358_v37 = vrot.slane %v11264_v23, %v12921_v14  ;;  %v4374_v61 = vrot.slane %v11268_v19, %v12921_v14  ;;  %v4390_v22 = vrot.slane %v11272_v28, %v12921_v14  ;;  %v4438_v34 = vrot.slane %v11280_v59, %v12921_v14 }
 0x351   :  { %v4454_v24 = vrot.slane %v11284_v44, %v12921_v14  ;;  %v11326_v42 = vmul.f32 %v10476_v53, %v4522_v16  ;;  %v4406_v0 = vrot.slane %v11276_v21, %v12921_v14  ;;  %v4603_v26 = vmul.f32 %v4246_v1, %v13043_v46  ;;  %v13045_v53 = vld [vmem:[#allocation68_spill] sm:$0xff] }
 0x352   :  { %v4607_v56 = vmul.f32 %v4262_v13, %v13044_v4  ;;  %v4470_v51 = vrot.slane %v11290_v18, %v12921_v14  ;;  %v4486_v50 = vrot.slane %v11301_v3, %v12921_v14  ;;  %v4502_v55 = vrot.slane %v11305_v43, %v12921_v14 }
 0x353   :  { %13042 = vst [vmem:[#allocation62_spill] sm:$0xff] %v11326_v42  ;;  %v4627_v11 = vmul.f32 %v4342_v32, %v13043_v46  ;;  %v4611_v9 = vmul.f32 %v4278_v33, %v13045_v53  ;;  %v4615_v2 = vmul.f32 %v4294_v15, %v13046_v12  ;;  %v4619_v16 = vmul.f32 %v4310_v35, %v13047_v62 }
 0x354   :  { %v4631_v1 = vmul.f32 %v4358_v37, %v13044_v4  ;;  %v4635_v13 = vmul.f32 %v4374_v61, %v13045_v53  ;;  %v4639_v39 = vmul.f32 %v4390_v22, %v13046_v12  ;;  %v4651_v42 = vmul.f32 %v4438_v34, %v13043_v46 }
 0x355   :  { %v4655_v45 = vmul.f32 %v4454_v24, %v13044_v4  ;;  %v4643_v29 = vmul.f32 %v4406_v0, %v13047_v62  ;;  %v4675_v6 = vadd.f32 %v4607_v56, %v4603_v26  ;;  %v11350_v33 = vrot.slane %v11044_v49, %v12918_v7  ;;  %v13048_v56 = vld [vmem:[#allocation108_spill] sm:$0xff] }
 0x356   :  { %v4695_v32 = vadd.f32 %v4631_v1, %v4627_v11  ;;  %v4659_v15 = vmul.f32 %v4470_v51, %v13045_v53  ;;  %v11355_v37 = vrot.slane %v11209_v20, %v12918_v7  ;;  %v11359_v61 = vrot.slane %v11213_v57, %v12918_v7  ;;  %v13052_v1 = vld [vmem:[#allocation45_spill] sm:$0xff] }
 0x357   :  { %v4715_v35 = vadd.f32 %v4655_v45, %v4651_v42  ;;  %v4663_v22 = vmul.f32 %v4486_v50, %v13046_v12  ;;  %v4676_v34 = vadd.f32 %v4675_v6, %v4611_v9  ;;  %v4326_v0 = vrot.slane %v11350_v33, %v12921_v14  ;;  %v13049_v12 = vld [vmem:[#allocation55_spill] sm:$0xff] }
 0x358   :  { %v4696_v24 = vadd.f32 %v4695_v32, %v4635_v13  ;;  %v4667_v49 = vmul.f32 %v4502_v55, %v13047_v62  ;;  %v4422_v45 = vrot.slane %v11355_v37, %v12921_v14  ;;  %v3834_v20 = vcombine.high %v11049_v60, %v11049_v60  ;;  %v13051_v62 = vld [vmem:[#allocation17_spill] sm:$0xff]  ;;  %v13053_v32 = vld [vmem:[#allocation38_spill] sm:$0xff] }
 0x359   :  { %v4716_v46 = vadd.f32 %v4715_v35, %v4659_v15  ;;  %v4677_v42 = vadd.f32 %v4676_v34, %v4615_v2  ;;  %v4518_v57 = vrot.slane %v11359_v61, %v12921_v14  ;;  %v3858_v6 = vcombine.high %v11052_v10, %v11052_v10  ;;  %v13050_v2 = vld [vmem:[#allocation57_spill] sm:$0xff] }
 0x35a   :  { %v4697_v26 = vadd.f32 %v4696_v24, %v4639_v39  ;;  %v11374_v51 = vmul.f32 %v4326_v0, %v13048_v56  ;;  %v3882_v50 = vcombine.high %v11055_v58, %v11055_v58  ;;  %v3906_v55 = vcombine.high %v11072_v52, %v11072_v52 }
 0x35b   :  { %v4717_v4 = vadd.f32 %v4716_v46, %v4663_v22  ;;  %v11380_v11 = vadd.f32 %v4677_v42, %v4619_v16  ;;  %v3978_v39 = vcombine.high %v11109_v54, %v11109_v54  ;;  %v4002_v10 = vcombine.high %v11120_v25, %v11120_v25 }
 0x35c   :  { %v11382_v60 = vadd.f32 %v4697_v26, %v4643_v29  ;;  %v11391_v9 = vmul.f32 %v4422_v45, %v13048_v56  ;;  %v3930_v58 = vcombine.high %v11075_v47, %v11075_v47  ;;  %v4026_v52 = vcombine.high %v11123_v5, %v11123_v5 }
 0x35d   :  { %v11388_v53 = vadd.f32 %v4717_v4, %v4667_v49  ;;  %v4050_v29 = vcombine.high %v11130_v17, %v11130_v17  ;;  %v4122_v54 = vcombine.high %v13049_v12, %v13049_v12  ;;  %v4146_v25 = vcombine.high %v13050_v2, %v13050_v2  ;;  %v13054_v17 = vld [vmem:[#allocation104_spill] sm:$0xff] }
 0x35e   :  { %v4170_v16 = vcombine.high %v13051_v62, %v13051_v62  ;;  %v4074_v13 = vcombine.high %v13052_v1, %v13052_v1  ;;  %v4194_v47 = vcombine.high %v13053_v32, %v13053_v32  ;;  %v4258_v5 = vrot.slane %v3834_v20, %v12921_v14 }
 0x35f   :  { %v4274_v15 = vrot.slane %v3858_v6, %v12921_v14  ;;  %v4218_v35 = vcombine.high %v13054_v17, %v13054_v17  ;;  %v4290_v22 = vrot.slane %v3882_v50, %v12921_v14  ;;  %v4354_v34 = vrot.slane %v3978_v39, %v12921_v14  ;;  %v13056_v39 = vld [vmem:[#allocation27_spill] sm:$0xff] }
 0x360   :  { %v4370_v24 = vrot.slane %v4002_v10, %v12921_v14  ;;  %v11417_v0 = vmul.f32 %v4518_v57, %v13048_v56  ;;  %v4306_v49 = vrot.slane %v3906_v55, %v12921_v14  ;;  %v4322_v46 = vrot.slane %v3930_v58, %v12921_v14  ;;  %v13055_v57 = vld [vmem:[#allocation26_spill] sm:$0xff] }
 0x361   :  { %v4450_v45 = vrot.slane %v4122_v54, %v12921_v14  ;;  %v4386_v20 = vrot.slane %v4026_v52, %v12921_v14  ;;  %v4402_v42 = vrot.slane %v4050_v29, %v12921_v14  ;;  %v4466_v26 = vrot.slane %v4146_v25, %v12921_v14  ;;  %v13057_v58 = vld [vmem:[#allocation70_spill] sm:$0xff]  ;;  %v13058_v54 = vld [vmem:[#allocation71_spill] sm:$0xff] }
 0x362   :  { %v4482_v6 = vrot.slane %v4170_v16, %v12921_v14  ;;  %v4418_v4 = vrot.slane %v4074_v13, %v12921_v14  ;;  %v4498_v50 = vrot.slane %v4194_v47, %v12921_v14  ;;  %v4606_v56 = vmul.f32 %v13055_v57, %v4258_v5  ;;  %v13059_v25 = vld [vmem:[#allocation91_spill] sm:$0xff] }
 0x363   :  { %v4610_v55 = vmul.f32 %v13056_v39, %v4274_v15  ;;  %v4514_v10 = vrot.slane %v4218_v35, %v12921_v14  ;;  %v4614_v12 = vmul.f32 %v13057_v58, %v4290_v22  ;;  %v4630_v52 = vmul.f32 %v13055_v57, %v4354_v34 }
 0x364   :  { %v4634_v29 = vmul.f32 %v13056_v39, %v4370_v24  ;;  %v4618_v2 = vmul.f32 %v13058_v54, %v4306_v49  ;;  %v4622_v62 = vmul.f32 %v13059_v25, %v4322_v46  ;;  %v4654_v16 = vmul.f32 %v13055_v57, %v4450_v45 }
 0x365   :  { %v4658_v1 = vmul.f32 %v13056_v39, %v4466_v26  ;;  %v4638_v13 = vmul.f32 %v13057_v58, %v4386_v20  ;;  %v4642_v32 = vmul.f32 %v13058_v54, %v4402_v42  ;;  %v4662_v47 = vmul.f32 %v13057_v58, %v4482_v6 }
 0x366   :  { %v4690_v5 = vadd.f32 %v4610_v55, %v4606_v56  ;;  %v4710_v15 = vadd.f32 %v4634_v29, %v4630_v52  ;;  %v3954_v35 = vcombine.high %v11205_v38, %v11205_v38  ;;  %v4098_v22 = vcombine.high %v11238_v40, %v11238_v40  ;;  %v13060_v55 = vld [vmem:[#allocation109_spill] sm:$0xff] }
 0x367   :  { %v4730_v17 = vadd.f32 %v4658_v1, %v4654_v16  ;;  %v4646_v34 = vmul.f32 %v13059_v25, %v4418_v4  ;;  %v4666_v24 = vmul.f32 %v13058_v54, %v4498_v50  ;;  %v4242_v46 = vcombine.high %v11247_v41, %v11247_v41 }
 0x368   :  { %v4691_v49 = vadd.f32 %v4690_v5, %v4614_v12  ;;  %v4670_v45 = vmul.f32 %v13059_v25, %v4514_v10  ;;  %v4711_v20 = vadd.f32 %v4710_v15, %v4638_v13  ;;  %v4338_v26 = vrot.slane %v3954_v35, %v12921_v14  ;;  %v13061_v5 = vld [vmem:[#allocation28_spill] sm:$0xff] }
 0x369   :  { %v4731_v42 = vadd.f32 %v4730_v17, %v4662_v47  ;;  %v4434_v38 = vrot.slane %v4098_v22, %v12921_v14  ;;  %v3833_v40 = vcombine.high %v11221_v63, %v11221_v63  ;;  %v3857_v4 = vcombine.high %v11227_v31, %v11227_v31  ;;  %v13062_v17 = vld [vmem:[#allocation29_spill] sm:$0xff] }
 0x36a   :  { %v4692_v6 = vadd.f32 %v4691_v49, %v4618_v2  ;;  %v4712_v50 = vadd.f32 %v4711_v20, %v4642_v32  ;;  %v4530_v56 = vrot.slane %v4242_v46, %v12921_v14  ;;  %v3881_v41 = vcombine.high %v11231_v36, %v11231_v36  ;;  %v13063_v46 = vld [vmem:[#allocation72_spill] sm:$0xff]  ;;  %v13064_v20 = vld [vmem:[#allocation73_spill] sm:$0xff] }
 0x36b   :  { %v4732_v57 = vadd.f32 %v4731_v42, %v4666_v24  ;;  %v11462_v10 = vmul.f32 %v13060_v55, %v4338_v26  ;;  %v3905_v58 = vcombine.high %v11242_v48, %v11242_v48  ;;  %v3929_v63 = vcombine.high %v11254_v30, %v11254_v30  ;;  %v13065_v26 = vld [vmem:[#allocation92_spill] sm:$0xff] }
 0x36c   :  { %v11459_v39 = vadd.f32 %v4692_v6, %v4622_v62  ;;  %v11468_v12 = vadd.f32 %v4712_v50, %v4646_v34  ;;  %v3977_v52 = vcombine.high %v11260_v27, %v11260_v27  ;;  %v4001_v36 = vcombine.high %v11264_v23, %v11264_v23 }
 0x36d   :  { %v11470_v31 = vadd.f32 %v4732_v57, %v4670_v45  ;;  %v4025_v29 = vcombine.high %v11268_v19, %v11268_v19  ;;  %v4049_v54 = vcombine.high %v11272_v28, %v11272_v28  ;;  %v4121_v48 = vcombine.high %v11280_v59, %v11280_v59 }
 0x36e   :  { %v4145_v30 = vcombine.high %v11284_v44, %v11284_v44  ;;  %v11485_v2 = vmul.f32 %v13060_v55, %v4434_v38  ;;  %v4073_v27 = vcombine.high %v11276_v21, %v11276_v21  ;;  %v4169_v23 = vcombine.high %v11290_v18, %v11290_v18 }
 0x36f   :  { %v4254_v19 = vrot.slane %v3833_v40, %v12921_v14  ;;  %v4193_v28 = vcombine.high %v11301_v3, %v11301_v3  ;;  %v4217_v59 = vcombine.high %v11305_v43, %v11305_v43  ;;  %v4270_v25 = vrot.slane %v3857_v4, %v12921_v14 }
 0x370   :  { %v4286_v44 = vrot.slane %v3881_v41, %v12921_v14  ;;  %v4302_v62 = vrot.slane %v3905_v58, %v12921_v14  ;;  %v4318_v16 = vrot.slane %v3929_v63, %v12921_v14  ;;  %v4350_v21 = vrot.slane %v3977_v52, %v12921_v14 }
 0x371   :  { %v4366_v18 = vrot.slane %v4001_v36, %v12921_v14  ;;  %v4382_v1 = vrot.slane %v4025_v29, %v12921_v14  ;;  %v4398_v13 = vrot.slane %v4049_v54, %v12921_v14  ;;  %v4446_v3 = vrot.slane %v4121_v48, %v12921_v14 }
 0x372   :  { %v4462_v43 = vrot.slane %v4145_v30, %v12921_v14  ;;  %v11507_v32 = vmul.f32 %v13060_v55, %v4530_v56  ;;  %v4414_v47 = vrot.slane %v4073_v27, %v12921_v14  ;;  %v4605_v15 = vmul.f32 %v4254_v19, %v13061_v5 }
 0x373   :  { %v4609_v35 = vmul.f32 %v4270_v25, %v13062_v17  ;;  %v4478_v22 = vrot.slane %v4169_v23, %v12921_v14  ;;  %v4494_v34 = vrot.slane %v4193_v28, %v12921_v14  ;;  %v4510_v24 = vrot.slane %v4217_v59, %v12921_v14  ;;  %v13066_v28 = vld [vmem:[#allocation30_spill] sm:$0xff]  ;;  %v13068_v25 = vld [vmem:[#allocation101_spill] sm:$0xff] }
 0x374   :  { %v4629_v49 = vmul.f32 %v4350_v21, %v13061_v5  ;;  %v4613_v45 = vmul.f32 %v4286_v44, %v13063_v46  ;;  %v4617_v42 = vmul.f32 %v4302_v62, %v13064_v20  ;;  %v4621_v6 = vmul.f32 %v4318_v16, %v13065_v26  ;;  %v2473_v21 = vpop.f32.mrf.mxu0 }
 0x375   :  { %v4633_v38 = vmul.f32 %v4366_v18, %v13062_v17  ;;  %v4637_v40 = vmul.f32 %v4382_v1, %v13063_v46  ;;  %v4641_v4 = vmul.f32 %v4398_v13, %v13064_v20  ;;  %v4653_v50 = vmul.f32 %v4446_v3, %v13061_v5  ;;  %v13069_v1 = vld [vmem:[#allocation114_spill] sm:$0xff] }
 0x376   :  { %v4657_v57 = vmul.f32 %v4462_v43, %v13062_v17  ;;  %v4645_v56 = vmul.f32 %v4414_v47, %v13065_v26  ;;  %v4685_v41 = vadd.f32 %v4609_v35, %v4605_v15  ;;  %v3953_v58 = vcombine.high %v11350_v33, %v11350_v33  ;;  %v13070_v3 = vld [vmem:[#allocation82_spill] sm:$0xff]  ;;  %v13071_v47 = vld [vmem:[#allocation65_spill] sm:$0xff]  ;;  %v2722_v15 = vpop.f32.mrf.mxu1 }
 0x377   :  { %v4705_v55 = vadd.f32 %v4633_v38, %v4629_v49  ;;  %v4661_v63 = vmul.f32 %v4478_v22, %v13063_v46  ;;  %v4097_v36 = vcombine.high %v11355_v37, %v11355_v37  ;;  %v4241_v29 = vcombine.high %v11359_v61, %v11359_v61  ;;  %v13072_v22 = vld [vmem:[#allocation31_spill] sm:$0xff] }
 0x378   :  { %v4725_v52 = vadd.f32 %v4657_v57, %v4653_v50  ;;  %v4665_v54 = vmul.f32 %v4494_v34, %v13064_v20  ;;  %v4686_v48 = vadd.f32 %v4685_v41, %v4613_v45  ;;  %v4334_v27 = vrot.slane %v3953_v58, %v12921_v14  ;;  %v13074_v20 = vld [vmem:[#allocation36_spill] sm:$0xff] }
 0x379   :  { %v4706_v30 = vadd.f32 %v4705_v55, %v4637_v40  ;;  %v4669_v23 = vmul.f32 %v4510_v24, %v13065_v26  ;;  %v13067_v33 = vrot.slane %v13066_v28, 1  ;;  %v11539_v44 = vmul.f32 0.35355338, %v13068_v25  ;;  %v13073_v24 = vld [vmem:[#allocation64_spill] sm:$0xff]  ;;  %v13075_v26 = vld [vmem:[#allocation37_spill] sm:$0xff] }
 0x37a   :  { %v4726_v19 = vadd.f32 %v4725_v52, %v4661_v63  ;;  %v4687_v37 = vadd.f32 %v4686_v48, %v4617_v42  ;;  %v4430_v61 = vrot.slane %v4097_v36, %v12921_v14  ;;  %v4526_v16 = vrot.slane %v4241_v29, %v12921_v14 }
 0x37b   :  { %v5625_v59 = vadd.f32 %v13067_v33, %v13066_v28  ;;  %v4707_v62 = vadd.f32 %v4706_v30, %v4641_v4  ;;  %v11544_v13 = vmul.f32 %v4334_v27, %v13069_v1  ;;  %v11547_v43 = vmul.f32 0.35355338, %v13070_v3 }
 0x37c   :  { %v4727_v18 = vadd.f32 %v4726_v19, %v4665_v54  ;;  %v5356_v5 = vrot.slane %v13071_v47, 4  ;;  %v11550_v17 = vadd.f32 %v4687_v37, %v4621_v6  ;;  %v5500_v34 = vrot.slane %v13072_v22, 4  ;;  %v13076_v6 = vld [vmem:[#allocation86_spill] sm:$0xff] }
 0x37d   :  { %v11552_v35 = vadd.f32 %v4707_v62, %v4645_v56  ;;  %v5644_v49 = vrot.slane %v13073_v24, 4  ;;  %v5164_v42 = vmul.f32 %v2473_v21, %v13074_v20  ;;  %v5188_v38 = vmul.f32 %v2473_v21, %v13075_v26 }
 0x37e   :  { %v11556_v46 = vadd.f32 %v4727_v18, %v4669_v23  ;;  %v5357_v45 = vadd.f32 %v5356_v5, %v13071_v47  ;;  %v5501_v40 = vadd.f32 %v5500_v34, %v13072_v22  ;;  %v5212_v50 = vmul.f32 %v2473_v21, %v13076_v6 }
 0x37f   :  { %v5645_v4 = vadd.f32 %v5644_v49, %v13073_v24  ;;  %v5168_v57 = vmul.f32 %v2722_v15, %v13074_v20  ;;  %v5326_v41 = vrot.slane %v5164_v42, 4  ;;  %v5470_v55 = vrot.slane %v5188_v38, 4 }
 0x380   :  { %v5358_v56 = vrot.slane %v5357_v45, 2  ;;  %v5192_v58 = vmul.f32 %v2722_v15, %v13075_v26  ;;  %v11566_v63 = vmul.f32 0.35355338, %v5625_v59  ;;  %v5502_v52 = vrot.slane %v5501_v40, 2 }
 0x381   :  { %v5646_v36 = vrot.slane %v5645_v4, 2  ;;  %v5614_v29 = vrot.slane %v5212_v50, 4  ;;  %v5327_v48 = vadd.f32 %v5326_v41, %v5164_v42  ;;  %v5471_v30 = vadd.f32 %v5470_v55, %v5188_v38 }
 0x382   :  { %v5359_v54 = vadd.f32 %v5358_v56, %v5357_v45  ;;  %v5350_v27 = vrot.slane %v5168_v57, 4  ;;  %v5503_v23 = vadd.f32 %v5502_v52, %v5501_v40  ;;  %v5494_v33 = vrot.slane %v5192_v58, 4 }
 0x383   :  { %v5647_v19 = vadd.f32 %v5646_v36, %v5645_v4  ;;  %v5615_v28 = vadd.f32 %v5614_v29, %v5212_v50  ;;  %v5328_v37 = vrot.slane %v5327_v48, 2  ;;  %v5472_v62 = vrot.slane %v5471_v30, 2 }
 0x384   :  { %v5360_v25 = vrot.slane %v5359_v54, 1  ;;  %v5351_v21 = vadd.f32 %v5350_v27, %v5168_v57  ;;  %v5504_v18 = vrot.slane %v5503_v23, 1  ;;  %v5495_v59 = vadd.f32 %v5494_v33, %v5192_v58 }
 0x385   :  { %v5648_v3 = vrot.slane %v5647_v19, 1  ;;  %v5616_v47 = vrot.slane %v5615_v28, 2  ;;  %v5329_v5 = vadd.f32 %v5328_v37, %v5327_v48  ;;  %v5473_v22 = vadd.f32 %v5472_v62, %v5471_v30  ;;  %v13083_v62 = vld [vmem:[#allocation78_spill] sm:$0xff] }
 0x386   :  { %v5216_v34 = vmul.f32 %v2722_v15, %v13076_v6  ;;  %v5352_v24 = vrot.slane %v5351_v21, 2  ;;  %v4649_v49 = vmul.f32 %v4430_v61, %v13069_v1  ;;  %v11571_v45 = vmul.f32 %v4526_v16, %v13069_v1 }
 0x387   :  { %v5617_v20 = vadd.f32 %v5616_v47, %v5615_v28  ;;  %v5496_v42 = vrot.slane %v5495_v59, 2  ;;  %v5361_v26 = vadd.f32 %v5360_v25, %v5359_v54  ;;  %v5330_v38 = vrot.slane %v5329_v5, 1  ;;  %v13077_v28 = vld [vmem:[#allocation77_spill] sm:$0xff] }
 0x388   :  { %v5474_v40 = vrot.slane %v5473_v22, 1  ;;  %v5353_v4 = vadd.f32 %v5352_v24, %v5351_v21  ;;  %v5505_v50 = vadd.f32 %v5504_v18, %v5503_v23  ;;  %v11573_v57 = vadd.f32 %v5648_v3, %v5647_v19 }
 0x389   :  { %v5618_v56 = vrot.slane %v5617_v20, 1  ;;  %v5497_v41 = vadd.f32 %v5496_v42, %v5495_v59  ;;  %v5331_v55 = vadd.f32 %v5330_v38, %v5329_v5  ;;  %v5638_v6 = vrot.slane %v5216_v34, 4  ;;  %v13093_v42 = vld [vmem:[#allocation112_spill] sm:$0xff] }
 0x38a   :  { %v5475_v58 = vadd.f32 %v5474_v40, %v5473_v22  ;;  %v5354_v15 = vrot.slane %v5353_v4, 1  ;;  %v4694_v16 = vadd.f32 %v11459_v39, %v11462_v10  ;;  %v4714_v1 = vadd.f32 %v11468_v12, %v11485_v2  ;;  %v13079_v39 = vld [vmem:[#allocation9_spill] sm:$0xff]  ;;  %v13090_v22 = vld [vmem:[#allocation74_spill] sm:$0xff] }
 0x38b   :  { %v5619_v52 = vadd.f32 %v5618_v56, %v5617_v20  ;;  %v5498_v61 = vrot.slane %v5497_v41, 1  ;;  %v5668_v36 = vmul.f32 0.35355338, %v5331_v55  ;;  %v5639_v48 = vadd.f32 %v5638_v6, %v5216_v34  ;;  %v13092_v20 = vld [vmem:[#allocation83_spill] sm:$0xff]  ;;  %v13096_v56 = vld [vmem:[#allocation113_spill] sm:$0xff] }
 0x38c   :  { %v5692_v29 = vmul.f32 0.35355338, %v5475_v58  ;;  %v5355_v54 = vadd.f32 %v5354_v15, %v5353_v4  ;;  %8329 = vmatprep.subr.mxu0 %v4694_v16  ;;  %8343 = vmatprep.subr.mxu1 %v4714_v1  ;;  %v4689_v23 = vadd.f32 %v11550_v17, %v11544_v13  ;;  %v4709_v19 = vadd.f32 %v11552_v35, %v4649_v49  ;;  %v13099_v15 = vld [vmem:[#allocation81_spill] sm:$0xff] }
 0x38d   :  { %v5716_v30 = vmul.f32 0.35355338, %v5619_v52  ;;  %v5499_v27 = vadd.f32 %v5498_v61, %v5497_v41  ;;  %v5807_v33 = vsel %vm13078_vm3, %v5668_v36, %v13077_v28  ;;  %v5640_v12 = vrot.slane %v5639_v48, 2  ;;  %8330 = vmatpush3.msra.mxu0 %v4694_v16  ;;  %8344 = vmatpush3.msra.mxu1 %v4714_v1  ;;  %vm13085_vm3 = vmmov %vm13082_vm5 }
 0x38e   :  { %v5825_v10 = vsel %vm13080_vm13, %v5692_v29, %v13079_v39  ;;  %v5672_v2 = vmul.f32 0.35355338, %v5355_v54  ;;  %v5808_v25 = vsel %vm13081_vm6, %v11539_v44, %v5807_v33  ;;  %8331 = vmatprep.subr.mxu0 %v4689_v23  ;;  %8345 = vmatprep.subr.mxu1 %v4709_v19  ;;  %v5697_v34 = vmul.f32 0.35355338, %v5505_v50  ;;  %vm13098_vm6 = vmmov %vm13085_vm3  ;;  %v13101_v50 = vld [vmem:[#allocation46_spill] sm:$0xff]  ;;  %v13104_v29 = vld [vmem:[#allocation56_spill] sm:$0xff] }
 0x38f   :  { %v5826_v37 = vsel %vm13082_vm5, %v11547_v43, %v5825_v10  ;;  %v5843_v13 = vsel %vm13084_vm0, %v5716_v30, %v13083_v62  ;;  %v5696_v17 = vmul.f32 0.35355338, %v5499_v27  ;;  %v11596_v18 = vsel %vm10659_vm2, -1e+30, %v5808_v25  ;;  %8332 = vmatpush3.msra.mxu0 %v4689_v23  ;;  %8346 = vmatpush3.msra.mxu1 %v4709_v19  ;;  %v13105_v54 = vld [vmem:[#allocation18_spill] sm:$0xff]  ;;  %v13107_v33 = vld [vmem:[#allocation88_spill] sm:$0xff] }
 0x390   :  { %v5844_v35 = vsel %vm13085_vm3, %v11566_v63, %v5843_v13  ;;  %v11600_v47 = vsel %vm12996_vm14, -1e+30, %v5826_v37  ;;  %v5641_v44 = vadd.f32 %v5640_v12, %v5639_v48  ;;  %v5673_v43 = vmul.f32 0.35355338, %v5361_v26  ;;  %v13095_v26 = vld [vmem:[#allocation85_spill] sm:$0xff]  ;;  %vm13100_vm3 = vmmov %vm13080_vm13  ;;  %v2751_v25 = vld [vmem:[%s12476_s6] sm:$0xff] }
 0x391   :  { %vm13088_vm0 = vcmask 1043456   ;;  %v5810_v63 = vsel %vm13080_vm13, %v5672_v2, %v13090_v22  ;;  %v11610_v49 = vsel %vm10677_vm4, -1e+30, %v5844_v35  ;;  %v13094_v38 = vmax.f32 %v13092_v20, %v13093_v42  ;;  %v13108_v39 = vld [vmem:[#allocation117_spill] sm:$0xff]  ;;  %v2752_v13 = vld [vmem:[%s12476_s6 + $0x8] sm:$0xff] }
 0x392   :  { %v5890_v59 = vsel %vm13088_vm0, %v11596_v18, -inf  ;;  %vm13089_vm5 = vmmov %vm13088_vm0  ;;  %v5642_v4 = vrot.slane %v5641_v44, 1  ;;  %v13097_v41 = vmax.f32 %v13095_v26, %v13096_v56  ;;  %v5811_v58 = vsel %vm13098_vm6, %v5673_v43, %v5810_v63  ;;  %v13114_v35 = vld [vmem:[#allocation111_spill] sm:$0xff]  ;;  %v13116_v43 = vld [vmem:[#allocation44_spill] sm:$0xff] }
 0x393   :  { %v5901_v5 = vsel %vm13089_vm5, %v11600_v47, -inf  ;;  %v5891_v40 = vmax.f32 %v13094_v38, %v5890_v59  ;;  %v5828_v6 = vsel %vm13100_vm3, %v5696_v17, %v13099_v15  ;;  %v4684_v52 = vadd.f32 %v13101_v50, %v11250_v8  ;;  %vm13102_vm0 = vmmov %vm13098_vm6  ;;  %v2756_v22 = vld [vmem:[%s12476_s6 + $0x28] sm:$0xff]  ;;  %v13118_v63 = vld [vmem:[#allocation62_spill] sm:$0xff] }
 0x394   :  { %v5902_v55 = vmax.f32 %v13097_v41, %v5901_v5  ;;  %v5643_v61 = vadd.f32 %v5642_v4, %v5641_v44  ;;  %v5829_v16 = vsel %vm13102_vm0, %v5697_v34, %v5828_v6  ;;  %v5871_v36 = vsel %vm10733_vm7, -1e+30, %v5811_v58  ;;  %vm13110_vm13 = vmmov %vm13089_vm5  ;;  %v13119_v34 = vld [vmem:[#allocation39_spill] sm:$0xff]  ;;  %v13122_v42 = vld [vmem:[#allocation13_spill] sm:$0xff] }
 0x395   :  { %v4704_v48 = vadd.f32 %v13105_v54, %v13104_v29  ;;  %v5877_v27 = vsel %vm10737_vm11, -1e+30, %v5829_v16  ;;  %v5892_v23 = vsel %vm13089_vm5, %v5871_v36, -inf  ;;  %8333 = vmatprep.subr.mxu0 %v4684_v52  ;;  %v4679_v19 = vadd.f32 %v11380_v11, %v11374_v51  ;;  %v13111_v51 = vld [vmem:[#allocation89_spill] sm:$0xff]  ;;  %v13112_v11 = vld [vmem:[#allocation118_spill] sm:$0xff]  ;;  %vm13115_vm3 = vmmov %vm13089_vm5 }
 0x396   :  { %v4699_v8 = vadd.f32 %v11382_v60, %v11391_v9  ;;  %v5720_v28 = vmul.f32 0.35355338, %v5643_v61  ;;  %v13109_v10 = vmax.f32 %v13107_v33, %v13108_v39  ;;  %v5903_v2 = vsel %vm13110_vm13, %v5877_v27, -inf  ;;  %8334 = vmatpush3.msra.mxu0 %v4684_v52  ;;  %v2755_v9 = vld [vmem:[%s12476_s6 + $0x20] sm:$0xff]  ;;  %vm13120_vm5 = vmmov %vm13115_vm3  ;;  %v13125_v58 = vld [vmem:[#allocation84_spill] sm:$0xff] }
 0x397   :  { %8347 = vmatprep.subr.mxu1 %v4704_v48  ;;  %vm4755_vm6 = vcmask 261120   ;;  %v5721_v37 = vmul.f32 0.35355338, %v11573_v57  ;;  %v13113_v62 = vmax.f32 %v13111_v51, %v13112_v11  ;;  %8335 = vmatprep.subr.mxu0 %v4679_v19  ;;  %v4734_v17 = vadd.f32 %v11470_v31, %v11507_v32  ;;  %v13124_v56 = vld [vmem:[#allocation75_spill] sm:$0xff]  ;;  %v13128_v50 = vld [vmem:[#allocation60_spill] sm:$0xff] }
 0x398   :  { %v5893_v12 = vmax.f32 %v13109_v10, %v5892_v23  ;;  %8348 = vmatpush3.msra.mxu1 %v4704_v48  ;;  %v4729_v57 = vadd.f32 %v11556_v46, %v11571_v45  ;;  %v5907_v44 = vsel %vm13115_vm3, %v13114_v35, -inf  ;;  %vm13117_vm0 = vcmask 1042434   ;;  %8336 = vmatpush3.msra.mxu0 %v4679_v19  ;;  %v13126_v6 = vld [vmem:[#allocation11_spill] sm:$0xff]  ;;  %v13134_v51 = vld [vmem:[#allocation116_spill] sm:$0xff] }
 0x399   :  { %v5904_v60 = vmax.f32 %v13113_v62, %v5903_v2  ;;  %v5846_v59 = vsel %vm13117_vm0, %v5720_v28, %v13116_v43  ;;  %8349 = vmatprep.subr.mxu1 %v4699_v8  ;;  %v4724_v20 = vadd.f32 %v13119_v34, %v13118_v63  ;;  %v5912_v31 = vsel %vm13120_vm5, %v11610_v49, -inf  ;;  %8337 = vmatprep.mubr.msk.f32.mxu0 %vm4755_vm6, %v2751_v25  ;;  %v13130_v54 = vld [vmem:[#allocation115_spill] sm:$0xff]  ;;  %v13133_v25 = vld [vmem:[#allocation12_spill] sm:$0xff]  ;;  %v2758_v34 = vld [vmem:[%s12476_s6 + $0x38] sm:$0xff] }
 0x39a   :  { %v5894_v5 = vmax.f32 %v5891_v40, %v5893_v12  ;;  %vm13121_vm13 = vcmask 1043459   ;;  %8350 = vmatpush3.msra.mxu1 %v4699_v8  ;;  %v4719_v45 = vadd.f32 %v11388_v53, %v11417_v0  ;;  %v5911_v38 = vmax.f32 %v5907_v44, %v13122_v42  ;;  %8351 = vmatprep.mubr.msk.f32.mxu1 %vm4755_vm6, %v2755_v9  ;;  %v13127_v0 = vld [vmem:[#allocation107_spill] sm:$0xff]  ;;  %vm13140_vm0 = vmmov %vm13115_vm3 }
 0x39b   :  { %v5847_v32 = vsel %vm13121_vm13, %v5721_v37, %v5846_v59  ;;  %v11668_v46 = vmax.f32 %v5902_v55, %v5904_v60  ;;  %8338 = vmatmul.mubr.msk.f32.vlgmr.msra.gmra.mxu0 %vm4755_vm6, %v2752_v13  ;;  %8352 = vmatmul.mubr.msk.f32.vlgmr.msra.gmra.mxu1 %vm4755_vm6, %v2756_v22  ;;  %v13129_v52 = vmax.f32 %v13127_v0, %v13128_v50  ;;  %v13131_v8 = vld [vmem:[#allocation79_spill] sm:$0xff]  ;;  %v13135_v13 = vld [vmem:[#allocation106_spill] sm:$0xff]  ;;  %v2753_v59 = vld [vmem:[%s12476_s6 + $0x10] sm:$0xff] }
 0x39c   :  { %v11676_v4 = vsel %vm10764_vm1, -1e+30, %v5847_v32  ;;  %v5922_v26 = vsub.f32 %v5871_v36, %v5894_v5  ;;  %v5917_v41 = vsub.f32 %v13124_v56, %v5894_v5  ;;  %v5918_v15 = vsub.f32 %v13125_v58, %v5894_v5  ;;  %8357 = vmatprep.subr.mxu0 %v4734_v17  ;;  %v13136_v22 = vld [vmem:[#allocation110_spill] sm:$0xff]  ;;  %8340 = vmatprep.mubr.msk.f32.mxu0 %vm4755_vm6, %v2753_v59  ;;  %vm13144_vm5 = vmmov %vm13140_vm0  ;;  %v13160_v30 = vld [vmem:[#allocation43_spill] sm:$0xff] }
 0x39d   :  { %v5914_v55 = vsel %vm13115_vm3, %v11676_v4, -inf  ;;  %v5919_v53 = vsub.f32 %v13126_v6, %v5894_v5  ;;  %v5913_v61 = vmax.f32 %v13129_v52, %v5912_v31  ;;  %v5928_v36 = vsub.f32 %v5877_v27, %v11668_v46  ;;  %8358 = vmatpush3.msra.mxu0 %v4734_v17  ;;  %v13132_v27 = vld [vmem:[#allocation87_spill] sm:$0xff]  ;;  %vm13145_vm13 = vmmov %vm13140_vm0 }
 0x39e   :  { %v5915_v16 = vmax.f32 %v5911_v38, %v5914_v55  ;;  %v5945_v29 = vmul.f32 1.442695, %v5922_v26  ;;  %v5920_v48 = vsub.f32 %v13130_v54, %v5894_v5  ;;  %8359 = vmatprep.subr.mxu0 %v4729_v57  ;;  %v5921_v23 = vsub.f32 %v11596_v18, %v5894_v5  ;;  %v2757_v5 = vld [vmem:[%s12476_s6 + $0x30] sm:$0xff]  ;;  %v13137_v31 = vld [vmem:[#allocation119_spill] sm:$0xff]  ;;  %vm13151_vm3 = vmmov %vm13140_vm0 }
 0x39f   :  { %v5935_v19 = vmul.f32 1.442695, %v5917_v41  ;;  %8360 = vmatpush3.msra.mxu0 %v4729_v57  ;;  %v5923_v28 = vsub.f32 %v13131_v8, %v11668_v46  ;;  %v5937_v33 = vmul.f32 1.442695, %v5918_v15  ;;  %v5939_v39 = vmul.f32 1.442695, %v5919_v53  ;;  %8354 = vmatprep.mubr.msk.f32.mxu1 %vm4755_vm6, %v2757_v5 }
 0x3a0   :  { %8361 = vmatprep.subr.mxu0 %v4724_v20  ;;  %v5916_v10 = vmax.f32 %v5913_v61, %v5915_v16  ;;  %8460 = vpow2.f32 %v5945_v29  ;;  %v5957_v12 = vmul.f32 1.442695, %v5928_v36  ;;  %v5924_v2 = vsub.f32 %v13132_v27, %v11668_v46  ;;  %8355 = vmatmul.mubr.msk.f32.gmra.mxu1 %vm4755_vm6, %v2758_v34  ;;  %v2760_v38 = vld [vmem:[%s12476_s6 + $0x48] sm:$0xff]  ;;  %v2761_v41 = vld [vmem:[%s12476_s6 + $0x50] sm:$0xff]  ;;  %v5125_v53 = vld [vmem:[%s12480_s10] sm:$0xff] }
 0x3a1   :  { %8362 = vmatpush3.msra.mxu0 %v4724_v20  ;;  %v5925_v37 = vsub.f32 %v13133_v25, %v11668_v46  ;;  %8462 = vpow2.f32 %v5935_v19  ;;  %v5941_v18 = vmul.f32 1.442695, %v5920_v48  ;;  %v5926_v11 = vsub.f32 %v13134_v51, %v11668_v46  ;;  %v2759_v20 = vld [vmem:[%s12476_s6 + $0x40] sm:$0xff]  ;;  %8379 = vmatprep.mubr.msk.f32.mxu1 %vm4755_vm6, %v5125_v53 }
 0x3a2   :  { %8363 = vmatprep.subr.mxu0 %v4719_v45  ;;  %8464 = vpow2.f32 %v5937_v33  ;;  %v5943_v62 = vmul.f32 1.442695, %v5921_v23  ;;  %v5927_v60 = vsub.f32 %v11600_v47, %v11668_v46  ;;  %v5947_v9 = vmul.f32 1.442695, %v5923_v28  ;;  %v5129_v0 = vld [vmem:[%s12480_s10 + $0x20] sm:$0xff] }
 0x3a3   :  { %8364 = vmatpush3.msra.mxu0 %v4719_v45  ;;  %8466 = vpow2.f32 %v5939_v39  ;;  %v5929_v17 = vsub.f32 %v13135_v13, %v5916_v10  ;;  %v5949_v57 = vmul.f32 1.442695, %v5924_v2  ;;  %v5930_v44 = vsub.f32 %v13114_v35, %v5916_v10  ;;  %v2754_v35 = vld [vmem:[%s12476_s6 + $0x18] sm:$0xff] }
 0x3a4   :  { %8468 = vpow2.f32 %v5957_v12  ;;  %v5951_v43 = vmul.f32 1.442695, %v5925_v37  ;;  %v5931_v47 = vsub.f32 %v13136_v22, %v5916_v10  ;;  %v5953_v63 = vmul.f32 1.442695, %v5926_v11  ;;  %8341 = vmatmul.mubr.msk.f32.gmra.mxu0 %vm4755_vm6, %v2754_v35 }
 0x3a5   :  { %8470 = vpow2.f32 %v5941_v18  ;;  %v5932_v32 = vsub.f32 %v13137_v31, %v5916_v10  ;;  %v5955_v46 = vmul.f32 1.442695, %v5927_v60  ;;  %v5933_v45 = vsub.f32 %v11610_v49, %v5916_v10  ;;  %8365 = vmatprep.mubr.msk.f32.mxu0 %vm4755_vm6, %v2759_v20 }
 0x3a6   :  { %8472 = vpow2.f32 %v5943_v62  ;;  %v5959_v42 = vmul.f32 1.442695, %v5929_v17  ;;  %v5934_v26 = vsub.f32 %v11676_v4, %v5916_v10  ;;  %v5961_v56 = vmul.f32 1.442695, %v5930_v44  ;;  %v2762_v4 = vld [vmem:[%s12476_s6 + $0x58] sm:$0xff] }
 0x3a7   :  { %8474 = vpow2.f32 %v5947_v9  ;;  %v5963_v55 = vmul.f32 1.442695, %v5931_v47  ;;  %v5965_v49 = vmul.f32 1.442695, %v5932_v32  ;;  %v5967_v58 = vmul.f32 1.442695, %v5933_v45 }
 0x3a8   :  { %8476 = vpow2.f32 %v5949_v57  ;;  %8366 = vmatmul.mubr.msk.f32.vlgmr.msra.gmra.mxu0 %vm4755_vm6, %v2760_v38  ;;  %v5969_v6 = vmul.f32 1.442695, %v5934_v26  ;;  %v13152_v47 = vld [vmem:[#allocation103_spill] sm:$0xff] }
 0x3a9   :  { %8478 = vpow2.f32 %v5951_v43  ;;  %8368 = vmatprep.mubr.msk.f32.mxu0 %vm4755_vm6, %v2761_v41  ;;  %v13148_v43 = vld [vmem:[#allocation16_spill] sm:$0xff] }
 0x3aa   :  { %8480 = vpow2.f32 %v5953_v63 }
 0x3ab   :  { %8482 = vpow2.f32 %v5955_v46 }
 0x3ac   :  { %8484 = vpow2.f32 %v5959_v42  ;;  %8369 = vmatmul.mubr.msk.f32.gmra.mxu0 %vm4755_vm6, %v2762_v4  ;;  %v13157_v4 = vld [vmem:[#allocation21_spill] sm:$0xff] }
 0x3ad   :  { %v8461_v15 = vpop.eup %8460  ;;  %8486 = vpow2.f32 %v5961_v56  ;;  %8393 = vmatprep.mubr.msk.f32.mxu0 %vm4755_vm6, %v5129_v0 }
 0x3ae   :  { %v8463_v50 = vpop.eup %8462  ;;  %8488 = vpow2.f32 %v5963_v55  ;;  %v11782_v9 = vsel %vm10733_vm7, 0.0, %v8461_v15  ;;  %vm13153_vm7 = vnez %v13152_v47 }
 0x3af   :  { %v8465_v52 = vpop.eup %8464  ;;  %8490 = vpow2.f32 %v5965_v49  ;;  %v11748_v16 = vsel %vm9784_vm8, 0.0, %v8463_v50  ;;  %vm13142_vm8 = vmmov %vm13140_vm0 }
 0x3b0   :  { %v8467_v36 = vpop.eup %8466  ;;  %8492 = vpow2.f32 %v5967_v58  ;;  %v11753_v54 = vsel %vm9791_vm9, 0.0, %v8465_v52  ;;  %v5989_v48 = vsel %vm13140_vm0, %v11748_v16, 0.0 }
 0x3b1   :  { %v8469_v23 = vpop.eup %8468  ;;  %8494 = vpow2.f32 %v5969_v6  ;;  %v11760_v8 = vsel %vm10190_vm15, 0.0, %v8467_v36  ;;  %v5990_v28 = vsel %vm13142_vm8, %v11753_v54, 0.0  ;;  %vm13155_vm8 = vmmov %vm13140_vm0 }
 0x3b2   :  { %v8471_v33 = vpop.eup %8470  ;;  %v5991_v39 = vadd.f32 %v5990_v28, %v5989_v48  ;;  %v5992_v2 = vsel %vm13144_vm5, %v11760_v8, 0.0  ;;  %v11814_v41 = vsel %vm10737_vm11, 0.0, %v8469_v23  ;;  %vm13156_vm5 = vmmov %vm13140_vm0  ;;  %vm13161_vm11 = vnez %v13160_v30 }
 0x3b3   :  { %v8473_v10 = vpop.eup %8472  ;;  %v11766_v27 = vsel %vm10264_vm12, 0.0, %v8471_v33  ;;  %vm13147_vm12 = vmmov %vm13140_vm0 }
 0x3b4   :  { %v8475_v25 = vpop.eup %8474  ;;  %v11772_v37 = vsel %vm10659_vm2, 0.0, %v8473_v10  ;;  %v5993_v18 = vadd.f32 %v5992_v2, %v5991_v39  ;;  %v5994_v62 = vsel %vm13145_vm13, %v11766_v27, 0.0  ;;  %vm13150_vm2 = vmmov %vm13140_vm0 }
 0x3b5   :  { %v8477_v51 = vpop.eup %8476  ;;  %v11776_v11 = vsel %vm9791_vm9, 0.0, %v8475_v25  ;;  %vm13149_vm9 = vnez %v13148_v43  ;;  %v5996_v5 = vsel %vm13150_vm2, %v11772_v37, 0.0  ;;  %vm13162_vm13 = vmmov %vm13140_vm0 }
 0x3b6   :  { %v8479_v60 = vpop.eup %8478  ;;  %v11786_v17 = vsel %vm9839_vm10, 0.0, %v8477_v51  ;;  %v5995_v21 = vadd.f32 %v5994_v62, %v5993_v18  ;;  %v6000_v57 = vsel %vm13147_vm12, %v11776_v11, 0.0  ;;  %vm13154_vm10 = vmmov %vm13140_vm0 }
 0x3b7   :  { %v8481_v44 = vpop.eup %8480  ;;  %v11792_v59 = vsel %vm13149_vm9, 0.0, %v8479_v60  ;;  %v6001_v1 = vsel %vm13151_vm3, %v11786_v17, 0.0  ;;  %v5998_v31 = vsel %vm13154_vm10, %v11782_v9, 0.0  ;;  %vm13163_vm12 = vmmov %vm13140_vm0  ;;  %vm7387_vm10 = vcmask 1042432  }
 0x3b8   :  { %v8483_v22 = vpop.eup %8482  ;;  %v11800_v63 = vsel %vm13153_vm7, 0.0, %v8481_v44  ;;  %v5997_v35 = vadd.f32 %v5996_v5, %v5995_v21  ;;  %v6002_v34 = vadd.f32 %v6001_v1, %v6000_v57  ;;  %v6003_v32 = vsel %vm13140_vm0, %v11792_v59, 0.0  ;;  %vm13165_vm2 = vmmov %vm13140_vm0 }
 0x3b9   :  { %v8485_v20 = vpop.eup %8484  ;;  %v11808_v45 = vsel %vm12996_vm14, 0.0, %v8483_v22  ;;  %v6005_v49 = vsel %vm13155_vm8, %v11800_v63, 0.0  ;;  %vm13158_vm14 = vnez %v13157_v4  ;;  %vm13166_vm3 = vmmov %vm13140_vm0 }
 0x3ba   :  { %v8487_v46 = vpop.eup %8486  ;;  %v5983_v42 = vsel %vm10190_vm15, 0.0, %v8485_v20  ;;  %v5999_v38 = vadd.f32 %v5998_v31, %v5997_v35  ;;  %v6004_v26 = vadd.f32 %v6003_v32, %v6002_v34  ;;  %vm13159_vm15 = vmmov %vm13140_vm0  ;;  %v6007_v61 = vsel %vm13162_vm13, %v11808_v45, 0.0 }
 0x3bb   :  { %v8489_v56 = vpop.eup %8488  ;;  %v5984_v55 = vsel %vm13149_vm9, 0.0, %v8487_v46  ;;  %v6011_v3 = vsel %vm13156_vm5, %v5983_v42, 0.0  ;;  %vm13164_vm9 = vmmov %vm13140_vm0 }
 0x3bc   :  { %v8491_v58 = vpop.eup %8490  ;;  %v5985_v15 = vsel %vm13158_vm14, 0.0, %v8489_v56  ;;  %v6006_v6 = vadd.f32 %v6005_v49, %v6004_v26  ;;  %v6012_v53 = vsel %vm13159_vm15, %v5984_v55, 0.0  ;;  %v6022_v0 = vmax.f32 %v5999_v38, 1e-30  ;;  %vm13167_vm7 = vmmov %vm13140_vm0 }
 0x3bd   :  { %v8493_v50 = vpop.eup %8492  ;;  %v5986_v52 = vsel %vm13161_vm11, 0.0, %v8491_v58  ;;  %v6013_v36 = vadd.f32 %v6012_v53, %v6011_v3  ;;  %v6014_v23 = vsel %vm13163_vm12, %v5985_v15, 0.0  ;;  %v6009_v28 = vsel %vm13164_vm9, %v11814_v41, 0.0 }
 0x3be   :  { %v8495_v29 = vpop.eup %8494  ;;  %v6008_v48 = vadd.f32 %v6007_v61, %v6006_v6  ;;  %8496 = vrcp.f32 %v6022_v0  ;;  %v5987_v19 = vsel %vm10677_vm4, 0.0, %v8493_v50  ;;  %v6016_v10 = vsel %vm13165_vm2, %v5986_v52, 0.0 }
 0x3bf   :  { %v6015_v33 = vadd.f32 %v6014_v23, %v6013_v36  ;;  %v11836_v12 = vsel %vm10764_vm1, 0.0, %v8495_v29  ;;  %v6018_v25 = vsel %vm13166_vm3, %v5987_v19, 0.0  ;;  %vm13202_vm4 = vcmask 1041409  }
 0x3c0   :  { %v6010_v39 = vadd.f32 %v6009_v28, %v6008_v48  ;;  %v6020_v24 = vsel %vm13167_vm7, %v11836_v12, 0.0  ;;  %vm13204_vm0 = vmmov %vm13202_vm4 }
 0x3c1   :  { %v6017_v2 = vadd.f32 %v6016_v10, %v6015_v33 }
 0x3c2   :  { %v6023_v18 = vmax.f32 %v6010_v39, 1e-30 }
 0x3c3   :  { %v6019_v51 = vadd.f32 %v6018_v25, %v6017_v2 }
 0x3c4   :  { %8498 = vrcp.f32 %v6023_v18 }
 0x3c5   :  { %v6021_v62 = vadd.f32 %v6020_v24, %v6019_v51 }
 0x3c7   :  { %v6024_v60 = vmax.f32 %v6021_v62, 1e-30 }
 0x3c9   :  { %8500 = vrcp.f32 %v6024_v60 }
 0x3cb   :  { %v8497_v13 = vpop.eup %8496 }
 0x3cc   :  { %v6028_v21 = vmul.f32 %v8497_v13, %v6022_v0 }
 0x3ce   :  { %v6031_v57 = vsub.f32 2.0, %v6028_v21 }
 0x3d0   :  { %v6034_v44 = vmul.f32 %v8497_v13, %v6031_v57 }
 0x3d1   :  { %v8499_v43 = vpop.eup %8498 }
 0x3d2   :  { %v6029_v40 = vmul.f32 %v8499_v43, %v6023_v18  ;;  %v6037_v1 = vmul.f32 %v6034_v44, %v11748_v16  ;;  %v6038_v22 = vmul.f32 %v6034_v44, %v11753_v54  ;;  %v6039_v16 = vmul.f32 %v6034_v44, %v11760_v8 }
 0x3d3   :  { %v6041_v49 = vmul.f32 %v6034_v44, %v11772_v37  ;;  %v6042_v0 = vmul.f32 %v6034_v44, %v11782_v9 }
 0x3d4   :  { %v6032_v5 = vsub.f32 2.0, %v6029_v40  ;;  %v11850_v32 = vrot.slane %v6037_v1, %v12918_v7  ;;  %v11853_v46 = vrot.slane %v6038_v22, %v12918_v7  ;;  %v11880_v37 = vrot.slane %v6039_v16, %v12918_v7  ;;  %v13168_v16 = vld [vmem:[#allocation48_spill] sm:$0xff] }
 0x3d5   :  { %v11926_v39 = vrot.slane %v6041_v49, %v12918_v7  ;;  %v11945_v24 = vrot.slane %v6042_v0, %v12918_v7 }
 0x3d6   :  { %v8501_v47 = vpop.eup %8500  ;;  %v11843_v35 = vmul.f32 %v8499_v43, %v6032_v5  ;;  %v6080_v3 = vcombine.high %v11850_v32, %v11850_v32  ;;  %v6104_v8 = vcombine.high %v11853_v46, %v11853_v46  ;;  %v6128_v23 = vcombine.high %v11880_v37, %v11880_v37 }
 0x3d7   :  { %v6030_v34 = vmul.f32 %v8501_v47, %v6024_v60  ;;  %v6176_v5 = vcombine.high %v11926_v39, %v11926_v39 }
 0x3d8   :  { %v6043_v20 = vmul.f32 %v11843_v35, %v11776_v11  ;;  %v6044_v31 = vmul.f32 %v11843_v35, %v11786_v17  ;;  %v6045_v11 = vmul.f32 %v11843_v35, %v11792_v59  ;;  %v6040_v17 = vmul.f32 %v6034_v44, %v11766_v27 }
 0x3d9   :  { %v6033_v38 = vsub.f32 2.0, %v6030_v34  ;;  %v6046_v27 = vmul.f32 %v11843_v35, %v11800_v63  ;;  %v11898_v30 = vrot.slane %v6080_v3, %v12918_v7  ;;  %v11901_v61 = vrot.slane %v6104_v8, %v12918_v7 }
 0x3da   :  { %v11857_v54 = vrot.slane %v6043_v20, %v12918_v7  ;;  %v11864_v56 = vrot.slane %v6044_v31, %v12918_v7  ;;  %v11920_v28 = vrot.slane %v6040_v17, %v12918_v7  ;;  %v11956_v57 = vrot.slane %v6128_v23, %v12918_v7  ;;  %v13169_v17 = vld [vmem:[#allocation49_spill] sm:$0xff] }
 0x3db   :  { %v11859_v26 = vmul.f32 %v8501_v47, %v6033_v38  ;;  %v11923_v33 = vrot.slane %v6046_v27, %v12918_v7  ;;  %v6512_v62 = vrot.slane %v11898_v30, %v12921_v14  ;;  %v6528_v60 = vrot.slane %v11901_v61, %v12921_v14 }
 0x3dc   :  { %v6224_v59 = vcombine.high %v11857_v54, %v11857_v54  ;;  %v6248_v53 = vcombine.high %v11864_v56, %v11864_v56  ;;  %v6152_v44 = vcombine.high %v11920_v28, %v11920_v28  ;;  %v6200_v38 = vcombine.high %v11945_v24, %v11945_v24 }
 0x3dd   :  { %v6049_v58 = vmul.f32 %v11859_v26, %v5983_v42  ;;  %v6050_v4 = vmul.f32 %v11859_v26, %v5984_v55  ;;  %v6051_v6 = vmul.f32 %v11859_v26, %v5985_v15  ;;  %v6047_v42 = vmul.f32 %v11843_v35, %v11808_v45 }
 0x3de   :  { %v11888_v55 = vrot.slane %v6045_v11, %v12918_v7  ;;  %v6052_v63 = vmul.f32 %v11859_v26, %v5986_v52  ;;  %v11907_v45 = vrot.slane %v6224_v59, %v12918_v7  ;;  %v11910_v36 = vrot.slane %v6248_v53, %v12918_v7 }
 0x3df   :  { %v11891_v15 = vrot.slane %v6049_v58, %v12918_v7  ;;  %v11894_v50 = vrot.slane %v6050_v4, %v12918_v7  ;;  %v11904_v9 = vrot.slane %v6051_v6, %v12918_v7  ;;  %v6053_v48 = vmul.f32 %v11859_v26, %v5987_v19 }
 0x3e0   :  { %v6272_v10 = vcombine.high %v11888_v55, %v11888_v55  ;;  %v11937_v25 = vrot.slane %v6047_v42, %v12918_v7  ;;  %v11942_v51 = vrot.slane %v6052_v63, %v12918_v7  ;;  %v6608_v13 = vrot.slane %v11907_v45, %v12921_v14 }
 0x3e1   :  { %v6368_v29 = vcombine.high %v11891_v15, %v11891_v15  ;;  %v6392_v52 = vcombine.high %v11894_v50, %v11894_v50  ;;  %v6416_v18 = vcombine.high %v11904_v9, %v11904_v9  ;;  %v6624_v21 = vrot.slane %v11910_v36, %v12921_v14 }
 0x3e2   :  { %v6296_v43 = vcombine.high %v11923_v33, %v11923_v33  ;;  %v11963_v40 = vrot.slane %v6053_v48, %v12918_v7  ;;  %v11968_v1 = vrot.slane %v6272_v10, %v12918_v7  ;;  %v6320_v34 = vcombine.high %v11937_v25, %v11937_v25 }
 0x3e3   :  { %v11931_v2 = vrot.slane %v6368_v29, %v12918_v7  ;;  %v11934_v19 = vrot.slane %v6392_v52, %v12918_v7  ;;  %v11977_v20 = vrot.slane %v6416_v18, %v12918_v7  ;;  %v6440_v31 = vcombine.high %v11942_v51, %v11942_v51 }
 0x3e4   :  { %v6866_v11 = vmul.f32 %v13168_v16, %v6512_v62  ;;  %v6870_v49 = vmul.f32 %v13169_v17, %v6528_v60  ;;  %v6890_v3 = vmul.f32 %v13168_v16, %v6608_v13  ;;  %v6894_v8 = vmul.f32 %v13169_v17, %v6624_v21  ;;  %v13170_v13 = vld [vmem:[#allocation93_spill] sm:$0xff] }
 0x3e5   :  { %v6704_v22 = vrot.slane %v11931_v2, %v12921_v14  ;;  %v6720_v47 = vrot.slane %v11934_v19, %v12921_v14  ;;  %v11988_v58 = vrot.slane %v6152_v44, %v12918_v7  ;;  %v11991_v4 = vrot.slane %v6296_v43, %v12918_v7 }
 0x3e6   :  { %v6464_v6 = vcombine.high %v11963_v40, %v11963_v40  ;;  %v6544_v59 = vrot.slane %v11956_v57, %v12921_v14  ;;  %v6640_v27 = vrot.slane %v11968_v1, %v12921_v14  ;;  %v6048_v42 = vmul.f32 %v11843_v35, %v11814_v41 }
 0x3e7   :  { %v6914_v53 = vmul.f32 %v13168_v16, %v6704_v22  ;;  %v6918_v0 = vmul.f32 %v13169_v17, %v6720_v47  ;;  %v12004_v63 = vrot.slane %v6176_v5, %v12918_v7  ;;  %v12007_v29 = vrot.slane %v6320_v34, %v12918_v7  ;;  %v8273_v17 = vpop.f32.mrf.mxu0 }
 0x3e8   :  { %v12010_v52 = vrot.slane %v6440_v31, %v12918_v7  ;;  %v6736_v48 = vrot.slane %v11977_v20, %v12921_v14  ;;  %v6942_v23 = vadd.f32 %v6870_v49, %v6866_v11  ;;  %v6962_v10 = vadd.f32 %v6894_v8, %v6890_v3  ;;  %v13171_v49 = vld [vmem:[#allocation94_spill] sm:$0xff] }
 0x3e9   :  { %v6054_v18 = vmul.f32 %v11859_v26, %v11836_v12  ;;  %v12017_v62 = vrot.slane %v6464_v6, %v12918_v7  ;;  %v6560_v41 = vrot.slane %v11988_v58, %v12921_v14  ;;  %v6656_v35 = vrot.slane %v11991_v4, %v12921_v14 }
 0x3ea   :  { %v12024_v60 = vrot.slane %v6048_v42, %v12918_v7  ;;  %v6874_v21 = vmul.f32 %v13170_v13, %v6544_v59  ;;  %v6898_v44 = vmul.f32 %v13170_v13, %v6640_v27  ;;  %v6982_v43 = vadd.f32 %v6918_v0, %v6914_v53 }
 0x3eb   :  { %v12029_v5 = vrot.slane %v6200_v38, %v12918_v7  ;;  %v6576_v12 = vrot.slane %v12004_v63, %v12921_v14  ;;  %v6672_v26 = vrot.slane %v12007_v29, %v12921_v14  ;;  %v6752_v22 = vrot.slane %v12010_v52, %v12921_v14 }
 0x3ec   :  { %v6922_v47 = vmul.f32 %v13170_v13, %v6736_v48  ;;  %v6943_v34 = vadd.f32 %v6942_v23, %v6874_v21  ;;  %v6963_v31 = vadd.f32 %v6962_v10, %v6898_v44  ;;  %v12039_v16 = vrot.slane %v6054_v18, %v12918_v7  ;;  %v12054_v18 = vpop.f32.mrf.mxu1 }
 0x3ed   :  { %v6768_v38 = vrot.slane %v12017_v62, %v12921_v14  ;;  %v6344_v11 = vcombine.high %v12024_v60, %v12024_v60  ;;  %v6878_v3 = vmul.f32 %v13171_v49, %v6560_v41  ;;  %v6902_v8 = vmul.f32 %v13171_v49, %v6656_v35  ;;  %13173 = vst [vmem:[#allocation20_spill] sm:$0xff] %v12054_v18 }
 0x3ee   :  { %v6983_v6 = vadd.f32 %v6982_v43, %v6922_v47  ;;  %v6592_v59 = vrot.slane %v12029_v5, %v12921_v14  ;;  %v6882_v27 = vmul.f32 %v8273_v17, %v6576_v12  ;;  %v6906_v53 = vmul.f32 %v8273_v17, %v6672_v26 }
 0x3ef   :  { %v6926_v0 = vmul.f32 %v13171_v49, %v6752_v22  ;;  %v6944_v42 = vadd.f32 %v6943_v34, %v6878_v3  ;;  %v6964_v48 = vadd.f32 %v6963_v31, %v6902_v8  ;;  %v6488_v23 = vcombine.high %v12039_v16, %v12039_v16 }
 0x3f0   :  { %v12052_v10 = vmul.f32 %v8273_v17, %v6768_v38  ;;  %v12057_v41 = vrot.slane %v6344_v11, %v12918_v7  ;;  %v12061_v35 = vrot.slane %v11850_v32, %v12918_v7  ;;  %v12065_v13 = vrot.slane %v11853_v46, %v12918_v7 }
 0x3f1   :  { %v12067_v21 = vadd.f32 %v6983_v6, %v6926_v0  ;;  %v12070_v44 = vmul.f32 %v12054_v18, %v6592_v59  ;;  %v12074_v43 = vrot.slane %v11880_v37, %v12918_v7  ;;  %v12078_v12 = vrot.slane %v11920_v28, %v12918_v7  ;;  %v13181_v0 = vld [vmem:[#allocation50_spill] sm:$0xff] }
 0x3f2   :  { %13172 = vst [vmem:[#allocation10_spill] sm:$0xff] %v12052_v10  ;;  %v12082_v32 = vrot.slane %v11857_v54, %v12918_v7  ;;  %v12086_v46 = vrot.slane %v11864_v56, %v12918_v7  ;;  %v12090_v26 = vrot.slane %v11891_v15, %v12918_v7  ;;  %v12094_v37 = vrot.slane %v11894_v50, %v12918_v7 }
 0x3f3   :  { %13174 = vst [vmem:[#allocation42_spill] sm:$0xff] %v12067_v21  ;;  %13175 = vst [vmem:[#allocation105_spill] sm:$0xff] %v12070_v44  ;;  %v12096_v22 = vadd.f32 %v6944_v42, %v6882_v27  ;;  %v12098_v28 = vadd.f32 %v6964_v48, %v6906_v53  ;;  %v12101_v47 = vrot.slane %v6488_v23, %v12918_v7  ;;  %v13182_v48 = vld [vmem:[#allocation51_spill] sm:$0xff] }
 0x3f4   :  { %v12105_v54 = vrot.slane %v11926_v39, %v12918_v7  ;;  %v6688_v56 = vrot.slane %v12057_v41, %v12921_v14  ;;  %v12111_v15 = vrot.slane %v11888_v55, %v12918_v7  ;;  %v12115_v50 = vrot.slane %v11923_v33, %v12918_v7 }
 0x3f5   :  { %13176 = vst [vmem:[#allocation32_spill] sm:$0xff] %v12096_v22  ;;  %13177 = vst [vmem:[#allocation33_spill] sm:$0xff] %v12098_v28  ;;  %v12119_v34 = vrot.slane %v11937_v25, %v12918_v7  ;;  %v12123_v31 = vrot.slane %v11904_v9, %v12918_v7  ;;  %v12127_v39 = vrot.slane %v11942_v51, %v12918_v7  ;;  %v13183_v22 = vld [vmem:[#allocation95_spill] sm:$0xff] }
 0x3f6   :  { %13178 = vst [vmem:[#allocation76_spill] sm:$0xff] %v12101_v47  ;;  %v6508_v55 = vrot.slane %v12061_v35, %v12921_v14  ;;  %v6524_v38 = vrot.slane %v12065_v13, %v12921_v14  ;;  %v6604_v33 = vrot.slane %v12082_v32, %v12921_v14  ;;  %v6620_v25 = vrot.slane %v12086_v46, %v12921_v14  ;;  %v13184_v47 = vld [vmem:[#allocation96_spill] sm:$0xff] }
 0x3f7   :  { %13179 = vst [vmem:[#allocation34_spill] sm:$0xff] %v12127_v39  ;;  %v6700_v9 = vrot.slane %v12090_v26, %v12921_v14  ;;  %v6716_v11 = vrot.slane %v12094_v37, %v12921_v14  ;;  %v12143_v51 = vrot.slane %v11963_v40, %v12918_v7  ;;  %v6540_v17 = vrot.slane %v12074_v43, %v12921_v14 }
 0x3f8   :  { %v6556_v49 = vrot.slane %v12078_v12, %v12921_v14  ;;  %v6572_v3 = vrot.slane %v12105_v54, %v12921_v14  ;;  %v12152_v8 = vmul.f32 %v12054_v18, %v6688_v56  ;;  %v6636_v6 = vrot.slane %v12111_v15, %v12921_v14  ;;  %v12166_v56 = vpop.f32.mrf.mxu0 }
 0x3f9   :  { %v6652_v59 = vrot.slane %v12115_v50, %v12921_v14  ;;  %v6668_v40 = vrot.slane %v12119_v34, %v12921_v14  ;;  %v6732_v27 = vrot.slane %v12123_v31, %v12921_v14  ;;  %v6748_v53 = vrot.slane %v12127_v39, %v12921_v14 }
 0x3fa   :  { %13180 = vst [vmem:[#allocation35_spill] sm:$0xff] %v12152_v8  ;;  %v6865_v42 = vmul.f32 %v6508_v55, %v13181_v0  ;;  %v6869_v23 = vmul.f32 %v6524_v38, %v13182_v48  ;;  %v6889_v18 = vmul.f32 %v6604_v33, %v13181_v0  ;;  %v6893_v21 = vmul.f32 %v6620_v25, %v13182_v48 }
 0x3fb   :  { %v6913_v10 = vmul.f32 %v6700_v9, %v13181_v0  ;;  %v6917_v28 = vmul.f32 %v6716_v11, %v13182_v48  ;;  %v6764_v8 = vrot.slane %v12143_v51, %v12921_v14  ;;  %v6873_v44 = vmul.f32 %v6540_v17, %v13183_v22  ;;  %v13185_v48 = vld [vmem:[#allocation53_spill] sm:$0xff] }
 0x3fc   :  { %v6877_v39 = vmul.f32 %v6556_v49, %v13184_v47  ;;  %v12177_v55 = vmul.f32 %v6572_v3, %v12166_v56  ;;  %v6897_v38 = vmul.f32 %v6636_v6, %v13183_v22  ;;  %v6901_v33 = vmul.f32 %v6652_v59, %v13184_v47 }
 0x3fd   :  { %v6096_v25 = vcombine.high %v11898_v30, %v11898_v30  ;;  %v6120_v9 = vcombine.high %v11901_v61, %v11901_v61  ;;  %v12186_v11 = vmul.f32 %v6668_v40, %v12166_v56  ;;  %v6937_v0 = vadd.f32 %v6869_v23, %v6865_v42 }
 0x3fe   :  { %v6240_v17 = vcombine.high %v11907_v45, %v11907_v45  ;;  %v6264_v49 = vcombine.high %v11910_v36, %v11910_v36  ;;  %v6921_v3 = vmul.f32 %v6732_v27, %v13183_v22  ;;  %v6957_v6 = vadd.f32 %v6893_v21, %v6889_v18 }
 0x3ff   :  { %v6977_v59 = vadd.f32 %v6917_v28, %v6913_v10  ;;  %v12195_v30 = vrot.slane %v11945_v24, %v12918_v7  ;;  %v12198_v61 = vmul.f32 %v6748_v53, %v13184_v47  ;;  %v6144_v40 = vcombine.high %v11956_v57, %v11956_v57 }
 0x400   :  { %v6384_v45 = vcombine.high %v11931_v2, %v11931_v2  ;;  %v6408_v36 = vcombine.high %v11934_v19, %v11934_v19  ;;  %v12208_v18 = vrot.slane %v12024_v60, %v12918_v7  ;;  %v12212_v24 = vrot.slane %v12039_v16, %v12918_v7 }
 0x401   :  { %v6520_v10 = vrot.slane %v6096_v25, %v12921_v14  ;;  %v6536_v21 = vrot.slane %v6120_v9, %v12921_v14  ;;  %v6938_v22 = vadd.f32 %v6937_v0, %v6873_v44  ;;  %v6288_v57 = vcombine.high %v11968_v1, %v11968_v1 }
 0x402   :  { %v6616_v2 = vrot.slane %v6240_v17, %v12921_v14  ;;  %v6632_v19 = vrot.slane %v6264_v49, %v12921_v14  ;;  %v6958_v28 = vadd.f32 %v6957_v6, %v6897_v38  ;;  %v12220_v47 = vadd.f32 %v6977_v59, %v6921_v3  ;;  %v13186_v38 = vld [vmem:[#allocation54_spill] sm:$0xff]  ;;  %v13187_v6 = vld [vmem:[#allocation97_spill] sm:$0xff] }
 0x403   :  { %v6588_v60 = vrot.slane %v12195_v30, %v12921_v14  ;;  %v6712_v7 = vrot.slane %v6384_v45, %v12921_v14  ;;  %v6168_v16 = vcombine.high %v11988_v58, %v11988_v58  ;;  %v6192_v44 = vcombine.high %v12004_v63, %v12004_v63 }
 0x404   :  { %v6552_v1 = vrot.slane %v6144_v40, %v12921_v14  ;;  %v6728_v27 = vrot.slane %v6408_v36, %v12921_v14  ;;  %v6312_v53 = vcombine.high %v11991_v4, %v11991_v4  ;;  %v6432_v42 = vcombine.high %v11977_v20, %v11977_v20 }
 0x405   :  { %v6868_v23 = vmul.f32 %v13185_v48, %v6520_v10  ;;  %v6872_v25 = vmul.f32 %v13186_v38, %v6536_v21  ;;  %v6336_v58 = vcombine.high %v12007_v29, %v12007_v29  ;;  %v6648_v9 = vrot.slane %v6288_v57, %v12921_v14 }
 0x406   :  { %v6892_v63 = vmul.f32 %v13185_v48, %v6616_v2  ;;  %v6896_v0 = vmul.f32 %v13186_v38, %v6632_v19  ;;  %v6684_v17 = vrot.slane %v12208_v18, %v12921_v14  ;;  %v6456_v4 = vcombine.high %v12010_v52, %v12010_v52 }
 0x407   :  { %v6916_v20 = vmul.f32 %v13185_v48, %v6712_v7  ;;  %v6920_v49 = vmul.f32 %v13186_v38, %v6728_v27  ;;  %v6568_v3 = vrot.slane %v6168_v16, %v12921_v14  ;;  %v6584_v29 = vrot.slane %v6192_v44, %v12921_v14  ;;  %v12263_v44 = vpop.f32.mrf.mxu0  ;;  %v12267_v27 = vpop.f32.mrf.mxu1 }
 0x408   :  { %v6876_v59 = vmul.f32 %v13187_v6, %v6552_v1  ;;  %v6952_v40 = vadd.f32 %v6872_v25, %v6868_v23  ;;  %v6744_v45 = vrot.slane %v6432_v42, %v12921_v14  ;;  %v6972_v36 = vadd.f32 %v6896_v0, %v6892_v63 }
 0x409   :  { %v6216_v10 = vcombine.high %v12029_v5, %v12029_v5  ;;  %v6360_v52 = vcombine.high %v12057_v41, %v12057_v41  ;;  %v6664_v21 = vrot.slane %v6312_v53, %v12921_v14  ;;  %v6680_v57 = vrot.slane %v6336_v58, %v12921_v14  ;;  %v13188_v53 = vld [vmem:[#allocation98_spill] sm:$0xff] }
 0x40a   :  { %v6900_v2 = vmul.f32 %v13187_v6, %v6648_v9  ;;  %v6953_v19 = vadd.f32 %v6952_v40, %v6876_v59  ;;  %v12259_v7 = vadd.f32 %v6938_v22, %v6877_v39  ;;  %v12261_v16 = vadd.f32 %v6958_v28, %v6901_v33 }
 0x40b   :  { %v6480_v1 = vcombine.high %v12017_v62, %v12017_v62  ;;  %v6992_v5 = vadd.f32 %v6920_v49, %v6916_v20  ;;  %v12270_v41 = vrot.slane %v6456_v4, %v12921_v14  ;;  %v6880_v42 = vmul.f32 %v13188_v53, %v6568_v3  ;;  %v12291_v49 = vpop.f32.mrf.mxu1 }
 0x40c   :  { %v6884_v48 = vmul.f32 %v12263_v44, %v6584_v29  ;;  %v6973_v23 = vadd.f32 %v6972_v36, %v6900_v2  ;;  %v6924_v39 = vmul.f32 %v13187_v6, %v6744_v45  ;;  %v6600_v33 = vrot.slane %v6216_v10, %v12921_v14  ;;  %v13189_v2 = vld [vmem:[#allocation58_spill] sm:$0xff] }
 0x40d   :  { %v6696_v22 = vrot.slane %v6360_v52, %v12921_v14  ;;  %v6095_v28 = vcombine.high %v12061_v35, %v12061_v35  ;;  %v6904_v38 = vmul.f32 %v13188_v53, %v6664_v21  ;;  %v6908_v25 = vmul.f32 %v12263_v44, %v6680_v57 }
 0x40e   :  { %v6954_v58 = vadd.f32 %v6953_v19, %v6880_v42  ;;  %v6119_v9 = vcombine.high %v12065_v13, %v12065_v13  ;;  %v12283_v63 = vadd.f32 %v6992_v5, %v6924_v39  ;;  %v6143_v0 = vcombine.high %v12074_v43, %v12074_v43  ;;  %v13190_v19 = vld [vmem:[#allocation59_spill] sm:$0xff] }
 0x40f   :  { %v6239_v4 = vcombine.high %v12082_v32, %v12082_v32  ;;  %v6263_v20 = vcombine.high %v12086_v46, %v12086_v46  ;;  %v6974_v35 = vadd.f32 %v6973_v23, %v6904_v38  ;;  %v6167_v3 = vcombine.high %v12078_v12, %v12078_v12 }
 0x410   :  { %v6383_v13 = vcombine.high %v12090_v26, %v12090_v26  ;;  %v6407_v29 = vcombine.high %v12094_v37, %v12094_v37  ;;  %v6888_v43 = vmul.f32 %v12291_v49, %v6600_v33  ;;  %v6912_v6 = vmul.f32 %v12291_v49, %v6696_v22 }
 0x411   :  { %v6287_v32 = vcombine.high %v12111_v15, %v12111_v15  ;;  %v6516_v46 = vrot.slane %v6095_v28, %v12921_v14  ;;  %v6955_v59 = vadd.f32 %v6954_v58, %v6884_v48  ;;  %v6191_v40 = vcombine.high %v12105_v54, %v12105_v54 }
 0x412   :  { %v6311_v12 = vcombine.high %v12115_v50, %v12115_v50  ;;  %v6532_v26 = vrot.slane %v6119_v9, %v12921_v14  ;;  %v6335_v37 = vcombine.high %v12119_v34, %v12119_v34  ;;  %v6431_v45 = vcombine.high %v12123_v31, %v12123_v31  ;;  %v13191_v31 = vld [vmem:[#allocation34_spill] sm:$0xff]  ;;  %v13193_v9 = vld [vmem:[#allocation100_spill] sm:$0xff] }
 0x413   :  { %v6612_v36 = vrot.slane %v6239_v4, %v12921_v14  ;;  %v6628_v15 = vrot.slane %v6263_v20, %v12921_v14  ;;  %v6548_v10 = vrot.slane %v6143_v0, %v12921_v14  ;;  %v6564_v52 = vrot.slane %v6167_v3, %v12921_v14 }
 0x414   :  { %v6708_v54 = vrot.slane %v6383_v13, %v12921_v14  ;;  %v6724_v50 = vrot.slane %v6407_v29, %v12921_v14  ;;  %v6975_v21 = vadd.f32 %v6974_v35, %v6908_v25  ;;  %v6644_v57 = vrot.slane %v6287_v32, %v12921_v14  ;;  %v13192_v25 = vld [vmem:[#allocation99_spill] sm:$0xff]  ;;  %v2493_v35 = vpop.f32.mrf.mxu0 }
 0x415   :  { %v6867_v34 = vmul.f32 %v6516_v46, %v13189_v2  ;;  %v6871_v5 = vmul.f32 %v6532_v26, %v13190_v19  ;;  %v6455_v42 = vcombine.high %v13191_v31, %v13191_v31  ;;  %v6479_v48 = vcombine.high %v12143_v51, %v12143_v51  ;;  %v13201_v51 = vld [vmem:[#allocation20_spill] sm:$0xff] }
 0x416   :  { %v6660_v23 = vrot.slane %v6311_v12, %v12921_v14  ;;  %v6891_v39 = vmul.f32 %v6612_v36, %v13189_v2  ;;  %v6580_v33 = vrot.slane %v6191_v40, %v12921_v14  ;;  %v6676_v22 = vrot.slane %v6335_v37, %v12921_v14 }
 0x417   :  { %v6740_v28 = vrot.slane %v6431_v45, %v12921_v14  ;;  %v6895_v38 = vmul.f32 %v6628_v15, %v13190_v19  ;;  %v6875_v58 = vmul.f32 %v6548_v10, %v13192_v25  ;;  %v6879_v0 = vmul.f32 %v6564_v52, %v13193_v9 }
 0x418   :  { %v6915_v4 = vmul.f32 %v6708_v54, %v13189_v2  ;;  %v6919_v20 = vmul.f32 %v6724_v50, %v13190_v19  ;;  %v6899_v3 = vmul.f32 %v6644_v57, %v13192_v25  ;;  %v6947_v13 = vadd.f32 %v6871_v5, %v6867_v34  ;;  %v2742_v50 = vpop.f32.mrf.mxu1 }
 0x419   :  { %v6967_v29 = vadd.f32 %v6895_v38, %v6891_v39  ;;  %v6215_v32 = vcombine.high %v12195_v30, %v12195_v30  ;;  %v6903_v46 = vmul.f32 %v6660_v23, %v13193_v9  ;;  %v6359_v12 = vcombine.high %v12208_v18, %v12208_v18 }
 0x41a   :  { %v6987_v40 = vadd.f32 %v6919_v20, %v6915_v4  ;;  %v6956_v26 = vadd.f32 %v6955_v59, %v6888_v43  ;;  %v6948_v37 = vadd.f32 %v6947_v13, %v6875_v58  ;;  %v6976_v15 = vadd.f32 %v6975_v21, %v6912_v6  ;;  %v13194_v59 = vld [vmem:[#allocation76_spill] sm:$0xff] }
 0x41b   :  { %v6968_v45 = vadd.f32 %v6967_v29, %v6899_v3  ;;  %v6596_v36 = vrot.slane %v6215_v32, %v12921_v14  ;;  %v6756_v10 = vrot.slane %v6455_v42, %v12921_v14  ;;  %v6883_v52 = vmul.f32 %v6580_v33, %v2493_v35  ;;  %v5130_v32 = vld [vmem:[%s12480_s10 + $0x28] sm:$0xff] }
 0x41c   :  { %v6923_v54 = vmul.f32 %v6740_v28, %v13192_v25  ;;  %v6692_v57 = vrot.slane %v6359_v12, %v12921_v14  ;;  %8371 = vmatprep.subr.mxu1 %v6956_v26  ;;  %v6907_v2 = vmul.f32 %v6676_v22, %v2493_v35  ;;  %v6949_v34 = vadd.f32 %v6948_v37, %v6879_v0  ;;  %v13198_v0 = vld [vmem:[#allocation33_spill] sm:$0xff] }
 0x41d   :  { %v6969_v19 = vadd.f32 %v6968_v45, %v6903_v46  ;;  %8385 = vmatprep.subr.mxu0 %v6976_v15  ;;  %8372 = vmatpush3.msra.mxu1 %v6956_v26  ;;  %v6776_v43 = vrot.slane %v6480_v1, %v12921_v14  ;;  %v6928_v6 = vmul.f32 %v13188_v53, %v12270_v41  ;;  %v13199_v46 = vld [vmem:[#allocation10_spill] sm:$0xff]  ;;  %v5131_v45 = vld [vmem:[%s12480_s10 + $0x30] sm:$0xff] }
 0x41e   :  { %v6504_v21 = vcombine.high %v13194_v59, %v13194_v59  ;;  %v6988_v5 = vadd.f32 %v6987_v40, %v6923_v54  ;;  %8386 = vmatpush3.msra.mxu0 %v6976_v15  ;;  %v6950_v31 = vadd.f32 %v6949_v34, %v6883_v52  ;;  %v6887_v23 = vmul.f32 %v6596_v36, %v2742_v50  ;;  %v13200_v40 = vld [vmem:[#allocation42_spill] sm:$0xff]  ;;  %v4738_v34 = vpop.permute.xlu0 %4737 }
 0x41f   :  { %v6970_v42 = vadd.f32 %v6969_v19, %v6907_v2  ;;  %v6911_v39 = vmul.f32 %v6692_v57, %v2742_v50  ;;  %v6994_v33 = vadd.f32 %v12283_v63, %v6928_v6  ;;  %v6772_v22 = vrot.slane %v6479_v48, %v12921_v14  ;;  %v5133_v52 = vld [vmem:[%s12480_s10 + $0x40] sm:$0xff]  ;;  %v5136_v57 = vld [vmem:[%s12480_s10 + $0x58] sm:$0xff] }
 0x420   :  { %v6927_v28 = vmul.f32 %v6756_v10, %v13193_v9  ;;  %v6503_v62 = vcombine.high %v12212_v24, %v12212_v24  ;;  %v6940_v1 = vadd.f32 %v12259_v7, %v12177_v55  ;;  %v6960_v41 = vadd.f32 %v12261_v16, %v12186_v11  ;;  %v13195_v11 = vld [vmem:[#allocation105_spill] sm:$0xff]  ;;  %v13196_v7 = vld [vmem:[#allocation32_spill] sm:$0xff]  ;;  %v13197_v9 = vld [vmem:[#allocation35_spill] sm:$0xff] }
 0x421   :  { %v6951_v53 = vadd.f32 %v6950_v31, %v6887_v23  ;;  %v6971_v38 = vadd.f32 %v6970_v42, %v6911_v39  ;;  %v6885_v63 = vmul.f32 %v6588_v60, %v12267_v27  ;;  %v6932_v48 = vmul.f32 %v12263_v44, %v6776_v43  ;;  %v4743_v42 = vpop.permute.xlu1 %4742 }
 0x422   :  { %v6792_v25 = vrot.slane %v6504_v21, %v12921_v14  ;;  %v6989_v58 = vadd.f32 %v6988_v5, %v6927_v28  ;;  %v6909_v55 = vmul.f32 %v6684_v17, %v12267_v27  ;;  %v6946_v16 = vadd.f32 %v13196_v7, %v13195_v11  ;;  %v4748_v6 = vpop.permute.xlu0 %4747 }
 0x423   :  { %8373 = vmatprep.subr.mxu1 %v6951_v53  ;;  %8387 = vmatprep.subr.mxu0 %v6971_v38  ;;  %v6966_v4 = vadd.f32 %v13198_v0, %v13197_v9  ;;  %v6995_v30 = vadd.f32 %v6994_v33, %v6932_v48  ;;  %v6931_v60 = vmul.f32 %v6772_v22, %v2493_v35  ;;  %v5126_v35 = vld [vmem:[%s12480_s10 + $0x8] sm:$0xff] }
 0x424   :  { %v6788_v44 = vrot.slane %v6503_v62, %v12921_v14  ;;  %8374 = vmatpush3.msra.mxu1 %v6951_v53  ;;  %8388 = vmatpush3.msra.mxu0 %v6971_v38  ;;  %v6784_v20 = vrot.slane %v13194_v59, %v12921_v14  ;;  %v6941_v18 = vadd.f32 %v6940_v1, %v6885_v63 }
 0x425   :  { %8375 = vmatprep.subr.mxu1 %v6946_v16  ;;  %8389 = vmatprep.subr.mxu0 %v6966_v4  ;;  %v6961_v17 = vadd.f32 %v6960_v41, %v6909_v55  ;;  %v6979_v3 = vadd.f32 %v12220_v47, %v12198_v61  ;;  %v6936_v13 = vmul.f32 %v12291_v49, %v6792_v25  ;;  %v5127_v47 = vld [vmem:[%s12480_s10 + $0x10] sm:$0xff]  ;;  %v5050_v22 = vpop.permute.xlu1 %5049 }
 0x426   :  { %v6990_v29 = vadd.f32 %v6989_v58, %v6931_v60  ;;  %8376 = vmatpush3.msra.mxu1 %v6946_v16  ;;  %8390 = vmatpush3.msra.mxu0 %v6966_v4  ;;  %v6985_v12 = vadd.f32 %v13200_v40, %v13199_v46  ;;  %v6929_v61 = vmul.f32 %v6764_v8, %v12166_v56  ;;  %v5055_v21 = vpop.permute.xlu0 %5054 }
 0x427   :  { %8377 = vmatprep.subr.mxu1 %v6941_v18  ;;  %8391 = vmatprep.subr.mxu0 %v6961_v17  ;;  %v6780_v49 = vrot.slane %v12212_v24, %v12921_v14  ;;  %v6935_v26 = vmul.f32 %v6788_v44, %v2742_v50  ;;  %v6996_v37 = vadd.f32 %v6995_v30, %v6936_v13  ;;  %v5132_v14 = vld [vmem:[%s12480_s10 + $0x38] sm:$0xff]  ;;  %v5135_v50 = vld [vmem:[%s12480_s10 + $0x50] sm:$0xff] }
 0x428   :  { %8378 = vmatpush3.msra.mxu1 %v6941_v18  ;;  %8392 = vmatpush3.msra.mxu0 %v6961_v17  ;;  %v6934_v8 = vmul.f32 %v13201_v51, %v6784_v20  ;;  %v6980_v56 = vadd.f32 %v6979_v3, %v6929_v61  ;;  %v5128_v24 = vld [vmem:[%s12480_s10 + $0x18] sm:$0xff] }
 0x429   :  { %8380 = vmatmul.mubr.msk.f32.vlgmr.msra.gmra.mxu1 %vm4755_vm6, %v5126_v35  ;;  %8394 = vmatmul.mubr.msk.f32.vlgmr.msra.gmra.mxu0 %vm4755_vm6, %v5130_v32  ;;  %v6991_v36 = vadd.f32 %v6990_v29, %v6935_v26  ;;  %v6933_v15 = vmul.f32 %v6780_v49, %v12267_v27  ;;  %v5134_v27 = vld [vmem:[%s12480_s10 + $0x48] sm:$0xff]  ;;  %v12435_v48 = vpop.permute.xlu1 %6999 }
 0x42a   :  { %8399 = vmatprep.subr.mxu1 %v6996_v37  ;;  %8382 = vmatprep.mubr.msk.f32.mxu1 %vm4755_vm6, %v5127_v47  ;;  %v6986_v10 = vadd.f32 %v6985_v12, %v6934_v8  ;;  %v12433_v33 = vpop.permute.xlu0 %7004 }
 0x42b   :  { %8400 = vmatpush3.msra.mxu1 %v6996_v37  ;;  %8396 = vmatprep.mubr.msk.f32.mxu0 %vm4755_vm6, %v5131_v45  ;;  %v6981_v54 = vadd.f32 %v6980_v56, %v6933_v15 }
 0x42c   :  { %8401 = vmatprep.subr.mxu1 %v6991_v36 }
 0x42d   :  { %8402 = vmatpush3.msra.mxu1 %v6991_v36  ;;  %8397 = vmatmul.mubr.msk.f32.gmra.mxu0 %vm4755_vm6, %v5132_v14  ;;  %v4753_v3 = vpop.permute.xlu1 %4752 }
 0x42e   :  { %8383 = vmatmul.mubr.msk.f32.gmra.mxu1 %vm4755_vm6, %v5128_v24  ;;  %8403 = vmatprep.subr.mxu1 %v6986_v10  ;;  %v5060_v1 = vpop.permute.xlu0 %5059 }
 0x42f   :  { %8404 = vmatpush3.msra.mxu1 %v6986_v10  ;;  %8407 = vmatprep.mubr.msk.f32.mxu1 %vm4755_vm6, %v5133_v52 }
 0x430   :  { %8405 = vmatprep.subr.mxu1 %v6981_v54 }
 0x431   :  { %8406 = vmatpush3.msra.mxu1 %v6981_v54 }
 0x432   :  { %8408 = vmatmul.mubr.msk.f32.vlgmr.msra.gmra.mxu1 %vm4755_vm6, %v5134_v27  ;;  %v12437_v30 = vpop.permute.xlu0 %7310 }
 0x433   :  { %8410 = vmatprep.mubr.msk.f32.mxu1 %vm4755_vm6, %v5135_v50  ;;  %v12439_v50 = vpop.permute.xlu1 %7009 }
 0x436   :  { %8411 = vmatmul.mubr.msk.f32.gmra.mxu1 %vm4755_vm6, %v5136_v57  ;;  %v5065_v26 = vpop.permute.xlu0 %5064  ;;  %vm13203_vm6 = vcmask 1042434  }
 0x437   :  { %vm13205_vm8 = vmmov %vm13203_vm6 }
 0x45b   :  { %v8339_v2 = vpop.f32.mrf.mxu0  ;;  %v8353_v5 = vpop.f32.mrf.mxu1 }
 0x45c   :  { %v4840_v58 = vadd.f32 %v8339_v2, %v4743_v42  ;;  %v4937_v55 = vadd.f32 %v8353_v5, %v4743_v42 }
 0x45d   :  { %v4834_v19 = vpop.f32.mrf.mxu0  ;;  %v4931_v23 = vpop.f32.mrf.mxu1 }
 0x45e   :  { %v4835_v53 = vadd.f32 %v4834_v19, %v4738_v34  ;;  %v4932_v38 = vadd.f32 %v4931_v23, %v4738_v34  ;;  %v5068_v44 = vmul.f32 %v5055_v21, %v4840_v58  ;;  %v5072_v20 = vmul.f32 %v5055_v21, %v4937_v55  ;;  %v7316_v19 = vpop.permute.xlu1 %7315 }
 0x460   :  { %v8356_v28 = vpop.f32.mrf.mxu1  ;;  %v5067_v0 = vmul.f32 %v5050_v22, %v4835_v53  ;;  %v5071_v4 = vmul.f32 %v5050_v22, %v4932_v38 }
 0x461   :  { %v4947_v40 = vadd.f32 %v8356_v28, %v4753_v3 }
 0x462   :  { %v4941_v41 = vpop.f32.mrf.mxu1  ;;  %v5079_v35 = vadd.f32 %v5068_v44, %v5067_v0  ;;  %v5088_v32 = vadd.f32 %v5072_v20, %v5071_v4  ;;  %v7015_v53 = vpop.permute.xlu1 %7014 }
 0x463   :  { %v4942_v7 = vadd.f32 %v4941_v41, %v4748_v6  ;;  %v5074_v51 = vmul.f32 %v5065_v26, %v4947_v40 }
 0x464   :  { %v8342_v43 = vpop.f32.mrf.mxu0 }
 0x465   :  { %v5073_v17 = vmul.f32 %v5060_v1, %v4942_v7  ;;  %v4850_v46 = vadd.f32 %v8342_v43, %v4753_v3 }
 0x466   :  { %v4844_v59 = vpop.f32.mrf.mxu0 }
 0x467   :  { %v4845_v11 = vadd.f32 %v4844_v59, %v4748_v6  ;;  %v5089_v49 = vadd.f32 %v5088_v32, %v5073_v17  ;;  %v5070_v45 = vmul.f32 %v5065_v26, %v4850_v46  ;;  %v7326_v32 = vpop.permute.xlu1 %7325 }
 0x468   :  { %v8367_v31 = vpop.f32.mrf.mxu0 }
 0x469   :  { %v5034_v16 = vadd.f32 %v8367_v31, %v4743_v42  ;;  %v5069_v18 = vmul.f32 %v5060_v1, %v4845_v11  ;;  %v5090_v36 = vadd.f32 %v5089_v49, %v5074_v51 }
 0x46a   :  { %v5028_v39 = vpop.f32.mrf.mxu0 }
 0x46b   :  { %v5029_v25 = vadd.f32 %v5028_v39, %v4738_v34  ;;  %v5076_v13 = vmul.f32 %v5055_v21, %v5034_v16  ;;  %v5080_v47 = vadd.f32 %v5079_v35, %v5069_v18  ;;  %v5091_v15 = vrot.slane %v5090_v36, 4 }
 0x46c   :  { %v8370_v62 = vpop.f32.mrf.mxu0 }
 0x46d   :  { %v5075_v60 = vmul.f32 %v5050_v22, %v5029_v25  ;;  %v5044_v61 = vadd.f32 %v8370_v62, %v4753_v3  ;;  %v5081_v56 = vadd.f32 %v5080_v47, %v5070_v45  ;;  %v5092_v54 = vadd.f32 %v5091_v15, %v5090_v36  ;;  %v7321_v22 = vpop.permute.xlu0 %7320 }
 0x46e   :  { %v5038_v63 = vpop.f32.mrf.mxu0 }
 0x46f   :  { %v5039_v9 = vadd.f32 %v5038_v63, %v4748_v6  ;;  %v5097_v12 = vadd.f32 %v5076_v13, %v5075_v60  ;;  %v5078_v8 = vmul.f32 %v5065_v26, %v5044_v61  ;;  %v5082_v24 = vrot.slane %v5081_v56, 4 }
 0x470   :  { %v5093_v2 = vrot.slane %v5092_v54, 2 }
 0x471   :  { %v5077_v29 = vmul.f32 %v5060_v1, %v5039_v9  ;;  %v5083_v52 = vadd.f32 %v5082_v24, %v5081_v56  ;;  %v5113_v3 = vpop.permute.xlu0 %5112 }
 0x472   :  { %v5094_v6 = vadd.f32 %v5093_v2, %v5092_v54 }
 0x473   :  { %v5098_v37 = vadd.f32 %v5097_v12, %v5077_v29  ;;  %v5084_v57 = vrot.slane %v5083_v52, 2 }
 0x474   :  { %v5095_v42 = vrot.slane %v5094_v6, 1 }
 0x475   :  { %v5099_v14 = vadd.f32 %v5098_v37, %v5078_v8  ;;  %v5085_v43 = vadd.f32 %v5084_v57, %v5083_v52 }
 0x476   :  { %v5096_v11 = vadd.f32 %v5095_v42, %v5094_v6 }
 0x477   :  { %v5100_v10 = vrot.slane %v5099_v14, 4  ;;  %v5086_v31 = vrot.slane %v5085_v43, 1 }
 0x478   :  { %v5116_v40 = vadd.f32 %v5113_v3, %v5096_v11 }
 0x479   :  { %v5101_v27 = vadd.f32 %v5100_v10, %v5099_v14  ;;  %v5087_v55 = vadd.f32 %v5086_v31, %v5085_v43 }
 0x47b   :  { %v5102_v34 = vrot.slane %v5101_v27, 2  ;;  %v5115_v46 = vadd.f32 %v5113_v3, %v5087_v55 }
 0x47d   :  { %v5103_v59 = vadd.f32 %v5102_v34, %v5101_v27  ;;  %v5121_v10 = vsel %vm13202_vm4, %v5116_v40, %v5115_v46  ;;  %v8502_v27 = vld [vmem:[%s12471_s1] sm:$0x3f] }
 0x47e   :  { %vm168_vm1 = vcmp.gt.f32.partialorder %v8502_v27, 0.5 }
 0x47f   :  { %v5104_v28 = vrot.slane %v5103_v59, 1 }
 0x481   :  { %v5105_v9 = vadd.f32 %v5104_v28, %v5103_v59 }
 0x483   :  { %v5117_v47 = vadd.f32 %v5113_v3, %v5105_v9 }
 0x485   :  { %v5122_v57 = vsel %vm13203_vm6, %v5117_v47, %v5121_v10 }
 0x4e9   :  { %v8381_v21 = vpop.f32.mrf.mxu1  ;;  %v8395_v5 = vpop.f32.mrf.mxu0 }
 0x4ea   :  { %v7198_v62 = vadd.f32 %v8395_v5, %v12433_v33  ;;  %v7101_v38 = vadd.f32 %v8381_v21, %v12433_v33  ;;  %v5124_v5 = vsel %vm168_vm1, 0.0, %v5122_v57 }
 0x4eb   :  { %v7095_v23 = vpop.f32.mrf.mxu1  ;;  %v7192_v39 = vpop.f32.mrf.mxu0 }
 0x4ec   :  { %v7096_v1 = vadd.f32 %v7095_v23, %v12435_v48  ;;  %v7193_v41 = vadd.f32 %v7192_v39, %v12435_v48  ;;  %v7333_v0 = vmul.f32 %v7316_v19, %v7198_v62  ;;  %v7329_v20 = vmul.f32 %v7316_v19, %v7101_v38 }
 0x4ed   :  { %v8398_v63 = vpop.f32.mrf.mxu0 }
 0x4ee   :  { %v7332_v25 = vmul.f32 %v12437_v30, %v7193_v41  ;;  %v8384_v58 = vpop.f32.mrf.mxu1  ;;  %v7328_v7 = vmul.f32 %v12437_v30, %v7096_v1  ;;  %v7208_v4 = vadd.f32 %v8398_v63, %v7015_v53  ;;  %v7386_v1 = vand.u32 2147483647, %v5124_v5 }
 0x4ef   :  { %v7202_v16 = vpop.f32.mrf.mxu0  ;;  %v7111_v18 = vadd.f32 %v8384_v58, %v7015_v53 }
 0x4f0   :  { %v7105_v60 = vpop.f32.mrf.mxu1  ;;  %v7203_v44 = vadd.f32 %v7202_v16, %v12439_v50  ;;  %v7349_v13 = vadd.f32 %v7333_v0, %v7332_v25  ;;  %v7340_v12 = vadd.f32 %v7329_v20, %v7328_v7  ;;  %v7335_v49 = vmul.f32 %v7326_v32, %v7208_v4  ;;  %v7374_v7 = vpop.permute.xlu1 %7373 }
 0x4f1   :  { %v7106_v17 = vadd.f32 %v7105_v60, %v12439_v50  ;;  %v7331_v45 = vmul.f32 %v7326_v32, %v7111_v18 }
 0x4f2   :  { %v7334_v29 = vmul.f32 %v7321_v22, %v7203_v44  ;;  %v8409_v35 = vpop.f32.mrf.mxu1 }
 0x4f3   :  { %v7330_v61 = vmul.f32 %v7321_v22, %v7106_v17  ;;  %v7295_v8 = vadd.f32 %v8409_v35, %v12433_v33 }
 0x4f4   :  { %v7350_v26 = vadd.f32 %v7349_v13, %v7334_v29  ;;  %v7289_v37 = vpop.f32.mrf.mxu1 }
 0x4f5   :  { %v7341_v51 = vadd.f32 %v7340_v12, %v7330_v61  ;;  %v7290_v56 = vadd.f32 %v7289_v37, %v12435_v48  ;;  %v7337_v33 = vmul.f32 %v7316_v19, %v7295_v8  ;;  %v7396_v19 = vld [vmem:[%s12472_s2] sm:$0x7]  ;;  %s8527_s2 = smov [#allocation4]  }
 0x4f6   :  { %v7351_v36 = vadd.f32 %v7350_v26, %v7335_v49  ;;  %v8412_v14 = vpop.f32.mrf.mxu1  ;;  %v7397_v63 = vmul.f32 %v7396_v19, %v7386_v1  ;;  %s7413_s13 = sshll.u32 %s8527_s2, 4  ;;  %s7414_s13 = int_to_ptr.vmem [resolvable:$true] %s7413_s13 }
 0x4f7   :  { %v7342_v24 = vadd.f32 %v7341_v51, %v7331_v45  ;;  %v7336_v15 = vmul.f32 %v12437_v30, %v7290_v56  ;;  %v7305_v34 = vadd.f32 %v8412_v14, %v7015_v53  ;;  %s8503_s24 = scalar_lea.vmem %s7414_s13, 16  ;;  %s8507_s25 = scalar_lea.vmem %s7414_s13, 32 }
 0x4f8   :  { %v7352_v52 = vrot.slane %v7351_v36, 4  ;;  %v7299_v54 = vpop.f32.mrf.mxu1  ;;  %v7398_v11 = vsel %vm7387_vm10, %v7397_v63, 0.0  ;;  %p8504_p0 = scmp.ne.s32.totalorder %s7414_s13, %s8503_s24  ;;  %p8508_p1 = scmp.lt.s32.totalorder %s7414_s13, %s7414_s13 }
 0x4f9   :  { %v7343_v2 = vrot.slane %v7342_v24, 4  ;;  %v7300_v48 = vadd.f32 %v7299_v54, %v12439_v50  ;;  %v7358_v59 = vadd.f32 %v7337_v33, %v7336_v15  ;;  %v7339_v42 = vmul.f32 %v7326_v32, %v7305_v34  ;;  %p8509_p2 = scmp.lt.s32.totalorder %s8507_s25, %s8503_s24 }
 0x4fa   :  { %v7353_v43 = vadd.f32 %v7352_v52, %v7351_v36  ;;  %v7399_v4 = vrot.slane %v7398_v11, 4 }
 0x4fb   :  { %v7344_v6 = vadd.f32 %v7343_v2, %v7342_v24  ;;  %v7338_v30 = vmul.f32 %v7321_v22, %v7300_v48  ;;  %p8510_p3 = por %p8509_p2, %p8508_p1 }
 0x4fc   :  { %v7354_v21 = vrot.slane %v7353_v43, 2  ;;  %v7400_v18 = vadd.f32 %v7399_v4, %v7398_v11 }
 0x4fd   :  { %v7345_v31 = vrot.slane %v7344_v6, 2  ;;  %v7359_v23 = vadd.f32 %v7358_v59, %v7338_v30  ;;  %p8511_p4 = pnand %p8510_p3, %p8504_p0 }
 0x4fe   :  { %v7355_v39 = vadd.f32 %v7354_v21, %v7353_v43  ;;  %v7401_v35 = vrot.slane %v7400_v18, 2 }
 0x4ff   :  { %v7346_v28 = vadd.f32 %v7345_v31, %v7344_v6  ;;  %v7360_v62 = vadd.f32 %v7359_v23, %v7339_v42 }
 0x500   :  { %v7356_v53 = vrot.slane %v7355_v39, 1  ;;  %v7402_v40 = vadd.f32 %v7401_v35, %v7400_v18 }
 0x501   :  { %v7361_v41 = vrot.slane %v7360_v62, 4  ;;  %v7347_v50 = vrot.slane %v7346_v28, 1 }
 0x502   :  { %v7357_v58 = vadd.f32 %v7356_v53, %v7355_v39  ;;  %v7403_v47 = vrot.slane %v7402_v40, 1 }
 0x503   :  { %v7362_v38 = vadd.f32 %v7361_v41, %v7360_v62  ;;  %v7348_v25 = vadd.f32 %v7347_v50, %v7346_v28 }
 0x504   :  { %v7377_v0 = vadd.f32 %v7374_v7, %v7357_v58  ;;  %v7404_v37 = vadd.f32 %v7403_v47, %v7402_v40 }
 0x505   :  { %v7363_v22 = vrot.slane %v7362_v38, 2  ;;  %v7376_v9 = vadd.f32 %v7374_v7, %v7348_v25 }
 0x507   :  { %v7364_v55 = vadd.f32 %v7363_v22, %v7362_v38  ;;  %v7382_v20 = vsel %vm13204_vm0, %v7377_v0, %v7376_v9 }
 0x509   :  { %v7365_v16 = vrot.slane %v7364_v55, 1 }
 0x50b   :  { %v7366_v60 = vadd.f32 %v7365_v16, %v7364_v55 }
 0x50d   :  { %v7378_v44 = vadd.f32 %v7374_v7, %v7366_v60 }
 0x50f   :  { %v7383_v17 = vsel %vm13205_vm8, %v7378_v44, %v7382_v20 }
 0x510   :  { %v7385_v3 = vsel %vm168_vm1, 0.0, %v7383_v17 }
 0x511   :  { %v7388_v13 = vsel %vm7387_vm10, %v7385_v3, 0.0 }
 0x512   :  { %v7389_v29 = vrot.slane %v7388_v13, 4 }
 0x514   :  { %v7390_v32 = vadd.f32 %v7389_v29, %v7388_v13 }
 0x516   :  { %v7391_v46 = vrot.slane %v7390_v32, 2 }
 0x518   :  { %v7392_v12 = vadd.f32 %v7391_v46, %v7390_v32 }
 0x51a   :  { %v7393_v61 = vrot.slane %v7392_v12, 1 }
 0x51c   :  { %v7394_v49 = vadd.f32 %v7393_v61, %v7392_v12 }
 0x51e   :  { %v7395_v26 = vmul.f32 0.33333334, %v7394_v49 }
 0x520   :  { %v7405_v45 = vadd.f32 %v7404_v37, %v7395_v26 }
 0x522   :  { %7406 = vst [vmem:[#allocation4] sm:$0x1] %v7405_v45 }
 0x523   :  { %8514 = shalt.err (!%p8511_p4)
}
 0x524   :  { %7416 = dma.vmem_to_hbm [thread:$0]  %s7414_s13, 16, %s12483_s14, [#allocation5]  }
 0x525   :  { %8523 = dma.done.wait [#allocation5], 16  }
 0x526   :  { %8524 = vsyncadd [#allocation5], 4294967280 }
 0x527   :  { %7420 = vsyncpa [#allocation5], 1 }

</bundles_post_ra>
